<compile_context>
chip_gen: v7x
topology: tpu7x:2x2x1
jax: 0.10.0
libtpu: 0.0.40
codegen_flags: <defaults>
</compile_context>

<pallas_src>
import jax
import jax.numpy as jnp
from jax.experimental import pallas as pl
from jax.experimental.pallas import tpu as pltpu


# ---------------------------------------------------------------------------
# Fused decoder kernel (one grid step == BB batch samples)
# ---------------------------------------------------------------------------
def _decoder_kernel(x_ref, w1_ref, b1_ref, w2_ref, b2_ref,
                    m1_ref, c1_ref, m2_ref, c2_ref, m3_ref, c3_ref,
                    o_ref, pad1_ref, pad2_ref, pad3_ref):
    f32 = jnp.float32
    cdt = pad1_ref.dtype                      # MXU operand dtype (bf16)
    BB = x_ref.shape[0]                       # samples per grid step

    # ---- zero only the borders (pad-row blocks + trailing pad-column lanes).
    # Every slab row that is read this step is either zeroed here or fully
    # rewritten below, so this is safe under megacore grid sharding.
    def zero_borders(pad_ref, H, n_int):
        R, Kp = pad_ref.shape
        pad_ref[0:BB, :] = jnp.zeros((BB, Kp), cdt)                    # top pad row
        pad_ref[(H + 1) * BB:(H + 2) * BB, :] = jnp.zeros((BB, Kp), cdt)  # bottom
        pad_ref[:, n_int:Kp] = jnp.zeros((R, Kp - n_int), cdt)         # pad columns

    zero_borders(pad1_ref, 4, 256)
    zero_borders(pad2_ref, 8, 256)
    zero_borders(pad3_ref, 16, 512)

    # ---------------- fc1 + ReLU, fc2 + ReLU (single big matmuls) -----------
    h1 = jnp.dot(x_ref[...], w1_ref[...], preferred_element_type=f32)
    h1 = jnp.maximum(h1 + b1_ref[...], 0.0).astype(cdt)               # (BB, 256)
    h2 = jnp.dot(h1, w2_ref[...], preferred_element_type=f32)
    h2 = jnp.maximum(h2 + b2_ref[...], 0.0).astype(cdt)               # (BB, 1024)

    # fc2 columns were pre-permuted to (row, col, channel) order, so column
    # chunk i is spatial row i of the (4, 4, 64) NHWC latent image; scatter it
    # into pad1's interior (stored row = padded_row * BB + sample).
    for i in range(4):
        pad1_ref[(1 + i) * BB:(2 + i) * BB, 0:256] = h2[:, i * 256:(i + 1) * 256]

    # ---------------- phase-decomposed ConvTranspose2d(4,4,s=2,p=1) ---------
    # Slab row p*BB+s holds padded input row p of sample s.  With the
    # parity-concatenated banded matrices A[u] = [M[0,u] | M[1,u]]:
    #   z[p*BB+s, 0:N]  = out row 2p   of sample s (pre-bias/act)
    #   z[p*BB+s, N:2N] = out row 2p-1 of sample s (stored at p -> row 2(p-1)+1)
    # i.e. Y_0[s,r] = z[r*BB+s, 0:N],  Y_1[s,r] = z[(r+1)*BB+s, N:2N].
    def deconv(pad_ref, m_ref, bias_ref, H):
        lo = pad_ref[0:(H + 1) * BB, :]            # rows p
        hi = pad_ref[BB:(H + 2) * BB, :]           # rows p+1 (aligned slice)
        z = jnp.dot(lo, m_ref[0], preferred_element_type=f32)
        z = z + jnp.dot(hi, m_ref[1], preferred_element_type=f32)
        return z + bias_ref[...]                   # ((H+1)*BB, 2N) f32

    def scatter(act, nxt_ref, H, N):
        # Output row 2r+a of sample s -> next-slab stored row (1+2r+a)*BB + s.
        for r in range(H):
            nxt_ref[(1 + 2 * r) * BB:(2 + 2 * r) * BB, 0:N] = \
                act[r * BB:(r + 1) * BB, 0:N]
            nxt_ref[(2 + 2 * r) * BB:(3 + 2 * r) * BB, 0:N] = \
                act[(r + 1) * BB:(r + 2) * BB, N:2 * N]

    # deconv1: (4,4,64) -> (8,8,32), ReLU -> pad2 interior
    z = deconv(pad1_ref, m1_ref, c1_ref, 4)
    scatter(jnp.maximum(z, 0.0).astype(cdt), pad2_ref, 4, 256)

    # deconv2: (8,8,32) -> (16,16,32), ReLU -> pad3 interior
    z = deconv(pad2_ref, m2_ref, c2_ref, 8)
    scatter(jnp.maximum(z, 0.0).astype(cdt), pad3_ref, 8, 512)

    # deconv3: (16,16,32) -> (32,32,1), sigmoid.  o_ref row r*BB+s packs image
    # rows 2r (lanes 0:32) and 2r+1 (lanes 32:64) of sample s -> one dense store.
    z = deconv(pad3_ref, m3_ref, c3_ref, 16)                          # (17*BB, 64)
    o_val = jnp.concatenate([z[0:16 * BB, 0:32], z[BB:17 * BB, 32:64]], axis=-1)
    o_ref[...] = jax.nn.sigmoid(o_val).astype(o_ref.dtype)


# ---------------------------------------------------------------------------
# Banded phase-decomposition matrices (built once in the wrapper, plain JAX)
# ---------------------------------------------------------------------------
def _banded_deconv_mats(w_t, W):
    """ConvTranspose2d(4,4,s=2,p=1) as banded matmul weights (f32).

    w_t: PyTorch ConvTranspose2d weight, shape (Cin, Cout, 4, 4);  W: input width.
    Returns (2, 2, (W+2)*Cin, 2*W*Cout).  [a, u] maps one padded-input row
    (lanes = (padded col, Cin), interior columns first, the two zero pad columns
    last) to the output-row strip of parity `a` (lanes = (out col, Cout)).
    """
    Cin, Cout = w_t.shape[0], w_t.shape[1]
    cols = jnp.arange(W)
    mats = []
    for a in (0, 1):
        for u in (0, 1):
            m = jnp.zeros(((W + 2) * Cin, 2 * W * Cout), jnp.float32)
            for b in (0, 1):
                for v in (0, 1):
                    sel = jnp.zeros((W + 2, 2 * W), jnp.float32)
                    sel = sel.at[(cols + b + v - 1) % (W + 2),
                                 2 * cols + b].set(1.0)
                    m = m + jnp.kron(sel, w_t[:, :, 3 - a - 2 * u, 3 - b - 2 * v])
            mats.append(m)
    return jnp.stack(mats, axis=0).reshape(2, 2, (W + 2) * Cin, 2 * W * Cout)


def _phase_mats(w_t, W, k_pad, dtype):
    """Lane-concatenate the two parities and pad K to a multiple of 128.

    Returns (2, k_pad, 2*N):  A[u] = [M[0,u] | M[1,u]], zero rows above K.
    """
    m = _banded_deconv_mats(w_t, W)                      # (2, 2, K, N) f32
    K = m.shape[2]
    A = jnp.stack([jnp.concatenate([m[0, u], m[1, u]], axis=-1)
                   for u in (0, 1)], axis=0)             # (2, K, 2N)
    if k_pad > K:
        A = jnp.pad(A, ((0, 0), (0, k_pad - K), (0, 0)))
    return A.astype(dtype)


# ---------------------------------------------------------------------------
# Wrapper: single fused pallas_call over batch blocks
# ---------------------------------------------------------------------------
def mnist_conv_decoder(params, x, *, block_batch=None, compute_dtype=jnp.bfloat16):
    """Forward pass of MNISTConvDecoder.  x: (B, 15) -> (B, 1, 32, 32)."""
    B = x.shape[0]
    f32 = jnp.float32
    cdt = compute_dtype

    BB = block_batch if block_batch is not None else (32 if B >= 32 else 8)
    G = (B + BB - 1) // BB
    Bp = G * BB
    xp = jnp.pad(x.astype(cdt), ((0, Bp - B), (0, 0)))

    # fc weights; fc2 columns permuted from NCHW (c, i, j) to NHWC (i, j, c).
    w1 = params["fc1_w"].astype(cdt)
    b1 = params["fc1_b"].reshape(1, 256).astype(f32)
    w2 = (params["fc2_w"].reshape(256, 64, 4, 4).transpose(0, 2, 3, 1)
          .reshape(256, 1024)).astype(cdt)
    b2 = (params["fc2_b"].reshape(64, 4, 4).transpose(1, 2, 0)
          .reshape(1, 1024)).astype(f32)

    # Parity-concatenated banded matrices (K padded to 128) + lane-tiled biases.
    m1 = _phase_mats(params["dc1_w"], 4, 384, cdt)       # (2, 384, 512)
    m2 = _phase_mats(params["dc2_w"], 8, 384, cdt)       # (2, 384, 1024)
    m3 = _phase_mats(params["dc3_w"], 16, 640, cdt)      # (2, 640, 64)
    c1 = jnp.tile(params["dc1_b"], 16).reshape(1, 512).astype(f32)
    c2 = jnp.tile(params["dc2_b"], 32).reshape(1, 1024).astype(f32)
    c3 = jnp.tile(params["dc3_b"], 64).reshape(1, 64).astype(f32)

    def _resident(a):  # full-array block, constant index map -> VMEM-resident
        nd = a.ndim
        return pl.BlockSpec(a.shape, lambda n: (0,) * nd)

    out2d = pl.pallas_call(
        _decoder_kernel,
        out_shape=jax.ShapeDtypeStruct((G * 16 * BB, 64), f32),
        grid_spec=pltpu.PrefetchScalarGridSpec(
            num_scalar_prefetch=0,
            grid=(G,),
            in_specs=[
                pl.BlockSpec((BB, 15), lambda n: (n, 0)),   # BB latents per step
                _resident(w1), _resident(b1), _resident(w2), _resident(b2),
                _resident(m1), _resident(c1),
                _resident(m2), _resident(c2),
                _resident(m3), _resident(c3),
            ],
            out_specs=pl.BlockSpec((16 * BB, 64), lambda n: (n, 0)),
            scratch_shapes=[                 # padded activation slabs (bf16)
                pltpu.VMEM((6 * BB, 384), cdt),    # deconv1 in: (4+2)  x (4+2)*64
                pltpu.VMEM((10 * BB, 384), cdt),   # deconv2 in: (8+2)  x (8+2)*32
                pltpu.VMEM((18 * BB, 640), cdt),   # deconv3 in: (16+2) x (16+2)*32
            ],
        ),
        compiler_params=pltpu.CompilerParams(
            dimension_semantics=("parallel",),     # batch blocks split across TCs
            vmem_limit_bytes=32 * 1024 * 1024,     # ~8 MiB used; safe on v7x
        ),
    )(xp, w1, b1, w2, b2, m1, c1, m2, c2, m3, c3)

    # Un-pack (G*16*BB, 64): row g*16*BB + r*BB + s, lanes a*32+col = pixel
    # (2r+a, col) of sample g*BB+s.  Cheap reshape/transpose on 4 KiB/sample.
    out = (out2d.reshape(G, 16, BB, 2, 32)
                 .transpose(0, 2, 1, 3, 4)
                 .reshape(Bp, 1, 32, 32))
    return out[:B]


# ---------------------------------------------------------------------------
# Pure-JAX reference (f32) for a tolerance check
# ---------------------------------------------------------------------------
def _deconv_ref(x, w_t, b):
    w = jnp.flip(w_t, axis=(2, 3)).transpose(1, 0, 2, 3)          # OIHW
    y = jax.lax.conv_general_dilated(
        x, w, window_strides=(1, 1), padding=((2, 2), (2, 2)),
        lhs_dilation=(2, 2), rhs_dilation=(1, 1),
        dimension_numbers=("NCHW", "OIHW", "NCHW"),
        precision=jax.lax.Precision.HIGHEST)
    return y + b.reshape(1, -1, 1, 1)


def decoder_reference(params, x):
    hp = jax.lax.Precision.HIGHEST
    h = jax.nn.relu(jnp.dot(x, params["fc1_w"], precision=hp) + params["fc1_b"])
    h = jax.nn.relu(jnp.dot(h, params["fc2_w"], precision=hp) + params["fc2_b"])
    h = h.reshape(-1, 64, 4, 4)
    h = jax.nn.relu(_deconv_ref(h, params["dc1_w"], params["dc1_b"]))
    h = jax.nn.relu(_deconv_ref(h, params["dc2_w"], params["dc2_b"]))
    return jax.nn.sigmoid(_deconv_ref(h, params["dc3_w"], params["dc3_b"]))


# ---------------------------------------------------------------------------
# Parameters (deterministic synthetic init, shapes from MNISTConvDecoder.__init__)
# ---------------------------------------------------------------------------
def init_params(key):
    ks = jax.random.split(key, 10)

    def u(k, shape, fan_in):
        bound = 1.0 / jnp.sqrt(jnp.float32(fan_in))
        return jax.random.uniform(k, shape, jnp.float32, -bound, bound)

    return dict(
        fc1_w=u(ks[0], (15, 256), 15),
        fc1_b=u(ks[1], (256,), 15),
        fc2_w=u(ks[2], (256, 64 * 4 * 4), 256),
        fc2_b=u(ks[3], (64 * 4 * 4,), 256),
        dc1_w=u(ks[4], (64, 32, 4, 4), 64 * 16),   # ConvTranspose2d(64->32)
        dc1_b=u(ks[5], (32,), 64 * 16),
        dc2_w=u(ks[6], (32, 32, 4, 4), 32 * 16),   # ConvTranspose2d(32->32)
        dc2_b=u(ks[7], (32,), 32 * 16),
        dc3_w=u(ks[8], (32, 1, 4, 4), 32 * 16),    # ConvTranspose2d(32->1)
        dc3_b=u(ks[9], (1,), 32 * 16),
    )


if __name__ == "__main__":
    key = jax.random.PRNGKey(0)
    pkey, xkey = jax.random.split(key)
    params = init_params(pkey)
    x = jax.random.normal(xkey, (2, 15), jnp.float32)

    out = jax.jit(mnist_conv_decoder)(params, x)
    out = jax.block_until_ready(out)

    assert out.shape == (2, 1, 32, 32), out.shape
    assert bool(jnp.all(jnp.isfinite(out)))
    assert bool(jnp.all((out >= 0.0) & (out <= 1.0)))   # sigmoid output range

    ref = decoder_reference(params, x)
    err = float(jnp.max(jnp.abs(out - ref)))
    assert err < 2e-2, f"max abs err vs reference: {err}"
    print("KERNEL_OK")
</pallas_src>

<mosaic_0001>
module attributes {stable_mosaic.version = 11 : i64} {
  func.func @_decoder_kernel(%arg0: i32, %arg1: memref<8x15xbf16, #tpu.memory_space<vmem>>, %arg2: memref<15x256xbf16, #tpu.memory_space<vmem>>, %arg3: memref<1x256xf32, #tpu.memory_space<vmem>>, %arg4: memref<256x1024xbf16, #tpu.memory_space<vmem>>, %arg5: memref<1x1024xf32, #tpu.memory_space<vmem>>, %arg6: memref<2x384x512xbf16, #tpu.memory_space<vmem>>, %arg7: memref<1x512xf32, #tpu.memory_space<vmem>>, %arg8: memref<2x384x1024xbf16, #tpu.memory_space<vmem>>, %arg9: memref<1x1024xf32, #tpu.memory_space<vmem>>, %arg10: memref<2x640x64xbf16, #tpu.memory_space<vmem>>, %arg11: memref<1x64xf32, #tpu.memory_space<vmem>>, %arg12: memref<128x64xf32, #tpu.memory_space<vmem>>, %arg13: memref<48x384xbf16, #tpu.memory_space<vmem>>, %arg14: memref<80x384xbf16, #tpu.memory_space<vmem>>, %arg15: memref<144x640xbf16, #tpu.memory_space<vmem>>) attributes {dimension_semantics = [#tpu.dimension_semantics<parallel>], iteration_bounds = array<i64: 1>, scalar_prefetch = 0 : i64, scratch_operands = 3 : i64, tpu.core_type = #tpu.core_type<tc>, window_params = [{transform_indices = @transform_0, window_bounds = array<i64: 8, 15>}, {pipeline_mode = #tpu.pipeline_mode<synchronous>, transform_indices = @transform_1, window_bounds = array<i64: 15, 256>}, {pipeline_mode = #tpu.pipeline_mode<synchronous>, transform_indices = @transform_2, window_bounds = array<i64: 1, 256>}, {pipeline_mode = #tpu.pipeline_mode<synchronous>, transform_indices = @transform_3, window_bounds = array<i64: 256, 1024>}, {pipeline_mode = #tpu.pipeline_mode<synchronous>, transform_indices = @transform_4, window_bounds = array<i64: 1, 1024>}, {pipeline_mode = #tpu.pipeline_mode<synchronous>, transform_indices = @transform_5, window_bounds = array<i64: 2, 384, 512>}, {pipeline_mode = #tpu.pipeline_mode<synchronous>, transform_indices = @transform_6, window_bounds = array<i64: 1, 512>}, {pipeline_mode = #tpu.pipeline_mode<synchronous>, transform_indices = @transform_7, window_bounds = array<i64: 2, 384, 1024>}, {pipeline_mode = #tpu.pipeline_mode<synchronous>, transform_indices = @transform_8, window_bounds = array<i64: 1, 1024>}, {pipeline_mode = #tpu.pipeline_mode<synchronous>, transform_indices = @transform_9, window_bounds = array<i64: 2, 640, 64>}, {pipeline_mode = #tpu.pipeline_mode<synchronous>, transform_indices = @transform_10, window_bounds = array<i64: 1, 64>}, {transform_indices = @transform_11, window_bounds = array<i64: 128, 64>}]} {
    %cst = arith.constant 0.000000e+00 : bf16
    %0 = vector.broadcast %cst : bf16 to vector<8x384xbf16>
    %c0 = arith.constant 0 : index
    %c0_0 = arith.constant 0 : index
    %1 = vector.load %arg13[%c0, %c0_0] : memref<48x384xbf16, #tpu.memory_space<vmem>>, vector<8x384xbf16>
    tpu.vector_store %arg13[%c0, %c0_0], %0 {strides = array<i32>} : memref<48x384xbf16, #tpu.memory_space<vmem>>, vector<8x384xbf16>,
    %cst_1 = arith.constant 0.000000e+00 : bf16
    %2 = vector.broadcast %cst_1 : bf16 to vector<8x384xbf16>
    %c40 = arith.constant 40 : index
    %c0_2 = arith.constant 0 : index
    %3 = vector.load %arg13[%c40, %c0_2] : memref<48x384xbf16, #tpu.memory_space<vmem>>, vector<8x384xbf16>
    tpu.vector_store %arg13[%c40, %c0_2], %2 {strides = array<i32>} : memref<48x384xbf16, #tpu.memory_space<vmem>>, vector<8x384xbf16>,
    %cst_3 = arith.constant 0.000000e+00 : bf16
    %4 = vector.broadcast %cst_3 : bf16 to vector<48x128xbf16>
    %c0_4 = arith.constant 0 : index
    %c256 = arith.constant 256 : index
    %5 = vector.load %arg13[%c0_4, %c256] : memref<48x384xbf16, #tpu.memory_space<vmem>>, vector<48x128xbf16>
    tpu.vector_store %arg13[%c0_4, %c256], %4 {strides = array<i32>} : memref<48x384xbf16, #tpu.memory_space<vmem>>, vector<48x128xbf16>,
    %cst_5 = arith.constant 0.000000e+00 : bf16
    %6 = vector.broadcast %cst_5 : bf16 to vector<8x384xbf16>
    %c0_6 = arith.constant 0 : index
    %c0_7 = arith.constant 0 : index
    %7 = vector.load %arg14[%c0_6, %c0_7] : memref<80x384xbf16, #tpu.memory_space<vmem>>, vector<8x384xbf16>
    tpu.vector_store %arg14[%c0_6, %c0_7], %6 {strides = array<i32>} : memref<80x384xbf16, #tpu.memory_space<vmem>>, vector<8x384xbf16>,
    %cst_8 = arith.constant 0.000000e+00 : bf16
    %8 = vector.broadcast %cst_8 : bf16 to vector<8x384xbf16>
    %c72 = arith.constant 72 : index
    %c0_9 = arith.constant 0 : index
    %9 = vector.load %arg14[%c72, %c0_9] : memref<80x384xbf16, #tpu.memory_space<vmem>>, vector<8x384xbf16>
    tpu.vector_store %arg14[%c72, %c0_9], %8 {strides = array<i32>} : memref<80x384xbf16, #tpu.memory_space<vmem>>, vector<8x384xbf16>,
    %cst_10 = arith.constant 0.000000e+00 : bf16
    %10 = vector.broadcast %cst_10 : bf16 to vector<80x128xbf16>
    %c0_11 = arith.constant 0 : index
    %c256_12 = arith.constant 256 : index
    %11 = vector.load %arg14[%c0_11, %c256_12] : memref<80x384xbf16, #tpu.memory_space<vmem>>, vector<80x128xbf16>
    tpu.vector_store %arg14[%c0_11, %c256_12], %10 {strides = array<i32>} : memref<80x384xbf16, #tpu.memory_space<vmem>>, vector<80x128xbf16>,
    %cst_13 = arith.constant 0.000000e+00 : bf16
    %12 = vector.broadcast %cst_13 : bf16 to vector<8x640xbf16>
    %c0_14 = arith.constant 0 : index
    %c0_15 = arith.constant 0 : index
    %13 = vector.load %arg15[%c0_14, %c0_15] : memref<144x640xbf16, #tpu.memory_space<vmem>>, vector<8x640xbf16>
    tpu.vector_store %arg15[%c0_14, %c0_15], %12 {strides = array<i32>} : memref<144x640xbf16, #tpu.memory_space<vmem>>, vector<8x640xbf16>,
    %cst_16 = arith.constant 0.000000e+00 : bf16
    %14 = vector.broadcast %cst_16 : bf16 to vector<8x640xbf16>
    %c136 = arith.constant 136 : index
    %c0_17 = arith.constant 0 : index
    %15 = vector.load %arg15[%c136, %c0_17] : memref<144x640xbf16, #tpu.memory_space<vmem>>, vector<8x640xbf16>
    tpu.vector_store %arg15[%c136, %c0_17], %14 {strides = array<i32>} : memref<144x640xbf16, #tpu.memory_space<vmem>>, vector<8x640xbf16>,
    %cst_18 = arith.constant 0.000000e+00 : bf16
    %16 = vector.broadcast %cst_18 : bf16 to vector<144x128xbf16>
    %c0_19 = arith.constant 0 : index
    %c512 = arith.constant 512 : index
    %17 = vector.load %arg15[%c0_19, %c512] : memref<144x640xbf16, #tpu.memory_space<vmem>>, vector<144x128xbf16>
    tpu.vector_store %arg15[%c0_19, %c512], %16 {strides = array<i32>} : memref<144x640xbf16, #tpu.memory_space<vmem>>, vector<144x128xbf16>,
    %c0_20 = arith.constant 0 : index
    %c0_21 = arith.constant 0 : index
    %18 = vector.load %arg1[%c0_20, %c0_21] : memref<8x15xbf16, #tpu.memory_space<vmem>>, vector<8x15xbf16>
    %c0_22 = arith.constant 0 : index
    %c0_23 = arith.constant 0 : index
    %19 = vector.load %arg2[%c0_22, %c0_23] : memref<15x256xbf16, #tpu.memory_space<vmem>>, vector<15x256xbf16>
    %cst_24 = arith.constant dense<0.000000e+00> : vector<8x256xf32>
    %20 = tpu.matmul %18, %19, %cst_24 {dimension_numbers = #tpu.dot_dimension_numbers<[1], [0], [0], [1], [0, 0, 1, 1], [], []>} : vector<8x15xbf16>, vector<15x256xbf16>, vector<8x256xf32> -> vector<8x256xf32>
    %c0_25 = arith.constant 0 : index
    %c0_26 = arith.constant 0 : index
    %21 = vector.load %arg3[%c0_25, %c0_26] : memref<1x256xf32, #tpu.memory_space<vmem>>, vector<1x256xf32>
    %22 = vector.broadcast %21 : vector<1x256xf32> to vector<8x256xf32>
    %23 = arith.addf %20, %22 : vector<8x256xf32>
    %cst_27 = arith.constant 0.000000e+00 : f32
    %24 = vector.broadcast %cst_27 : f32 to vector<8x256xf32>
    %25 = arith.maximumf %23, %24 : vector<8x256xf32>
    %26 = arith.truncf %25 : vector<8x256xf32> to vector<8x256xbf16>
    %c0_28 = arith.constant 0 : index
    %c0_29 = arith.constant 0 : index
    %27 = vector.load %arg4[%c0_28, %c0_29] : memref<256x1024xbf16, #tpu.memory_space<vmem>>, vector<256x1024xbf16>
    %cst_30 = arith.constant dense<0.000000e+00> : vector<8x1024xf32>
    %28 = tpu.matmul %26, %27, %cst_30 {dimension_numbers = #tpu.dot_dimension_numbers<[1], [0], [0], [1], [0, 0, 1, 1], [], []>} : vector<8x256xbf16>, vector<256x1024xbf16>, vector<8x1024xf32> -> vector<8x1024xf32>
    %c0_31 = arith.constant 0 : index
    %c0_32 = arith.constant 0 : index
    %29 = vector.load %arg5[%c0_31, %c0_32] : memref<1x1024xf32, #tpu.memory_space<vmem>>, vector<1x1024xf32>
    %30 = vector.broadcast %29 : vector<1x1024xf32> to vector<8x1024xf32>
    %31 = arith.addf %28, %30 : vector<8x1024xf32>
    %cst_33 = arith.constant 0.000000e+00 : f32
    %32 = vector.broadcast %cst_33 : f32 to vector<8x1024xf32>
    %33 = arith.maximumf %31, %32 : vector<8x1024xf32>
    %34 = arith.truncf %33 : vector<8x1024xf32> to vector<8x1024xbf16>
    %35 = vector.extract_strided_slice %34 {offsets = [0, 0], sizes = [8, 256], strides = [1, 1]} : vector<8x1024xbf16> to vector<8x256xbf16>
    %c8 = arith.constant 8 : index
    %c0_34 = arith.constant 0 : index
    %36 = vector.load %arg13[%c8, %c0_34] : memref<48x384xbf16, #tpu.memory_space<vmem>>, vector<8x256xbf16>
    tpu.vector_store %arg13[%c8, %c0_34], %35 {strides = array<i32>} : memref<48x384xbf16, #tpu.memory_space<vmem>>, vector<8x256xbf16>,
    %37 = vector.extract_strided_slice %34 {offsets = [0, 256], sizes = [8, 256], strides = [1, 1]} : vector<8x1024xbf16> to vector<8x256xbf16>
    %c16 = arith.constant 16 : index
    %c0_35 = arith.constant 0 : index
    %38 = vector.load %arg13[%c16, %c0_35] : memref<48x384xbf16, #tpu.memory_space<vmem>>, vector<8x256xbf16>
    tpu.vector_store %arg13[%c16, %c0_35], %37 {strides = array<i32>} : memref<48x384xbf16, #tpu.memory_space<vmem>>, vector<8x256xbf16>,
    %39 = vector.extract_strided_slice %34 {offsets = [0, 512], sizes = [8, 256], strides = [1, 1]} : vector<8x1024xbf16> to vector<8x256xbf16>
    %c24 = arith.constant 24 : index
    %c0_36 = arith.constant 0 : index
    %40 = vector.load %arg13[%c24, %c0_36] : memref<48x384xbf16, #tpu.memory_space<vmem>>, vector<8x256xbf16>
    tpu.vector_store %arg13[%c24, %c0_36], %39 {strides = array<i32>} : memref<48x384xbf16, #tpu.memory_space<vmem>>, vector<8x256xbf16>,
    %41 = vector.extract_strided_slice %34 {offsets = [0, 768], sizes = [8, 256], strides = [1, 1]} : vector<8x1024xbf16> to vector<8x256xbf16>
    %c32 = arith.constant 32 : index
    %c0_37 = arith.constant 0 : index
    %42 = vector.load %arg13[%c32, %c0_37] : memref<48x384xbf16, #tpu.memory_space<vmem>>, vector<8x256xbf16>
    tpu.vector_store %arg13[%c32, %c0_37], %41 {strides = array<i32>} : memref<48x384xbf16, #tpu.memory_space<vmem>>, vector<8x256xbf16>,
    %c0_38 = arith.constant 0 : index
    %c0_39 = arith.constant 0 : index
    %43 = vector.load %arg13[%c0_38, %c0_39] : memref<48x384xbf16, #tpu.memory_space<vmem>>, vector<40x384xbf16>
    %c8_40 = arith.constant 8 : index
    %c0_41 = arith.constant 0 : index
    %44 = vector.load %arg13[%c8_40, %c0_41] : memref<48x384xbf16, #tpu.memory_space<vmem>>, vector<40x384xbf16>
    %c0_42 = arith.constant 0 : index
    %c0_43 = arith.constant 0 : index
    %c0_44 = arith.constant 0 : index
    %45 = vector.load %arg6[%c0_42, %c0_43, %c0_44] : memref<2x384x512xbf16, #tpu.memory_space<vmem>>, vector<1x384x512xbf16>
    %46 = vector.shape_cast %45 : vector<1x384x512xbf16> to vector<384x512xbf16>
    %cst_45 = arith.constant dense<0.000000e+00> : vector<40x512xf32>
    %47 = tpu.matmul %43, %46, %cst_45 {dimension_numbers = #tpu.dot_dimension_numbers<[1], [0], [0], [1], [0, 0, 1, 1], [], []>} : vector<40x384xbf16>, vector<384x512xbf16>, vector<40x512xf32> -> vector<40x512xf32>
    %c1 = arith.constant 1 : index
    %c0_46 = arith.constant 0 : index
    %c0_47 = arith.constant 0 : index
    %48 = vector.load %arg6[%c1, %c0_46, %c0_47] : memref<2x384x512xbf16, #tpu.memory_space<vmem>>, vector<1x384x512xbf16>
    %49 = vector.shape_cast %48 : vector<1x384x512xbf16> to vector<384x512xbf16>
    %cst_48 = arith.constant dense<0.000000e+00> : vector<40x512xf32>
    %50 = tpu.matmul %44, %49, %cst_48 {dimension_numbers = #tpu.dot_dimension_numbers<[1], [0], [0], [1], [0, 0, 1, 1], [], []>} : vector<40x384xbf16>, vector<384x512xbf16>, vector<40x512xf32> -> vector<40x512xf32>
    %51 = arith.addf %47, %50 : vector<40x512xf32>
    %c0_49 = arith.constant 0 : index
    %c0_50 = arith.constant 0 : index
    %52 = vector.load %arg7[%c0_49, %c0_50] : memref<1x512xf32, #tpu.memory_space<vmem>>, vector<1x512xf32>
    %53 = vector.broadcast %52 : vector<1x512xf32> to vector<40x512xf32>
    %54 = arith.addf %51, %53 : vector<40x512xf32>
    %cst_51 = arith.constant 0.000000e+00 : f32
    %55 = vector.broadcast %cst_51 : f32 to vector<40x512xf32>
    %56 = arith.maximumf %54, %55 : vector<40x512xf32>
    %57 = arith.truncf %56 : vector<40x512xf32> to vector<40x512xbf16>
    %58 = vector.extract_strided_slice %57 {offsets = [0, 0], sizes = [8, 256], strides = [1, 1]} : vector<40x512xbf16> to vector<8x256xbf16>
    %c8_52 = arith.constant 8 : index
    %c0_53 = arith.constant 0 : index
    %59 = vector.load %arg14[%c8_52, %c0_53] : memref<80x384xbf16, #tpu.memory_space<vmem>>, vector<8x256xbf16>
    tpu.vector_store %arg14[%c8_52, %c0_53], %58 {strides = array<i32>} : memref<80x384xbf16, #tpu.memory_space<vmem>>, vector<8x256xbf16>,
    %60 = vector.extract_strided_slice %57 {offsets = [8, 256], sizes = [8, 256], strides = [1, 1]} : vector<40x512xbf16> to vector<8x256xbf16>
    %c16_54 = arith.constant 16 : index
    %c0_55 = arith.constant 0 : index
    %61 = vector.load %arg14[%c16_54, %c0_55] : memref<80x384xbf16, #tpu.memory_space<vmem>>, vector<8x256xbf16>
    tpu.vector_store %arg14[%c16_54, %c0_55], %60 {strides = array<i32>} : memref<80x384xbf16, #tpu.memory_space<vmem>>, vector<8x256xbf16>,
    %62 = vector.extract_strided_slice %57 {offsets = [8, 0], sizes = [8, 256], strides = [1, 1]} : vector<40x512xbf16> to vector<8x256xbf16>
    %c24_56 = arith.constant 24 : index
    %c0_57 = arith.constant 0 : index
    %63 = vector.load %arg14[%c24_56, %c0_57] : memref<80x384xbf16, #tpu.memory_space<vmem>>, vector<8x256xbf16>
    tpu.vector_store %arg14[%c24_56, %c0_57], %62 {strides = array<i32>} : memref<80x384xbf16, #tpu.memory_space<vmem>>, vector<8x256xbf16>,
    %64 = vector.extract_strided_slice %57 {offsets = [16, 256], sizes = [8, 256], strides = [1, 1]} : vector<40x512xbf16> to vector<8x256xbf16>
    %c32_58 = arith.constant 32 : index
    %c0_59 = arith.constant 0 : index
    %65 = vector.load %arg14[%c32_58, %c0_59] : memref<80x384xbf16, #tpu.memory_space<vmem>>, vector<8x256xbf16>
    tpu.vector_store %arg14[%c32_58, %c0_59], %64 {strides = array<i32>} : memref<80x384xbf16, #tpu.memory_space<vmem>>, vector<8x256xbf16>,
    %66 = vector.extract_strided_slice %57 {offsets = [16, 0], sizes = [8, 256], strides = [1, 1]} : vector<40x512xbf16> to vector<8x256xbf16>
    %c40_60 = arith.constant 40 : index
    %c0_61 = arith.constant 0 : index
    %67 = vector.load %arg14[%c40_60, %c0_61] : memref<80x384xbf16, #tpu.memory_space<vmem>>, vector<8x256xbf16>
    tpu.vector_store %arg14[%c40_60, %c0_61], %66 {strides = array<i32>} : memref<80x384xbf16, #tpu.memory_space<vmem>>, vector<8x256xbf16>,
    %68 = vector.extract_strided_slice %57 {offsets = [24, 256], sizes = [8, 256], strides = [1, 1]} : vector<40x512xbf16> to vector<8x256xbf16>
    %c48 = arith.constant 48 : index
    %c0_62 = arith.constant 0 : index
    %69 = vector.load %arg14[%c48, %c0_62] : memref<80x384xbf16, #tpu.memory_space<vmem>>, vector<8x256xbf16>
    tpu.vector_store %arg14[%c48, %c0_62], %68 {strides = array<i32>} : memref<80x384xbf16, #tpu.memory_space<vmem>>, vector<8x256xbf16>,
    %70 = vector.extract_strided_slice %57 {offsets = [24, 0], sizes = [8, 256], strides = [1, 1]} : vector<40x512xbf16> to vector<8x256xbf16>
    %c56 = arith.constant 56 : index
    %c0_63 = arith.constant 0 : index
    %71 = vector.load %arg14[%c56, %c0_63] : memref<80x384xbf16, #tpu.memory_space<vmem>>, vector<8x256xbf16>
    tpu.vector_store %arg14[%c56, %c0_63], %70 {strides = array<i32>} : memref<80x384xbf16, #tpu.memory_space<vmem>>, vector<8x256xbf16>,
    %72 = vector.extract_strided_slice %57 {offsets = [32, 256], sizes = [8, 256], strides = [1, 1]} : vector<40x512xbf16> to vector<8x256xbf16>
    %c64 = arith.constant 64 : index
    %c0_64 = arith.constant 0 : index
    %73 = vector.load %arg14[%c64, %c0_64] : memref<80x384xbf16, #tpu.memory_space<vmem>>, vector<8x256xbf16>
    tpu.vector_store %arg14[%c64, %c0_64], %72 {strides = array<i32>} : memref<80x384xbf16, #tpu.memory_space<vmem>>, vector<8x256xbf16>,
    %c0_65 = arith.constant 0 : index
    %c0_66 = arith.constant 0 : index
    %74 = vector.load %arg14[%c0_65, %c0_66] : memref<80x384xbf16, #tpu.memory_space<vmem>>, vector<72x384xbf16>
    %c8_67 = arith.constant 8 : index
    %c0_68 = arith.constant 0 : index
    %75 = vector.load %arg14[%c8_67, %c0_68] : memref<80x384xbf16, #tpu.memory_space<vmem>>, vector<72x384xbf16>
    %c0_69 = arith.constant 0 : index
    %c0_70 = arith.constant 0 : index
    %c0_71 = arith.constant 0 : index
    %76 = vector.load %arg8[%c0_69, %c0_70, %c0_71] : memref<2x384x1024xbf16, #tpu.memory_space<vmem>>, vector<1x384x1024xbf16>
    %77 = vector.shape_cast %76 : vector<1x384x1024xbf16> to vector<384x1024xbf16>
    %cst_72 = arith.constant dense<0.000000e+00> : vector<72x1024xf32>
    %78 = tpu.matmul %74, %77, %cst_72 {dimension_numbers = #tpu.dot_dimension_numbers<[1], [0], [0], [1], [0, 0, 1, 1], [], []>} : vector<72x384xbf16>, vector<384x1024xbf16>, vector<72x1024xf32> -> vector<72x1024xf32>
    %c1_73 = arith.constant 1 : index
    %c0_74 = arith.constant 0 : index
    %c0_75 = arith.constant 0 : index
    %79 = vector.load %arg8[%c1_73, %c0_74, %c0_75] : memref<2x384x1024xbf16, #tpu.memory_space<vmem>>, vector<1x384x1024xbf16>
    %80 = vector.shape_cast %79 : vector<1x384x1024xbf16> to vector<384x1024xbf16>
    %cst_76 = arith.constant dense<0.000000e+00> : vector<72x1024xf32>
    %81 = tpu.matmul %75, %80, %cst_76 {dimension_numbers = #tpu.dot_dimension_numbers<[1], [0], [0], [1], [0, 0, 1, 1], [], []>} : vector<72x384xbf16>, vector<384x1024xbf16>, vector<72x1024xf32> -> vector<72x1024xf32>
    %82 = arith.addf %78, %81 : vector<72x1024xf32>
    %c0_77 = arith.constant 0 : index
    %c0_78 = arith.constant 0 : index
    %83 = vector.load %arg9[%c0_77, %c0_78] : memref<1x1024xf32, #tpu.memory_space<vmem>>, vector<1x1024xf32>
    %84 = vector.broadcast %83 : vector<1x1024xf32> to vector<72x1024xf32>
    %85 = arith.addf %82, %84 : vector<72x1024xf32>
    %cst_79 = arith.constant 0.000000e+00 : f32
    %86 = vector.broadcast %cst_79 : f32 to vector<72x1024xf32>
    %87 = arith.maximumf %85, %86 : vector<72x1024xf32>
    %88 = arith.truncf %87 : vector<72x1024xf32> to vector<72x1024xbf16>
    %89 = vector.extract_strided_slice %88 {offsets = [0, 0], sizes = [8, 512], strides = [1, 1]} : vector<72x1024xbf16> to vector<8x512xbf16>
    %c8_80 = arith.constant 8 : index
    %c0_81 = arith.constant 0 : index
    %90 = vector.load %arg15[%c8_80, %c0_81] : memref<144x640xbf16, #tpu.memory_space<vmem>>, vector<8x512xbf16>
    tpu.vector_store %arg15[%c8_80, %c0_81], %89 {strides = array<i32>} : memref<144x640xbf16, #tpu.memory_space<vmem>>, vector<8x512xbf16>,
    %91 = vector.extract_strided_slice %88 {offsets = [8, 512], sizes = [8, 512], strides = [1, 1]} : vector<72x1024xbf16> to vector<8x512xbf16>
    %c16_82 = arith.constant 16 : index
    %c0_83 = arith.constant 0 : index
    %92 = vector.load %arg15[%c16_82, %c0_83] : memref<144x640xbf16, #tpu.memory_space<vmem>>, vector<8x512xbf16>
    tpu.vector_store %arg15[%c16_82, %c0_83], %91 {strides = array<i32>} : memref<144x640xbf16, #tpu.memory_space<vmem>>, vector<8x512xbf16>,
    %93 = vector.extract_strided_slice %88 {offsets = [8, 0], sizes = [8, 512], strides = [1, 1]} : vector<72x1024xbf16> to vector<8x512xbf16>
    %c24_84 = arith.constant 24 : index
    %c0_85 = arith.constant 0 : index
    %94 = vector.load %arg15[%c24_84, %c0_85] : memref<144x640xbf16, #tpu.memory_space<vmem>>, vector<8x512xbf16>
    tpu.vector_store %arg15[%c24_84, %c0_85], %93 {strides = array<i32>} : memref<144x640xbf16, #tpu.memory_space<vmem>>, vector<8x512xbf16>,
    %95 = vector.extract_strided_slice %88 {offsets = [16, 512], sizes = [8, 512], strides = [1, 1]} : vector<72x1024xbf16> to vector<8x512xbf16>
    %c32_86 = arith.constant 32 : index
    %c0_87 = arith.constant 0 : index
    %96 = vector.load %arg15[%c32_86, %c0_87] : memref<144x640xbf16, #tpu.memory_space<vmem>>, vector<8x512xbf16>
    tpu.vector_store %arg15[%c32_86, %c0_87], %95 {strides = array<i32>} : memref<144x640xbf16, #tpu.memory_space<vmem>>, vector<8x512xbf16>,
    %97 = vector.extract_strided_slice %88 {offsets = [16, 0], sizes = [8, 512], strides = [1, 1]} : vector<72x1024xbf16> to vector<8x512xbf16>
    %c40_88 = arith.constant 40 : index
    %c0_89 = arith.constant 0 : index
    %98 = vector.load %arg15[%c40_88, %c0_89] : memref<144x640xbf16, #tpu.memory_space<vmem>>, vector<8x512xbf16>
    tpu.vector_store %arg15[%c40_88, %c0_89], %97 {strides = array<i32>} : memref<144x640xbf16, #tpu.memory_space<vmem>>, vector<8x512xbf16>,
    %99 = vector.extract_strided_slice %88 {offsets = [24, 512], sizes = [8, 512], strides = [1, 1]} : vector<72x1024xbf16> to vector<8x512xbf16>
    %c48_90 = arith.constant 48 : index
    %c0_91 = arith.constant 0 : index
    %100 = vector.load %arg15[%c48_90, %c0_91] : memref<144x640xbf16, #tpu.memory_space<vmem>>, vector<8x512xbf16>
    tpu.vector_store %arg15[%c48_90, %c0_91], %99 {strides = array<i32>} : memref<144x640xbf16, #tpu.memory_space<vmem>>, vector<8x512xbf16>,
    %101 = vector.extract_strided_slice %88 {offsets = [24, 0], sizes = [8, 512], strides = [1, 1]} : vector<72x1024xbf16> to vector<8x512xbf16>
    %c56_92 = arith.constant 56 : index
    %c0_93 = arith.constant 0 : index
    %102 = vector.load %arg15[%c56_92, %c0_93] : memref<144x640xbf16, #tpu.memory_space<vmem>>, vector<8x512xbf16>
    tpu.vector_store %arg15[%c56_92, %c0_93], %101 {strides = array<i32>} : memref<144x640xbf16, #tpu.memory_space<vmem>>, vector<8x512xbf16>,
    %103 = vector.extract_strided_slice %88 {offsets = [32, 512], sizes = [8, 512], strides = [1, 1]} : vector<72x1024xbf16> to vector<8x512xbf16>
    %c64_94 = arith.constant 64 : index
    %c0_95 = arith.constant 0 : index
    %104 = vector.load %arg15[%c64_94, %c0_95] : memref<144x640xbf16, #tpu.memory_space<vmem>>, vector<8x512xbf16>
    tpu.vector_store %arg15[%c64_94, %c0_95], %103 {strides = array<i32>} : memref<144x640xbf16, #tpu.memory_space<vmem>>, vector<8x512xbf16>,
    %105 = vector.extract_strided_slice %88 {offsets = [32, 0], sizes = [8, 512], strides = [1, 1]} : vector<72x1024xbf16> to vector<8x512xbf16>
    %c72_96 = arith.constant 72 : index
    %c0_97 = arith.constant 0 : index
    %106 = vector.load %arg15[%c72_96, %c0_97] : memref<144x640xbf16, #tpu.memory_space<vmem>>, vector<8x512xbf16>
    tpu.vector_store %arg15[%c72_96, %c0_97], %105 {strides = array<i32>} : memref<144x640xbf16, #tpu.memory_space<vmem>>, vector<8x512xbf16>,
    %107 = vector.extract_strided_slice %88 {offsets = [40, 512], sizes = [8, 512], strides = [1, 1]} : vector<72x1024xbf16> to vector<8x512xbf16>
    %c80 = arith.constant 80 : index
    %c0_98 = arith.constant 0 : index
    %108 = vector.load %arg15[%c80, %c0_98] : memref<144x640xbf16, #tpu.memory_space<vmem>>, vector<8x512xbf16>
    tpu.vector_store %arg15[%c80, %c0_98], %107 {strides = array<i32>} : memref<144x640xbf16, #tpu.memory_space<vmem>>, vector<8x512xbf16>,
    %109 = vector.extract_strided_slice %88 {offsets = [40, 0], sizes = [8, 512], strides = [1, 1]} : vector<72x1024xbf16> to vector<8x512xbf16>
    %c88 = arith.constant 88 : index
    %c0_99 = arith.constant 0 : index
    %110 = vector.load %arg15[%c88, %c0_99] : memref<144x640xbf16, #tpu.memory_space<vmem>>, vector<8x512xbf16>
    tpu.vector_store %arg15[%c88, %c0_99], %109 {strides = array<i32>} : memref<144x640xbf16, #tpu.memory_space<vmem>>, vector<8x512xbf16>,
    %111 = vector.extract_strided_slice %88 {offsets = [48, 512], sizes = [8, 512], strides = [1, 1]} : vector<72x1024xbf16> to vector<8x512xbf16>
    %c96 = arith.constant 96 : index
    %c0_100 = arith.constant 0 : index
    %112 = vector.load %arg15[%c96, %c0_100] : memref<144x640xbf16, #tpu.memory_space<vmem>>, vector<8x512xbf16>
    tpu.vector_store %arg15[%c96, %c0_100], %111 {strides = array<i32>} : memref<144x640xbf16, #tpu.memory_space<vmem>>, vector<8x512xbf16>,
    %113 = vector.extract_strided_slice %88 {offsets = [48, 0], sizes = [8, 512], strides = [1, 1]} : vector<72x1024xbf16> to vector<8x512xbf16>
    %c104 = arith.constant 104 : index
    %c0_101 = arith.constant 0 : index
    %114 = vector.load %arg15[%c104, %c0_101] : memref<144x640xbf16, #tpu.memory_space<vmem>>, vector<8x512xbf16>
    tpu.vector_store %arg15[%c104, %c0_101], %113 {strides = array<i32>} : memref<144x640xbf16, #tpu.memory_space<vmem>>, vector<8x512xbf16>,
    %115 = vector.extract_strided_slice %88 {offsets = [56, 512], sizes = [8, 512], strides = [1, 1]} : vector<72x1024xbf16> to vector<8x512xbf16>
    %c112 = arith.constant 112 : index
    %c0_102 = arith.constant 0 : index
    %116 = vector.load %arg15[%c112, %c0_102] : memref<144x640xbf16, #tpu.memory_space<vmem>>, vector<8x512xbf16>
    tpu.vector_store %arg15[%c112, %c0_102], %115 {strides = array<i32>} : memref<144x640xbf16, #tpu.memory_space<vmem>>, vector<8x512xbf16>,
    %117 = vector.extract_strided_slice %88 {offsets = [56, 0], sizes = [8, 512], strides = [1, 1]} : vector<72x1024xbf16> to vector<8x512xbf16>
    %c120 = arith.constant 120 : index
    %c0_103 = arith.constant 0 : index
    %118 = vector.load %arg15[%c120, %c0_103] : memref<144x640xbf16, #tpu.memory_space<vmem>>, vector<8x512xbf16>
    tpu.vector_store %arg15[%c120, %c0_103], %117 {strides = array<i32>} : memref<144x640xbf16, #tpu.memory_space<vmem>>, vector<8x512xbf16>,
    %119 = vector.extract_strided_slice %88 {offsets = [64, 512], sizes = [8, 512], strides = [1, 1]} : vector<72x1024xbf16> to vector<8x512xbf16>
    %c128 = arith.constant 128 : index
    %c0_104 = arith.constant 0 : index
    %120 = vector.load %arg15[%c128, %c0_104] : memref<144x640xbf16, #tpu.memory_space<vmem>>, vector<8x512xbf16>
    tpu.vector_store %arg15[%c128, %c0_104], %119 {strides = array<i32>} : memref<144x640xbf16, #tpu.memory_space<vmem>>, vector<8x512xbf16>,
    %c0_105 = arith.constant 0 : index
    %c0_106 = arith.constant 0 : index
    %121 = vector.load %arg15[%c0_105, %c0_106] : memref<144x640xbf16, #tpu.memory_space<vmem>>, vector<136x640xbf16>
    %c8_107 = arith.constant 8 : index
    %c0_108 = arith.constant 0 : index
    %122 = vector.load %arg15[%c8_107, %c0_108] : memref<144x640xbf16, #tpu.memory_space<vmem>>, vector<136x640xbf16>
    %c0_109 = arith.constant 0 : index
    %c0_110 = arith.constant 0 : index
    %c0_111 = arith.constant 0 : index
    %123 = vector.load %arg10[%c0_109, %c0_110, %c0_111] : memref<2x640x64xbf16, #tpu.memory_space<vmem>>, vector<1x640x64xbf16>
    %124 = vector.shape_cast %123 : vector<1x640x64xbf16> to vector<640x64xbf16>
    %cst_112 = arith.constant dense<0.000000e+00> : vector<136x64xf32>
    %125 = tpu.matmul %121, %124, %cst_112 {dimension_numbers = #tpu.dot_dimension_numbers<[1], [0], [0], [1], [0, 0, 1, 1], [], []>} : vector<136x640xbf16>, vector<640x64xbf16>, vector<136x64xf32> -> vector<136x64xf32>
    %c1_113 = arith.constant 1 : index
    %c0_114 = arith.constant 0 : index
    %c0_115 = arith.constant 0 : index
    %126 = vector.load %arg10[%c1_113, %c0_114, %c0_115] : memref<2x640x64xbf16, #tpu.memory_space<vmem>>, vector<1x640x64xbf16>
    %127 = vector.shape_cast %126 : vector<1x640x64xbf16> to vector<640x64xbf16>
    %cst_116 = arith.constant dense<0.000000e+00> : vector<136x64xf32>
    %128 = tpu.matmul %122, %127, %cst_116 {dimension_numbers = #tpu.dot_dimension_numbers<[1], [0], [0], [1], [0, 0, 1, 1], [], []>} : vector<136x640xbf16>, vector<640x64xbf16>, vector<136x64xf32> -> vector<136x64xf32>
    %129 = arith.addf %125, %128 : vector<136x64xf32>
    %c0_117 = arith.constant 0 : index
    %c0_118 = arith.constant 0 : index
    %130 = vector.load %arg11[%c0_117, %c0_118] : memref<1x64xf32, #tpu.memory_space<vmem>>, vector<1x64xf32>
    %131 = vector.broadcast %130 : vector<1x64xf32> to vector<136x64xf32>
    %132 = arith.addf %129, %131 : vector<136x64xf32>
    %133 = vector.extract_strided_slice %132 {offsets = [0, 0], sizes = [128, 32], strides = [1, 1]} : vector<136x64xf32> to vector<128x32xf32>
    %134 = vector.extract_strided_slice %132 {offsets = [8, 32], sizes = [128, 32], strides = [1, 1]} : vector<136x64xf32> to vector<128x32xf32>
    %135 = tpu.concatenate %133, %134 in 1 : vector<128x32xf32>, vector<128x32xf32> -> vector<128x64xf32>
    %136 = arith.negf %135 : vector<128x64xf32>
    %137 = math.exp %136 : vector<128x64xf32>
    %cst_119 = arith.constant 1.000000e+00 : f32
    %138 = vector.broadcast %cst_119 : f32 to vector<128x64xf32>
    %139 = arith.addf %138, %137 : vector<128x64xf32>
    %140 = arith.divf %138, %139 : vector<128x64xf32>
    %c0_120 = arith.constant 0 : index
    %c0_121 = arith.constant 0 : index
    %141 = vector.load %arg12[%c0_120, %c0_121] : memref<128x64xf32, #tpu.memory_space<vmem>>, vector<128x64xf32>
    tpu.vector_store %arg12[%c0_120, %c0_121], %140 {strides = array<i32>} : memref<128x64xf32, #tpu.memory_space<vmem>>, vector<128x64xf32>,
    return
  }
  func.func @transform_0(%arg0: i32) -> (i32, i32) {
    %c0_i32 = arith.constant 0 : i32
    %c0_i32_0 = arith.constant 0 : i32
    return %arg0, %c0_i32 : i32, i32
  }
  func.func @transform_1(%arg0: i32) -> (i32, i32) {
    %c0_i32 = arith.constant 0 : i32
    %c0_i32_0 = arith.constant 0 : i32
    %c0_i32_1 = arith.constant 0 : i32
    return %c0_i32, %c0_i32_0 : i32, i32
  }
  func.func @transform_2(%arg0: i32) -> (i32, i32) {
    %c0_i32 = arith.constant 0 : i32
    %c0_i32_0 = arith.constant 0 : i32
    %c0_i32_1 = arith.constant 0 : i32
    return %c0_i32, %c0_i32_0 : i32, i32
  }
  func.func @transform_3(%arg0: i32) -> (i32, i32) {
    %c0_i32 = arith.constant 0 : i32
    %c0_i32_0 = arith.constant 0 : i32
    %c0_i32_1 = arith.constant 0 : i32
    return %c0_i32, %c0_i32_0 : i32, i32
  }
  func.func @transform_4(%arg0: i32) -> (i32, i32) {
    %c0_i32 = arith.constant 0 : i32
    %c0_i32_0 = arith.constant 0 : i32
    %c0_i32_1 = arith.constant 0 : i32
    return %c0_i32, %c0_i32_0 : i32, i32
  }
  func.func @transform_5(%arg0: i32) -> (i32, i32, i32) {
    %c0_i32 = arith.constant 0 : i32
    %c0_i32_0 = arith.constant 0 : i32
    %c0_i32_1 = arith.constant 0 : i32
    %c0_i32_2 = arith.constant 0 : i32
    return %c0_i32, %c0_i32_0, %c0_i32_1 : i32, i32, i32
  }
  func.func @transform_6(%arg0: i32) -> (i32, i32) {
    %c0_i32 = arith.constant 0 : i32
    %c0_i32_0 = arith.constant 0 : i32
    %c0_i32_1 = arith.constant 0 : i32
    return %c0_i32, %c0_i32_0 : i32, i32
  }
  func.func @transform_7(%arg0: i32) -> (i32, i32, i32) {
    %c0_i32 = arith.constant 0 : i32
    %c0_i32_0 = arith.constant 0 : i32
    %c0_i32_1 = arith.constant 0 : i32
    %c0_i32_2 = arith.constant 0 : i32
    return %c0_i32, %c0_i32_0, %c0_i32_1 : i32, i32, i32
  }
  func.func @transform_8(%arg0: i32) -> (i32, i32) {
    %c0_i32 = arith.constant 0 : i32
    %c0_i32_0 = arith.constant 0 : i32
    %c0_i32_1 = arith.constant 0 : i32
    return %c0_i32, %c0_i32_0 : i32, i32
  }
  func.func @transform_9(%arg0: i32) -> (i32, i32, i32) {
    %c0_i32 = arith.constant 0 : i32
    %c0_i32_0 = arith.constant 0 : i32
    %c0_i32_1 = arith.constant 0 : i32
    %c0_i32_2 = arith.constant 0 : i32
    return %c0_i32, %c0_i32_0, %c0_i32_1 : i32, i32, i32
  }
  func.func @transform_10(%arg0: i32) -> (i32, i32) {
    %c0_i32 = arith.constant 0 : i32
    %c0_i32_0 = arith.constant 0 : i32
    %c0_i32_1 = arith.constant 0 : i32
    return %c0_i32, %c0_i32_0 : i32, i32
  }
  func.func @transform_11(%arg0: i32) -> (i32, i32) {
    %c0_i32 = arith.constant 0 : i32
    %c0_i32_0 = arith.constant 0 : i32
    return %arg0, %c0_i32 : i32, i32
  }
}

</mosaic_0001>

<bundles_post_ra>
// kernel: tile.24
= control target key start
LH: loop header
LB: loop body
LE: loop exit
PB: predicated region body
PF: predicated region fallthrough
CT: control target
= control target key end

     0   :  { %s93_s8 = smov 96   ;;  %vm3_vm0 = vcmask 261120   ;;  %s95_s15 = smov 64   ;;  %vm10_vm1 = vcmask 1048320   ;;  %vm17_vm2 = vcmask 785920   ;;  %vm24_vm3 = vcmask 523520   ;;  %s142_s0 = inlined_call_operand.vmem [shape: f32[32,32], index: 0, kind: input, shape index: {}]   ;;  %s143_s1 = inlined_call_operand.vmem [shape: f32[1,1024], index: 1, kind: output, shape index: {}]  }
   0x1   :  { %v80_v0 = vld [vmem:[%s142_s0 + $0x3] ss:$4 sm:$0xff]   ;;  %v82_v1 = vld [vmem:[%s142_s0 + $0x1] ss:$4 sm:$0xff]   ;;  %v2_v2 = vld [vmem:[%s142_s0] ss:$4 sm:$0xff]  }
   0x2   :  { %8 = vrot.lane.b32.xlu0 %v80_v0, %s93_s8  ;;  %v81_v3 = vld [vmem:[%s142_s0 + $0x2] ss:$4 sm:$0xff]   ;;  %s94_s0 = smov 32   ;;  %4 = vst.msk [vmem:[#allocation0] ss:$8 sm:$0xf] %vm3_vm0, %v2_v2  }
   0x3   :  { %22 = vrot.lane.b32.xlu1 %v82_v1, %s94_s0  ;;  %5 = vst.msk [vmem:[#allocation0] ss:$8 sm:$0xf0] %vm3_vm0, %v2_v2  }
   0x6   :  { %15 = vrot.lane.b32.xlu0 %v81_v3, %s95_s15 }
  0x74   :  { %v9_v4 = vpop.permute.xlu0 %8  }
  0x75   :  { %11 = vst.msk [vmem:[#allocation0] ss:$8 sm:$0xf] %vm10_vm1, %v9_v4   ;;  %12 = vst.msk [vmem:[#allocation0] ss:$8 sm:$0xf0] %vm10_vm1, %v9_v4   ;;  %v23_v5 = vpop.permute.xlu1 %22  }
  0x78   :  { %v16_v6 = vpop.permute.xlu0 %15  }
  0x79   :  { %18 = vst.msk [vmem:[#allocation0] ss:$8 sm:$0xf] %vm17_vm2, %v16_v6   ;;  %19 = vst.msk [vmem:[#allocation0] ss:$8 sm:$0xf0] %vm17_vm2, %v16_v6  }
  0x7a   :  { %25 = vst.msk [vmem:[#allocation0] ss:$8 sm:$0xf] %vm24_vm3, %v23_v5   ;;  %26 = vst.msk [vmem:[#allocation0] ss:$8 sm:$0xf0] %vm24_vm3, %v23_v5  }
  0x81   :  { %v30_v7 = vld [vmem:[#allocation0] sm:$0x1]  ;;  %v34_v8 = vld [vmem:[#allocation0 + $0x8] sm:$0x1]  ;;  %v39_v9 = vld [vmem:[#allocation0 + $0x10] sm:$0x1] }
  0x82   :  { %32 = vst [vmem:[%s143_s1] sm:$0x1] %v30_v7  ;;  %83 = vst [vmem:[%s143_s1 + $0x1] sm:$0x1] %v34_v8  ;;  %v45_v10 = vld [vmem:[#allocation0 + $0x18] sm:$0x1] }
  0x83   :  { %84 = vst [vmem:[%s143_s1 + $0x2] sm:$0x1] %v39_v9  ;;  %v51_v11 = vld [vmem:[#allocation0 + $0x20] sm:$0x1]  ;;  %v57_v12 = vld [vmem:[#allocation0 + $0x28] sm:$0x1] }
  0x84   :  { %85 = vst [vmem:[%s143_s1 + $0x3] sm:$0x1] %v45_v10  ;;  %86 = vst [vmem:[%s143_s1 + $0x4] sm:$0x1] %v51_v11  ;;  %v63_v13 = vld [vmem:[#allocation0 + $0x30] sm:$0x1] }
  0x85   :  { %87 = vst [vmem:[%s143_s1 + $0x5] sm:$0x1] %v57_v12  ;;  %v69_v14 = vld [vmem:[#allocation0 + $0x38] sm:$0x1]  ;;  %88 = vst [vmem:[%s143_s1 + $0x6] sm:$0x1] %v63_v13 }
  0x86   :  { %89 = vst [vmem:[%s143_s1 + $0x7] sm:$0x1] %v69_v14 }

// kernel: tile.23
= control target key start
LH: loop header
LB: loop body
LE: loop exit
PB: predicated region body
PF: predicated region fallthrough
CT: control target
= control target key end

     0   :  { %s40_s0 = inlined_call_operand.vmem [shape: f32[32], index: 0, kind: input, shape index: {}]   ;;  %s41_s1 = inlined_call_operand.vmem [shape: f32[32,32], index: 1, kind: output, shape index: {}]  }
   0x1   :  { %v4_v0 = vld [vmem:[%s40_s0] ss:$0 sm:$0xff] }
   0x2   :  { %5 = vst [vmem:[%s41_s1] sm:$0xff] %v4_v0  ;;  %12 = vst [vmem:[%s41_s1 + $0x8] sm:$0xff] %v4_v0 }
   0x3   :  { %13 = vst [vmem:[%s41_s1 + $0x10] sm:$0xff] %v4_v0  ;;  %14 = vst [vmem:[%s41_s1 + $0x18] sm:$0xff] %v4_v0 }

// kernel: tile.18
= control target key start
LH: loop header
LB: loop body
LE: loop exit
PB: predicated region body
PF: predicated region fallthrough
CT: control target
= control target key end

     0   :  { %s28_s0 = inlined_call_operand.vmem [shape: f32[32], index: 0, kind: input, shape index: {}]   ;;  %s29_s1 = inlined_call_operand.vmem [shape: f32[16,32], index: 1, kind: output, shape index: {}]  }
   0x1   :  { %v4_v0 = vld [vmem:[%s28_s0] ss:$0 sm:$0xff] }
   0x2   :  { %5 = vst [vmem:[%s29_s1] sm:$0xff] %v4_v0  ;;  %8 = vst [vmem:[%s29_s1 + $0x8] sm:$0xff] %v4_v0 }

// kernel: tile.19
= control target key start
LH: loop header
LB: loop body
LE: loop exit
PB: predicated region body
PF: predicated region fallthrough
CT: control target
= control target key end

     0   :  { %s57_s8 = smov 96   ;;  %vm3_vm0 = vcmask 261120   ;;  %s59_s15 = smov 64   ;;  %vm9_vm1 = vcmask 1048320   ;;  %vm15_vm2 = vcmask 785920   ;;  %vm21_vm3 = vcmask 523520   ;;  %s94_s0 = inlined_call_operand.vmem [shape: f32[16,32], index: 0, kind: input, shape index: {}]   ;;  %s95_s1 = inlined_call_operand.vmem [shape: f32[1,512], index: 1, kind: output, shape index: {}]  }
   0x1   :  { %v48_v0 = vld [vmem:[%s94_s0 + $0x3] ss:$4 sm:$0xf]   ;;  %v49_v1 = vld [vmem:[%s94_s0 + $0x2] ss:$4 sm:$0xf]  }
   0x2   :  { %7 = vrot.lane.b32.xlu0 %v48_v0, %s57_s8  ;;  %v50_v2 = vld [vmem:[%s94_s0 + $0x1] ss:$4 sm:$0xf]   ;;  %v2_v3 = vld [vmem:[%s94_s0] ss:$4 sm:$0xf]  }
   0x3   :  { %s58_s0 = smov 32   ;;  %4 = vst.msk [vmem:[#allocation0] ss:$8 sm:$0xf] %vm3_vm0, %v2_v3  }
   0x4   :  { %19 = vrot.lane.b32.xlu1 %v50_v2, %s58_s0 }
   0x6   :  { %13 = vrot.lane.b32.xlu0 %v49_v1, %s59_s15 }
  0x74   :  { %v8_v4 = vpop.permute.xlu0 %7  }
  0x75   :  { %10 = vst.msk [vmem:[#allocation0] ss:$8 sm:$0xf] %vm9_vm1, %v8_v4  }
  0x76   :  { %v20_v5 = vpop.permute.xlu1 %19  }
  0x78   :  { %v14_v6 = vpop.permute.xlu0 %13  }
  0x79   :  { %16 = vst.msk [vmem:[#allocation0] ss:$8 sm:$0xf] %vm15_vm2, %v14_v6  }
  0x7a   :  { %22 = vst.msk [vmem:[#allocation0] ss:$8 sm:$0xf] %vm21_vm3, %v20_v5  }
  0x81   :  { %v26_v7 = vld [vmem:[#allocation0] sm:$0x1]  ;;  %v30_v8 = vld [vmem:[#allocation0 + $0x8] sm:$0x1]  ;;  %v35_v9 = vld [vmem:[#allocation0 + $0x10] sm:$0x1] }
  0x82   :  { %28 = vst [vmem:[%s95_s1] sm:$0x1] %v26_v7  ;;  %51 = vst [vmem:[%s95_s1 + $0x1] sm:$0x1] %v30_v8  ;;  %v41_v10 = vld [vmem:[#allocation0 + $0x18] sm:$0x1] }
  0x83   :  { %52 = vst [vmem:[%s95_s1 + $0x2] sm:$0x1] %v35_v9  ;;  %53 = vst [vmem:[%s95_s1 + $0x3] sm:$0x1] %v41_v10 }

// kernel: mnist_conv_decoder.1
= control target key start
LH: loop header
LB: loop body
LE: loop exit
PB: predicated region body
PF: predicated region fallthrough
CT: control target
= control target key end

     0   :  { %vm105_vm0 = vcmask 1046528   ;;  %vm106_vm1 = vcmask 1047552   ;;  %v10929_v1 = vmov 65535   ;;  %v10930_v3 = vmov 0   ;;  %s14306_s1 = inlined_call_operand.vmem [shape: bf16[15,256], index: 1, kind: input, shape index: {}]   ;;  %s14307_s3 = inlined_call_operand.vmem [shape: bf16[256,1024], index: 3, kind: input, shape index: {}]   ;;  %s14308_s0 = inlined_call_operand.vmem [shape: bf16[8,15], index: 0, kind: input, shape index: {}]   ;;  %s14309_s2 = inlined_call_operand.vmem [shape: f32[1,256], index: 2, kind: input, shape index: {}]   ;;  %s14310_s5 = inlined_call_operand.vmem [shape: bf16[2,384,512], index: 5, kind: input, shape index: {}]   ;;  %s14311_s4 = inlined_call_operand.vmem [shape: f32[1,1024], index: 4, kind: input, shape index: {}]   ;;  %s14312_s7 = inlined_call_operand.vmem [shape: bf16[2,384,1024], index: 7, kind: input, shape index: {}]   ;;  %s14313_s6 = inlined_call_operand.vmem [shape: f32[1,512], index: 6, kind: input, shape index: {}]   ;;  %s14314_s9 = inlined_call_operand.vmem [shape: bf16[2,640,64], index: 9, kind: input, shape index: {}]   ;;  %s14315_s8 = inlined_call_operand.vmem [shape: f32[1,1024], index: 8, kind: input, shape index: {}]   ;;  %s14316_s10 = inlined_call_operand.vmem [shape: f32[1,64], index: 10, kind: input, shape index: {}]   ;;  %s14317_s11 = inlined_call_operand.vmem [shape: f32[128,64], index: 11, kind: output, shape index: {}]  }
   0x1   :  { %v10484_v0 = vld [vmem:[%s14306_s1 + $0x4] ss:$8 sps:$4 sm:$0xff]   ;;  %v107_v2 = vsel %vm105_vm0, 4294967295, %v10929_v1  ;;  %147 = vmatprep.mubr.bf16.mxu0 %v10930_v3  ;;  %39 = vst [vmem:[#allocation2] sm:$0xf] %v10930_v3  ;;  %46 = vst [vmem:[#allocation2 + $0x28] sm:$0xff] %v10930_v3 }
   0x2   :  { %40 = vst [vmem:[#allocation2 + $0x8] sm:$0xf] %v10930_v3  ;;  %42 = vst [vmem:[#allocation2 + $0x30] sm:$0xf0] %v10930_v3  ;;  %v108_v4 = vsel %vm106_vm1, %v107_v2, 0  ;;  %v160_v6 = vld [vmem:[%s14307_s3] sm:$0xff] }
   0x3   :  { %43 = vst [vmem:[#allocation2 + $0x38] sm:$0xf0] %v10930_v3  ;;  %48 = vst [vmem:[#allocation3] sm:$0xf] %v10930_v3  ;;  %v10486_v5 = vld [vmem:[%s14306_s1] ss:$8 sps:$4 sm:$0xff]   ;;  %v113_v7 = vand.u32 %v10484_v0, %v108_v4 }
   0x4   :  { %49 = vst [vmem:[#allocation3 + $0x8] sm:$0xf] %v10930_v3  ;;  %51 = vst [vmem:[#allocation3 + $0x60] sm:$0xf0] %v10930_v3  ;;  %v164_v8 = vld [vmem:[%s14307_s3 + $0x20] sm:$0xff]  ;;  %v161_v9 = vld [vmem:[%s14307_s3 + $0x8] sm:$0xff]  ;;  %v110_v11 = vand.u32 %v10486_v5, %v108_v4 }
   0x5   :  { %52 = vst [vmem:[#allocation3 + $0x68] sm:$0xf0] %v10930_v3  ;;  %59 = vst [vmem:[#allocation4] sm:$0xf] %v10930_v3  ;;  %v165_v10 = vld [vmem:[%s14307_s3 + $0x28] sm:$0xff]  ;;  %v8654_v12 = vcombine.high %v160_v6, %v164_v8  ;;  %v168_v14 = vld [vmem:[%s14307_s3 + $0x40] sm:$0xff]  ;;  %115 = vmatprep.subr.bf16.mxu0 %v113_v7  ;;  %v8653_v17 = vcombine.low %v160_v6, %v164_v8 }
   0x6   :  { %60 = vst [vmem:[#allocation4 + $0x8] sm:$0xf] %v10930_v3  ;;  %61 = vst [vmem:[#allocation4 + $0x10] sm:$0xf] %v10930_v3  ;;  %v8656_v13 = vcombine.high %v161_v9, %v165_v10  ;;  %v172_v15 = vld [vmem:[%s14307_s3 + $0x60] sm:$0xff]  ;;  %v169_v16 = vld [vmem:[%s14307_s3 + $0x48] sm:$0xff]  ;;  %116 = vmatpush1.bf16.msra.mxu0 %v110_v11  ;;  %v8655_v23 = vcombine.low %v161_v9, %v165_v10 }
   0x7   :  { %62 = vst [vmem:[#allocation4 + $0x18] sm:$0xf] %v10930_v3  ;;  %64 = vst [vmem:[#allocation4 + $0x140] sm:$0xf0] %v10930_v3  ;;  %v8662_v18 = vcombine.high %v168_v14, %v172_v15  ;;  %v173_v19 = vld [vmem:[%s14307_s3 + $0x68] sm:$0xff]  ;;  %v176_v20 = vld [vmem:[%s14307_s3 + $0x80] sm:$0xff]  ;;  %970 = vmatprep.subr.bf16.mxu1 %v8654_v12  ;;  %v8661_v25 = vcombine.low %v168_v14, %v172_v15 }
   0x8   :  { %65 = vst [vmem:[#allocation4 + $0x148] sm:$0xf0] %v10930_v3  ;;  %66 = vst [vmem:[#allocation4 + $0x150] sm:$0xf0] %v10930_v3  ;;  %v180_v21 = vld [vmem:[%s14307_s3 + $0xa0] sm:$0xff]  ;;  %vm101_vm2 = vcmask 121856   ;;  %1011 = vmatprep.subr.bf16.mxu0 %v8656_v13  ;;  %971 = vmatpush1.bf16.msra.mxu1 %v8653_v17  ;;  %v8664_v24 = vcombine.high %v169_v16, %v173_v19  ;;  %v8663_v31 = vcombine.low %v169_v16, %v173_v19 }
   0x9   :  { %67 = vst [vmem:[#allocation4 + $0x158] sm:$0xf0] %v10930_v3  ;;  %45 = vst [vmem:[#allocation2 + $0x10] sm:$0xff] %v10930_v3  ;;  %v78_v22 = vld [vmem:[%s14308_s0] sm:$0xf]  ;;  %972 = vmatprep.subr.bf16.mxu1 %v8662_v18  ;;  %v8670_v26 = vcombine.high %v176_v20, %v180_v21  ;;  %v177_v27 = vld [vmem:[%s14307_s3 + $0x88] sm:$0xff]  ;;  %v8669_v33 = vcombine.low %v176_v20, %v180_v21 }
   0xa   :  { %47 = vst [vmem:[#allocation2 + $0x40] sm:$0xff] %v10930_v3  ;;  %54 = vst [vmem:[#allocation3 + $0x10] sm:$0xff] %v10930_v3  ;;  %v181_v28 = vld [vmem:[%s14307_s3 + $0xa8] sm:$0xff]  ;;  %8652 = vmatmul.mubr.msk.bf16.vlgmr.msra.gmra.mrb[0].mxu0 %vm101_vm2, %v78_v22  ;;  %v184_v29 = vld [vmem:[%s14307_s3 + $0xc0] sm:$0xff]  ;;  %vm1387_vm3 = vcmask 1043456   ;;  %vm10932_vm4 = vmmov 0  }
   0xb   :  { %58 = vst [vmem:[#allocation3 + $0x70] sm:$0xff] %v10930_v3  ;;  %69 = vst [vmem:[#allocation4 + $0x20] sm:$0xff] %v10930_v3  ;;  %v188_v30 = vld [vmem:[%s14307_s3 + $0xe0] sm:$0xff]  ;;  %1012 = vmatpush1.bf16.msra.mxu0 %v8655_v23  ;;  %v8672_v32 = vcombine.high %v177_v27, %v181_v28  ;;  %v185_v35 = vld [vmem:[%s14307_s3 + $0xc8] sm:$0xff]  ;;  %v8671_v39 = vcombine.low %v177_v27, %v181_v28  ;;  %vm8516_vm5 = vcmask 261120   ;;  %vm8629_vm6 = vcmask 523264  }
   0xc   :  { %77 = vst [vmem:[#allocation4 + $0x160] sm:$0xff] %v10930_v3  ;;  %1013 = vmatprep.subr.bf16.mxu0 %v8664_v24  ;;  %973 = vmatpush1.bf16.msra.mxu1 %v8661_v25  ;;  %v8678_v34 = vcombine.high %v184_v29, %v188_v30  ;;  %v189_v36 = vld [vmem:[%s14307_s3 + $0xe8] sm:$0xff]  ;;  %v192_v37 = vld [vmem:[%s14307_s3 + $0x100] sm:$0xff]  ;;  %v8677_v41 = vcombine.low %v184_v29, %v188_v30 }
   0xd   :  { %974 = vmatprep.subr.bf16.mxu1 %v8670_v26  ;;  %v196_v38 = vld [vmem:[%s14307_s3 + $0x120] sm:$0xff]  ;;  %v8680_v40 = vcombine.high %v185_v35, %v189_v36  ;;  %v193_v43 = vld [vmem:[%s14307_s3 + $0x108] sm:$0xff]  ;;  %v8679_v47 = vcombine.low %v185_v35, %v189_v36 }
   0xe   :  { %v8686_v42 = vcombine.high %v192_v37, %v196_v38  ;;  %v197_v44 = vld [vmem:[%s14307_s3 + $0x128] sm:$0xff]  ;;  %v200_v45 = vld [vmem:[%s14307_s3 + $0x140] sm:$0xff]  ;;  %v8685_v49 = vcombine.low %v192_v37, %v196_v38 }
   0xf   :  { %1014 = vmatpush1.bf16.msra.mxu0 %v8663_v31  ;;  %v204_v46 = vld [vmem:[%s14307_s3 + $0x160] sm:$0xff]  ;;  %v8688_v48 = vcombine.high %v193_v43, %v197_v44  ;;  %v201_v51 = vld [vmem:[%s14307_s3 + $0x148] sm:$0xff]  ;;  %v8687_v55 = vcombine.low %v193_v43, %v197_v44 }
  0x10   :  { %1015 = vmatprep.subr.bf16.mxu0 %v8672_v32  ;;  %975 = vmatpush1.bf16.msra.mxu1 %v8669_v33  ;;  %v8694_v50 = vcombine.high %v200_v45, %v204_v46  ;;  %v205_v52 = vld [vmem:[%s14307_s3 + $0x168] sm:$0xff]  ;;  %v208_v53 = vld [vmem:[%s14307_s3 + $0x180] sm:$0xff]  ;;  %v8693_v57 = vcombine.low %v200_v45, %v204_v46 }
  0x11   :  { %976 = vmatprep.subr.bf16.mxu1 %v8678_v34  ;;  %v212_v54 = vld [vmem:[%s14307_s3 + $0x1a0] sm:$0xff]  ;;  %v8696_v56 = vcombine.high %v201_v51, %v205_v52  ;;  %v209_v59 = vld [vmem:[%s14307_s3 + $0x188] sm:$0xff]  ;;  %v8695_v63 = vcombine.low %v201_v51, %v205_v52 }
  0x12   :  { %v8702_v58 = vcombine.high %v208_v53, %v212_v54  ;;  %v213_v60 = vld [vmem:[%s14307_s3 + $0x1a8] sm:$0xff]  ;;  %v216_v61 = vld [vmem:[%s14307_s3 + $0x1c0] sm:$0xff]  ;;  %v8701_v1 = vcombine.low %v208_v53, %v212_v54 }
  0x13   :  { %1016 = vmatpush1.bf16.msra.mxu0 %v8671_v39  ;;  %v220_v62 = vld [vmem:[%s14307_s3 + $0x1e0] sm:$0xff]  ;;  %v8704_v0 = vcombine.high %v209_v59, %v213_v60  ;;  %v217_v3 = vld [vmem:[%s14307_s3 + $0x1c8] sm:$0xff]  ;;  %v8703_v7 = vcombine.low %v209_v59, %v213_v60 }
  0x14   :  { %1017 = vmatprep.subr.bf16.mxu0 %v8680_v40  ;;  %977 = vmatpush1.bf16.msra.mxu1 %v8677_v41  ;;  %v8710_v2 = vcombine.high %v216_v61, %v220_v62  ;;  %v221_v4 = vld [vmem:[%s14307_s3 + $0x1e8] sm:$0xff]  ;;  %v224_v5 = vld [vmem:[%s14307_s3 + $0x200] sm:$0xff]  ;;  %v8709_v9 = vcombine.low %v216_v61, %v220_v62 }
  0x15   :  { %978 = vmatprep.subr.bf16.mxu1 %v8686_v42  ;;  %v228_v6 = vld [vmem:[%s14307_s3 + $0x220] sm:$0xff]  ;;  %v8712_v8 = vcombine.high %v217_v3, %v221_v4  ;;  %v225_v11 = vld [vmem:[%s14307_s3 + $0x208] sm:$0xff]  ;;  %v8711_v15 = vcombine.low %v217_v3, %v221_v4 }
  0x16   :  { %v8718_v10 = vcombine.high %v224_v5, %v228_v6  ;;  %v229_v12 = vld [vmem:[%s14307_s3 + $0x228] sm:$0xff]  ;;  %v232_v13 = vld [vmem:[%s14307_s3 + $0x240] sm:$0xff]  ;;  %v8717_v17 = vcombine.low %v224_v5, %v228_v6 }
  0x17   :  { %1018 = vmatpush1.bf16.msra.mxu0 %v8679_v47  ;;  %v236_v14 = vld [vmem:[%s14307_s3 + $0x260] sm:$0xff]  ;;  %v8720_v16 = vcombine.high %v225_v11, %v229_v12  ;;  %v233_v19 = vld [vmem:[%s14307_s3 + $0x248] sm:$0xff]  ;;  %v8719_v23 = vcombine.low %v225_v11, %v229_v12  ;;  %v163_v12 = vld [vmem:[%s14307_s3 + $0x18] sm:$0xff] }
  0x18   :  { %1019 = vmatprep.subr.bf16.mxu0 %v8688_v48  ;;  %979 = vmatpush1.bf16.msra.mxu1 %v8685_v49  ;;  %v8726_v18 = vcombine.high %v232_v13, %v236_v14  ;;  %v237_v20 = vld [vmem:[%s14307_s3 + $0x268] sm:$0xff]  ;;  %v240_v21 = vld [vmem:[%s14307_s3 + $0x280] sm:$0xff]  ;;  %v8725_v25 = vcombine.low %v232_v13, %v236_v14  ;;  %v167_v13 = vld [vmem:[%s14307_s3 + $0x38] sm:$0xff] }
  0x19   :  { %980 = vmatprep.subr.bf16.mxu1 %v8694_v50  ;;  %v244_v22 = vld [vmem:[%s14307_s3 + $0x2a0] sm:$0xff]  ;;  %v8728_v24 = vcombine.high %v233_v19, %v237_v20  ;;  %v241_v27 = vld [vmem:[%s14307_s3 + $0x288] sm:$0xff]  ;;  %v8727_v31 = vcombine.low %v233_v19, %v237_v20 }
  0x1a   :  { %v8734_v26 = vcombine.high %v240_v21, %v244_v22  ;;  %v245_v28 = vld [vmem:[%s14307_s3 + $0x2a8] sm:$0xff]  ;;  %v248_v29 = vld [vmem:[%s14307_s3 + $0x2c0] sm:$0xff]  ;;  %v8733_v33 = vcombine.low %v240_v21, %v244_v22 }
  0x1b   :  { %1020 = vmatpush1.bf16.msra.mxu0 %v8687_v55  ;;  %v252_v30 = vld [vmem:[%s14307_s3 + $0x2e0] sm:$0xff]  ;;  %v8736_v32 = vcombine.high %v241_v27, %v245_v28  ;;  %v249_v35 = vld [vmem:[%s14307_s3 + $0x2c8] sm:$0xff]  ;;  %v8735_v39 = vcombine.low %v241_v27, %v245_v28 }
  0x1c   :  { %1021 = vmatprep.subr.bf16.mxu0 %v8696_v56  ;;  %981 = vmatpush1.bf16.msra.mxu1 %v8693_v57  ;;  %v8742_v34 = vcombine.high %v248_v29, %v252_v30  ;;  %v253_v36 = vld [vmem:[%s14307_s3 + $0x2e8] sm:$0xff]  ;;  %v256_v37 = vld [vmem:[%s14307_s3 + $0x300] sm:$0xff]  ;;  %v8741_v41 = vcombine.low %v248_v29, %v252_v30 }
  0x1d   :  { %982 = vmatprep.subr.bf16.mxu1 %v8702_v58  ;;  %v260_v38 = vld [vmem:[%s14307_s3 + $0x320] sm:$0xff]  ;;  %v8744_v40 = vcombine.high %v249_v35, %v253_v36  ;;  %v257_v43 = vld [vmem:[%s14307_s3 + $0x308] sm:$0xff]  ;;  %v8743_v47 = vcombine.low %v249_v35, %v253_v36  ;;  %v175_v35 = vld [vmem:[%s14307_s3 + $0x78] sm:$0xff] }
  0x1e   :  { %v8750_v42 = vcombine.high %v256_v37, %v260_v38  ;;  %v261_v44 = vld [vmem:[%s14307_s3 + $0x328] sm:$0xff]  ;;  %v264_v45 = vld [vmem:[%s14307_s3 + $0x340] sm:$0xff]  ;;  %v8749_v49 = vcombine.low %v256_v37, %v260_v38  ;;  %v178_v38 = vld [vmem:[%s14307_s3 + $0x90] sm:$0xff] }
  0x1f   :  { %1022 = vmatpush1.bf16.msra.mxu0 %v8695_v63  ;;  %v268_v46 = vld [vmem:[%s14307_s3 + $0x360] sm:$0xff]  ;;  %v8752_v48 = vcombine.high %v257_v43, %v261_v44  ;;  %v265_v51 = vld [vmem:[%s14307_s3 + $0x348] sm:$0xff]  ;;  %v8751_v53 = vcombine.low %v257_v43, %v261_v44  ;;  %v183_v43 = vld [vmem:[%s14307_s3 + $0xb8] sm:$0xff] }
  0x20   :  { %1023 = vmatprep.subr.bf16.mxu0 %v8704_v0  ;;  %983 = vmatpush1.bf16.msra.mxu1 %v8701_v1  ;;  %v8758_v50 = vcombine.high %v264_v45, %v268_v46  ;;  %v269_v52 = vld [vmem:[%s14307_s3 + $0x368] sm:$0xff]  ;;  %v8757_v55 = vcombine.low %v264_v45, %v268_v46  ;;  %v272_v57 = vld [vmem:[%s14307_s3 + $0x380] sm:$0xff] }
  0x21   :  { %984 = vmatprep.subr.bf16.mxu1 %v8710_v2  ;;  %v8760_v54 = vcombine.high %v265_v51, %v269_v52  ;;  %v8759_v56 = vcombine.low %v265_v51, %v269_v52  ;;  %v276_v58 = vld [vmem:[%s14307_s3 + $0x3a0] sm:$0xff]  ;;  %v273_v59 = vld [vmem:[%s14307_s3 + $0x388] sm:$0xff]  ;;  %v191_v51 = vld [vmem:[%s14307_s3 + $0xf8] sm:$0xff] }
  0x22   :  { %v8766_v60 = vcombine.high %v272_v57, %v276_v58  ;;  %v277_v61 = vld [vmem:[%s14307_s3 + $0x3a8] sm:$0xff]  ;;  %v8765_v0 = vcombine.low %v272_v57, %v276_v58  ;;  %v280_v1 = vld [vmem:[%s14307_s3 + $0x3c0] sm:$0xff]  ;;  %v198_v57 = vld [vmem:[%s14307_s3 + $0x130] sm:$0xff] }
  0x23   :  { %1024 = vmatpush1.bf16.msra.mxu0 %v8703_v7  ;;  %v8767_v62 = vcombine.low %v273_v59, %v277_v61  ;;  %v8768_v63 = vcombine.high %v273_v59, %v277_v61  ;;  %v284_v2 = vld [vmem:[%s14307_s3 + $0x3e0] sm:$0xff]  ;;  %v281_v3 = vld [vmem:[%s14307_s3 + $0x3c8] sm:$0xff]  ;;  %v195_v58 = vld [vmem:[%s14307_s3 + $0x118] sm:$0xff] }
  0x24   :  { %1025 = vmatprep.subr.bf16.mxu0 %v8712_v8  ;;  %985 = vmatpush1.bf16.msra.mxu1 %v8709_v9  ;;  %v8774_v4 = vcombine.high %v280_v1, %v284_v2  ;;  %v285_v5 = vld [vmem:[%s14307_s3 + $0x3e8] sm:$0xff]  ;;  %v8773_v8 = vcombine.low %v280_v1, %v284_v2  ;;  %v162_v9 = vld [vmem:[%s14307_s3 + $0x10] sm:$0xff]  ;;  %v81_v20 = vld [vmem:[%s14309_s2] sm:$0x3] }
  0x25   :  { %986 = vmatprep.subr.bf16.mxu1 %v8718_v10  ;;  %v8775_v6 = vcombine.low %v281_v3, %v285_v5  ;;  %v8776_v7 = vcombine.high %v281_v3, %v285_v5  ;;  %v166_v10 = vld [vmem:[%s14307_s3 + $0x30] sm:$0xff]  ;;  %v199_v59 = vld [vmem:[%s14307_s3 + $0x138] sm:$0xff] }
  0x26   :  { %v8658_v11 = vcombine.high %v162_v9, %v166_v10  ;;  %v8657_v14 = vcombine.low %v162_v9, %v166_v10  ;;  %v206_v1 = vld [vmem:[%s14307_s3 + $0x170] sm:$0xff]  ;;  %v203_v2 = vld [vmem:[%s14307_s3 + $0x158] sm:$0xff]  ;;  %v8691_v5 = vcombine.low %v195_v58, %v199_v59 }
  0x27   :  { %1026 = vmatpush1.bf16.msra.mxu0 %v8711_v15  ;;  %v8659_v15 = vcombine.low %v163_v12, %v167_v13  ;;  %v207_v3 = vld [vmem:[%s14307_s3 + $0x178] sm:$0xff]  ;;  %v214_v9 = vld [vmem:[%s14307_s3 + $0x1b0] sm:$0xff] }
  0x28   :  { %1027 = vmatprep.subr.bf16.mxu0 %v8720_v16  ;;  %987 = vmatpush1.bf16.msra.mxu1 %v8717_v17  ;;  %v8660_v16 = vcombine.high %v163_v12, %v167_v13  ;;  %v83_v17 = vlaneseq  ;;  %v211_v10 = vld [vmem:[%s14307_s3 + $0x198] sm:$0xff]  ;;  %v8699_v13 = vcombine.low %v203_v2, %v207_v3 }
  0x29   :  { %988 = vmatprep.subr.bf16.mxu1 %v8726_v18 }
  0x2a   :  { %v11207_v18 = vshrl.u32 %v83_v17, 7  ;;  %v222_v17 = vld [vmem:[%s14307_s3 + $0x1f0] sm:$0xff] }
  0x2b   :  { %1028 = vmatpush1.bf16.msra.mxu0 %v8719_v23 }
  0x2c   :  { %1029 = vmatprep.subr.bf16.mxu0 %v8728_v24  ;;  %989 = vmatpush1.bf16.msra.mxu1 %v8725_v25  ;;  %v11210_v19 = vsub.s32 0, %v11207_v18  ;;  %v11216_v21 = vsub.s32 1, %v11207_v18 }
  0x2d   :  { %990 = vmatprep.subr.bf16.mxu1 %v8734_v26 }
  0x2e   :  { %v86_v22 = vrot.slane %v81_v20, %v11210_v19  ;;  %v90_v23 = vrot.slane %v81_v20, %v11216_v21  ;;  %v219_v20 = vld [vmem:[%s14307_s3 + $0x1d8] sm:$0xff] }
  0x2f   :  { %1030 = vmatpush1.bf16.msra.mxu0 %v8727_v31 }
  0x30   :  { %1031 = vmatprep.subr.bf16.mxu0 %v8736_v32  ;;  %991 = vmatpush1.bf16.msra.mxu1 %v8733_v33  ;;  %v170_v32 = vld [vmem:[%s14307_s3 + $0x50] sm:$0xff] }
  0x31   :  { %992 = vmatprep.subr.bf16.mxu1 %v8742_v34  ;;  %v174_v33 = vld [vmem:[%s14307_s3 + $0x70] sm:$0xff]  ;;  %v171_v34 = vld [vmem:[%s14307_s3 + $0x58] sm:$0xff] }
  0x32   :  { %v8665_v44 = vcombine.low %v170_v32, %v174_v33  ;;  %v8667_v45 = vcombine.low %v171_v34, %v175_v35 }
  0x33   :  { %1032 = vmatpush1.bf16.msra.mxu0 %v8735_v39  ;;  %v8666_v39 = vcombine.high %v170_v32, %v174_v33 }
  0x34   :  { %1033 = vmatprep.subr.bf16.mxu0 %v8744_v40  ;;  %993 = vmatpush1.bf16.msra.mxu1 %v8741_v41  ;;  %v8668_v40 = vcombine.high %v171_v34, %v175_v35  ;;  %v182_v41 = vld [vmem:[%s14307_s3 + $0xb0] sm:$0xff] }
  0x35   :  { %994 = vmatprep.subr.bf16.mxu1 %v8750_v42  ;;  %v179_v42 = vld [vmem:[%s14307_s3 + $0x98] sm:$0xff]  ;;  %v8674_v46 = vcombine.high %v178_v38, %v182_v41  ;;  %v8673_v52 = vcombine.low %v178_v38, %v182_v41  ;;  %v234_v35 = vld [vmem:[%s14307_s3 + $0x250] sm:$0xff] }
  0x36   :  { %v235_v38 = vld [vmem:[%s14307_s3 + $0x258] sm:$0xff] }
  0x37   :  { %1034 = vmatpush1.bf16.msra.mxu0 %v8743_v47  ;;  %v8676_v47 = vcombine.high %v179_v42, %v183_v43 }
  0x38   :  { %1035 = vmatprep.subr.bf16.mxu0 %v8752_v48  ;;  %995 = vmatpush1.bf16.msra.mxu1 %v8749_v49  ;;  %v186_v48 = vld [vmem:[%s14307_s3 + $0xd0] sm:$0xff] }
  0x39   :  { %996 = vmatprep.subr.bf16.mxu1 %v8758_v50  ;;  %v190_v49 = vld [vmem:[%s14307_s3 + $0xf0] sm:$0xff]  ;;  %v187_v50 = vld [vmem:[%s14307_s3 + $0xd8] sm:$0xff] }
  0x3a   :  { %v8683_v61 = vcombine.low %v187_v50, %v191_v51 }
  0x3b   :  { %1036 = vmatpush1.bf16.msra.mxu0 %v8751_v53  ;;  %v8675_v53 = vcombine.low %v179_v42, %v183_v43 }
  0x3c   :  { %1037 = vmatprep.subr.bf16.mxu0 %v8760_v54  ;;  %997 = vmatpush1.bf16.msra.mxu1 %v8757_v55  ;;  %v8682_v54 = vcombine.high %v186_v48, %v190_v49  ;;  %v8684_v55 = vcombine.high %v187_v50, %v191_v51 }
  0x3d   :  { %998 = vmatprep.subr.bf16.mxu1 %v8766_v60  ;;  %v8681_v60 = vcombine.low %v186_v48, %v190_v49 }
  0x3f   :  { %1038 = vmatpush1.bf16.msra.mxu0 %v8759_v56  ;;  %v194_v56 = vld [vmem:[%s14307_s3 + $0x110] sm:$0xff] }
  0x40   :  { %1039 = vmatprep.subr.bf16.mxu0 %v8768_v63  ;;  %999 = vmatpush1.bf16.msra.mxu1 %v8765_v0  ;;  %v8692_v63 = vcombine.high %v195_v58, %v199_v59  ;;  %v202_v0 = vld [vmem:[%s14307_s3 + $0x150] sm:$0xff] }
  0x41   :  { %1000 = vmatprep.subr.bf16.mxu1 %v8774_v4  ;;  %v8689_v4 = vcombine.low %v194_v56, %v198_v57  ;;  %v8697_v12 = vcombine.low %v202_v0, %v206_v1 }
  0x43   :  { %1040 = vmatpush1.bf16.msra.mxu0 %v8767_v62  ;;  %v8690_v62 = vcombine.high %v194_v56, %v198_v57 }
  0x44   :  { %1041 = vmatprep.subr.bf16.mxu0 %v8776_v7  ;;  %1001 = vmatpush1.bf16.msra.mxu1 %v8773_v8  ;;  %v8700_v7 = vcombine.high %v203_v2, %v207_v3  ;;  %v210_v8 = vld [vmem:[%s14307_s3 + $0x190] sm:$0xff] }
  0x45   :  { %1052 = vmatprep.subr.bf16.mxu1 %v8658_v11  ;;  %v215_v11 = vld [vmem:[%s14307_s3 + $0x1b8] sm:$0xff] }
  0x47   :  { %1042 = vmatpush1.bf16.msra.mxu0 %v8775_v6  ;;  %v8698_v6 = vcombine.high %v202_v0, %v206_v1 }
  0x48   :  { %1093 = vmatprep.subr.bf16.mxu0 %v8660_v16  ;;  %v218_v16 = vld [vmem:[%s14307_s3 + $0x1d0] sm:$0xff] }
  0xdd   :  { %v149_v24 = vpop.f32.mrb[0].mxu0 }
  0xde   :  { %v150_v25 = vadd.f32 %v149_v24, %v86_v22  ;;  %v151_v26 = vpop.f32.mrb[1].mxu0  ;;  %v223_v22 = vld [vmem:[%s14307_s3 + $0x1f8] sm:$0xff]  ;;  %v8707_v24 = vcombine.low %v211_v10, %v215_v11 }
  0xdf   :  { %v152_v27 = vadd.f32 %v151_v26, %v90_v23  ;;  %v153_v28 = vpop.f32.mrb[2].mxu0  ;;  %v8705_v23 = vcombine.low %v210_v8, %v214_v9  ;;  %v8716_v26 = vcombine.high %v219_v20, %v223_v22  ;;  %v8715_v32 = vcombine.low %v219_v20, %v223_v22 }
  0xe0   :  { %v156_v29 = vmax.f32 %v150_v25, 0.0  ;;  %v154_v30 = vpop.f32.mrb[3].mxu0  ;;  %v8714_v25 = vcombine.high %v218_v16, %v222_v17  ;;  %v230_v28 = vld [vmem:[%s14307_s3 + $0x230] sm:$0xff] }
  0xe1   :  { %v157_v31 = vmax.f32 %v152_v27, 0.0  ;;  %v226_v27 = vld [vmem:[%s14307_s3 + $0x210] sm:$0xff]  ;;  %v231_v30 = vld [vmem:[%s14307_s3 + $0x238] sm:$0xff] }
  0xe2   :  { %v11232_v37 = vpack.c.bf16 %v156_v29, %v156_v29  ;;  %v227_v29 = vld [vmem:[%s14307_s3 + $0x218] sm:$0xff]  ;;  %v8722_v33 = vcombine.high %v226_v27, %v230_v28 }
  0xe3   :  { %v159_v36 = vpack.c.bf16 %v157_v31, %v157_v31  ;;  %v8713_v31 = vcombine.low %v218_v16, %v222_v17  ;;  %v8724_v34 = vcombine.high %v227_v29, %v231_v30  ;;  %v8723_v41 = vcombine.low %v227_v29, %v231_v30 }
  0xe5   :  { %1002 = vmatprep.mubr.bf16.mxu1 %v159_v36  ;;  %1043 = vmatprep.mubr.bf16.mxu0 %v159_v36 }
  0xe6   :  { %1003 = vmatmul.mubr.bf16.vlgmr.msra.gmra.mrb[0].mxu1 %v11232_v37  ;;  %1044 = vmatmul.mubr.bf16.vlgmr.msra.gmra.mrb[4].mxu0 %v11232_v37 }
  0xe7   :  { %1053 = vmatpush1.bf16.msra.mxu1 %v8657_v14  ;;  %1094 = vmatpush1.bf16.msra.mxu0 %v8659_v15  ;;  %v8706_v14 = vcombine.high %v210_v8, %v214_v9  ;;  %v8708_v15 = vcombine.high %v211_v10, %v215_v11 }
  0xe8   :  { %1084 = vmatprep.mubr.bf16.mxu1 %v159_v36  ;;  %1125 = vmatprep.mubr.bf16.mxu0 %v159_v36  ;;  %v238_v36 = vld [vmem:[%s14307_s3 + $0x270] sm:$0xff] }
  0xe9   :  { %1054 = vmatprep.subr.bf16.mxu1 %v8666_v39  ;;  %1095 = vmatprep.subr.bf16.mxu0 %v8668_v40  ;;  %v239_v39 = vld [vmem:[%s14307_s3 + $0x278] sm:$0xff]  ;;  %v8721_v40 = vcombine.low %v226_v27, %v230_v28  ;;  %v8730_v42 = vcombine.high %v234_v35, %v238_v36  ;;  %v8729_v48 = vcombine.low %v234_v35, %v238_v36 }
  0xea   :  { %v8732_v43 = vcombine.high %v235_v38, %v239_v39  ;;  %v8731_v49 = vcombine.low %v235_v38, %v239_v39  ;;  %v10490_v35 = vld [vmem:[%s14310_s5 + $0x308] ss:$16 sps:$4 sm:$0xff]   ;;  %v10492_v36 = vld [vmem:[%s14310_s5 + $0x30c] ss:$16 sps:$4 sm:$0xff]   ;;  %v10495_v38 = vld [vmem:[%s14310_s5 + $0x324] ss:$16 sps:$4 sm:$0xff]  }
  0xeb   :  { %1055 = vmatpush1.bf16.msra.mxu1 %v8665_v44  ;;  %1096 = vmatpush1.bf16.msra.mxu0 %v8667_v45  ;;  %v242_v44 = vld [vmem:[%s14307_s3 + $0x290] sm:$0xff]  ;;  %v10496_v39 = vld [vmem:[%s14310_s5 + $0x328] ss:$16 sps:$4 sm:$0xff]  }
  0xec   :  { %1056 = vmatprep.subr.bf16.mxu1 %v8674_v46  ;;  %1097 = vmatprep.subr.bf16.mxu0 %v8676_v47  ;;  %v246_v45 = vld [vmem:[%s14307_s3 + $0x2b0] sm:$0xff]  ;;  %v243_v46 = vld [vmem:[%s14307_s3 + $0x298] sm:$0xff] }
  0xed   :  { %v247_v47 = vld [vmem:[%s14307_s3 + $0x2b8] sm:$0xff]  ;;  %v8738_v50 = vcombine.high %v242_v44, %v246_v45  ;;  %v8737_v56 = vcombine.low %v242_v44, %v246_v45  ;;  %v10507_v45 = vld [vmem:[%s14310_s5 + $0x364] ss:$16 sps:$4 sm:$0xff]  }
  0xee   :  { %v8740_v51 = vcombine.high %v243_v46, %v247_v47  ;;  %v8739_v57 = vcombine.low %v243_v46, %v247_v47  ;;  %v10502_v44 = vld [vmem:[%s14310_s5 + $0x348] ss:$16 sps:$4 sm:$0xff]   ;;  %v10510_v46 = vld [vmem:[%s14310_s5 + $0x36c] ss:$16 sps:$4 sm:$0xff]   ;;  %v10505_v47 = vld [vmem:[%s14310_s5 + $0x360] ss:$16 sps:$4 sm:$0xff]  }
  0xef   :  { %1057 = vmatpush1.bf16.msra.mxu1 %v8673_v52  ;;  %1098 = vmatpush1.bf16.msra.mxu0 %v8675_v53  ;;  %v250_v52 = vld [vmem:[%s14307_s3 + $0x2d0] sm:$0xff] }
  0xf0   :  { %1058 = vmatprep.subr.bf16.mxu1 %v8682_v54  ;;  %1099 = vmatprep.subr.bf16.mxu0 %v8684_v55  ;;  %v254_v53 = vld [vmem:[%s14307_s3 + $0x2f0] sm:$0xff]  ;;  %v251_v54 = vld [vmem:[%s14307_s3 + $0x2d8] sm:$0xff] }
  0xf1   :  { %v255_v55 = vld [vmem:[%s14307_s3 + $0x2f8] sm:$0xff]  ;;  %v8746_v58 = vcombine.high %v250_v52, %v254_v53  ;;  %v8745_v0 = vcombine.low %v250_v52, %v254_v53  ;;  %v10519_v53 = vld [vmem:[%s14310_s5 + $0x3a4] ss:$16 sps:$4 sm:$0xff]  }
  0xf2   :  { %v8748_v59 = vcombine.high %v251_v54, %v255_v55  ;;  %v8747_v1 = vcombine.low %v251_v54, %v255_v55  ;;  %v10514_v52 = vld [vmem:[%s14310_s5 + $0x388] ss:$16 sps:$4 sm:$0xff]   ;;  %v10522_v54 = vld [vmem:[%s14310_s5 + $0x3ac] ss:$16 sps:$4 sm:$0xff]   ;;  %v10517_v55 = vld [vmem:[%s14310_s5 + $0x3a0] ss:$16 sps:$4 sm:$0xff]  }
  0xf3   :  { %1059 = vmatpush1.bf16.msra.mxu1 %v8681_v60  ;;  %1100 = vmatpush1.bf16.msra.mxu0 %v8683_v61  ;;  %v258_v60 = vld [vmem:[%s14307_s3 + $0x310] sm:$0xff] }
  0xf4   :  { %1060 = vmatprep.subr.bf16.mxu1 %v8690_v62  ;;  %1101 = vmatprep.subr.bf16.mxu0 %v8692_v63  ;;  %v262_v61 = vld [vmem:[%s14307_s3 + $0x330] sm:$0xff]  ;;  %v259_v62 = vld [vmem:[%s14307_s3 + $0x318] sm:$0xff] }
  0xf5   :  { %v263_v63 = vld [vmem:[%s14307_s3 + $0x338] sm:$0xff]  ;;  %v8754_v2 = vcombine.high %v258_v60, %v262_v61  ;;  %v8753_v8 = vcombine.low %v258_v60, %v262_v61  ;;  %v10531_v61 = vld [vmem:[%s14310_s5 + $0x3e4] ss:$16 sps:$4 sm:$0xff]  }
  0xf6   :  { %v8756_v3 = vcombine.high %v259_v62, %v263_v63  ;;  %v8755_v9 = vcombine.low %v259_v62, %v263_v63  ;;  %v10526_v60 = vld [vmem:[%s14310_s5 + $0x3c8] ss:$16 sps:$4 sm:$0xff]   ;;  %v10534_v62 = vld [vmem:[%s14310_s5 + $0x3ec] ss:$16 sps:$4 sm:$0xff]   ;;  %v10529_v63 = vld [vmem:[%s14310_s5 + $0x3e0] ss:$16 sps:$4 sm:$0xff]  }
  0xf7   :  { %1061 = vmatpush1.bf16.msra.mxu1 %v8689_v4  ;;  %1102 = vmatpush1.bf16.msra.mxu0 %v8691_v5  ;;  %v266_v4 = vld [vmem:[%s14307_s3 + $0x350] sm:$0xff] }
  0xf8   :  { %1062 = vmatprep.subr.bf16.mxu1 %v8698_v6  ;;  %1103 = vmatprep.subr.bf16.mxu0 %v8700_v7  ;;  %v270_v5 = vld [vmem:[%s14307_s3 + $0x370] sm:$0xff]  ;;  %v267_v6 = vld [vmem:[%s14307_s3 + $0x358] sm:$0xff] }
  0xf9   :  { %v271_v7 = vld [vmem:[%s14307_s3 + $0x378] sm:$0xff]  ;;  %v8762_v10 = vcombine.high %v266_v4, %v270_v5  ;;  %v8761_v16 = vcombine.low %v266_v4, %v270_v5  ;;  %v10543_v5 = vld [vmem:[%s14310_s5 + $0x424] ss:$16 sps:$4 sm:$0xff]  }
  0xfa   :  { %v8764_v11 = vcombine.high %v267_v6, %v271_v7  ;;  %v8763_v17 = vcombine.low %v267_v6, %v271_v7  ;;  %v10538_v4 = vld [vmem:[%s14310_s5 + $0x408] ss:$16 sps:$4 sm:$0xff]   ;;  %v10546_v6 = vld [vmem:[%s14310_s5 + $0x42c] ss:$16 sps:$4 sm:$0xff]   ;;  %v10541_v7 = vld [vmem:[%s14310_s5 + $0x420] ss:$16 sps:$4 sm:$0xff]  }
  0xfb   :  { %1063 = vmatpush1.bf16.msra.mxu1 %v8697_v12  ;;  %1104 = vmatpush1.bf16.msra.mxu0 %v8699_v13  ;;  %v274_v12 = vld [vmem:[%s14307_s3 + $0x390] sm:$0xff] }
  0xfc   :  { %1064 = vmatprep.subr.bf16.mxu1 %v8706_v14  ;;  %1105 = vmatprep.subr.bf16.mxu0 %v8708_v15  ;;  %v278_v13 = vld [vmem:[%s14307_s3 + $0x3b0] sm:$0xff]  ;;  %v275_v14 = vld [vmem:[%s14307_s3 + $0x398] sm:$0xff] }
  0xfd   :  { %v279_v15 = vld [vmem:[%s14307_s3 + $0x3b8] sm:$0xff]  ;;  %v8770_v20 = vcombine.high %v274_v12, %v278_v13  ;;  %v8769_v27 = vcombine.low %v274_v12, %v278_v13  ;;  %v10555_v13 = vld [vmem:[%s14310_s5 + $0x464] ss:$16 sps:$4 sm:$0xff]  }
  0xfe   :  { %v8772_v22 = vcombine.high %v275_v14, %v279_v15  ;;  %v8771_v28 = vcombine.low %v275_v14, %v279_v15  ;;  %v10550_v12 = vld [vmem:[%s14310_s5 + $0x448] ss:$16 sps:$4 sm:$0xff]   ;;  %v10558_v14 = vld [vmem:[%s14310_s5 + $0x46c] ss:$16 sps:$4 sm:$0xff]   ;;  %v10553_v15 = vld [vmem:[%s14310_s5 + $0x460] ss:$16 sps:$4 sm:$0xff]  }
  0xff   :  { %1065 = vmatpush1.bf16.msra.mxu1 %v8705_v23  ;;  %1106 = vmatpush1.bf16.msra.mxu0 %v8707_v24  ;;  %v282_v23 = vld [vmem:[%s14307_s3 + $0x3d0] sm:$0xff] }
 0x100   :  { %1066 = vmatprep.subr.bf16.mxu1 %v8714_v25  ;;  %1107 = vmatprep.subr.bf16.mxu0 %v8716_v26  ;;  %v286_v24 = vld [vmem:[%s14307_s3 + $0x3f0] sm:$0xff]  ;;  %v283_v25 = vld [vmem:[%s14307_s3 + $0x3d8] sm:$0xff] }
 0x101   :  { %v287_v26 = vld [vmem:[%s14307_s3 + $0x3f8] sm:$0xff]  ;;  %v8778_v29 = vcombine.high %v282_v23, %v286_v24 }
 0x102   :  { %v8780_v30 = vcombine.high %v283_v25, %v287_v26 }
 0x103   :  { %1067 = vmatpush1.bf16.msra.mxu1 %v8713_v31  ;;  %1108 = vmatpush1.bf16.msra.mxu0 %v8715_v32  ;;  %v8777_v31 = vcombine.low %v282_v23, %v286_v24  ;;  %v8779_v32 = vcombine.low %v283_v25, %v287_v26  ;;  %v10562_v23 = vld [vmem:[%s14310_s5 + $0x488] ss:$16 sps:$4 sm:$0xff]   ;;  %v10567_v24 = vld [vmem:[%s14310_s5 + $0x4a4] ss:$16 sps:$4 sm:$0xff]   ;;  %v10570_v25 = vld [vmem:[%s14310_s5 + $0x4ac] ss:$16 sps:$4 sm:$0xff]  }
 0x104   :  { %1068 = vmatprep.subr.bf16.mxu1 %v8722_v33  ;;  %1109 = vmatprep.subr.bf16.mxu0 %v8724_v34  ;;  %v10487_v33 = vld [vmem:[%s14310_s5 + $0x300] ss:$16 sps:$4 sm:$0xff]   ;;  %v10489_v34 = vld [vmem:[%s14310_s5 + $0x304] ss:$16 sps:$4 sm:$0xff]  }
 0x105   :  { %v10565_v26 = vld [vmem:[%s14310_s5 + $0x4a0] ss:$16 sps:$4 sm:$0xff]  }
 0x107   :  { %1069 = vmatpush1.bf16.msra.mxu1 %v8721_v40  ;;  %1110 = vmatpush1.bf16.msra.mxu0 %v8723_v41  ;;  %v10498_v40 = vld [vmem:[%s14310_s5 + $0x32c] ss:$16 sps:$4 sm:$0xff]   ;;  %v10501_v41 = vld [vmem:[%s14310_s5 + $0x344] ss:$16 sps:$4 sm:$0xff]  }
 0x108   :  { %1070 = vmatprep.subr.bf16.mxu1 %v8730_v42  ;;  %1111 = vmatprep.subr.bf16.mxu0 %v8732_v43  ;;  %v10499_v42 = vld [vmem:[%s14310_s5 + $0x340] ss:$16 sps:$4 sm:$0xff]   ;;  %v10504_v43 = vld [vmem:[%s14310_s5 + $0x34c] ss:$16 sps:$4 sm:$0xff]  }
 0x10b   :  { %1071 = vmatpush1.bf16.msra.mxu1 %v8729_v48  ;;  %1112 = vmatpush1.bf16.msra.mxu0 %v8731_v49  ;;  %v10508_v48 = vld [vmem:[%s14310_s5 + $0x368] ss:$16 sps:$4 sm:$0xff]   ;;  %v10513_v49 = vld [vmem:[%s14310_s5 + $0x384] ss:$16 sps:$4 sm:$0xff]  }
 0x10c   :  { %1072 = vmatprep.subr.bf16.mxu1 %v8738_v50  ;;  %1113 = vmatprep.subr.bf16.mxu0 %v8740_v51  ;;  %v10516_v50 = vld [vmem:[%s14310_s5 + $0x38c] ss:$16 sps:$4 sm:$0xff]   ;;  %v10511_v51 = vld [vmem:[%s14310_s5 + $0x380] ss:$16 sps:$4 sm:$0xff]  }
 0x10f   :  { %1073 = vmatpush1.bf16.msra.mxu1 %v8737_v56  ;;  %1114 = vmatpush1.bf16.msra.mxu0 %v8739_v57  ;;  %v10520_v56 = vld [vmem:[%s14310_s5 + $0x3a8] ss:$16 sps:$4 sm:$0xff]   ;;  %v10525_v57 = vld [vmem:[%s14310_s5 + $0x3c4] ss:$16 sps:$4 sm:$0xff]  }
 0x110   :  { %1074 = vmatprep.subr.bf16.mxu1 %v8746_v58  ;;  %1115 = vmatprep.subr.bf16.mxu0 %v8748_v59  ;;  %v10528_v58 = vld [vmem:[%s14310_s5 + $0x3cc] ss:$16 sps:$4 sm:$0xff]   ;;  %v10523_v59 = vld [vmem:[%s14310_s5 + $0x3c0] ss:$16 sps:$4 sm:$0xff]  }
 0x113   :  { %1075 = vmatpush1.bf16.msra.mxu1 %v8745_v0  ;;  %1116 = vmatpush1.bf16.msra.mxu0 %v8747_v1  ;;  %v10532_v0 = vld [vmem:[%s14310_s5 + $0x3e8] ss:$16 sps:$4 sm:$0xff]   ;;  %v10537_v1 = vld [vmem:[%s14310_s5 + $0x404] ss:$16 sps:$4 sm:$0xff]  }
 0x114   :  { %1076 = vmatprep.subr.bf16.mxu1 %v8754_v2  ;;  %1117 = vmatprep.subr.bf16.mxu0 %v8756_v3  ;;  %v10540_v2 = vld [vmem:[%s14310_s5 + $0x40c] ss:$16 sps:$4 sm:$0xff]   ;;  %v10535_v3 = vld [vmem:[%s14310_s5 + $0x400] ss:$16 sps:$4 sm:$0xff]  }
 0x117   :  { %1077 = vmatpush1.bf16.msra.mxu1 %v8753_v8  ;;  %1118 = vmatpush1.bf16.msra.mxu0 %v8755_v9  ;;  %v10544_v8 = vld [vmem:[%s14310_s5 + $0x428] ss:$16 sps:$4 sm:$0xff]   ;;  %v10549_v9 = vld [vmem:[%s14310_s5 + $0x444] ss:$16 sps:$4 sm:$0xff]  }
 0x118   :  { %1078 = vmatprep.subr.bf16.mxu1 %v8762_v10  ;;  %1119 = vmatprep.subr.bf16.mxu0 %v8764_v11  ;;  %v10552_v10 = vld [vmem:[%s14310_s5 + $0x44c] ss:$16 sps:$4 sm:$0xff]   ;;  %v10547_v11 = vld [vmem:[%s14310_s5 + $0x440] ss:$16 sps:$4 sm:$0xff]  }
 0x11b   :  { %1079 = vmatpush1.bf16.msra.mxu1 %v8761_v16  ;;  %1120 = vmatpush1.bf16.msra.mxu0 %v8763_v17  ;;  %v10556_v16 = vld [vmem:[%s14310_s5 + $0x468] ss:$16 sps:$4 sm:$0xff]   ;;  %v10561_v17 = vld [vmem:[%s14310_s5 + $0x484] ss:$16 sps:$4 sm:$0xff]  }
 0x11c   :  { %1080 = vmatprep.subr.bf16.mxu1 %v8770_v20  ;;  %1121 = vmatprep.subr.bf16.mxu0 %v8772_v22  ;;  %v10564_v20 = vld [vmem:[%s14310_s5 + $0x48c] ss:$16 sps:$4 sm:$0xff]   ;;  %v10559_v22 = vld [vmem:[%s14310_s5 + $0x480] ss:$16 sps:$4 sm:$0xff]  }
 0x11f   :  { %1081 = vmatpush1.bf16.msra.mxu1 %v8769_v27  ;;  %1122 = vmatpush1.bf16.msra.mxu0 %v8771_v28  ;;  %v10568_v27 = vld [vmem:[%s14310_s5 + $0x4a8] ss:$16 sps:$4 sm:$0xff]   ;;  %v10571_v28 = vld [vmem:[%s14310_s5 + $0x4c0] ss:$16 sps:$4 sm:$0xff]  }
 0x120   :  { %1082 = vmatprep.subr.bf16.mxu1 %v8778_v29  ;;  %1123 = vmatprep.subr.bf16.mxu0 %v8780_v30  ;;  %v10573_v29 = vld [vmem:[%s14310_s5 + $0x4c4] ss:$16 sps:$4 sm:$0xff]   ;;  %v10574_v30 = vld [vmem:[%s14310_s5 + $0x4c8] ss:$16 sps:$4 sm:$0xff]  }
 0x123   :  { %1083 = vmatpush1.bf16.msra.mxu1 %v8777_v31  ;;  %1124 = vmatpush1.bf16.msra.mxu0 %v8779_v32  ;;  %v10576_v31 = vld [vmem:[%s14310_s5 + $0x4cc] ss:$16 sps:$4 sm:$0xff]   ;;  %v10579_v32 = vld [vmem:[%s14310_s5 + $0x4e4] ss:$16 sps:$4 sm:$0xff]  }
 0x124   :  { %1892 = vmatprep.subr.bf16.mxu1 %v10489_v34  ;;  %2010 = vmatprep.subr.bf16.mxu0 %v10492_v36  ;;  %v10580_v34 = vld [vmem:[%s14310_s5 + $0x4e8] ss:$16 sps:$4 sm:$0xff]   ;;  %v10585_v36 = vld [vmem:[%s14310_s5 + $0x504] ss:$16 sps:$4 sm:$0xff]  }
 0x126   :  { %1085 = vmatmul.mubr.bf16.vlgmr.msra.gmra.mrb[4].mxu1 %v11232_v37  ;;  %1126 = vmatmul.mubr.bf16.vlgmr.msra.gmra.mrb[8].mxu0 %v11232_v37  ;;  %v10493_v37 = vld [vmem:[%s14310_s5 + $0x320] ss:$16 sps:$4 sm:$0xff]  }
 0x127   :  { %1893 = vmatpush1.bf16.msra.mxu1 %v10487_v33  ;;  %2011 = vmatpush1.bf16.msra.mxu0 %v10490_v35  ;;  %v10577_v33 = vld [vmem:[%s14310_s5 + $0x4e0] ss:$16 sps:$4 sm:$0xff]   ;;  %v10582_v35 = vld [vmem:[%s14310_s5 + $0x4ec] ss:$16 sps:$4 sm:$0xff]  }
 0x128   :  { %1894 = vmatprep.subr.bf16.mxu1 %v10495_v38  ;;  %2012 = vmatprep.subr.bf16.mxu0 %v10498_v40  ;;  %v11605_v38 = vsub.s32 2, %v11207_v18  ;;  %v11611_v40 = vsub.s32 3, %v11207_v18 }
 0x12b   :  { %1895 = vmatpush1.bf16.msra.mxu1 %v10493_v37  ;;  %2013 = vmatpush1.bf16.msra.mxu0 %v10496_v39  ;;  %v10588_v37 = vld [vmem:[%s14310_s5 + $0x50c] ss:$16 sps:$4 sm:$0xff]   ;;  %v288_v39 = vld [vmem:[%s14311_s4] sm:$0xff] }
 0x12c   :  { %1896 = vmatprep.subr.bf16.mxu1 %v10501_v41  ;;  %2014 = vmatprep.subr.bf16.mxu0 %v10504_v43  ;;  %v293_v41 = vrot.slane %v288_v39, %v11210_v19  ;;  %v297_v43 = vrot.slane %v288_v39, %v11216_v21 }
 0x12f   :  { %1897 = vmatpush1.bf16.msra.mxu1 %v10499_v42  ;;  %2015 = vmatpush1.bf16.msra.mxu0 %v10502_v44  ;;  %v301_v42 = vrot.slane %v288_v39, %v11605_v38  ;;  %v305_v44 = vrot.slane %v288_v39, %v11611_v40 }
 0x130   :  { %1898 = vmatprep.subr.bf16.mxu1 %v10507_v45  ;;  %2016 = vmatprep.subr.bf16.mxu0 %v10510_v46 }
 0x133   :  { %1899 = vmatpush1.bf16.msra.mxu1 %v10505_v47  ;;  %2017 = vmatpush1.bf16.msra.mxu0 %v10508_v48 }
 0x134   :  { %1900 = vmatprep.subr.bf16.mxu1 %v10513_v49  ;;  %2018 = vmatprep.subr.bf16.mxu0 %v10516_v50 }
 0x137   :  { %1901 = vmatpush1.bf16.msra.mxu1 %v10511_v51  ;;  %2019 = vmatpush1.bf16.msra.mxu0 %v10514_v52 }
 0x138   :  { %1902 = vmatprep.subr.bf16.mxu1 %v10519_v53  ;;  %2020 = vmatprep.subr.bf16.mxu0 %v10522_v54 }
 0x13b   :  { %1903 = vmatpush1.bf16.msra.mxu1 %v10517_v55  ;;  %2021 = vmatpush1.bf16.msra.mxu0 %v10520_v56 }
 0x13c   :  { %1904 = vmatprep.subr.bf16.mxu1 %v10525_v57  ;;  %2022 = vmatprep.subr.bf16.mxu0 %v10528_v58 }
 0x13f   :  { %1905 = vmatpush1.bf16.msra.mxu1 %v10523_v59  ;;  %2023 = vmatpush1.bf16.msra.mxu0 %v10526_v60 }
 0x140   :  { %1906 = vmatprep.subr.bf16.mxu1 %v10531_v61  ;;  %2024 = vmatprep.subr.bf16.mxu0 %v10534_v62 }
 0x143   :  { %1907 = vmatpush1.bf16.msra.mxu1 %v10529_v63  ;;  %2025 = vmatpush1.bf16.msra.mxu0 %v10532_v0 }
 0x144   :  { %1908 = vmatprep.subr.bf16.mxu1 %v10537_v1  ;;  %2026 = vmatprep.subr.bf16.mxu0 %v10540_v2 }
 0x147   :  { %1909 = vmatpush1.bf16.msra.mxu1 %v10535_v3  ;;  %2027 = vmatpush1.bf16.msra.mxu0 %v10538_v4  ;;  %v308_v3 = vsub.s32 4, %v11207_v18  ;;  %v316_v4 = vsub.s32 6, %v11207_v18 }
 0x148   :  { %1910 = vmatprep.subr.bf16.mxu1 %v10543_v5  ;;  %2028 = vmatprep.subr.bf16.mxu0 %v10546_v6  ;;  %v312_v5 = vsub.s32 5, %v11207_v18  ;;  %v320_v6 = vsub.s32 7, %v11207_v18 }
 0x14b   :  { %1911 = vmatpush1.bf16.msra.mxu1 %v10541_v7  ;;  %2029 = vmatpush1.bf16.msra.mxu0 %v10544_v8  ;;  %v309_v7 = vrot.slane %v288_v39, %v308_v3  ;;  %v317_v8 = vrot.slane %v288_v39, %v316_v4 }
 0x14c   :  { %1912 = vmatprep.subr.bf16.mxu1 %v10549_v9  ;;  %2030 = vmatprep.subr.bf16.mxu0 %v10552_v10  ;;  %v313_v9 = vrot.slane %v288_v39, %v312_v5  ;;  %v321_v10 = vrot.slane %v288_v39, %v320_v6 }
 0x14f   :  { %1913 = vmatpush1.bf16.msra.mxu1 %v10547_v11  ;;  %2031 = vmatpush1.bf16.msra.mxu0 %v10550_v12 }
 0x150   :  { %1914 = vmatprep.subr.bf16.mxu1 %v10555_v13  ;;  %2032 = vmatprep.subr.bf16.mxu0 %v10558_v14 }
 0x153   :  { %1915 = vmatpush1.bf16.msra.mxu1 %v10553_v15  ;;  %2033 = vmatpush1.bf16.msra.mxu0 %v10556_v16 }
 0x154   :  { %1916 = vmatprep.subr.bf16.mxu1 %v10561_v17  ;;  %2034 = vmatprep.subr.bf16.mxu0 %v10564_v20 }
 0x157   :  { %1917 = vmatpush1.bf16.msra.mxu1 %v10559_v22  ;;  %2035 = vmatpush1.bf16.msra.mxu0 %v10562_v23 }
 0x158   :  { %1918 = vmatprep.subr.bf16.mxu1 %v10567_v24  ;;  %2036 = vmatprep.subr.bf16.mxu0 %v10570_v25 }
 0x15b   :  { %1919 = vmatpush1.bf16.msra.mxu1 %v10565_v26  ;;  %2037 = vmatpush1.bf16.msra.mxu0 %v10568_v27 }
 0x15c   :  { %1920 = vmatprep.subr.bf16.mxu1 %v10573_v29  ;;  %2038 = vmatprep.subr.bf16.mxu0 %v10576_v31 }
 0x15f   :  { %1921 = vmatpush1.bf16.msra.mxu1 %v10571_v28  ;;  %2039 = vmatpush1.bf16.msra.mxu0 %v10574_v30 }
 0x160   :  { %1922 = vmatprep.subr.bf16.mxu1 %v10579_v32  ;;  %2040 = vmatprep.subr.bf16.mxu0 %v10582_v35 }
 0x163   :  { %1923 = vmatpush1.bf16.msra.mxu1 %v10577_v33  ;;  %2041 = vmatpush1.bf16.msra.mxu0 %v10580_v34 }
 0x164   :  { %1951 = vmatprep.subr.bf16.mxu1 %v10585_v36  ;;  %2071 = vmatprep.subr.bf16.mxu0 %v10588_v37 }
 0x1b9   :  { %v1004_v45 = vpop.f32.mrb[0].mxu1  ;;  %v1045_v46 = vpop.f32.mrb[4].mxu0 }
 0x1ba   :  { %v1005_v47 = vadd.f32 %v1004_v45, %v293_v41  ;;  %v1046_v48 = vadd.f32 %v1045_v46, %v301_v42  ;;  %v1006_v49 = vpop.f32.mrb[1].mxu1  ;;  %v1047_v50 = vpop.f32.mrb[5].mxu0  ;;  %v10583_v46 = vld [vmem:[%s14310_s5 + $0x500] ss:$16 sps:$4 sm:$0xff]  }
 0x1bb   :  { %v1007_v51 = vadd.f32 %v1006_v49, %v297_v43  ;;  %v1048_v52 = vadd.f32 %v1047_v50, %v305_v44  ;;  %v1008_v53 = vpop.f32.mrb[2].mxu1  ;;  %v1049_v54 = vpop.f32.mrb[6].mxu0 }
 0x1bc   :  { %v1134_v55 = vmax.f32 %v1005_v47, 0.0  ;;  %v1136_v56 = vmax.f32 %v1046_v48, 0.0  ;;  %v1009_v57 = vpop.f32.mrb[3].mxu1  ;;  %v1050_v58 = vpop.f32.mrb[7].mxu0  ;;  %v10586_v47 = vld [vmem:[%s14310_s5 + $0x508] ss:$16 sps:$4 sm:$0xff]  }
 0x1bd   :  { %v1135_v59 = vmax.f32 %v1007_v51, 0.0  ;;  %v1137_v60 = vmax.f32 %v1048_v52, 0.0  ;;  %v10591_v52 = vld [vmem:[%s14310_s5 + $0x524] ss:$16 sps:$4 sm:$0xff]   ;;  %v10594_v53 = vld [vmem:[%s14310_s5 + $0x52c] ss:$16 sps:$4 sm:$0xff]  }
 0x1be   :  { %v1142_v61 = vpack.c.bf16 %v1134_v55, %v1134_v55  ;;  %v1144_v62 = vpack.c.bf16 %v1136_v56, %v1136_v56  ;;  %v10589_v55 = vld [vmem:[%s14310_s5 + $0x520] ss:$16 sps:$4 sm:$0xff]   ;;  %v10592_v56 = vld [vmem:[%s14310_s5 + $0x528] ss:$16 sps:$4 sm:$0xff]   ;;  %v10597_v57 = vld [vmem:[%s14310_s5 + $0x544] ss:$16 sps:$4 sm:$0xff]  }
 0x1bf   :  { %v1143_v63 = vpack.c.bf16 %v1135_v59, %v1135_v59  ;;  %v1145_v0 = vpack.c.bf16 %v1137_v60, %v1137_v60  ;;  %v10600_v58 = vld [vmem:[%s14310_s5 + $0x54c] ss:$16 sps:$4 sm:$0xff]   ;;  %v10595_v60 = vld [vmem:[%s14310_s5 + $0x540] ss:$16 sps:$4 sm:$0xff]  }
 0x1c0   :  { %v1152_v1 = vrot.slane %v1142_v61, 4  ;;  %1158 = vst [vmem:[#allocation2 + $0x18] sm:$0xf] %v1144_v62  ;;  %v10598_v61 = vld [vmem:[%s14310_s5 + $0x548] ss:$16 sps:$4 sm:$0xff]  }
 0x1c1   :  { %v1153_v2 = vrot.slane %v1143_v63, 4  ;;  %1159 = vst [vmem:[#allocation2 + $0x20] sm:$0xf] %v1145_v0  ;;  %v10603_v0 = vld [vmem:[%s14310_s5 + $0x564] ss:$16 sps:$4 sm:$0xff]  }
 0x1c2   :  { %1156 = vst [vmem:[#allocation2] sm:$0xf0] %v1152_v1  ;;  %v10606_v1 = vld [vmem:[%s14310_s5 + $0x56c] ss:$16 sps:$4 sm:$0xff]  }
 0x1c3   :  { %1157 = vst [vmem:[#allocation2 + $0x8] sm:$0xf0] %v1153_v2  ;;  %v10601_v2 = vld [vmem:[%s14310_s5 + $0x560] ss:$16 sps:$4 sm:$0xff]  }
 0x1c9   :  { %v1179_v39 = vld [vmem:[#allocation2] sm:$0xf0] }
 0x1ca   :  { %v1180_v36 = vld [vmem:[#allocation2 + $0x8] sm:$0xf0]  ;;  %v1388_v48 = vrot.slane %v1179_v39, 4 }
 0x1cb   :  { %v1391_v43 = vrot.slane %v1180_v36, 4  ;;  %v10639_v36 = vld [vmem:[%s14310_s5 + $0x24] ss:$16 sps:$4 sm:$0xff]   ;;  %v10642_v39 = vld [vmem:[%s14310_s5 + $0x2c] ss:$16 sps:$4 sm:$0xff]  }
 0x1f9   :  { %v1086_v11 = vpop.f32.mrb[4].mxu1  ;;  %v1127_v12 = vpop.f32.mrb[8].mxu0 }
 0x1fa   :  { %v1087_v13 = vadd.f32 %v1086_v11, %v309_v7  ;;  %v1128_v14 = vadd.f32 %v1127_v12, %v317_v8  ;;  %v1088_v15 = vpop.f32.mrb[5].mxu1  ;;  %v1129_v16 = vpop.f32.mrb[9].mxu0  ;;  %v10604_v7 = vld [vmem:[%s14310_s5 + $0x568] ss:$16 sps:$4 sm:$0xff]   ;;  %v10609_v8 = vld [vmem:[%s14310_s5 + $0x584] ss:$16 sps:$4 sm:$0xff]  }
 0x1fb   :  { %v1089_v17 = vadd.f32 %v1088_v15, %v313_v9  ;;  %v1130_v20 = vadd.f32 %v1129_v16, %v321_v10  ;;  %v1090_v22 = vpop.f32.mrb[6].mxu1  ;;  %v1131_v23 = vpop.f32.mrb[10].mxu0  ;;  %v10612_v9 = vld [vmem:[%s14310_s5 + $0x58c] ss:$16 sps:$4 sm:$0xff]   ;;  %v10607_v10 = vld [vmem:[%s14310_s5 + $0x580] ss:$16 sps:$4 sm:$0xff]  }
 0x1fc   :  { %v1138_v24 = vmax.f32 %v1087_v13, 0.0  ;;  %v1140_v25 = vmax.f32 %v1128_v14, 0.0  ;;  %v1091_v26 = vpop.f32.mrb[7].mxu1  ;;  %v1132_v27 = vpop.f32.mrb[11].mxu0  ;;  %v10610_v11 = vld [vmem:[%s14310_s5 + $0x588] ss:$16 sps:$4 sm:$0xff]  }
 0x1fd   :  { %v1139_v28 = vmax.f32 %v1089_v17, 0.0  ;;  %v1141_v29 = vmax.f32 %v1130_v20, 0.0  ;;  %v10615_v12 = vld [vmem:[%s14310_s5 + $0x5a4] ss:$16 sps:$4 sm:$0xff]   ;;  %v10618_v13 = vld [vmem:[%s14310_s5 + $0x5ac] ss:$16 sps:$4 sm:$0xff]  }
 0x1fe   :  { %v1146_v30 = vpack.c.bf16 %v1138_v24, %v1138_v24  ;;  %v1148_v31 = vpack.c.bf16 %v1140_v25, %v1140_v25  ;;  %v10613_v14 = vld [vmem:[%s14310_s5 + $0x5a0] ss:$16 sps:$4 sm:$0xff]   ;;  %v10616_v15 = vld [vmem:[%s14310_s5 + $0x5a8] ss:$16 sps:$4 sm:$0xff]   ;;  %v10621_v16 = vld [vmem:[%s14310_s5 + $0x5c4] ss:$16 sps:$4 sm:$0xff]  }
 0x1ff   :  { %v1147_v32 = vpack.c.bf16 %v1139_v28, %v1139_v28  ;;  %v1149_v33 = vpack.c.bf16 %v1141_v29, %v1141_v29  ;;  %v10624_v17 = vld [vmem:[%s14310_s5 + $0x5cc] ss:$16 sps:$4 sm:$0xff]   ;;  %v10619_v22 = vld [vmem:[%s14310_s5 + $0x5c0] ss:$16 sps:$4 sm:$0xff]   ;;  %v10622_v23 = vld [vmem:[%s14310_s5 + $0x5c8] ss:$16 sps:$4 sm:$0xff]  }
 0x200   :  { %v1162_v34 = vrot.slane %v1146_v30, 4  ;;  %1168 = vst [vmem:[#allocation2 + $0x30] sm:$0xf] %v1148_v31  ;;  %v11711_v20 = vld [vmem:[#allocation2 + $0x28] sm:$0xff]  ;;  %v10627_v24 = vld [vmem:[%s14310_s5 + $0x5e4] ss:$16 sps:$4 sm:$0xff]  }
 0x201   :  { %v1163_v35 = vrot.slane %v1147_v32, 4  ;;  %1169 = vst [vmem:[#allocation2 + $0x38] sm:$0xf] %v1149_v33  ;;  %v10630_v25 = vld [vmem:[%s14310_s5 + $0x5ec] ss:$16 sps:$4 sm:$0xff]   ;;  %v1395_v30 = vrot.slane %v11711_v20, 4 }
 0x202   :  { %1166 = vst [vmem:[#allocation2 + $0x18] sm:$0xf0] %v1162_v34  ;;  %v1181_v26 = vld [vmem:[#allocation2 + $0x10] sm:$0xf0]  ;;  %v10625_v27 = vld [vmem:[%s14310_s5 + $0x5e0] ss:$16 sps:$4 sm:$0xff]  }
 0x203   :  { %1167 = vst [vmem:[#allocation2 + $0x20] sm:$0xf0] %v1163_v35  ;;  %v10628_v28 = vld [vmem:[%s14310_s5 + $0x5e8] ss:$16 sps:$4 sm:$0xff]   ;;  %v1394_v29 = vrot.slane %v1181_v26, 4 }
 0x204   :  { %v10633_v31 = vld [vmem:[%s14310_s5 + $0x4] ss:$16 sps:$4 sm:$0xff]   ;;  %v10636_v32 = vld [vmem:[%s14310_s5 + $0xc] ss:$16 sps:$4 sm:$0xff]   ;;  %v10631_v34 = vld [vmem:[%s14310_s5] ss:$16 sps:$4 sm:$0xff]  }
 0x205   :  { %v1396_v33 = vsel %vm1387_vm3, %v1394_v29, %v1395_v30  ;;  %v10634_v35 = vld [vmem:[%s14310_s5 + $0x8] ss:$16 sps:$4 sm:$0xff]   ;;  %v10702_v26 = vld [vmem:[%s14310_s5 + $0x16c] ss:$16 sps:$4 sm:$0xff]   ;;  %v10705_v29 = vld [vmem:[%s14310_s5 + $0x184] ss:$16 sps:$4 sm:$0xff]  }
 0x207   :  { %v1182_v59 = vld [vmem:[#allocation2 + $0x30] sm:$0xff] }
 0x208   :  { %v1183_v45 = vld [vmem:[#allocation2 + $0x38] sm:$0xff]  ;;  %v1397_v62 = vrot.slane %v1182_v59, 4  ;;  %v10661_v59 = vld [vmem:[%s14310_s5 + $0xa0] ss:$16 sps:$4 sm:$0xff]  }
 0x209   :  { %v11629_v37 = vld [vmem:[#allocation2 + $0x18] sm:$0xff]  ;;  %v1399_v51 = vrot.slane %v1183_v45, 4 }
 0x20a   :  { %v11631_v41 = vld [vmem:[#allocation2 + $0x20] sm:$0xff]  ;;  %v1389_v42 = vrot.slane %v11629_v37, 4  ;;  %v10648_v45 = vld [vmem:[%s14310_s5 + $0x4c] ss:$16 sps:$4 sm:$0xff]  }
 0x20b   :  { %v1392_v44 = vrot.slane %v11631_v41, 4 }
 0x20c   :  { %v1390_v50 = vsel %vm1387_vm3, %v1388_v48, %v1389_v42  ;;  %v1398_v63 = vsel %vm1387_vm3, %v1389_v42, %v1397_v62  ;;  %v10637_v42 = vld [vmem:[%s14310_s5 + $0x20] ss:$16 sps:$4 sm:$0xff]   ;;  %v10651_v48 = vld [vmem:[%s14310_s5 + $0x64] ss:$16 sps:$4 sm:$0xff]  }
 0x20d   :  { %v1393_v49 = vsel %vm1387_vm3, %v1391_v43, %v1392_v44  ;;  %v1400_v54 = vsel %vm1387_vm3, %v1392_v44, %v1399_v51  ;;  %v10640_v43 = vld [vmem:[%s14310_s5 + $0x28] ss:$16 sps:$4 sm:$0xff]   ;;  %v10645_v44 = vld [vmem:[%s14310_s5 + $0x44] ss:$16 sps:$4 sm:$0xff]  }
 0x20e   :  { %1924 = vmatprep.mubr.bf16.mxu1 %v1393_v49  ;;  %2042 = vmatprep.mubr.bf16.mxu0 %v1393_v49  ;;  %v10654_v49 = vld [vmem:[%s14310_s5 + $0x6c] ss:$16 sps:$4 sm:$0xff]  }
 0x20f   :  { %1925 = vmatmul.mubr.bf16.vlgmr.msra.gmra.mrb[8].mxu1 %v1390_v50  ;;  %2043 = vmatmul.mubr.bf16.vlgmr.msra.gmra.mrb[12].mxu0 %v1390_v50  ;;  %v10649_v50 = vld [vmem:[%s14310_s5 + $0x60] ss:$16 sps:$4 sm:$0xff]  }
 0x210   :  { %1952 = vmatpush1.bf16.msra.mxu1 %v10583_v46  ;;  %2072 = vmatpush1.bf16.msra.mxu0 %v10586_v47  ;;  %v10643_v46 = vld [vmem:[%s14310_s5 + $0x40] ss:$16 sps:$4 sm:$0xff]   ;;  %v10646_v47 = vld [vmem:[%s14310_s5 + $0x48] ss:$16 sps:$4 sm:$0xff]  }
 0x211   :  { %1934 = vmatprep.mubr.bf16.mxu1 %v1400_v54  ;;  %2052 = vmatprep.mubr.bf16.mxu0 %v1400_v54  ;;  %v10655_v54 = vld [vmem:[%s14310_s5 + $0x80] ss:$16 sps:$4 sm:$0xff]  }
 0x212   :  { %1953 = vmatprep.subr.bf16.mxu1 %v10591_v52  ;;  %2073 = vmatprep.subr.bf16.mxu0 %v10594_v53  ;;  %v10657_v52 = vld [vmem:[%s14310_s5 + $0x84] ss:$16 sps:$4 sm:$0xff]   ;;  %v10660_v53 = vld [vmem:[%s14310_s5 + $0x8c] ss:$16 sps:$4 sm:$0xff]  }
 0x214   :  { %1954 = vmatpush1.bf16.msra.mxu1 %v10589_v55  ;;  %2074 = vmatpush1.bf16.msra.mxu0 %v10592_v56  ;;  %v10658_v55 = vld [vmem:[%s14310_s5 + $0x88] ss:$16 sps:$4 sm:$0xff]   ;;  %v10663_v56 = vld [vmem:[%s14310_s5 + $0xa4] ss:$16 sps:$4 sm:$0xff]  }
 0x215   :  { %1955 = vmatprep.subr.bf16.mxu1 %v10597_v57  ;;  %2075 = vmatprep.subr.bf16.mxu0 %v10600_v58  ;;  %v10666_v57 = vld [vmem:[%s14310_s5 + $0xac] ss:$16 sps:$4 sm:$0xff]  }
 0x216   :  { %v1171_v58 = vld [vmem:[#allocation2 + $0x8] sm:$0xff] }
 0x217   :  { %1935 = vmatmul.mubr.bf16.gmra.mrb[12].mxu1 %v1398_v63  ;;  %2053 = vmatmul.mubr.bf16.gmra.mrb[16].mxu0 %v1398_v63  ;;  %v10667_v63 = vld [vmem:[%s14310_s5 + $0xc0] ss:$16 sps:$4 sm:$0xff]  }
 0x218   :  { %1956 = vmatpush1.bf16.msra.mxu1 %v10595_v60  ;;  %2076 = vmatpush1.bf16.msra.mxu0 %v10598_v61  ;;  %v10664_v60 = vld [vmem:[%s14310_s5 + $0xa8] ss:$16 sps:$4 sm:$0xff]   ;;  %v10669_v61 = vld [vmem:[%s14310_s5 + $0xc4] ss:$16 sps:$4 sm:$0xff]  }
 0x219   :  { %1944 = vmatprep.mubr.bf16.mxu1 %v1399_v51  ;;  %2062 = vmatprep.mubr.bf16.mxu0 %v1399_v51  ;;  %v10652_v51 = vld [vmem:[%s14310_s5 + $0x68] ss:$16 sps:$4 sm:$0xff]  }
 0x21a   :  { %1957 = vmatprep.subr.bf16.mxu1 %v10603_v0  ;;  %2077 = vmatprep.subr.bf16.mxu0 %v10606_v1  ;;  %v10670_v0 = vld [vmem:[%s14310_s5 + $0xc8] ss:$16 sps:$4 sm:$0xff]   ;;  %v10675_v1 = vld [vmem:[%s14310_s5 + $0xe4] ss:$16 sps:$4 sm:$0xff]  }
 0x21c   :  { %1958 = vmatpush1.bf16.msra.mxu1 %v10601_v2  ;;  %2078 = vmatpush1.bf16.msra.mxu0 %v10604_v7  ;;  %v10678_v2 = vld [vmem:[%s14310_s5 + $0xec] ss:$16 sps:$4 sm:$0xff]   ;;  %v10673_v7 = vld [vmem:[%s14310_s5 + $0xe0] ss:$16 sps:$4 sm:$0xff]  }
 0x21d   :  { %1959 = vmatprep.subr.bf16.mxu1 %v10609_v8  ;;  %2079 = vmatprep.subr.bf16.mxu0 %v10612_v9  ;;  %v10676_v8 = vld [vmem:[%s14310_s5 + $0xe8] ss:$16 sps:$4 sm:$0xff]   ;;  %v10681_v9 = vld [vmem:[%s14310_s5 + $0x104] ss:$16 sps:$4 sm:$0xff]  }
 0x21f   :  { %1945 = vmatmul.mubr.bf16.gmra.mrb[16].mxu1 %v1397_v62  ;;  %2063 = vmatmul.mubr.bf16.gmra.mrb[20].mxu0 %v1397_v62  ;;  %v10672_v62 = vld [vmem:[%s14310_s5 + $0xcc] ss:$16 sps:$4 sm:$0xff]  }
 0x220   :  { %1960 = vmatpush1.bf16.msra.mxu1 %v10607_v10  ;;  %2080 = vmatpush1.bf16.msra.mxu0 %v10610_v11  ;;  %v10684_v10 = vld [vmem:[%s14310_s5 + $0x10c] ss:$16 sps:$4 sm:$0xff]   ;;  %v10679_v11 = vld [vmem:[%s14310_s5 + $0x100] ss:$16 sps:$4 sm:$0xff]  }
 0x221   :  { %1961 = vmatprep.subr.bf16.mxu1 %v10615_v12  ;;  %2081 = vmatprep.subr.bf16.mxu0 %v10618_v13  ;;  %v10682_v12 = vld [vmem:[%s14310_s5 + $0x108] ss:$16 sps:$4 sm:$0xff]   ;;  %v10687_v13 = vld [vmem:[%s14310_s5 + $0x124] ss:$16 sps:$4 sm:$0xff]  }
 0x222   :  { %1983 = vmatprep.mubr.bf16.mxu1 %v11711_v20  ;;  %2103 = vmatprep.mubr.bf16.mxu0 %v11711_v20 }
 0x224   :  { %1962 = vmatpush1.bf16.msra.mxu1 %v10613_v14  ;;  %2082 = vmatpush1.bf16.msra.mxu0 %v10616_v15  ;;  %v10690_v14 = vld [vmem:[%s14310_s5 + $0x12c] ss:$16 sps:$4 sm:$0xff]   ;;  %v10685_v15 = vld [vmem:[%s14310_s5 + $0x120] ss:$16 sps:$4 sm:$0xff]  }
 0x225   :  { %1963 = vmatprep.subr.bf16.mxu1 %v10621_v16  ;;  %2083 = vmatprep.subr.bf16.mxu0 %v10624_v17  ;;  %v10688_v16 = vld [vmem:[%s14310_s5 + $0x128] ss:$16 sps:$4 sm:$0xff]   ;;  %v10693_v17 = vld [vmem:[%s14310_s5 + $0x144] ss:$16 sps:$4 sm:$0xff]  }
 0x228   :  { %1964 = vmatpush1.bf16.msra.mxu1 %v10619_v22  ;;  %2084 = vmatpush1.bf16.msra.mxu0 %v10622_v23  ;;  %v10696_v22 = vld [vmem:[%s14310_s5 + $0x14c] ss:$16 sps:$4 sm:$0xff]   ;;  %v10691_v23 = vld [vmem:[%s14310_s5 + $0x140] ss:$16 sps:$4 sm:$0xff]  }
 0x229   :  { %1965 = vmatprep.subr.bf16.mxu1 %v10627_v24  ;;  %2085 = vmatprep.subr.bf16.mxu0 %v10630_v25  ;;  %v10694_v24 = vld [vmem:[%s14310_s5 + $0x148] ss:$16 sps:$4 sm:$0xff]   ;;  %v10699_v25 = vld [vmem:[%s14310_s5 + $0x164] ss:$16 sps:$4 sm:$0xff]  }
 0x22c   :  { %1966 = vmatpush1.bf16.msra.mxu1 %v10625_v27  ;;  %2086 = vmatpush1.bf16.msra.mxu0 %v10628_v28  ;;  %v10697_v27 = vld [vmem:[%s14310_s5 + $0x160] ss:$16 sps:$4 sm:$0xff]   ;;  %v10700_v28 = vld [vmem:[%s14310_s5 + $0x168] ss:$16 sps:$4 sm:$0xff]  }
 0x22d   :  { %2612 = vmatprep.subr.bf16.mxu1 %v10633_v31  ;;  %2730 = vmatprep.subr.bf16.mxu0 %v10636_v32  ;;  %v10703_v31 = vld [vmem:[%s14310_s5 + $0x180] ss:$16 sps:$4 sm:$0xff]   ;;  %v10706_v32 = vld [vmem:[%s14310_s5 + $0x188] ss:$16 sps:$4 sm:$0xff]  }
 0x22f   :  { %1984 = vmatmul.mubr.bf16.vlgmr.msra.gmra.mrb[8].mxu1 %v1396_v33  ;;  %2104 = vmatmul.mubr.bf16.vlgmr.msra.gmra.mrb[12].mxu0 %v1396_v33  ;;  %v10711_v33 = vld [vmem:[%s14310_s5 + $0x1a4] ss:$16 sps:$4 sm:$0xff]  }
 0x230   :  { %2613 = vmatpush1.bf16.msra.mxu1 %v10631_v34  ;;  %2731 = vmatpush1.bf16.msra.mxu0 %v10634_v35  ;;  %v10714_v34 = vld [vmem:[%s14310_s5 + $0x1ac] ss:$16 sps:$4 sm:$0xff]   ;;  %v10709_v35 = vld [vmem:[%s14310_s5 + $0x1a0] ss:$16 sps:$4 sm:$0xff]  }
 0x231   :  { %2614 = vmatprep.subr.bf16.mxu1 %v10639_v36  ;;  %2732 = vmatprep.subr.bf16.mxu0 %v10642_v39  ;;  %v10712_v36 = vld [vmem:[%s14310_s5 + $0x1a8] ss:$16 sps:$4 sm:$0xff]   ;;  %v10717_v39 = vld [vmem:[%s14310_s5 + $0x1c4] ss:$16 sps:$4 sm:$0xff]  }
 0x232   :  { %1993 = vmatprep.mubr.bf16.mxu1 %v11711_v20  ;;  %2113 = vmatprep.mubr.bf16.mxu0 %v11711_v20 }
 0x234   :  { %2615 = vmatpush1.bf16.msra.mxu1 %v10637_v42  ;;  %2733 = vmatpush1.bf16.msra.mxu0 %v10640_v43  ;;  %v10720_v42 = vld [vmem:[%s14310_s5 + $0x1cc] ss:$16 sps:$4 sm:$0xff]   ;;  %v10715_v43 = vld [vmem:[%s14310_s5 + $0x1c0] ss:$16 sps:$4 sm:$0xff]  }
 0x235   :  { %2616 = vmatprep.subr.bf16.mxu1 %v10645_v44  ;;  %2734 = vmatprep.subr.bf16.mxu0 %v10648_v45  ;;  %v10718_v44 = vld [vmem:[%s14310_s5 + $0x1c8] ss:$16 sps:$4 sm:$0xff]   ;;  %v10723_v45 = vld [vmem:[%s14310_s5 + $0x1e4] ss:$16 sps:$4 sm:$0xff]  }
 0x237   :  { %1994 = vmatmul.mubr.bf16.gmra.mrb[12].mxu1 %v1395_v30  ;;  %2114 = vmatmul.mubr.bf16.gmra.mrb[16].mxu0 %v1395_v30 }
 0x238   :  { %2617 = vmatpush1.bf16.msra.mxu1 %v10643_v46  ;;  %2735 = vmatpush1.bf16.msra.mxu0 %v10646_v47  ;;  %v10726_v46 = vld [vmem:[%s14310_s5 + $0x1ec] ss:$16 sps:$4 sm:$0xff]   ;;  %v10721_v47 = vld [vmem:[%s14310_s5 + $0x1e0] ss:$16 sps:$4 sm:$0xff]  }
 0x239   :  { %2618 = vmatprep.subr.bf16.mxu1 %v10651_v48  ;;  %2736 = vmatprep.subr.bf16.mxu0 %v10654_v49  ;;  %v10724_v48 = vld [vmem:[%s14310_s5 + $0x1e8] ss:$16 sps:$4 sm:$0xff]   ;;  %v10729_v49 = vld [vmem:[%s14310_s5 + $0x204] ss:$16 sps:$4 sm:$0xff]  }
 0x23a   :  { %2003 = vmatprep.mubr.bf16.mxu1 %v11711_v20  ;;  %2123 = vmatprep.mubr.bf16.mxu0 %v11711_v20 }
 0x23c   :  { %2619 = vmatpush1.bf16.msra.mxu1 %v10649_v50  ;;  %2737 = vmatpush1.bf16.msra.mxu0 %v10652_v51  ;;  %v10732_v50 = vld [vmem:[%s14310_s5 + $0x20c] ss:$16 sps:$4 sm:$0xff]   ;;  %v10727_v51 = vld [vmem:[%s14310_s5 + $0x200] ss:$16 sps:$4 sm:$0xff]  }
 0x23d   :  { %2620 = vmatprep.subr.bf16.mxu1 %v10657_v52  ;;  %2738 = vmatprep.subr.bf16.mxu0 %v10660_v53  ;;  %v1170_v52 = vld [vmem:[#allocation2] sm:$0xff]  ;;  %v10730_v53 = vld [vmem:[%s14310_s5 + $0x208] ss:$16 sps:$4 sm:$0xff]  }
 0x23f   :  { %2004 = vmatmul.mubr.bf16.gmra.mrb[20].mxu1 %v1395_v30  ;;  %2124 = vmatmul.mubr.bf16.gmra.mrb[24].mxu0 %v1395_v30  ;;  %v10708_v30 = vld [vmem:[%s14310_s5 + $0x18c] ss:$16 sps:$4 sm:$0xff]  }
 0x240   :  { %2621 = vmatpush1.bf16.msra.mxu1 %v10655_v54  ;;  %2644 = vmatprep.mubr.bf16.mxu1 %v1171_v58  ;;  %v10735_v54 = vld [vmem:[%s14310_s5 + $0x224] ss:$16 sps:$4 sm:$0xff]  }
 0x241   :  { %2739 = vmatpush1.bf16.msra.mxu0 %v10658_v55  ;;  %2762 = vmatprep.mubr.bf16.mxu0 %v1171_v58  ;;  %v10738_v55 = vld [vmem:[%s14310_s5 + $0x22c] ss:$16 sps:$4 sm:$0xff]   ;;  %v10741_v58 = vld [vmem:[%s14310_s5 + $0x244] ss:$16 sps:$4 sm:$0xff]  }
 0x242   :  { %2622 = vmatprep.subr.bf16.mxu1 %v10663_v56  ;;  %2740 = vmatprep.subr.bf16.mxu0 %v10666_v57  ;;  %v10733_v56 = vld [vmem:[%s14310_s5 + $0x220] ss:$16 sps:$4 sm:$0xff]   ;;  %v10736_v57 = vld [vmem:[%s14310_s5 + $0x228] ss:$16 sps:$4 sm:$0xff]  }
 0x244   :  { %2623 = vmatpush1.bf16.msra.mxu1 %v10661_v59  ;;  %v10744_v59 = vld [vmem:[%s14310_s5 + $0x24c] ss:$16 sps:$4 sm:$0xff]  }
 0x245   :  { %2741 = vmatpush1.bf16.msra.mxu0 %v10664_v60  ;;  %2624 = vmatprep.subr.bf16.mxu1 %v10669_v61  ;;  %v10742_v60 = vld [vmem:[%s14310_s5 + $0x248] ss:$16 sps:$4 sm:$0xff]   ;;  %v10747_v61 = vld [vmem:[%s14310_s5 + $0x264] ss:$16 sps:$4 sm:$0xff]  }
 0x246   :  { %2742 = vmatprep.subr.bf16.mxu0 %v10672_v62  ;;  %v1177_v62 = vld [vmem:[#allocation2 + $0x38] sm:$0xf] }
 0x248   :  { %2625 = vmatpush1.bf16.msra.mxu1 %v10667_v63  ;;  %v10750_v63 = vld [vmem:[%s14310_s5 + $0x26c] ss:$16 sps:$4 sm:$0xff]  }
 0x249   :  { %2743 = vmatpush1.bf16.msra.mxu0 %v10670_v0  ;;  %2626 = vmatprep.subr.bf16.mxu1 %v10675_v1  ;;  %v10745_v0 = vld [vmem:[%s14310_s5 + $0x260] ss:$16 sps:$4 sm:$0xff]   ;;  %v10748_v1 = vld [vmem:[%s14310_s5 + $0x268] ss:$16 sps:$4 sm:$0xff]  }
 0x24a   :  { %2744 = vmatprep.subr.bf16.mxu0 %v10678_v2  ;;  %v10753_v2 = vld [vmem:[%s14310_s5 + $0x284] ss:$16 sps:$4 sm:$0xff]  }
 0x24c   :  { %2627 = vmatpush1.bf16.msra.mxu1 %v10673_v7  ;;  %v10751_v7 = vld [vmem:[%s14310_s5 + $0x280] ss:$16 sps:$4 sm:$0xff]  }
 0x24d   :  { %2745 = vmatpush1.bf16.msra.mxu0 %v10676_v8  ;;  %2628 = vmatprep.subr.bf16.mxu1 %v10681_v9  ;;  %v1176_v8 = vld [vmem:[#allocation2 + $0x30] sm:$0xf]  ;;  %v10754_v9 = vld [vmem:[%s14310_s5 + $0x288] ss:$16 sps:$4 sm:$0xff]  }
 0x24e   :  { %2746 = vmatprep.subr.bf16.mxu0 %v10684_v10  ;;  %v10759_v10 = vld [vmem:[%s14310_s5 + $0x2a4] ss:$16 sps:$4 sm:$0xff]  }
 0x250   :  { %2629 = vmatpush1.bf16.msra.mxu1 %v10679_v11  ;;  %v10762_v11 = vld [vmem:[%s14310_s5 + $0x2ac] ss:$16 sps:$4 sm:$0xff]  }
 0x251   :  { %2747 = vmatpush1.bf16.msra.mxu0 %v10682_v12  ;;  %2630 = vmatprep.subr.bf16.mxu1 %v10687_v13  ;;  %v10757_v12 = vld [vmem:[%s14310_s5 + $0x2a0] ss:$16 sps:$4 sm:$0xff]   ;;  %v10760_v13 = vld [vmem:[%s14310_s5 + $0x2a8] ss:$16 sps:$4 sm:$0xff]  }
 0x252   :  { %2748 = vmatprep.subr.bf16.mxu0 %v10690_v14  ;;  %v10765_v14 = vld [vmem:[%s14310_s5 + $0x2c4] ss:$16 sps:$4 sm:$0xff]  }
 0x254   :  { %2631 = vmatpush1.bf16.msra.mxu1 %v10685_v15  ;;  %v10768_v15 = vld [vmem:[%s14310_s5 + $0x2cc] ss:$16 sps:$4 sm:$0xff]  }
 0x255   :  { %2749 = vmatpush1.bf16.msra.mxu0 %v10688_v16  ;;  %2632 = vmatprep.subr.bf16.mxu1 %v10693_v17  ;;  %v10763_v16 = vld [vmem:[%s14310_s5 + $0x2c0] ss:$16 sps:$4 sm:$0xff]   ;;  %v10766_v17 = vld [vmem:[%s14310_s5 + $0x2c8] ss:$16 sps:$4 sm:$0xff]  }
 0x256   :  { %2750 = vmatprep.subr.bf16.mxu0 %v10696_v22  ;;  %v10771_v22 = vld [vmem:[%s14310_s5 + $0x2e4] ss:$16 sps:$4 sm:$0xff]  }
 0x258   :  { %2633 = vmatpush1.bf16.msra.mxu1 %v10691_v23  ;;  %v10774_v23 = vld [vmem:[%s14310_s5 + $0x2ec] ss:$16 sps:$4 sm:$0xff]  }
 0x259   :  { %2751 = vmatpush1.bf16.msra.mxu0 %v10694_v24  ;;  %2634 = vmatprep.subr.bf16.mxu1 %v10699_v25  ;;  %v10769_v24 = vld [vmem:[%s14310_s5 + $0x2e0] ss:$16 sps:$4 sm:$0xff]   ;;  %v10772_v25 = vld [vmem:[%s14310_s5 + $0x2e8] ss:$16 sps:$4 sm:$0xff]  }
 0x25a   :  { %2752 = vmatprep.subr.bf16.mxu0 %v10702_v26  ;;  %v9069_v26 = vld [vmem:[%s14312_s7 + $0x600] sm:$0xff] }
 0x25c   :  { %2635 = vmatpush1.bf16.msra.mxu1 %v10697_v27  ;;  %v9073_v27 = vld [vmem:[%s14312_s7 + $0x620] sm:$0xff] }
 0x25d   :  { %2753 = vmatpush1.bf16.msra.mxu0 %v10700_v28  ;;  %2636 = vmatprep.subr.bf16.mxu1 %v10705_v29  ;;  %v9070_v28 = vld [vmem:[%s14312_s7 + $0x608] sm:$0xff]  ;;  %v9261_v29 = vcombine.low %v9069_v26, %v9073_v27 }
 0x25e   :  { %2754 = vmatprep.subr.bf16.mxu0 %v10708_v30  ;;  %v9262_v30 = vcombine.high %v9069_v26, %v9073_v27 }
 0x260   :  { %2637 = vmatpush1.bf16.msra.mxu1 %v10703_v31  ;;  %v9074_v31 = vld [vmem:[%s14312_s7 + $0x628] sm:$0xff] }
 0x261   :  { %2755 = vmatpush1.bf16.msra.mxu0 %v10706_v32  ;;  %2638 = vmatprep.subr.bf16.mxu1 %v10711_v33  ;;  %v9077_v32 = vld [vmem:[%s14312_s7 + $0x640] sm:$0xff] }
 0x262   :  { %2756 = vmatprep.subr.bf16.mxu0 %v10714_v34  ;;  %v9081_v33 = vld [vmem:[%s14312_s7 + $0x660] sm:$0xff]  ;;  %v9263_v34 = vcombine.low %v9070_v28, %v9074_v31 }
 0x264   :  { %2639 = vmatpush1.bf16.msra.mxu1 %v10709_v35  ;;  %v9264_v35 = vcombine.high %v9070_v28, %v9074_v31  ;;  %v9125_v28 = vld [vmem:[%s14312_s7 + $0x7c0] sm:$0xff] }
 0x265   :  { %2757 = vmatpush1.bf16.msra.mxu0 %v10712_v36  ;;  %2640 = vmatprep.subr.bf16.mxu1 %v10717_v39  ;;  %v9270_v36 = vcombine.high %v9077_v32, %v9081_v33  ;;  %v9078_v39 = vld [vmem:[%s14312_s7 + $0x648] sm:$0xff] }
 0x266   :  { %2758 = vmatprep.subr.bf16.mxu0 %v10720_v42  ;;  %v9082_v42 = vld [vmem:[%s14312_s7 + $0x668] sm:$0xff] }
 0x268   :  { %2641 = vmatpush1.bf16.msra.mxu1 %v10715_v43  ;;  %v9272_v43 = vcombine.high %v9078_v39, %v9082_v42 }
 0x269   :  { %2759 = vmatpush1.bf16.msra.mxu0 %v10718_v44  ;;  %2642 = vmatprep.subr.bf16.mxu1 %v10723_v45  ;;  %v9085_v44 = vld [vmem:[%s14312_s7 + $0x680] sm:$0xff] }
 0x26a   :  { %2760 = vmatprep.subr.bf16.mxu0 %v10726_v46  ;;  %v9089_v45 = vld [vmem:[%s14312_s7 + $0x6a0] sm:$0xff]  ;;  %v9086_v46 = vld [vmem:[%s14312_s7 + $0x688] sm:$0xff] }
 0x26c   :  { %2643 = vmatpush1.bf16.msra.mxu1 %v10721_v47  ;;  %v9090_v47 = vld [vmem:[%s14312_s7 + $0x6a8] sm:$0xff] }
 0x26d   :  { %2761 = vmatpush1.bf16.msra.mxu0 %v10724_v48  ;;  %2671 = vmatprep.subr.bf16.mxu1 %v10729_v49  ;;  %v9269_v48 = vcombine.low %v9077_v32, %v9081_v33  ;;  %v9271_v49 = vcombine.low %v9078_v39, %v9082_v42  ;;  %v9130_v33 = vld [vmem:[%s14312_s7 + $0x7e8] sm:$0xff] }
 0x26e   :  { %2791 = vmatprep.subr.bf16.mxu0 %v10732_v50  ;;  %v9278_v50 = vcombine.high %v9085_v44, %v9089_v45 }
 0x26f   :  { %2645 = vmatmul.mubr.bf16.vlgmr.msra.gmra.mrb[8].mxu1 %v1170_v52 }
 0x270   :  { %2763 = vmatmul.mubr.bf16.vlgmr.msra.gmra.mrb[12].mxu0 %v1170_v52  ;;  %2654 = vmatprep.mubr.bf16.mxu1 %v11631_v41  ;;  %v9093_v52 = vld [vmem:[%s14312_s7 + $0x6c0] sm:$0xff] }
 0x271   :  { %2672 = vmatpush1.bf16.msra.mxu1 %v10727_v51  ;;  %2772 = vmatprep.mubr.bf16.mxu0 %v11631_v41  ;;  %v10739_v41 = vld [vmem:[%s14310_s5 + $0x240] ss:$16 sps:$4 sm:$0xff]   ;;  %v9280_v51 = vcombine.high %v9086_v46, %v9090_v47 }
 0x272   :  { %2792 = vmatpush1.bf16.msra.mxu0 %v10730_v53  ;;  %2673 = vmatprep.subr.bf16.mxu1 %v10735_v54  ;;  %v9097_v53 = vld [vmem:[%s14312_s7 + $0x6e0] sm:$0xff]  ;;  %v9094_v54 = vld [vmem:[%s14312_s7 + $0x6c8] sm:$0xff] }
 0x273   :  { %2793 = vmatprep.subr.bf16.mxu0 %v10738_v55  ;;  %v9098_v55 = vld [vmem:[%s14312_s7 + $0x6e8] sm:$0xff] }
 0x275   :  { %2674 = vmatpush1.bf16.msra.mxu1 %v10733_v56  ;;  %v1178_v56 = vld [vmem:[#allocation2 + $0x40] sm:$0xf] }
 0x276   :  { %2794 = vmatpush1.bf16.msra.mxu0 %v10736_v57  ;;  %2675 = vmatprep.subr.bf16.mxu1 %v10741_v58  ;;  %v9277_v57 = vcombine.low %v9085_v44, %v9089_v45  ;;  %v9279_v58 = vcombine.low %v9086_v46, %v9090_v47  ;;  %v9138_v44 = vld [vmem:[%s14312_s7 + $0x828] sm:$0xff]  ;;  %v9141_v45 = vld [vmem:[%s14312_s7 + $0x840] sm:$0xff] }
 0x277   :  { %2655 = vmatmul.mubr.bf16.gmra.mrb[12].mxu1 %v11629_v37  ;;  %2795 = vmatprep.subr.bf16.mxu0 %v10744_v59  ;;  %v9286_v59 = vcombine.high %v9093_v52, %v9097_v53  ;;  %v9145_v47 = vld [vmem:[%s14312_s7 + $0x860] sm:$0xff] }
 0x278   :  { %2773 = vmatmul.mubr.bf16.gmra.mrb[16].mxu0 %v11629_v37  ;;  %2664 = vmatprep.mubr.bf16.mxu1 %v1177_v62  ;;  %v10756_v37 = vld [vmem:[%s14310_s5 + $0x28c] ss:$16 sps:$4 sm:$0xff]  }
 0x279   :  { %2676 = vmatpush1.bf16.msra.mxu1 %v10739_v41  ;;  %2782 = vmatprep.mubr.bf16.mxu0 %v1177_v62  ;;  %v9288_v41 = vcombine.high %v9094_v54, %v9098_v55  ;;  %v9106_v62 = vld [vmem:[%s14312_s7 + $0x728] sm:$0xff] }
 0x27a   :  { %2796 = vmatpush1.bf16.msra.mxu0 %v10742_v60  ;;  %2677 = vmatprep.subr.bf16.mxu1 %v10747_v61  ;;  %v9105_v60 = vld [vmem:[%s14312_s7 + $0x720] sm:$0xff]  ;;  %v9102_v61 = vld [vmem:[%s14312_s7 + $0x708] sm:$0xff] }
 0x27b   :  { %2797 = vmatprep.subr.bf16.mxu0 %v10750_v63  ;;  %v9285_v63 = vcombine.low %v9093_v52, %v9097_v53  ;;  %v9334_v52 = vcombine.high %v9141_v45, %v9145_v47 }
 0x27d   :  { %2678 = vmatpush1.bf16.msra.mxu1 %v10745_v0  ;;  %v9287_v0 = vcombine.low %v9094_v54, %v9098_v55  ;;  %v9333_v54 = vcombine.low %v9141_v45, %v9145_v47 }
 0x27e   :  { %2798 = vmatpush1.bf16.msra.mxu0 %v10748_v1  ;;  %2679 = vmatprep.subr.bf16.mxu1 %v10753_v2  ;;  %v9296_v2 = vcombine.high %v9102_v61, %v9106_v62 }
 0x27f   :  { %2665 = vmatmul.mubr.bf16.gmra.mrb[24].mxu1 %v1176_v8  ;;  %2799 = vmatprep.subr.bf16.mxu0 %v10756_v37  ;;  %v9109_v37 = vld [vmem:[%s14312_s7 + $0x740] sm:$0xff] }
 0x280   :  { %2783 = vmatmul.mubr.bf16.gmra.mrb[28].mxu0 %v1176_v8  ;;  %2703 = vmatprep.mubr.bf16.mxu1 %v11711_v20  ;;  %v9110_v8 = vld [vmem:[%s14312_s7 + $0x748] sm:$0xff] }
 0x281   :  { %2680 = vmatpush1.bf16.msra.mxu1 %v10751_v7  ;;  %2823 = vmatprep.mubr.bf16.mxu0 %v11711_v20  ;;  %v9113_v7 = vld [vmem:[%s14312_s7 + $0x760] sm:$0xff] }
 0x282   :  { %2800 = vmatpush1.bf16.msra.mxu0 %v10754_v9  ;;  %2681 = vmatprep.subr.bf16.mxu1 %v10759_v10  ;;  %v9114_v9 = vld [vmem:[%s14312_s7 + $0x768] sm:$0xff] }
 0x283   :  { %2801 = vmatprep.subr.bf16.mxu0 %v10762_v11  ;;  %v9295_v11 = vcombine.low %v9102_v61, %v9106_v62  ;;  %v9157_v62 = vld [vmem:[%s14312_s7 + $0x8c0] sm:$0xff] }
 0x285   :  { %2682 = vmatpush1.bf16.msra.mxu1 %v10757_v12  ;;  %v9302_v12 = vcombine.high %v9109_v37, %v9113_v7 }
 0x286   :  { %2802 = vmatpush1.bf16.msra.mxu0 %v10760_v13  ;;  %2683 = vmatprep.subr.bf16.mxu1 %v10765_v14  ;;  %v9304_v13 = vcombine.high %v9110_v8, %v9114_v9  ;;  %v9301_v14 = vcombine.low %v9109_v37, %v9113_v7 }
 0x287   :  { %2803 = vmatprep.subr.bf16.mxu0 %v10768_v15  ;;  %v9303_v15 = vcombine.low %v9110_v8, %v9114_v9  ;;  %v9165_v9 = vld [vmem:[%s14312_s7 + $0x900] sm:$0xff] }
 0x289   :  { %2684 = vmatpush1.bf16.msra.mxu1 %v10763_v16  ;;  %v9117_v16 = vld [vmem:[%s14312_s7 + $0x780] sm:$0xff] }
 0x28a   :  { %2804 = vmatpush1.bf16.msra.mxu0 %v10766_v17  ;;  %2685 = vmatprep.subr.bf16.mxu1 %v10771_v22  ;;  %v9121_v17 = vld [vmem:[%s14312_s7 + $0x7a0] sm:$0xff]  ;;  %v9118_v22 = vld [vmem:[%s14312_s7 + $0x788] sm:$0xff] }
 0x28b   :  { %2805 = vmatprep.subr.bf16.mxu0 %v10774_v23  ;;  %v9310_v23 = vcombine.high %v9117_v16, %v9121_v17 }
 0x28d   :  { %2686 = vmatpush1.bf16.msra.mxu1 %v10769_v24  ;;  %v9122_v24 = vld [vmem:[%s14312_s7 + $0x7a8] sm:$0xff] }
 0x28e   :  { %2806 = vmatpush1.bf16.msra.mxu0 %v10772_v25  ;;  %4383 = vmatprep.subr.bf16.mxu1 %v9262_v30  ;;  %v9309_v25 = vcombine.low %v9117_v16, %v9121_v17  ;;  %v9311_v26 = vcombine.low %v9118_v22, %v9122_v24  ;;  %v9312_v27 = vcombine.high %v9118_v22, %v9122_v24  ;;  %v9126_v30 = vld [vmem:[%s14312_s7 + $0x7c8] sm:$0xff]  ;;  %v9173_v17 = vld [vmem:[%s14312_s7 + $0x940] sm:$0xff] }
 0x28f   :  { %4541 = vmatprep.subr.bf16.mxu0 %v9264_v35  ;;  %v9137_v35 = vld [vmem:[%s14312_s7 + $0x820] sm:$0xff]  ;;  %v9320_v39 = vcombine.high %v9126_v30, %v9130_v33 }
 0x290   :  { %2704 = vmatmul.mubr.bf16.vlgmr.msra.gmra.mrb[8].mxu1 %v11711_v20  ;;  %v9177_v22 = vld [vmem:[%s14312_s7 + $0x960] sm:$0xff] }
 0x291   :  { %2824 = vmatmul.mubr.bf16.vlgmr.msra.gmra.mrb[12].mxu0 %v11711_v20  ;;  %2713 = vmatprep.mubr.bf16.mxu1 %v11711_v20  ;;  %v9366_v24 = vcombine.high %v9173_v17, %v9177_v22 }
 0x292   :  { %2833 = vmatprep.mubr.bf16.mxu0 %v11711_v20  ;;  %4384 = vmatpush1.bf16.msra.mxu1 %v9261_v29  ;;  %v9129_v29 = vld [vmem:[%s14312_s7 + $0x7e0] sm:$0xff] }
 0x293   :  { %4542 = vmatpush1.bf16.msra.mxu0 %v9263_v34  ;;  %4385 = vmatprep.subr.bf16.mxu1 %v9270_v36  ;;  %v9317_v31 = vcombine.low %v9125_v28, %v9129_v29  ;;  %v9318_v32 = vcombine.high %v9125_v28, %v9129_v29  ;;  %v9133_v34 = vld [vmem:[%s14312_s7 + $0x800] sm:$0xff]  ;;  %v9319_v36 = vcombine.low %v9126_v30, %v9130_v33 }
 0x294   :  { %4543 = vmatprep.subr.bf16.mxu0 %v9272_v43  ;;  %v9326_v42 = vcombine.high %v9133_v34, %v9137_v35  ;;  %v9134_v43 = vld [vmem:[%s14312_s7 + $0x808] sm:$0xff]  ;;  %v9181_v29 = vld [vmem:[%s14312_s7 + $0x980] sm:$0xff] }
 0x295   :  { %v9328_v46 = vcombine.high %v9134_v43, %v9138_v44  ;;  %v9185_v30 = vld [vmem:[%s14312_s7 + $0x9a0] sm:$0xff] }
 0x296   :  { %4386 = vmatpush1.bf16.msra.mxu1 %v9269_v48  ;;  %v9142_v48 = vld [vmem:[%s14312_s7 + $0x848] sm:$0xff] }
 0x297   :  { %4544 = vmatpush1.bf16.msra.mxu0 %v9271_v49  ;;  %4387 = vmatprep.subr.bf16.mxu1 %v9278_v50  ;;  %v9146_v49 = vld [vmem:[%s14312_s7 + $0x868] sm:$0xff]  ;;  %v9325_v50 = vcombine.low %v9133_v34, %v9137_v35  ;;  %v9374_v34 = vcombine.high %v9181_v29, %v9185_v30 }
 0x298   :  { %2714 = vmatmul.mubr.bf16.gmra.mrb[12].mxu1 %v11711_v20  ;;  %4545 = vmatprep.subr.bf16.mxu0 %v9280_v51  ;;  %v9327_v51 = vcombine.low %v9134_v43, %v9138_v44  ;;  %v9336_v53 = vcombine.high %v9142_v48, %v9146_v49  ;;  %v9335_v55 = vcombine.low %v9142_v48, %v9146_v49  ;;  %v9186_v35 = vld [vmem:[%s14312_s7 + $0x9a8] sm:$0xff]  ;;  %v9189_v49 = vld [vmem:[%s14312_s7 + $0x9c0] sm:$0xff] }
 0x299   :  { %2834 = vmatmul.mubr.bf16.gmra.mrb[16].mxu0 %v11711_v20  ;;  %2723 = vmatprep.mubr.bf16.mxu1 %v11711_v20 }
 0x29a   :  { %2843 = vmatprep.mubr.bf16.mxu0 %v11711_v20  ;;  %v9101_v20 = vld [vmem:[%s14312_s7 + $0x700] sm:$0xff]  ;;  %4388 = vmatpush1.bf16.msra.mxu1 %v9277_v57 }
 0x29b   :  { %4546 = vmatpush1.bf16.msra.mxu0 %v9279_v58  ;;  %4389 = vmatprep.subr.bf16.mxu1 %v9286_v59  ;;  %v9294_v1 = vcombine.high %v9101_v20, %v9105_v60  ;;  %v9293_v10 = vcombine.low %v9101_v20, %v9105_v60  ;;  %v9153_v57 = vld [vmem:[%s14312_s7 + $0x8a0] sm:$0xff]  ;;  %v9150_v58 = vld [vmem:[%s14312_s7 + $0x888] sm:$0xff] }
 0x29c   :  { %4547 = vmatprep.subr.bf16.mxu0 %v9288_v41  ;;  %v9154_v41 = vld [vmem:[%s14312_s7 + $0x8a8] sm:$0xff] }
 0x29d   :  { %v9343_v60 = vcombine.low %v9150_v58, %v9154_v41  ;;  %v9344_v61 = vcombine.high %v9150_v58, %v9154_v41  ;;  %v12241_v58 = vld [vmem:[%s14312_s7 + $0xa20] sm:$0xff] }
 0x29e   :  { %4390 = vmatpush1.bf16.msra.mxu1 %v9285_v63  ;;  %v9161_v63 = vld [vmem:[%s14312_s7 + $0x8e0] sm:$0xff] }
 0x29f   :  { %4548 = vmatpush1.bf16.msra.mxu0 %v9287_v0  ;;  %4391 = vmatprep.subr.bf16.mxu1 %v9294_v1  ;;  %v9158_v0 = vld [vmem:[%s14312_s7 + $0x8c8] sm:$0xff]  ;;  %v9350_v1 = vcombine.high %v9157_v62, %v9161_v63  ;;  %v9349_v37 = vcombine.low %v9157_v62, %v9161_v63 }
 0x2a0   :  { %2724 = vmatmul.mubr.bf16.gmra.mrb[28].mxu1 %v1178_v56  ;;  %4549 = vmatprep.subr.bf16.mxu0 %v9296_v2  ;;  %v9162_v2 = vld [vmem:[%s14312_s7 + $0x8e8] sm:$0xff] }
 0x2a1   :  { %2844 = vmatmul.mubr.bf16.gmra.mrb[32].mxu0 %v1178_v56  ;;  %v9149_v56 = vld [vmem:[%s14312_s7 + $0x880] sm:$0xff]  ;;  %v9351_v7 = vcombine.low %v9158_v0, %v9162_v2  ;;  %v9352_v8 = vcombine.high %v9158_v0, %v9162_v2 }
 0x2a2   :  { %4392 = vmatpush1.bf16.msra.mxu1 %v9293_v10  ;;  %v9342_v59 = vcombine.high %v9149_v56, %v9153_v57  ;;  %v9341_v20 = vcombine.low %v9149_v56, %v9153_v57  ;;  %v9169_v10 = vld [vmem:[%s14312_s7 + $0x920] sm:$0xff] }
 0x2a3   :  { %4550 = vmatpush1.bf16.msra.mxu0 %v9295_v11  ;;  %4393 = vmatprep.subr.bf16.mxu1 %v9302_v12  ;;  %v9166_v11 = vld [vmem:[%s14312_s7 + $0x908] sm:$0xff]  ;;  %v9358_v12 = vcombine.high %v9165_v9, %v9169_v10  ;;  %v12236_v57 = vld [vmem:[%s14312_s7 + $0xa00] sm:$0xff] }
 0x2a4   :  { %4551 = vmatprep.subr.bf16.mxu0 %v9304_v13  ;;  %v9170_v13 = vld [vmem:[%s14312_s7 + $0x928] sm:$0xff]  ;;  %v9390_v41 = vcombine.high %v12236_v57, %v12241_v58 }
 0x2a5   :  { %v9360_v16 = vcombine.high %v9166_v11, %v9170_v13 }
 0x2a6   :  { %4394 = vmatpush1.bf16.msra.mxu1 %v9301_v14  ;;  %v9357_v14 = vcombine.low %v9165_v9, %v9169_v10 }
 0x2a7   :  { %4552 = vmatpush1.bf16.msra.mxu0 %v9303_v15  ;;  %4395 = vmatprep.subr.bf16.mxu1 %v9310_v23  ;;  %v9359_v15 = vcombine.low %v9166_v11, %v9170_v13  ;;  %v9174_v23 = vld [vmem:[%s14312_s7 + $0x948] sm:$0xff] }
 0x2a8   :  { %4553 = vmatprep.subr.bf16.mxu0 %v9312_v27 }
 0x2aa   :  { %4396 = vmatpush1.bf16.msra.mxu1 %v9309_v25  ;;  %v9178_v25 = vld [vmem:[%s14312_s7 + $0x968] sm:$0xff] }
 0x2ab   :  { %4554 = vmatpush1.bf16.msra.mxu0 %v9311_v26  ;;  %4397 = vmatprep.subr.bf16.mxu1 %v9318_v32  ;;  %v9365_v26 = vcombine.low %v9173_v17, %v9177_v22  ;;  %v9367_v27 = vcombine.low %v9174_v23, %v9178_v25  ;;  %v9368_v28 = vcombine.high %v9174_v23, %v9178_v25 }
 0x2ac   :  { %4555 = vmatprep.subr.bf16.mxu0 %v9320_v39 }
 0x2ae   :  { %4398 = vmatpush1.bf16.msra.mxu1 %v9317_v31  ;;  %v9182_v31 = vld [vmem:[%s14312_s7 + $0x988] sm:$0xff] }
 0x2af   :  { %4556 = vmatpush1.bf16.msra.mxu0 %v9319_v36  ;;  %4399 = vmatprep.subr.bf16.mxu1 %v9326_v42  ;;  %v9373_v42 = vcombine.low %v9181_v29, %v9185_v30  ;;  %v9375_v43 = vcombine.low %v9182_v31, %v9186_v35  ;;  %v9376_v44 = vcombine.high %v9182_v31, %v9186_v35 }
 0x2b0   :  { %4557 = vmatprep.subr.bf16.mxu0 %v9328_v46 }
 0x2b2   :  { %4400 = vmatpush1.bf16.msra.mxu1 %v9325_v50  ;;  %v9193_v50 = vld [vmem:[%s14312_s7 + $0x9e0] sm:$0xff] }
 0x2b3   :  { %4558 = vmatpush1.bf16.msra.mxu0 %v9327_v51  ;;  %4401 = vmatprep.subr.bf16.mxu1 %v9334_v52  ;;  %v9190_v51 = vld [vmem:[%s14312_s7 + $0x9c8] sm:$0xff]  ;;  %v9382_v52 = vcombine.high %v9189_v49, %v9193_v50 }
 0x2b4   :  { %4559 = vmatprep.subr.bf16.mxu0 %v9336_v53  ;;  %v9194_v53 = vld [vmem:[%s14312_s7 + $0x9e8] sm:$0xff] }
 0x2b5   :  { %v9384_v56 = vcombine.high %v9190_v51, %v9194_v53 }
 0x2b6   :  { %4402 = vmatpush1.bf16.msra.mxu1 %v9333_v54  ;;  %v9381_v54 = vcombine.low %v9189_v49, %v9193_v50 }
 0x2b7   :  { %4560 = vmatpush1.bf16.msra.mxu0 %v9335_v55  ;;  %4403 = vmatprep.subr.bf16.mxu1 %v9342_v59  ;;  %v9383_v55 = vcombine.low %v9190_v51, %v9194_v53  ;;  %v9389_v59 = vcombine.low %v12236_v57, %v12241_v58  ;;  %v9221_v57 = vld [vmem:[%s14312_s7 + $0xac0] sm:$0xff] }
 0x2b8   :  { %4561 = vmatprep.subr.bf16.mxu0 %v9344_v61 }
 0x2ba   :  { %4404 = vmatpush1.bf16.msra.mxu1 %v9341_v20  ;;  %v12250_v20 = vld [vmem:[%s14312_s7 + $0xa08] sm:$0xff] }
 0x2bb   :  { %4562 = vmatpush1.bf16.msra.mxu0 %v9343_v60  ;;  %4405 = vmatprep.subr.bf16.mxu1 %v9350_v1  ;;  %v12255_v60 = vld [vmem:[%s14312_s7 + $0xa28] sm:$0xff] }
 0x2bc   :  { %4563 = vmatprep.subr.bf16.mxu0 %v9352_v8  ;;  %v9391_v61 = vcombine.low %v12250_v20, %v12255_v60  ;;  %v9392_v62 = vcombine.high %v12250_v20, %v12255_v60  ;;  %v9225_v20 = vld [vmem:[%s14312_s7 + $0xae0] sm:$0xff]  ;;  %v9222_v60 = vld [vmem:[%s14312_s7 + $0xac8] sm:$0xff] }
 0x2be   :  { %4406 = vmatpush1.bf16.msra.mxu1 %v9349_v37 }
 0x2bf   :  { %4564 = vmatpush1.bf16.msra.mxu0 %v9351_v7  ;;  %4407 = vmatprep.subr.bf16.mxu1 %v9358_v12 }
 0x2c0   :  { %4565 = vmatprep.subr.bf16.mxu0 %v9360_v16 }
 0x2c2   :  { %4408 = vmatpush1.bf16.msra.mxu1 %v9357_v14 }
 0x2c3   :  { %4566 = vmatpush1.bf16.msra.mxu0 %v9359_v15  ;;  %4409 = vmatprep.subr.bf16.mxu1 %v9366_v24 }
 0x2c4   :  { %4567 = vmatprep.subr.bf16.mxu0 %v9368_v28 }
 0x2c6   :  { %4410 = vmatpush1.bf16.msra.mxu1 %v9365_v26  ;;  %v2852_v26 = vld [vmem:[%s14313_s6] sm:$0xf] }
 0x2c7   :  { %4568 = vmatpush1.bf16.msra.mxu0 %v9367_v27  ;;  %4411 = vmatprep.subr.bf16.mxu1 %v9374_v34  ;;  %v2857_v27 = vrot.slane %v2852_v26, %v11210_v19  ;;  %v12270_v28 = vrot.slane %v2852_v26, %v11605_v38  ;;  %v2861_v29 = vrot.slane %v2852_v26, %v11216_v21 }
 0x2c8   :  { %4569 = vmatprep.subr.bf16.mxu0 %v9376_v44  ;;  %v12274_v30 = vrot.slane %v2852_v26, %v11611_v40 }
 0x2ca   :  { %4412 = vmatpush1.bf16.msra.mxu1 %v9373_v42 }
 0x2cb   :  { %4570 = vmatpush1.bf16.msra.mxu0 %v9375_v43  ;;  %4413 = vmatprep.subr.bf16.mxu1 %v9382_v52 }
 0x2cc   :  { %4571 = vmatprep.subr.bf16.mxu0 %v9384_v56 }
 0x2ce   :  { %4414 = vmatpush1.bf16.msra.mxu1 %v9381_v54 }
 0x2cf   :  { %4572 = vmatpush1.bf16.msra.mxu0 %v9383_v55  ;;  %4462 = vmatprep.subr.bf16.mxu1 %v9390_v41 }
 0x2d0   :  { %4620 = vmatprep.subr.bf16.mxu0 %v9392_v62 }
 0x2f2   :  { %v1946_v32 = vpop.f32.mrb[16].mxu1  ;;  %v2064_v33 = vpop.f32.mrb[20].mxu0 }
 0x2f3   :  { %v1947_v36 = vpop.f32.mrb[17].mxu1  ;;  %v2066_v39 = vpop.f32.mrb[21].mxu0 }
 0x2f4   :  { %v1948_v45 = vpop.f32.mrb[18].mxu1  ;;  %v2068_v46 = vpop.f32.mrb[22].mxu0 }
 0x2f5   :  { %v1949_v47 = vpop.f32.mrb[19].mxu1  ;;  %v2069_v48 = vpop.f32.mrb[23].mxu0 }
 0x312   :  { %v2125_v63 = vpop.f32.mrb[24].mxu0  ;;  %v2005_v0 = vpop.f32.mrb[20].mxu1 }
 0x313   :  { %v2126_v1 = vadd.f32 %v2125_v63, %v2064_v33  ;;  %v2127_v2 = vpop.f32.mrb[25].mxu0  ;;  %v2006_v37 = vpop.f32.mrb[21].mxu1 }
 0x314   :  { %v2128_v7 = vadd.f32 %v2127_v2, %v2066_v39  ;;  %v2007_v8 = vpop.f32.mrb[22].mxu1  ;;  %v2129_v9 = vpop.f32.mrb[26].mxu0 }
 0x315   :  { %v2008_v10 = vpop.f32.mrb[23].mxu1  ;;  %v2130_v11 = vpop.f32.mrb[27].mxu0 }
 0x352   :  { %v2666_v12 = vpop.f32.mrb[24].mxu1 }
 0x353   :  { %v2784_v13 = vpop.f32.mrb[28].mxu0  ;;  %v2667_v14 = vpop.f32.mrb[25].mxu1 }
 0x354   :  { %v12261_v15 = vadd.f32 %v2784_v13, %v2126_v1  ;;  %v2786_v16 = vpop.f32.mrb[29].mxu0  ;;  %v2668_v17 = vpop.f32.mrb[26].mxu1 }
 0x355   :  { %v12263_v22 = vadd.f32 %v2786_v16, %v2128_v7  ;;  %v2788_v23 = vpop.f32.mrb[30].mxu0  ;;  %v2669_v24 = vpop.f32.mrb[27].mxu1 }
 0x356   :  { %v2789_v25 = vpop.f32.mrb[31].mxu0 }
 0x363   :  { %v2705_v31 = vpop.f32.mrb[8].mxu1 }
 0x364   :  { %v2874_v32 = vadd.f32 %v2857_v27, %v2705_v31  ;;  %v2825_v33 = vpop.f32.mrb[12].mxu0  ;;  %v2707_v34 = vpop.f32.mrb[9].mxu1 }
 0x365   :  { %v2876_v35 = vadd.f32 %v12270_v28, %v2825_v33  ;;  %v2875_v36 = vadd.f32 %v2861_v29, %v2707_v34  ;;  %v2827_v39 = vpop.f32.mrb[13].mxu0  ;;  %v2709_v42 = vpop.f32.mrb[10].mxu1 }
 0x366   :  { %v2877_v43 = vadd.f32 %v12274_v30, %v2827_v39  ;;  %v2878_v44 = vadd.f32 %v2857_v27, %v2709_v42  ;;  %v2829_v45 = vpop.f32.mrb[14].mxu0  ;;  %v2711_v46 = vpop.f32.mrb[11].mxu1  ;;  %v2892_v50 = vmax.f32 %v2874_v32, 0.0 }
 0x367   :  { %v2880_v47 = vadd.f32 %v12270_v28, %v2829_v45  ;;  %v2879_v48 = vadd.f32 %v2861_v29, %v2711_v46  ;;  %v2831_v49 = vpop.f32.mrb[15].mxu0  ;;  %v2894_v53 = vmax.f32 %v2876_v35, 0.0  ;;  %v2893_v54 = vmax.f32 %v2875_v36, 0.0 }
 0x368   :  { %v2896_v51 = vmax.f32 %v2878_v44, 0.0  ;;  %v2881_v52 = vadd.f32 %v12274_v30, %v2831_v49  ;;  %v2895_v41 = vmax.f32 %v2877_v43, 0.0 }
 0x369   :  { %v2898_v55 = vmax.f32 %v2880_v47, 0.0  ;;  %v2897_v56 = vmax.f32 %v2879_v48, 0.0 }
 0x36a   :  { %v2910_v62 = vpack.c.bf16 %v2896_v51, %v2892_v50  ;;  %v2899_v63 = vmax.f32 %v2881_v52, 0.0 }
 0x36b   :  { %v2912_v0 = vpack.c.bf16 %v2898_v55, %v2894_v53  ;;  %v2911_v1 = vpack.c.bf16 %v2897_v56, %v2893_v54  ;;  %v2715_v2 = vpop.f32.mrb[12].mxu1 }
 0x36c   :  { %v2922_v37 = vrot.slane %v2910_v62, 4  ;;  %2936 = vst [vmem:[#allocation3 + $0x18] sm:$0xf0] %v2910_v62  ;;  %v2913_v7 = vpack.c.bf16 %v2899_v63, %v2895_v41  ;;  %v2882_v8 = vadd.f32 %v2857_v27, %v2715_v2  ;;  %v2835_v9 = vpop.f32.mrb[16].mxu0  ;;  %v2717_v10 = vpop.f32.mrb[13].mxu1  ;;  %v9205_v63 = vld [vmem:[%s14312_s7 + $0xa40] sm:$0xff] }
 0x36d   :  { %v2930_v11 = vrot.slane %v2912_v0, 4  ;;  %v2923_v12 = vrot.slane %v2911_v1, 4  ;;  %2937 = vst [vmem:[#allocation3 + $0x20] sm:$0xf0] %v2911_v1  ;;  %v2884_v13 = vadd.f32 %v12270_v28, %v2835_v9  ;;  %v2883_v14 = vadd.f32 %v2861_v29, %v2717_v10  ;;  %v2837_v16 = vpop.f32.mrb[17].mxu0  ;;  %v2719_v17 = vpop.f32.mrb[14].mxu1 }
 0x36e   :  { %2926 = vst [vmem:[#allocation3] sm:$0xf0] %v2922_v37  ;;  %v2931_v23 = vrot.slane %v2913_v7, 4  ;;  %v2885_v24 = vadd.f32 %v12274_v30, %v2837_v16  ;;  %v2886_v25 = vadd.f32 %v2857_v27, %v2719_v17  ;;  %v2839_v26 = vpop.f32.mrb[18].mxu0  ;;  %v2721_v31 = vpop.f32.mrb[15].mxu1  ;;  %v2900_v35 = vmax.f32 %v2882_v8, 0.0 }
 0x36f   :  { %2934 = vst [vmem:[#allocation3 + $0x18] sm:$0xf] %v2930_v11  ;;  %2927 = vst [vmem:[#allocation3 + $0x8] sm:$0xf0] %v2923_v12  ;;  %v2888_v32 = vadd.f32 %v12270_v28, %v2839_v26  ;;  %v2887_v33 = vadd.f32 %v2861_v29, %v2721_v31  ;;  %v2841_v34 = vpop.f32.mrb[19].mxu0  ;;  %v2902_v42 = vmax.f32 %v2884_v13, 0.0 }
 0x370   :  { %2935 = vst [vmem:[#allocation3 + $0x20] sm:$0xf] %v2931_v23  ;;  %v2904_v36 = vmax.f32 %v2886_v25, 0.0  ;;  %v2889_v39 = vadd.f32 %v12274_v30, %v2841_v34  ;;  %v2901_v43 = vmax.f32 %v2883_v14, 0.0  ;;  %v2903_v46 = vmax.f32 %v2885_v24, 0.0  ;;  %v9209_v0 = vld [vmem:[%s14312_s7 + $0xa60] sm:$0xff] }
 0x371   :  { %v2906_v44 = vmax.f32 %v2888_v32, 0.0  ;;  %v2905_v45 = vmax.f32 %v2887_v33, 0.0 }
 0x372   :  { %v2914_v47 = vpack.c.bf16 %v2904_v36, %v2900_v35  ;;  %v2907_v27 = vmax.f32 %v2889_v39, 0.0  ;;  %v9217_v36 = vld [vmem:[%s14312_s7 + $0xaa0] sm:$0xff]  ;;  %v9214_v39 = vld [vmem:[%s14312_s7 + $0xa88] sm:$0xff] }
 0x373   :  { %v2916_v48 = vpack.c.bf16 %v2906_v44, %v2902_v42  ;;  %v2915_v49 = vpack.c.bf16 %v2905_v45, %v2901_v43  ;;  %v2725_v50 = vpop.f32.mrb[28].mxu1  ;;  %v9218_v42 = vld [vmem:[%s14312_s7 + $0xaa8] sm:$0xff]  ;;  %v9397_v43 = vcombine.low %v9205_v63, %v9209_v0 }
 0x374   :  { %v2942_v51 = vrot.slane %v2914_v47, 4  ;;  %2956 = vst [vmem:[#allocation3 + $0x48] sm:$0xf0] %v2914_v47  ;;  %v2917_v52 = vpack.c.bf16 %v2907_v27, %v2903_v46  ;;  %v2845_v29 = vpop.f32.mrb[32].mxu0  ;;  %v2726_v53 = vpop.f32.mrb[29].mxu1  ;;  %v9408_v58 = vcombine.high %v9214_v39, %v9218_v42 }
 0x375   :  { %2938 = vst [vmem:[#allocation3 + $0x30] sm:$0xf] %v2916_v48  ;;  %v2950_v54 = vrot.slane %v2916_v48, 4  ;;  %v2943_v55 = vrot.slane %v2915_v49, 4  ;;  %2957 = vst [vmem:[#allocation3 + $0x50] sm:$0xf0] %v2915_v49  ;;  %v2846_v56 = vadd.f32 %v2845_v29, %v12261_v15  ;;  %v9414_v53 = vcombine.high %v9221_v57, %v9225_v20 }
 0x376   :  { %v2847_v41 = vpop.f32.mrb[33].mxu0  ;;  %v2975_v62 = vld [vmem:[#allocation3] sm:$0xf0]  ;;  %2946 = vst [vmem:[#allocation3 + $0x30] sm:$0xf0] %v2942_v51  ;;  %v2951_v1 = vrot.slane %v2917_v52, 4 }
 0x377   :  { %2939 = vst [vmem:[#allocation3 + $0x38] sm:$0xf] %v2917_v52  ;;  %v2848_v2 = vadd.f32 %v2847_v41, %v12263_v22  ;;  %v2976_v37 = vld [vmem:[#allocation3 + $0x8] sm:$0xf0]  ;;  %v2963_v7 = vld [vmem:[#allocation3 + $0x18] sm:$0xff]  ;;  %v2849_v8 = vpop.f32.mrb[34].mxu0  ;;  %v2890_v9 = vadd.f32 %v12270_v28, %v2846_v56  ;;  %v9398_v28 = vcombine.high %v9205_v63, %v9209_v0  ;;  %v9407_v52 = vcombine.low %v9214_v39, %v9218_v42 }
 0x378   :  { %v9206_v15 = vld [vmem:[%s14312_s7 + $0xa48] sm:$0xff]  ;;  %2954 = vst [vmem:[#allocation3 + $0x48] sm:$0xf] %v2950_v54  ;;  %2947 = vst [vmem:[#allocation3 + $0x38] sm:$0xf0] %v2943_v55  ;;  %v3384_v11 = vrot.slane %v2976_v37, 4 }
 0x379   :  { %v2964_v10 = vld [vmem:[#allocation3 + $0x20] sm:$0xff]  ;;  %v3381_v12 = vrot.slane %v2975_v62, 4  ;;  %v3382_v13 = vrot.slane %v2963_v7, 4  ;;  %v2850_v14 = vpop.f32.mrb[35].mxu0  ;;  %2955 = vst [vmem:[#allocation3 + $0x50] sm:$0xf] %v2951_v1  ;;  %v2891_v16 = vadd.f32 %v12274_v30, %v2848_v2  ;;  %v9413_v2 = vcombine.low %v9221_v57, %v9225_v20 }
 0x37a   :  { %v9210_v22 = vld [vmem:[%s14312_s7 + $0xa68] sm:$0xff]  ;;  %v3385_v17 = vrot.slane %v2964_v10, 4  ;;  %v2727_v23 = vpop.f32.mrb[30].mxu1  ;;  %v2908_v24 = vmax.f32 %v2890_v9, 0.0  ;;  %v9213_v30 = vld [vmem:[%s14312_s7 + $0xa80] sm:$0xff]  ;;  %v9072_v20 = vld [vmem:[%s14312_s7 + $0x618] sm:$0xff] }
 0x37b   :  { %v2728_v25 = vpop.f32.mrb[31].mxu1  ;;  %v2909_v26 = vmax.f32 %v2891_v16, 0.0  ;;  %v9400_v32 = vcombine.high %v9206_v15, %v9210_v22  ;;  %v12306_v34 = vsel %vm1387_vm3, %v3381_v12, %v3382_v13  ;;  %v9399_v45 = vcombine.low %v9206_v15, %v9210_v22  ;;  %v9229_v55 = vld [vmem:[%s14312_s7 + $0xb00] sm:$0xff]  ;;  %v9230_v63 = vld [vmem:[%s14312_s7 + $0xb08] sm:$0xff] }
 0x37c   :  { %v12301_v31 = vsel %vm1387_vm3, %v3384_v11, %v3385_v17  ;;  %v2918_v33 = vpack.c.bf16 %v2908_v24, %v2908_v24  ;;  %v9406_v49 = vcombine.high %v9213_v30, %v9217_v36  ;;  %v9405_v51 = vcombine.low %v9213_v30, %v9217_v36  ;;  %v9233_v56 = vld [vmem:[%s14312_s7 + $0xb20] sm:$0xff]  ;;  %v9234_v0 = vld [vmem:[%s14312_s7 + $0xb28] sm:$0xff] }
 0x37d   :  { %4415 = vmatprep.mubr.bf16.mxu1 %v12301_v31  ;;  %4573 = vmatprep.mubr.bf16.mxu0 %v12301_v31  ;;  %v2919_v35 = vpack.c.bf16 %v2909_v26, %v2909_v26  ;;  %v2966_v44 = vld [vmem:[#allocation3 + $0x30] sm:$0xff]  ;;  %v9422_v8 = vcombine.high %v9229_v55, %v9233_v56  ;;  %v9424_v15 = vcombine.high %v9230_v63, %v9234_v0  ;;  %v9237_v9 = vld [vmem:[%s14312_s7 + $0xb40] sm:$0xff]  ;;  %v9238_v12 = vld [vmem:[%s14312_s7 + $0xb48] sm:$0xff] }
 0x37e   :  { %4416 = vmatmul.mubr.bf16.vlgmr.msra.gmra.mrb[32].mxu1 %v12306_v34  ;;  %4574 = vmatmul.mubr.bf16.vlgmr.msra.gmra.mrb[36].mxu0 %v12306_v34  ;;  %2958 = vst [vmem:[#allocation3 + $0x60] sm:$0xf] %v2918_v33  ;;  %v3390_v27 = vrot.slane %v2966_v44, 4  ;;  %v9241_v11 = vld [vmem:[%s14312_s7 + $0xb60] sm:$0xff]  ;;  %v9421_v14 = vcombine.low %v9229_v55, %v9233_v56  ;;  %v9423_v22 = vcombine.low %v9230_v63, %v9234_v0  ;;  %v9250_v33 = vld [vmem:[%s14312_s7 + $0xba8] sm:$0xff]  ;;  %v9079_v63 = vld [vmem:[%s14312_s7 + $0x650] sm:$0xff] }
 0x37f   :  { %4463 = vmatpush1.bf16.msra.mxu1 %v9389_v59  ;;  %4621 = vmatpush1.bf16.msra.mxu0 %v9391_v61  ;;  %2959 = vst [vmem:[#allocation3 + $0x68] sm:$0xf] %v2919_v35  ;;  %v2967_v46 = vld [vmem:[#allocation3 + $0x38] sm:$0xff]  ;;  %v9226_v61 = vld [vmem:[%s14312_s7 + $0xae8] sm:$0xff]  ;;  %v2969_v62 = vld [vmem:[#allocation3 + $0x48] sm:$0xff]  ;;  %v9429_v30 = vcombine.low %v9237_v9, %v9241_v11 }
 0x380   :  { %4464 = vmatprep.subr.bf16.mxu1 %v9398_v28  ;;  %4622 = vmatprep.subr.bf16.mxu0 %v9400_v32  ;;  %v3392_v47 = vrot.slane %v2967_v46, 4  ;;  %v2970_v48 = vld [vmem:[#allocation3 + $0x50] sm:$0xff]  ;;  %v12346_v29 = vsel %vm1387_vm3, %v3382_v13, %v3390_v27  ;;  %v9416_v54 = vcombine.high %v9222_v60, %v9226_v61  ;;  %v9415_v37 = vcombine.low %v9222_v60, %v9226_v61  ;;  %v9242_v13 = vld [vmem:[%s14312_s7 + $0xb68] sm:$0xff]  ;;  %v9245_v24 = vld [vmem:[%s14312_s7 + $0xb80] sm:$0xff] }
 0x381   :  { %v3398_v59 = vrot.slane %v2970_v48, 4  ;;  %v3396_v7 = vrot.slane %v2969_v62, 4  ;;  %v9432_v23 = vcombine.high %v9238_v12, %v9242_v13  ;;  %v9249_v25 = vld [vmem:[%s14312_s7 + $0xba0] sm:$0xff]  ;;  %v9246_v32 = vld [vmem:[%s14312_s7 + $0xb88] sm:$0xff]  ;;  %v9431_v35 = vcombine.low %v9238_v12, %v9242_v13  ;;  %v9076_v60 = vld [vmem:[%s14312_s7 + $0x638] sm:$0xff] }
 0x382   :  { %v12341_v50 = vsel %vm1387_vm3, %v3385_v17, %v3392_v47  ;;  %v9430_v17 = vcombine.high %v9237_v9, %v9241_v11  ;;  %v9438_v39 = vcombine.high %v9245_v24, %v9249_v25  ;;  %v9440_v42 = vcombine.high %v9246_v32, %v9250_v33  ;;  %v9257_v44 = vld [vmem:[%s14312_s7 + $0xbe0] sm:$0xff]  ;;  %v9258_v46 = vld [vmem:[%s14312_s7 + $0xbe8] sm:$0xff]  ;;  %v9083_v0 = vld [vmem:[%s14312_s7 + $0x670] sm:$0xff] }
 0x383   :  { %4465 = vmatpush1.bf16.msra.mxu1 %v9397_v43  ;;  %4623 = vmatpush1.bf16.msra.mxu0 %v9399_v45  ;;  %v12357_v41 = vsel %vm1387_vm3, %v3392_v47, %v3398_v59  ;;  %v12382_v16 = vsel %vm1387_vm3, %v3390_v27, %v3396_v7  ;;  %v9253_v43 = vld [vmem:[%s14312_s7 + $0xbc0] sm:$0xff]  ;;  %v9254_v45 = vld [vmem:[%s14312_s7 + $0xbc8] sm:$0xff]  ;;  %v9437_v47 = vcombine.low %v9245_v24, %v9249_v25  ;;  %v9087_v11 = vld [vmem:[%s14312_s7 + $0x690] sm:$0xff] }
 0x384   :  { %4425 = vmatprep.mubr.bf16.mxu1 %v12341_v50  ;;  %4583 = vmatprep.mubr.bf16.mxu0 %v12341_v50  ;;  %v9439_v27 = vcombine.low %v9246_v32, %v9250_v33  ;;  %v9448_v57 = vcombine.high %v9254_v45, %v9258_v46  ;;  %v9445_v61 = vcombine.low %v9253_v43, %v9257_v44  ;;  %v12440_v55 = vld [vmem:[#allocation2 + $0x28] sm:$0xff]  ;;  %v9091_v12 = vld [vmem:[%s14312_s7 + $0x6b0] sm:$0xff]  ;;  %v9088_v13 = vld [vmem:[%s14312_s7 + $0x698] sm:$0xff] }
 0x385   :  { %4466 = vmatprep.subr.bf16.mxu1 %v9406_v49  ;;  %4624 = vmatprep.subr.bf16.mxu0 %v9408_v58  ;;  %v2978_v28 = vld [vmem:[#allocation3 + $0x60] sm:$0xff]  ;;  %v9446_v49 = vcombine.high %v9253_v43, %v9257_v44  ;;  %v9071_v58 = vld [vmem:[%s14312_s7 + $0x610] sm:$0xff]  ;;  %v12445_v62 = vrot.slane %v12440_v55, 4  ;;  %v9096_v32 = vld [vmem:[%s14312_s7 + $0x6d8] sm:$0xff] }
 0x386   :  { %4426 = vmatmul.mubr.bf16.gmra.mrb[36].mxu1 %v12346_v29  ;;  %4584 = vmatmul.mubr.bf16.gmra.mrb[40].mxu0 %v12346_v29  ;;  %v2979_v1 = vld [vmem:[#allocation3 + $0x68] sm:$0xff]  ;;  %v12404_v36 = vrot.slane %v2978_v28, 4  ;;  %v9100_v33 = vld [vmem:[%s14312_s7 + $0x6f8] sm:$0xff] }
 0x387   :  { %4435 = vmatprep.mubr.bf16.mxu1 %v12357_v41  ;;  %4593 = vmatprep.mubr.bf16.mxu0 %v12357_v41  ;;  %v12370_v10 = vrot.slane %v2979_v1, 4  ;;  %v9080_v1 = vld [vmem:[%s14312_s7 + $0x658] sm:$0xff]  ;;  %v9095_v25 = vld [vmem:[%s14312_s7 + $0x6d0] sm:$0xff] }
 0x388   :  { %4467 = vmatpush1.bf16.msra.mxu1 %v9405_v51  ;;  %4625 = vmatpush1.bf16.msra.mxu0 %v9407_v52  ;;  %v12420_v48 = vsel %vm1387_vm3, %v3396_v7, %v12404_v36  ;;  %v9447_v51 = vcombine.low %v9254_v45, %v9258_v46  ;;  %v9267_v7 = vcombine.low %v9072_v20, %v9076_v60  ;;  %v9099_v28 = vld [vmem:[%s14312_s7 + $0x6f0] sm:$0xff]  ;;  %v9104_v45 = vld [vmem:[%s14312_s7 + $0x718] sm:$0xff] }
 0x389   :  { %4468 = vmatprep.subr.bf16.mxu1 %v9414_v53  ;;  %4626 = vmatprep.subr.bf16.mxu0 %v9416_v54  ;;  %v12394_v26 = vsel %vm1387_vm3, %v3398_v59, %v12370_v10  ;;  %v9075_v59 = vld [vmem:[%s14312_s7 + $0x630] sm:$0xff]  ;;  %v9268_v53 = vcombine.high %v9072_v20, %v9076_v60  ;;  %v2977_v54 = vld [vmem:[#allocation3 + $0x10] sm:$0xf0] }
 0x38a   :  { %v9266_v52 = vcombine.high %v9071_v58, %v9075_v59  ;;  %v3387_v56 = vrot.slane %v2977_v54, 4  ;;  %v9103_v43 = vld [vmem:[%s14312_s7 + $0x710] sm:$0xff]  ;;  %v9108_v46 = vld [vmem:[%s14312_s7 + $0x738] sm:$0xff] }
 0x38b   :  { %v9107_v44 = vld [vmem:[%s14312_s7 + $0x730] sm:$0xff]  ;;  %v9112_v20 = vld [vmem:[%s14312_s7 + $0x758] sm:$0xff] }
 0x38c   :  { %4469 = vmatpush1.bf16.msra.mxu1 %v9413_v2  ;;  %4627 = vmatpush1.bf16.msra.mxu0 %v9415_v37  ;;  %v9084_v2 = vld [vmem:[%s14312_s7 + $0x678] sm:$0xff]  ;;  %v9265_v37 = vcombine.low %v9071_v58, %v9075_v59  ;;  %v9111_v58 = vld [vmem:[%s14312_s7 + $0x750] sm:$0xff] }
 0x38d   :  { %4470 = vmatprep.subr.bf16.mxu1 %v9422_v8  ;;  %4628 = vmatprep.subr.bf16.mxu0 %v9424_v15  ;;  %v12461_v8 = vsel %vm1387_vm3, %v3387_v56, %v12445_v62  ;;  %v9274_v15 = vcombine.high %v9079_v63, %v9083_v0  ;;  %v9276_v9 = vcombine.high %v9080_v1, %v9084_v2  ;;  %v9115_v59 = vld [vmem:[%s14312_s7 + $0x770] sm:$0xff]  ;;  %v9116_v60 = vld [vmem:[%s14312_s7 + $0x778] sm:$0xff] }
 0x38e   :  { %4436 = vmatmul.mubr.bf16.gmra.mrb[40].mxu1 %v12382_v16  ;;  %4594 = vmatmul.mubr.bf16.gmra.mrb[44].mxu0 %v12382_v16  ;;  %v9119_v54 = vld [vmem:[%s14312_s7 + $0x790] sm:$0xff] }
 0x38f   :  { %4445 = vmatprep.mubr.bf16.mxu1 %v12394_v26  ;;  %4603 = vmatprep.mubr.bf16.mxu0 %v12394_v26  ;;  %v9123_v56 = vld [vmem:[%s14312_s7 + $0x7b0] sm:$0xff] }
 0x390   :  { %4471 = vmatpush1.bf16.msra.mxu1 %v9421_v14  ;;  %4629 = vmatpush1.bf16.msra.mxu0 %v9423_v22  ;;  %v9092_v14 = vld [vmem:[%s14312_s7 + $0x6b8] sm:$0xff]  ;;  %v9273_v22 = vcombine.low %v9079_v63, %v9083_v0 }
 0x391   :  { %4472 = vmatprep.subr.bf16.mxu1 %v9430_v17  ;;  %4630 = vmatprep.subr.bf16.mxu0 %v9432_v23  ;;  %v9275_v17 = vcombine.low %v9080_v1, %v9084_v2  ;;  %v9282_v23 = vcombine.high %v9087_v11, %v9091_v12  ;;  %v9284_v24 = vcombine.high %v9088_v13, %v9092_v14  ;;  %v9120_v63 = vld [vmem:[%s14312_s7 + $0x798] sm:$0xff] }
 0x392   :  { %v9124_v0 = vld [vmem:[%s14312_s7 + $0x7b8] sm:$0xff]  ;;  %v9305_v1 = vcombine.low %v9111_v58, %v9115_v59  ;;  %v9307_v2 = vcombine.low %v9112_v20, %v9116_v60 }
 0x394   :  { %4473 = vmatpush1.bf16.msra.mxu1 %v9429_v30  ;;  %4631 = vmatpush1.bf16.msra.mxu0 %v9431_v35  ;;  %v9281_v30 = vcombine.low %v9087_v11, %v9091_v12  ;;  %v9283_v35 = vcombine.low %v9088_v13, %v9092_v14  ;;  %v9128_v11 = vld [vmem:[%s14312_s7 + $0x7d8] sm:$0xff]  ;;  %v9313_v13 = vcombine.low %v9119_v54, %v9123_v56 }
 0x395   :  { %4474 = vmatprep.subr.bf16.mxu1 %v9438_v39  ;;  %4632 = vmatprep.subr.bf16.mxu0 %v9440_v42  ;;  %v9290_v39 = vcombine.high %v9095_v25, %v9099_v28  ;;  %v9292_v42 = vcombine.high %v9096_v32, %v9100_v33  ;;  %v9132_v12 = vld [vmem:[%s14312_s7 + $0x7f8] sm:$0xff]  ;;  %v9315_v14 = vcombine.low %v9120_v63, %v9124_v0 }
 0x396   :  { %4446 = vmatmul.mubr.bf16.gmra.mrb[44].mxu1 %v12420_v48  ;;  %4604 = vmatmul.mubr.bf16.gmra.mrb[48].mxu0 %v12420_v48 }
 0x397   :  { %4455 = vmatprep.mubr.bf16.mxu1 %v12370_v10  ;;  %4613 = vmatprep.mubr.bf16.mxu0 %v12370_v10 }
 0x398   :  { %4475 = vmatpush1.bf16.msra.mxu1 %v9437_v47  ;;  %4633 = vmatpush1.bf16.msra.mxu0 %v9439_v27  ;;  %v9289_v47 = vcombine.low %v9095_v25, %v9099_v28  ;;  %v9291_v27 = vcombine.low %v9096_v32, %v9100_v33  ;;  %v9136_v25 = vld [vmem:[%s14312_s7 + $0x818] sm:$0xff]  ;;  %v9323_v33 = vcombine.low %v9128_v11, %v9132_v12 }
 0x399   :  { %4476 = vmatprep.subr.bf16.mxu1 %v9446_v49  ;;  %4634 = vmatprep.subr.bf16.mxu0 %v9448_v57  ;;  %v9298_v49 = vcombine.high %v9103_v43, %v9107_v44  ;;  %v9300_v57 = vcombine.high %v9104_v45, %v9108_v46  ;;  %v9140_v28 = vld [vmem:[%s14312_s7 + $0x838] sm:$0xff] }
 0x39c   :  { %4477 = vmatpush1.bf16.msra.mxu1 %v9445_v61  ;;  %4635 = vmatpush1.bf16.msra.mxu0 %v9447_v51  ;;  %v9297_v61 = vcombine.low %v9103_v43, %v9107_v44  ;;  %v9299_v51 = vcombine.low %v9104_v45, %v9108_v46  ;;  %v9144_v43 = vld [vmem:[%s14312_s7 + $0x858] sm:$0xff]  ;;  %v9331_v46 = vcombine.low %v9136_v25, %v9140_v28 }
 0x39d   :  { %4699 = vmatprep.subr.bf16.mxu1 %v9266_v52  ;;  %4861 = vmatprep.subr.bf16.mxu0 %v9268_v53  ;;  %v9306_v52 = vcombine.high %v9111_v58, %v9115_v59  ;;  %v9308_v53 = vcombine.high %v9112_v20, %v9116_v60  ;;  %v9148_v44 = vld [vmem:[%s14312_s7 + $0x878] sm:$0xff] }
 0x39e   :  { %4456 = vmatmul.mubr.bf16.gmra.mrb[48].mxu1 %v12404_v36  ;;  %4614 = vmatmul.mubr.bf16.gmra.mrb[52].mxu0 %v12404_v36  ;;  %v9152_v58 = vld [vmem:[%s14312_s7 + $0x898] sm:$0xff]  ;;  %v9339_v60 = vcombine.low %v9144_v43, %v9148_v44 }
 0x39f   :  { %4494 = vmatprep.mubr.bf16.mxu1 %v12440_v55  ;;  %4652 = vmatprep.mubr.bf16.mxu0 %v12440_v55  ;;  %v9156_v59 = vld [vmem:[%s14312_s7 + $0x8b8] sm:$0xff] }
 0x3a6   :  { %4495 = vmatmul.mubr.bf16.vlgmr.msra.gmra.mrb[32].mxu1 %v12461_v8  ;;  %4653 = vmatmul.mubr.bf16.vlgmr.msra.gmra.mrb[36].mxu0 %v12461_v8 }
 0x3a7   :  { %4700 = vmatpush1.bf16.msra.mxu1 %v9265_v37  ;;  %4862 = vmatpush1.bf16.msra.mxu0 %v9267_v7  ;;  %v9314_v37 = vcombine.high %v9119_v54, %v9123_v56  ;;  %v9316_v7 = vcombine.high %v9120_v63, %v9124_v0  ;;  %v9160_v54 = vld [vmem:[%s14312_s7 + $0x8d8] sm:$0xff]  ;;  %v9347_v63 = vcombine.low %v9152_v58, %v9156_v59 }
 0x3a8   :  { %4701 = vmatprep.subr.bf16.mxu1 %v9274_v15  ;;  %4863 = vmatprep.subr.bf16.mxu0 %v9276_v9  ;;  %v9127_v15 = vld [vmem:[%s14312_s7 + $0x7d0] sm:$0xff] }
 0x3a9   :  { %4504 = vmatprep.mubr.bf16.mxu1 %v12440_v55  ;;  %4662 = vmatprep.mubr.bf16.mxu0 %v12440_v55  ;;  %v9131_v9 = vld [vmem:[%s14312_s7 + $0x7f0] sm:$0xff] }
 0x3aa   :  { %v9321_v32 = vcombine.low %v9127_v15, %v9131_v9 }
 0x3ab   :  { %4702 = vmatpush1.bf16.msra.mxu1 %v9273_v22  ;;  %4864 = vmatpush1.bf16.msra.mxu0 %v9275_v17  ;;  %v9322_v22 = vcombine.high %v9127_v15, %v9131_v9  ;;  %v9324_v17 = vcombine.high %v9128_v11, %v9132_v12  ;;  %v9172_v15 = vld [vmem:[%s14312_s7 + $0x938] sm:$0xff] }
 0x3ac   :  { %4703 = vmatprep.subr.bf16.mxu1 %v9282_v23  ;;  %4865 = vmatprep.subr.bf16.mxu0 %v9284_v24  ;;  %v9135_v23 = vld [vmem:[%s14312_s7 + $0x810] sm:$0xff] }
 0x3ad   :  { %v9139_v24 = vld [vmem:[%s14312_s7 + $0x830] sm:$0xff] }
 0x3ae   :  { %4505 = vmatmul.mubr.bf16.gmra.mrb[36].mxu1 %v12445_v62  ;;  %4663 = vmatmul.mubr.bf16.gmra.mrb[40].mxu0 %v12445_v62  ;;  %v9329_v45 = vcombine.low %v9135_v23, %v9139_v24 }
 0x3af   :  { %4704 = vmatpush1.bf16.msra.mxu1 %v9281_v30  ;;  %4866 = vmatpush1.bf16.msra.mxu0 %v9283_v35  ;;  %v9330_v30 = vcombine.high %v9135_v23, %v9139_v24  ;;  %v9332_v35 = vcombine.high %v9136_v25, %v9140_v28  ;;  %v9180_v23 = vld [vmem:[%s14312_s7 + $0x978] sm:$0xff] }
 0x3b0   :  { %4705 = vmatprep.subr.bf16.mxu1 %v9290_v39  ;;  %4867 = vmatprep.subr.bf16.mxu0 %v9292_v42  ;;  %v9143_v39 = vld [vmem:[%s14312_s7 + $0x850] sm:$0xff] }
 0x3b1   :  { %4514 = vmatprep.mubr.bf16.mxu1 %v12440_v55  ;;  %4672 = vmatprep.mubr.bf16.mxu0 %v12440_v55  ;;  %v9147_v42 = vld [vmem:[%s14312_s7 + $0x870] sm:$0xff] }
 0x3b2   :  { %v9337_v20 = vcombine.low %v9143_v39, %v9147_v42 }
 0x3b3   :  { %4706 = vmatpush1.bf16.msra.mxu1 %v9289_v47  ;;  %4868 = vmatpush1.bf16.msra.mxu0 %v9291_v27  ;;  %v9151_v47 = vld [vmem:[%s14312_s7 + $0x890] sm:$0xff]  ;;  %v9338_v27 = vcombine.high %v9143_v39, %v9147_v42  ;;  %v9188_v39 = vld [vmem:[%s14312_s7 + $0x9b8] sm:$0xff] }
 0x3b4   :  { %4707 = vmatprep.subr.bf16.mxu1 %v9298_v49  ;;  %4869 = vmatprep.subr.bf16.mxu0 %v9300_v57  ;;  %v9340_v49 = vcombine.high %v9144_v43, %v9148_v44  ;;  %v9155_v57 = vld [vmem:[%s14312_s7 + $0x8b0] sm:$0xff] }
 0x3b5   :  { %v9345_v56 = vcombine.low %v9151_v47, %v9155_v57 }
 0x3b6   :  { %4515 = vmatmul.mubr.bf16.gmra.mrb[40].mxu1 %v12445_v62  ;;  %4673 = vmatmul.mubr.bf16.gmra.mrb[44].mxu0 %v12445_v62 }
 0x3b7   :  { %4708 = vmatpush1.bf16.msra.mxu1 %v9297_v61  ;;  %4870 = vmatpush1.bf16.msra.mxu0 %v9299_v51  ;;  %v9346_v61 = vcombine.high %v9151_v47, %v9155_v57  ;;  %v9348_v51 = vcombine.high %v9152_v58, %v9156_v59  ;;  %v9195_v47 = vld [vmem:[%s14312_s7 + $0x9f0] sm:$0xff] }
 0x3b8   :  { %4709 = vmatprep.subr.bf16.mxu1 %v9306_v52  ;;  %4871 = vmatprep.subr.bf16.mxu0 %v9308_v53  ;;  %v9159_v52 = vld [vmem:[%s14312_s7 + $0x8d0] sm:$0xff] }
 0x3b9   :  { %4524 = vmatprep.mubr.bf16.mxu1 %v12440_v55  ;;  %4682 = vmatprep.mubr.bf16.mxu0 %v12440_v55  ;;  %v9163_v53 = vld [vmem:[%s14312_s7 + $0x8f0] sm:$0xff] }
 0x3ba   :  { %v9354_v0 = vcombine.high %v9159_v52, %v9163_v53  ;;  %v9353_v9 = vcombine.low %v9159_v52, %v9163_v53  ;;  %v9204_v52 = vld [vmem:[%s14312_s7 + $0xa38] sm:$0xff] }
 0x3bb   :  { %4710 = vmatpush1.bf16.msra.mxu1 %v9305_v1  ;;  %4872 = vmatpush1.bf16.msra.mxu0 %v9307_v2  ;;  %v9167_v2 = vld [vmem:[%s14312_s7 + $0x910] sm:$0xff] }
 0x3bc   :  { %4711 = vmatprep.subr.bf16.mxu1 %v9314_v37  ;;  %4873 = vmatprep.subr.bf16.mxu0 %v9316_v7  ;;  %v9171_v37 = vld [vmem:[%s14312_s7 + $0x930] sm:$0xff]  ;;  %v9168_v7 = vld [vmem:[%s14312_s7 + $0x918] sm:$0xff] }
 0x3bd   :  { %v9362_v12 = vcombine.high %v9167_v2, %v9171_v37  ;;  %v9361_v24 = vcombine.low %v9167_v2, %v9171_v37  ;;  %v9363_v25 = vcombine.low %v9168_v7, %v9172_v15  ;;  %v9208_v2 = vld [vmem:[%s14312_s7 + $0xa58] sm:$0xff] }
 0x3be   :  { %4525 = vmatmul.mubr.bf16.gmra.mrb[44].mxu1 %v12445_v62  ;;  %4683 = vmatmul.mubr.bf16.gmra.mrb[48].mxu0 %v12445_v62  ;;  %v9212_v37 = vld [vmem:[%s14312_s7 + $0xa78] sm:$0xff] }
 0x3bf   :  { %4712 = vmatpush1.bf16.msra.mxu1 %v9313_v13  ;;  %4874 = vmatpush1.bf16.msra.mxu0 %v9315_v14  ;;  %v9364_v13 = vcombine.high %v9168_v7, %v9172_v15  ;;  %v9175_v14 = vld [vmem:[%s14312_s7 + $0x950] sm:$0xff] }
 0x3c0   :  { %4713 = vmatprep.subr.bf16.mxu1 %v9322_v22  ;;  %4875 = vmatprep.subr.bf16.mxu0 %v9324_v17  ;;  %v9179_v22 = vld [vmem:[%s14312_s7 + $0x970] sm:$0xff]  ;;  %v9176_v17 = vld [vmem:[%s14312_s7 + $0x958] sm:$0xff] }
 0x3c1   :  { %4534 = vmatprep.mubr.bf16.mxu1 %v12440_v55  ;;  %4692 = vmatprep.mubr.bf16.mxu0 %v12440_v55  ;;  %v9370_v28 = vcombine.high %v9175_v14, %v9179_v22  ;;  %v9369_v42 = vcombine.low %v9175_v14, %v9179_v22  ;;  %v9371_v43 = vcombine.low %v9176_v17, %v9180_v23 }
 0x3c2   :  { %v9403_v22 = vcombine.low %v9208_v2, %v9212_v37 }
 0x3c3   :  { %4714 = vmatpush1.bf16.msra.mxu1 %v9321_v32  ;;  %4876 = vmatpush1.bf16.msra.mxu0 %v9323_v33  ;;  %v9372_v32 = vcombine.high %v9176_v17, %v9180_v23  ;;  %v9183_v33 = vld [vmem:[%s14312_s7 + $0x990] sm:$0xff]  ;;  %v9216_v17 = vld [vmem:[%s14312_s7 + $0xa98] sm:$0xff] }
 0x3c4   :  { %4715 = vmatprep.subr.bf16.mxu1 %v9330_v30  ;;  %4877 = vmatprep.subr.bf16.mxu0 %v9332_v35  ;;  %v9187_v30 = vld [vmem:[%s14312_s7 + $0x9b0] sm:$0xff]  ;;  %v9184_v35 = vld [vmem:[%s14312_s7 + $0x998] sm:$0xff] }
 0x3c5   :  { %v9378_v44 = vcombine.high %v9183_v33, %v9187_v30  ;;  %v9377_v57 = vcombine.low %v9183_v33, %v9187_v30  ;;  %v9379_v58 = vcombine.low %v9184_v35, %v9188_v39  ;;  %v9220_v23 = vld [vmem:[%s14312_s7 + $0xab8] sm:$0xff] }
 0x3c6   :  { %4535 = vmatmul.mubr.bf16.gmra.mrb[52].mxu1 %v12445_v62  ;;  %4693 = vmatmul.mubr.bf16.gmra.mrb[56].mxu0 %v12445_v62  ;;  %v9411_v30 = vcombine.low %v9216_v17, %v9220_v23 }
 0x3c7   :  { %4716 = vmatpush1.bf16.msra.mxu1 %v9329_v45  ;;  %4878 = vmatpush1.bf16.msra.mxu0 %v9331_v46  ;;  %v9380_v45 = vcombine.high %v9184_v35, %v9188_v39  ;;  %v9191_v46 = vld [vmem:[%s14312_s7 + $0x9d0] sm:$0xff] }
 0x3c8   :  { %4731 = vmatprep.mubr.bf16.mxu1 %v12301_v31  ;;  %4893 = vmatprep.mubr.bf16.mxu0 %v12301_v31  ;;  %v9164_v31 = vld [vmem:[%s14312_s7 + $0x8f8] sm:$0xff]  ;;  %v9386_v59 = vcombine.high %v9191_v46, %v9195_v47  ;;  %v9385_v53 = vcombine.low %v9191_v46, %v9195_v47  ;;  %v9231_v39 = vld [vmem:[%s14312_s7 + $0xb10] sm:$0xff] }
 0x3c9   :  { %4717 = vmatprep.subr.bf16.mxu1 %v9338_v27  ;;  %4879 = vmatprep.subr.bf16.mxu0 %v9340_v49  ;;  %v9356_v1 = vcombine.high %v9160_v54, %v9164_v31  ;;  %v9355_v11 = vcombine.low %v9160_v54, %v9164_v31  ;;  %v9192_v27 = vld [vmem:[%s14312_s7 + $0x9d8] sm:$0xff]  ;;  %v9243_v47 = vld [vmem:[%s14312_s7 + $0xb70] sm:$0xff] }
 0x3ca   :  { %v9196_v49 = vld [vmem:[%s14312_s7 + $0x9f8] sm:$0xff] }
 0x3cb   :  { %4718 = vmatpush1.bf16.msra.mxu1 %v9337_v20  ;;  %4880 = vmatpush1.bf16.msra.mxu0 %v9339_v60  ;;  %v9388_v20 = vcombine.high %v9192_v27, %v9196_v49  ;;  %v9199_v60 = vld [vmem:[%s14312_s7 + $0xa10] sm:$0xff]  ;;  %v9387_v54 = vcombine.low %v9192_v27, %v9196_v49  ;;  %v9236_v46 = vld [vmem:[%s14312_s7 + $0xb38] sm:$0xff] }
 0x3cc   :  { %4719 = vmatprep.subr.bf16.mxu1 %v9346_v61  ;;  %4881 = vmatprep.subr.bf16.mxu0 %v9348_v51  ;;  %v9203_v61 = vld [vmem:[%s14312_s7 + $0xa30] sm:$0xff]  ;;  %v9200_v51 = vld [vmem:[%s14312_s7 + $0xa18] sm:$0xff] }
 0x3cd   :  { %v9394_v31 = vcombine.high %v9199_v60, %v9203_v61  ;;  %v9395_v15 = vcombine.low %v9200_v51, %v9204_v52  ;;  %v9240_v27 = vld [vmem:[%s14312_s7 + $0xb58] sm:$0xff] }
 0x3ce   :  { %v9244_v49 = vld [vmem:[%s14312_s7 + $0xb78] sm:$0xff] }
 0x3cf   :  { %4720 = vmatpush1.bf16.msra.mxu1 %v9345_v56  ;;  %4882 = vmatpush1.bf16.msra.mxu0 %v9347_v63  ;;  %v9396_v56 = vcombine.high %v9200_v51, %v9204_v52  ;;  %v9207_v63 = vld [vmem:[%s14312_s7 + $0xa50] sm:$0xff] }
 0x3d0   :  { %4721 = vmatprep.subr.bf16.mxu1 %v9354_v0  ;;  %4883 = vmatprep.subr.bf16.mxu0 %v9356_v1  ;;  %v9211_v0 = vld [vmem:[%s14312_s7 + $0xa70] sm:$0xff]  ;;  %v9393_v1 = vcombine.low %v9199_v60, %v9203_v61  ;;  %v9436_v60 = vcombine.high %v9240_v27, %v9244_v49 }
 0x3d1   :  { %v9402_v7 = vcombine.high %v9207_v63, %v9211_v0  ;;  %v9247_v61 = vld [vmem:[%s14312_s7 + $0xb90] sm:$0xff] }
 0x3d2   :  { %v9251_v51 = vld [vmem:[%s14312_s7 + $0xbb0] sm:$0xff] }
 0x3d3   :  { %4722 = vmatpush1.bf16.msra.mxu1 %v9353_v9  ;;  %4884 = vmatpush1.bf16.msra.mxu0 %v9355_v11  ;;  %v9215_v9 = vld [vmem:[%s14312_s7 + $0xa90] sm:$0xff] }
 0x3d4   :  { %4723 = vmatprep.subr.bf16.mxu1 %v9362_v12  ;;  %4885 = vmatprep.subr.bf16.mxu0 %v9364_v13  ;;  %v9219_v11 = vld [vmem:[%s14312_s7 + $0xab0] sm:$0xff]  ;;  %v9404_v12 = vcombine.high %v9208_v2, %v9212_v37  ;;  %v9401_v13 = vcombine.low %v9207_v63, %v9211_v0  ;;  %v9256_v63 = vld [vmem:[%s14312_s7 + $0xbd8] sm:$0xff] }
 0x3d5   :  { %v9410_v14 = vcombine.high %v9215_v9, %v9219_v11  ;;  %v9260_v0 = vld [vmem:[%s14312_s7 + $0xbf8] sm:$0xff] }
 0x3d7   :  { %4724 = vmatpush1.bf16.msra.mxu1 %v9361_v24  ;;  %4886 = vmatpush1.bf16.msra.mxu0 %v9363_v25  ;;  %v9224_v24 = vld [vmem:[%s14312_s7 + $0xad8] sm:$0xff] }
 0x3d8   :  { %4725 = vmatprep.subr.bf16.mxu1 %v9370_v28  ;;  %4887 = vmatprep.subr.bf16.mxu0 %v9372_v32  ;;  %v9228_v25 = vld [vmem:[%s14312_s7 + $0xaf8] sm:$0xff]  ;;  %v9409_v28 = vcombine.low %v9215_v9, %v9219_v11  ;;  %v9412_v32 = vcombine.high %v9216_v17, %v9220_v23  ;;  %v2981_v9 = vld [vmem:[%s14312_s7] sm:$0xff] }
 0x3d9   :  { %v9420_v35 = vcombine.high %v9224_v24, %v9228_v25  ;;  %v2985_v11 = vld [vmem:[%s14312_s7 + $0x20] sm:$0xff] }
 0x3da   :  { %v2993_v23 = vld [vmem:[%s14312_s7 + $0x60] sm:$0xff] }
 0x3db   :  { %4726 = vmatpush1.bf16.msra.mxu1 %v9369_v42  ;;  %4888 = vmatpush1.bf16.msra.mxu0 %v9371_v43  ;;  %v9235_v42 = vld [vmem:[%s14312_s7 + $0xb30] sm:$0xff] }
 0x3dc   :  { %4727 = vmatprep.subr.bf16.mxu1 %v9378_v44  ;;  %4889 = vmatprep.subr.bf16.mxu0 %v9380_v45  ;;  %v9419_v44 = vcombine.low %v9224_v24, %v9228_v25  ;;  %v9232_v45 = vld [vmem:[%s14312_s7 + $0xb18] sm:$0xff] }
 0x3df   :  { %4728 = vmatpush1.bf16.msra.mxu1 %v9377_v57  ;;  %4890 = vmatpush1.bf16.msra.mxu0 %v9379_v58  ;;  %v9425_v57 = vcombine.low %v9231_v39, %v9235_v42  ;;  %v9428_v58 = vcombine.high %v9232_v45, %v9236_v46 }
 0x3e0   :  { %4729 = vmatprep.subr.bf16.mxu1 %v9386_v59  ;;  %4891 = vmatprep.subr.bf16.mxu0 %v9388_v20  ;;  %v9427_v59 = vcombine.low %v9232_v45, %v9236_v46  ;;  %v3006_v45 = vld [vmem:[%s14312_s7 + $0xc8] sm:$0xff] }
 0x3e1   :  { %v3010_v46 = vld [vmem:[%s14312_s7 + $0xe8] sm:$0xff] }
 0x3e3   :  { %4730 = vmatpush1.bf16.msra.mxu1 %v9385_v53  ;;  %4892 = vmatpush1.bf16.msra.mxu0 %v9387_v54  ;;  %v9435_v53 = vcombine.low %v9240_v27, %v9244_v49  ;;  %v9248_v54 = vld [vmem:[%s14312_s7 + $0xb98] sm:$0xff]  ;;  %v9480_v49 = vcombine.high %v3006_v45, %v3010_v46 }
 0x3e4   :  { %4780 = vmatprep.subr.bf16.mxu1 %v9394_v31  ;;  %4942 = vmatprep.subr.bf16.mxu0 %v9396_v56  ;;  %v9252_v31 = vld [vmem:[%s14312_s7 + $0xbb8] sm:$0xff]  ;;  %v9259_v56 = vld [vmem:[%s14312_s7 + $0xbf0] sm:$0xff] }
 0x3e5   :  { %v9444_v2 = vcombine.high %v9248_v54, %v9252_v31  ;;  %v9443_v37 = vcombine.low %v9248_v54, %v9252_v31  ;;  %v3022_v54 = vld [vmem:[%s14312_s7 + $0x148] sm:$0xff] }
 0x3e6   :  { %4732 = vmatmul.mubr.bf16.vlgmr.msra.gmra.mrb[56].mxu1 %v12306_v34  ;;  %4894 = vmatmul.mubr.bf16.vlgmr.msra.gmra.mrb[60].mxu0 %v12306_v34  ;;  %v9223_v34 = vld [vmem:[%s14312_s7 + $0xad0] sm:$0xff]  ;;  %v3026_v31 = vld [vmem:[%s14312_s7 + $0x168] sm:$0xff] }
 0x3e7   :  { %4741 = vmatprep.mubr.bf16.mxu1 %v12341_v50  ;;  %4781 = vmatpush1.bf16.msra.mxu1 %v9393_v1  ;;  %v9441_v1 = vcombine.low %v9247_v61, %v9251_v51 }
 0x3e8   :  { %4903 = vmatprep.mubr.bf16.mxu0 %v12341_v50  ;;  %4782 = vmatprep.subr.bf16.mxu1 %v9402_v7  ;;  %v9227_v50 = vld [vmem:[%s14312_s7 + $0xaf0] sm:$0xff] }
 0x3e9   :  { %4943 = vmatpush1.bf16.msra.mxu0 %v9395_v15  ;;  %v9418_v33 = vcombine.high %v9223_v34, %v9227_v50  ;;  %v9417_v43 = vcombine.low %v9223_v34, %v9227_v50  ;;  %v9452_v15 = vcombine.high %v9256_v63, %v9260_v0  ;;  %v2990_v34 = vld [vmem:[%s14312_s7 + $0x48] sm:$0xff]  ;;  %v9453_v50 = vcombine.low %v2981_v9, %v2985_v11 }
 0x3ea   :  { %4944 = vmatprep.subr.bf16.mxu0 %v9404_v12 }
 0x3eb   :  { %4783 = vmatpush1.bf16.msra.mxu1 %v9401_v13  ;;  %v9451_v13 = vcombine.low %v9256_v63, %v9260_v0  ;;  %v9496_v0 = vcombine.high %v3022_v54, %v3026_v31 }
 0x3ec   :  { %4784 = vmatprep.subr.bf16.mxu1 %v9410_v14  ;;  %v2982_v14 = vld [vmem:[%s14312_s7 + $0x8] sm:$0xff] }
 0x3ed   :  { %4945 = vmatpush1.bf16.msra.mxu0 %v9403_v22  ;;  %v2986_v22 = vld [vmem:[%s14312_s7 + $0x28] sm:$0xff] }
 0x3ee   :  { %4742 = vmatmul.mubr.bf16.gmra.mrb[60].mxu1 %v12346_v29  ;;  %4904 = vmatmul.mubr.bf16.gmra.mrb[64].mxu0 %v12346_v29  ;;  %v9426_v29 = vcombine.high %v9231_v39, %v9235_v42  ;;  %v9456_v17 = vcombine.high %v2982_v14, %v2986_v22  ;;  %v9455_v24 = vcombine.low %v2982_v14, %v2986_v22  ;;  %v3038_v14 = vld [vmem:[%s14312_s7 + $0x1c8] sm:$0xff] }
 0x3ef   :  { %4751 = vmatprep.mubr.bf16.mxu1 %v12357_v41  ;;  %4913 = vmatprep.mubr.bf16.mxu0 %v12357_v41  ;;  %v9239_v41 = vld [vmem:[%s14312_s7 + $0xb50] sm:$0xff]  ;;  %v3042_v22 = vld [vmem:[%s14312_s7 + $0x1e8] sm:$0xff] }
 0x3f0   :  { %4785 = vmatpush1.bf16.msra.mxu1 %v9409_v28  ;;  %4946 = vmatprep.subr.bf16.mxu0 %v9412_v32  ;;  %v9434_v20 = vcombine.high %v9239_v41, %v9243_v47  ;;  %v9433_v52 = vcombine.low %v9239_v41, %v9243_v47  ;;  %v2997_v32 = vld [vmem:[%s14312_s7 + $0x80] sm:$0xff] }
 0x3f1   :  { %4786 = vmatprep.subr.bf16.mxu1 %v9418_v33  ;;  %4947 = vmatpush1.bf16.msra.mxu0 %v9411_v30  ;;  %v3001_v33 = vld [vmem:[%s14312_s7 + $0xa0] sm:$0xff]  ;;  %v2998_v30 = vld [vmem:[%s14312_s7 + $0x88] sm:$0xff] }
 0x3f2   :  { %4948 = vmatprep.subr.bf16.mxu0 %v9420_v35  ;;  %v3002_v35 = vld [vmem:[%s14312_s7 + $0xa8] sm:$0xff]  ;;  %v9469_v41 = vcombine.low %v2997_v32, %v3001_v33 }
 0x3f3   :  { %v9471_v47 = vcombine.low %v2998_v30, %v3002_v35 }
 0x3f4   :  { %4787 = vmatpush1.bf16.msra.mxu1 %v9417_v43  ;;  %v9470_v43 = vcombine.high %v2997_v32, %v3001_v33  ;;  %v9511_v32 = vcombine.low %v3038_v14, %v3042_v22 }
 0x3f5   :  { %4788 = vmatprep.subr.bf16.mxu1 %v9426_v29  ;;  %4949 = vmatpush1.bf16.msra.mxu0 %v9419_v44  ;;  %v9472_v44 = vcombine.high %v2998_v30, %v3002_v35  ;;  %v3005_v29 = vld [vmem:[%s14312_s7 + $0xc0] sm:$0xff] }
 0x3f6   :  { %4752 = vmatmul.mubr.bf16.gmra.mrb[64].mxu1 %v12382_v16  ;;  %4914 = vmatmul.mubr.bf16.gmra.mrb[68].mxu0 %v12382_v16  ;;  %v9442_v16 = vcombine.high %v9247_v61, %v9251_v51  ;;  %v9479_v61 = vcombine.low %v3006_v45, %v3010_v46  ;;  %v3053_v35 = vld [vmem:[%s14312_s7 + $0x240] sm:$0xff] }
 0x3f7   :  { %4761 = vmatprep.mubr.bf16.mxu1 %v12394_v26  ;;  %4923 = vmatprep.mubr.bf16.mxu0 %v12394_v26  ;;  %v9255_v26 = vld [vmem:[%s14312_s7 + $0xbd0] sm:$0xff]  ;;  %v3065_v46 = vld [vmem:[%s14312_s7 + $0x2a0] sm:$0xff] }
 0x3f8   :  { %4789 = vmatpush1.bf16.msra.mxu1 %v9425_v57  ;;  %4950 = vmatprep.subr.bf16.mxu0 %v9428_v58  ;;  %v9450_v7 = vcombine.high %v9255_v26, %v9259_v56  ;;  %v9449_v12 = vcombine.low %v9255_v26, %v9259_v56  ;;  %v3013_v57 = vld [vmem:[%s14312_s7 + $0x100] sm:$0xff] }
 0x3f9   :  { %4951 = vmatpush1.bf16.msra.mxu0 %v9427_v59  ;;  %4790 = vmatprep.subr.bf16.mxu1 %v9434_v20  ;;  %v3017_v58 = vld [vmem:[%s14312_s7 + $0x120] sm:$0xff]  ;;  %v3014_v59 = vld [vmem:[%s14312_s7 + $0x108] sm:$0xff] }
 0x3fa   :  { %4952 = vmatprep.subr.bf16.mxu0 %v9436_v60  ;;  %v3018_v20 = vld [vmem:[%s14312_s7 + $0x128] sm:$0xff]  ;;  %v9486_v51 = vcombine.high %v3013_v57, %v3017_v58  ;;  %v9485_v26 = vcombine.low %v3013_v57, %v3017_v58 }
 0x3fb   :  { %v9487_v56 = vcombine.low %v3014_v59, %v3018_v20 }
 0x3fc   :  { %4791 = vmatpush1.bf16.msra.mxu1 %v9433_v52  ;;  %v9488_v52 = vcombine.high %v3014_v59, %v3018_v20  ;;  %v3069_v20 = vld [vmem:[%s14312_s7 + $0x2c0] sm:$0xff] }
 0x3fd   :  { %4953 = vmatpush1.bf16.msra.mxu0 %v9435_v53  ;;  %4792 = vmatprep.subr.bf16.mxu1 %v9442_v16  ;;  %v3021_v53 = vld [vmem:[%s14312_s7 + $0x140] sm:$0xff] }
 0x3fe   :  { %4762 = vmatmul.mubr.bf16.gmra.mrb[68].mxu1 %v12420_v48  ;;  %4924 = vmatmul.mubr.bf16.gmra.mrb[72].mxu0 %v12420_v48  ;;  %v9454_v48 = vcombine.high %v2981_v9, %v2985_v11  ;;  %v3025_v16 = vld [vmem:[%s14312_s7 + $0x160] sm:$0xff]  ;;  %v9495_v9 = vcombine.low %v3022_v54, %v3026_v31 }
 0x3ff   :  { %4771 = vmatprep.mubr.bf16.mxu1 %v12370_v10  ;;  %4933 = vmatprep.mubr.bf16.mxu0 %v12370_v10  ;;  %v2989_v10 = vld [vmem:[%s14312_s7 + $0x40] sm:$0xff]  ;;  %v9494_v63 = vcombine.high %v3021_v53, %v3025_v16 }
 0x400   :  { %4793 = vmatpush1.bf16.msra.mxu1 %v9441_v1  ;;  %4954 = vmatprep.subr.bf16.mxu0 %v9444_v2  ;;  %v9462_v25 = vcombine.high %v2989_v10, %v2993_v23  ;;  %v9461_v39 = vcombine.low %v2989_v10, %v2993_v23  ;;  %v3029_v1 = vld [vmem:[%s14312_s7 + $0x180] sm:$0xff] }
 0x401   :  { %4955 = vmatpush1.bf16.msra.mxu0 %v9443_v37  ;;  %4794 = vmatprep.subr.bf16.mxu1 %v9450_v7  ;;  %v3033_v2 = vld [vmem:[%s14312_s7 + $0x1a0] sm:$0xff]  ;;  %v3030_v37 = vld [vmem:[%s14312_s7 + $0x188] sm:$0xff] }
 0x402   :  { %4956 = vmatprep.subr.bf16.mxu0 %v9452_v15  ;;  %v3034_v7 = vld [vmem:[%s14312_s7 + $0x1a8] sm:$0xff]  ;;  %v9493_v15 = vcombine.low %v3021_v53, %v3025_v16  ;;  %v9502_v11 = vcombine.high %v3029_v1, %v3033_v2  ;;  %v3077_v54 = vld [vmem:[%s14312_s7 + $0x300] sm:$0xff] }
 0x403   :  { %v9503_v10 = vcombine.low %v3030_v37, %v3034_v7  ;;  %v3081_v31 = vld [vmem:[%s14312_s7 + $0x320] sm:$0xff] }
 0x404   :  { %4795 = vmatpush1.bf16.msra.mxu1 %v9449_v12  ;;  %v9504_v12 = vcombine.high %v3030_v37, %v3034_v7  ;;  %v3085_v37 = vld [vmem:[%s14312_s7 + $0x340] sm:$0xff] }
 0x405   :  { %4957 = vmatpush1.bf16.msra.mxu0 %v9451_v13  ;;  %5983 = vmatprep.subr.bf16.mxu1 %v9454_v48  ;;  %v3037_v13 = vld [vmem:[%s14312_s7 + $0x1c0] sm:$0xff] }
 0x406   :  { %4772 = vmatmul.mubr.bf16.gmra.mrb[72].mxu1 %v12404_v36  ;;  %4934 = vmatmul.mubr.bf16.gmra.mrb[76].mxu0 %v12404_v36  ;;  %v2994_v36 = vld [vmem:[%s14312_s7 + $0x68] sm:$0xff]  ;;  %v3041_v48 = vld [vmem:[%s14312_s7 + $0x1e0] sm:$0xff] }
 0x407   :  { %4812 = vmatprep.mubr.bf16.mxu1 %v12440_v55  ;;  %4974 = vmatprep.mubr.bf16.mxu0 %v12440_v55  ;;  %v9464_v28 = vcombine.high %v2990_v34, %v2994_v36  ;;  %v9463_v42 = vcombine.low %v2990_v34, %v2994_v36  ;;  %v9510_v23 = vcombine.high %v3037_v13, %v3041_v48  ;;  %v3045_v36 = vld [vmem:[%s14312_s7 + $0x200] sm:$0xff] }
 0x408   :  { %6141 = vmatprep.subr.bf16.mxu0 %v9456_v17  ;;  %v9501_v17 = vcombine.low %v3029_v1, %v3033_v2  ;;  %v9512_v34 = vcombine.high %v3038_v14, %v3042_v22  ;;  %v9550_v1 = vcombine.high %v3077_v54, %v3081_v31  ;;  %v3089_v7 = vld [vmem:[%s14312_s7 + $0x360] sm:$0xff] }
 0x409   :  { %v3093_v14 = vld [vmem:[%s14312_s7 + $0x380] sm:$0xff] }
 0x40a   :  { %v3097_v22 = vld [vmem:[%s14312_s7 + $0x3a0] sm:$0xff] }
 0x40e   :  { %4813 = vmatmul.mubr.bf16.vlgmr.msra.gmra.mrb[56].mxu1 %v12461_v8  ;;  %4975 = vmatmul.mubr.bf16.vlgmr.msra.gmra.mrb[60].mxu0 %v12461_v8  ;;  %v3009_v8 = vld [vmem:[%s14312_s7 + $0xe0] sm:$0xff] }
 0x40f   :  { %5984 = vmatpush1.bf16.msra.mxu1 %v9453_v50  ;;  %6142 = vmatpush1.bf16.msra.mxu0 %v9455_v24  ;;  %v9478_v27 = vcombine.high %v3005_v29, %v3009_v8  ;;  %v9477_v60 = vcombine.low %v3005_v29, %v3009_v8  ;;  %v3049_v50 = vld [vmem:[%s14312_s7 + $0x220] sm:$0xff]  ;;  %v3046_v24 = vld [vmem:[%s14312_s7 + $0x208] sm:$0xff] }
 0x410   :  { %5985 = vmatprep.subr.bf16.mxu1 %v9462_v25  ;;  %6143 = vmatprep.subr.bf16.mxu0 %v9464_v28  ;;  %v3050_v25 = vld [vmem:[%s14312_s7 + $0x228] sm:$0xff]  ;;  %v9509_v28 = vcombine.low %v3037_v13, %v3041_v48  ;;  %v9518_v33 = vcombine.high %v3045_v36, %v3049_v50  ;;  %v3061_v29 = vld [vmem:[%s14312_s7 + $0x280] sm:$0xff]  ;;  %v9558_v13 = vcombine.high %v3085_v37, %v3089_v7 }
 0x411   :  { %4822 = vmatprep.mubr.bf16.mxu1 %v12440_v55  ;;  %4984 = vmatprep.mubr.bf16.mxu0 %v12440_v55  ;;  %v9520_v30 = vcombine.high %v3046_v24, %v3050_v25  ;;  %v9534_v58 = vcombine.high %v3061_v29, %v3065_v46 }
 0x413   :  { %5986 = vmatpush1.bf16.msra.mxu1 %v9461_v39  ;;  %6144 = vmatpush1.bf16.msra.mxu0 %v9463_v42  ;;  %v3057_v39 = vld [vmem:[%s14312_s7 + $0x260] sm:$0xff]  ;;  %v3054_v42 = vld [vmem:[%s14312_s7 + $0x248] sm:$0xff] }
 0x414   :  { %5987 = vmatprep.subr.bf16.mxu1 %v9470_v43  ;;  %6145 = vmatprep.subr.bf16.mxu0 %v9472_v44  ;;  %v3058_v43 = vld [vmem:[%s14312_s7 + $0x268] sm:$0xff]  ;;  %v9517_v44 = vcombine.low %v3045_v36, %v3049_v50  ;;  %v9526_v8 = vcombine.high %v3053_v35, %v3057_v39  ;;  %v9566_v36 = vcombine.high %v3093_v14, %v3097_v22 }
 0x415   :  { %v9528_v45 = vcombine.high %v3054_v42, %v3058_v43  ;;  %v9527_v57 = vcombine.low %v3054_v42, %v3058_v43  ;;  %v3109_v42 = vld [vmem:[%s14312_s7 + $0x400] sm:$0xff] }
 0x416   :  { %4823 = vmatmul.mubr.bf16.gmra.mrb[60].mxu1 %v12445_v62  ;;  %4985 = vmatmul.mubr.bf16.gmra.mrb[64].mxu0 %v12445_v62  ;;  %v3113_v43 = vld [vmem:[%s14312_s7 + $0x420] sm:$0xff] }
 0x417   :  { %5988 = vmatpush1.bf16.msra.mxu1 %v9469_v41  ;;  %6146 = vmatpush1.bf16.msra.mxu0 %v9471_v47  ;;  %v3062_v41 = vld [vmem:[%s14312_s7 + $0x288] sm:$0xff] }
 0x418   :  { %5989 = vmatprep.subr.bf16.mxu1 %v9478_v27  ;;  %6147 = vmatprep.subr.bf16.mxu0 %v9480_v49  ;;  %v3066_v47 = vld [vmem:[%s14312_s7 + $0x2a8] sm:$0xff]  ;;  %v12917_v27 = vld [vmem:[#allocation3 + $0x8] sm:$0xff]  ;;  %v9525_v49 = vcombine.low %v3053_v35, %v3057_v39 }
 0x419   :  { %4832 = vmatprep.mubr.bf16.mxu1 %v12440_v55  ;;  %4994 = vmatprep.mubr.bf16.mxu0 %v12440_v55  ;;  %v9536_v59 = vcombine.high %v3062_v41, %v3066_v47 }
 0x41b   :  { %5990 = vmatpush1.bf16.msra.mxu1 %v9477_v60  ;;  %6148 = vmatpush1.bf16.msra.mxu0 %v9479_v61  ;;  %v3070_v60 = vld [vmem:[%s14312_s7 + $0x2c8] sm:$0xff] }
 0x41c   :  { %5991 = vmatprep.subr.bf16.mxu1 %v9486_v51  ;;  %6149 = vmatprep.subr.bf16.mxu0 %v9488_v52  ;;  %v3074_v61 = vld [vmem:[%s14312_s7 + $0x2e8] sm:$0xff]  ;;  %v9533_v51 = vcombine.low %v3061_v29, %v3065_v46  ;;  %v9535_v52 = vcombine.low %v3062_v41, %v3066_v47  ;;  %v3117_v41 = vld [vmem:[%s14312_s7 + $0x440] sm:$0xff] }
 0x41d   :  { %v9544_v16 = vcombine.high %v3070_v60, %v3074_v61  ;;  %v3121_v47 = vld [vmem:[%s14312_s7 + $0x460] sm:$0xff] }
 0x41e   :  { %4833 = vmatmul.mubr.bf16.gmra.mrb[64].mxu1 %v12445_v62  ;;  %4995 = vmatmul.mubr.bf16.gmra.mrb[68].mxu0 %v12445_v62 }
 0x41f   :  { %5992 = vmatpush1.bf16.msra.mxu1 %v9485_v26  ;;  %6150 = vmatpush1.bf16.msra.mxu0 %v9487_v56  ;;  %v3078_v26 = vld [vmem:[%s14312_s7 + $0x308] sm:$0xff] }
 0x420   :  { %5993 = vmatprep.subr.bf16.mxu1 %v9494_v63  ;;  %6151 = vmatprep.subr.bf16.mxu0 %v9496_v0  ;;  %v3082_v56 = vld [vmem:[%s14312_s7 + $0x328] sm:$0xff]  ;;  %v9543_v0 = vcombine.low %v3070_v60, %v3074_v61  ;;  %v3125_v60 = vld [vmem:[%s14312_s7 + $0x480] sm:$0xff] }
 0x421   :  { %4842 = vmatprep.mubr.bf16.mxu1 %v12440_v55  ;;  %5004 = vmatprep.mubr.bf16.mxu0 %v12440_v55  ;;  %v9552_v2 = vcombine.high %v3078_v26, %v3082_v56  ;;  %v3129_v61 = vld [vmem:[%s14312_s7 + $0x4a0] sm:$0xff] }
 0x423   :  { %5994 = vmatpush1.bf16.msra.mxu1 %v9493_v15  ;;  %6152 = vmatpush1.bf16.msra.mxu0 %v9495_v9  ;;  %v3086_v15 = vld [vmem:[%s14312_s7 + $0x348] sm:$0xff] }
 0x424   :  { %5995 = vmatprep.subr.bf16.mxu1 %v9502_v11  ;;  %6153 = vmatprep.subr.bf16.mxu0 %v9504_v12  ;;  %v3090_v9 = vld [vmem:[%s14312_s7 + $0x368] sm:$0xff]  ;;  %v9549_v11 = vcombine.low %v3077_v54, %v3081_v31  ;;  %v9551_v12 = vcombine.low %v3078_v26, %v3082_v56  ;;  %v3133_v56 = vld [vmem:[%s14312_s7 + $0x4c0] sm:$0xff] }
 0x425   :  { %v9560_v48 = vcombine.high %v3086_v15, %v3090_v9  ;;  %v3126_v31 = vld [vmem:[%s14312_s7 + $0x488] sm:$0xff] }
 0x426   :  { %4843 = vmatmul.mubr.bf16.gmra.mrb[68].mxu1 %v12445_v62  ;;  %5005 = vmatmul.mubr.bf16.gmra.mrb[72].mxu0 %v12445_v62  ;;  %v3130_v26 = vld [vmem:[%s14312_s7 + $0x4a8] sm:$0xff] }
 0x427   :  { %5996 = vmatpush1.bf16.msra.mxu1 %v9501_v17  ;;  %6154 = vmatpush1.bf16.msra.mxu0 %v9503_v10  ;;  %v3094_v17 = vld [vmem:[%s14312_s7 + $0x388] sm:$0xff] }
 0x428   :  { %5997 = vmatprep.subr.bf16.mxu1 %v9510_v23  ;;  %6155 = vmatprep.subr.bf16.mxu0 %v9512_v34  ;;  %v3098_v10 = vld [vmem:[%s14312_s7 + $0x3a8] sm:$0xff]  ;;  %v9557_v23 = vcombine.low %v3085_v37, %v3089_v7  ;;  %v9559_v34 = vcombine.low %v3086_v15, %v3090_v9  ;;  %v9600_v37 = vcombine.high %v3126_v31, %v3130_v26  ;;  %v13037_v9 = vld [vmem:[#allocation3 + $0x18] sm:$0xff] }
 0x429   :  { %4852 = vmatprep.mubr.bf16.mxu1 %v12440_v55  ;;  %5014 = vmatprep.mubr.bf16.mxu0 %v12440_v55  ;;  %v9519_v55 = vcombine.low %v3046_v24, %v3050_v25  ;;  %v9568_v50 = vcombine.high %v3094_v17, %v3098_v10  ;;  %v3101_v24 = vld [vmem:[%s14312_s7 + $0x3c0] sm:$0xff]  ;;  %v9599_v15 = vcombine.low %v3126_v31, %v3130_v26 }
 0x42a   :  { %v3105_v25 = vld [vmem:[%s14312_s7 + $0x3e0] sm:$0xff] }
 0x42b   :  { %5998 = vmatpush1.bf16.msra.mxu1 %v9509_v28  ;;  %6156 = vmatpush1.bf16.msra.mxu0 %v9511_v32  ;;  %v3102_v28 = vld [vmem:[%s14312_s7 + $0x3c8] sm:$0xff]  ;;  %v9574_v35 = vcombine.high %v3101_v24, %v3105_v25  ;;  %v9573_v29 = vcombine.low %v3101_v24, %v3105_v25 }
 0x42c   :  { %5999 = vmatprep.subr.bf16.mxu1 %v9518_v33  ;;  %6157 = vmatprep.subr.bf16.mxu0 %v9520_v30  ;;  %v3106_v32 = vld [vmem:[%s14312_s7 + $0x3e8] sm:$0xff]  ;;  %v9565_v33 = vcombine.low %v3093_v14, %v3097_v22  ;;  %v9567_v30 = vcombine.low %v3094_v17, %v3098_v10 }
 0x42d   :  { %v9576_v39 = vcombine.high %v3102_v28, %v3106_v32  ;;  %v3142_v10 = vld [vmem:[%s14312_s7 + $0x508] sm:$0xff] }
 0x42e   :  { %4853 = vmatmul.mubr.bf16.gmra.mrb[76].mxu1 %v12445_v62  ;;  %5015 = vmatmul.mubr.bf16.gmra.mrb[80].mxu0 %v12445_v62  ;;  %v3073_v62 = vld [vmem:[%s14312_s7 + $0x2e0] sm:$0xff]  ;;  %v3154_v24 = vld [vmem:[%s14312_s7 + $0x568] sm:$0xff] }
 0x42f   :  { %6000 = vmatpush1.bf16.msra.mxu1 %v9517_v44  ;;  %6158 = vmatpush1.bf16.msra.mxu0 %v9519_v55  ;;  %v9542_v53 = vcombine.high %v3069_v20, %v3073_v62  ;;  %v9541_v63 = vcombine.low %v3069_v20, %v3073_v62  ;;  %v3110_v44 = vld [vmem:[%s14312_s7 + $0x408] sm:$0xff] }
 0x430   :  { %6015 = vmatprep.mubr.bf16.mxu1 %v12917_v27  ;;  %6173 = vmatprep.mubr.bf16.mxu0 %v12917_v27  ;;  %v3114_v55 = vld [vmem:[%s14312_s7 + $0x428] sm:$0xff] }
 0x431   :  { %6001 = vmatprep.subr.bf16.mxu1 %v9526_v8  ;;  %6159 = vmatprep.subr.bf16.mxu0 %v9528_v45  ;;  %v9575_v8 = vcombine.low %v3102_v28, %v3106_v32  ;;  %v9582_v45 = vcombine.high %v3109_v42, %v3113_v43  ;;  %v9584_v46 = vcombine.high %v3110_v44, %v3114_v55  ;;  %v13005_v20 = vld [vmem:[#allocation3] sm:$0xff] }
 0x432   :  { %v9583_v62 = vcombine.low %v3110_v44, %v3114_v55 }
 0x433   :  { %6002 = vmatpush1.bf16.msra.mxu1 %v9525_v49  ;;  %6160 = vmatpush1.bf16.msra.mxu0 %v9527_v57  ;;  %v9581_v49 = vcombine.low %v3109_v42, %v3113_v43  ;;  %v3118_v57 = vld [vmem:[%s14312_s7 + $0x448] sm:$0xff]  ;;  %v3161_v42 = vld [vmem:[%s14312_s7 + $0x5a0] sm:$0xff]  ;;  %v13079_v43 = vld [vmem:[#allocation3 + $0x50] sm:$0xff] }
 0x434   :  { %6003 = vmatprep.subr.bf16.mxu1 %v9534_v58  ;;  %6161 = vmatprep.subr.bf16.mxu0 %v9536_v59  ;;  %v3122_v58 = vld [vmem:[%s14312_s7 + $0x468] sm:$0xff]  ;;  %v9590_v59 = vcombine.high %v3117_v41, %v3121_v47 }
 0x435   :  { %v9591_v54 = vcombine.low %v3118_v57, %v3122_v58 }
 0x437   :  { %6004 = vmatpush1.bf16.msra.mxu1 %v9533_v51  ;;  %6162 = vmatpush1.bf16.msra.mxu0 %v9535_v52  ;;  %v9592_v51 = vcombine.high %v3118_v57, %v3122_v58  ;;  %v13015_v52 = vld [vmem:[#allocation3 + $0x20] sm:$0xff] }
 0x438   :  { %6005 = vmatprep.subr.bf16.mxu1 %v9542_v53  ;;  %6163 = vmatprep.subr.bf16.mxu0 %v9544_v16  ;;  %v9589_v53 = vcombine.low %v3117_v41, %v3121_v47  ;;  %v9598_v16 = vcombine.high %v3125_v60, %v3129_v61  ;;  %v3169_v41 = vld [vmem:[%s14312_s7 + $0x5e0] sm:$0xff]  ;;  %v3166_v47 = vld [vmem:[%s14312_s7 + $0x5c8] sm:$0xff] }
 0x43b   :  { %6006 = vmatpush1.bf16.msra.mxu1 %v9541_v63  ;;  %6164 = vmatpush1.bf16.msra.mxu0 %v9543_v0  ;;  %v3137_v63 = vld [vmem:[%s14312_s7 + $0x4e0] sm:$0xff]  ;;  %v3134_v0 = vld [vmem:[%s14312_s7 + $0x4c8] sm:$0xff] }
 0x43c   :  { %6007 = vmatprep.subr.bf16.mxu1 %v9550_v1  ;;  %6165 = vmatprep.subr.bf16.mxu0 %v9552_v2  ;;  %v3138_v1 = vld [vmem:[%s14312_s7 + $0x4e8] sm:$0xff]  ;;  %v9597_v2 = vcombine.low %v3125_v60, %v3129_v61  ;;  %v9606_v7 = vcombine.high %v3133_v56, %v3137_v63  ;;  %v9605_v14 = vcombine.low %v3133_v56, %v3137_v63  ;;  %v13101_v60 = vld [vmem:[#allocation3 + $0x48] sm:$0xff]  ;;  %v2984_v56 = vld [vmem:[%s14312_s7 + $0x18] sm:$0xff] }
 0x43d   :  { %v9607_v22 = vcombine.low %v3134_v0, %v3138_v1  ;;  %v13105_v61 = vld [vmem:[#allocation3 + $0x68] sm:$0xf]  ;;  %v2988_v63 = vld [vmem:[%s14312_s7 + $0x38] sm:$0xff] }
 0x43f   :  { %6008 = vmatpush1.bf16.msra.mxu1 %v9549_v11  ;;  %6166 = vmatpush1.bf16.msra.mxu0 %v9551_v12  ;;  %v9608_v11 = vcombine.high %v3134_v0, %v3138_v1  ;;  %v3141_v12 = vld [vmem:[%s14312_s7 + $0x500] sm:$0xff]  ;;  %v9460_v0 = vcombine.high %v2984_v56, %v2988_v63  ;;  %v13121_v1 = vld [vmem:[#allocation3 + $0x60] sm:$0xf] }
 0x440   :  { %6009 = vmatprep.subr.bf16.mxu1 %v9558_v13  ;;  %6167 = vmatprep.subr.bf16.mxu0 %v9560_v48  ;;  %v3145_v13 = vld [vmem:[%s14312_s7 + $0x520] sm:$0xff] }
 0x441   :  { %v13047_v48 = vld [vmem:[#allocation3 + $0x38] sm:$0xff]  ;;  %v9614_v17 = vcombine.high %v3141_v12, %v3145_v13  ;;  %v9613_v25 = vcombine.low %v3141_v12, %v3145_v13  ;;  %v2992_v12 = vld [vmem:[%s14312_s7 + $0x58] sm:$0xff] }
 0x442   :  { %v2996_v13 = vld [vmem:[%s14312_s7 + $0x78] sm:$0xff] }
 0x443   :  { %6010 = vmatpush1.bf16.msra.mxu1 %v9557_v23  ;;  %6168 = vmatpush1.bf16.msra.mxu0 %v9559_v34  ;;  %v3146_v23 = vld [vmem:[%s14312_s7 + $0x528] sm:$0xff]  ;;  %v3149_v34 = vld [vmem:[%s14312_s7 + $0x540] sm:$0xff] }
 0x444   :  { %6011 = vmatprep.subr.bf16.mxu1 %v9566_v36  ;;  %6169 = vmatprep.subr.bf16.mxu0 %v9568_v50  ;;  %v3153_v36 = vld [vmem:[%s14312_s7 + $0x560] sm:$0xff]  ;;  %v3150_v50 = vld [vmem:[%s14312_s7 + $0x548] sm:$0xff]  ;;  %v9616_v28 = vcombine.high %v3142_v10, %v3146_v23  ;;  %v9615_v32 = vcombine.low %v3142_v10, %v3146_v23 }
 0x445   :  { %v9621_v44 = vcombine.low %v3149_v34, %v3153_v36  ;;  %v9623_v55 = vcombine.low %v3150_v50, %v3154_v24 }
 0x447   :  { %6012 = vmatpush1.bf16.msra.mxu1 %v9565_v33  ;;  %6170 = vmatpush1.bf16.msra.mxu0 %v9567_v30  ;;  %v9622_v33 = vcombine.high %v3149_v34, %v3153_v36  ;;  %v13069_v30 = vld [vmem:[#allocation3 + $0x30] sm:$0xff]  ;;  %v9459_v34 = vcombine.low %v2984_v56, %v2988_v63  ;;  %v3027_v56 = vld [vmem:[%s14312_s7 + $0x170] sm:$0xff] }
 0x448   :  { %6013 = vmatprep.subr.bf16.mxu1 %v9574_v35  ;;  %6171 = vmatprep.subr.bf16.mxu0 %v9576_v39  ;;  %v9624_v35 = vcombine.high %v3150_v50, %v3154_v24  ;;  %v3157_v39 = vld [vmem:[%s14312_s7 + $0x580] sm:$0xff]  ;;  %v3024_v63 = vld [vmem:[%s14312_s7 + $0x158] sm:$0xff] }
 0x449   :  { %v9629_v57 = vcombine.low %v3157_v39, %v3161_v42 }
 0x44b   :  { %6014 = vmatpush1.bf16.msra.mxu1 %v9573_v29  ;;  %6172 = vmatpush1.bf16.msra.mxu0 %v9575_v8  ;;  %v9630_v29 = vcombine.high %v3157_v39, %v3161_v42  ;;  %v3158_v8 = vld [vmem:[%s14312_s7 + $0x588] sm:$0xff]  ;;  %v9467_v42 = vcombine.low %v2992_v12, %v2996_v13 }
 0x44c   :  { %6062 = vmatprep.subr.bf16.mxu1 %v9582_v45  ;;  %6220 = vmatprep.subr.bf16.mxu0 %v9584_v46  ;;  %v3162_v45 = vld [vmem:[%s14312_s7 + $0x5a8] sm:$0xff]  ;;  %v3165_v46 = vld [vmem:[%s14312_s7 + $0x5c0] sm:$0xff] }
 0x44d   :  { %v9632_v58 = vcombine.high %v3158_v8, %v3162_v45 }
 0x44e   :  { %6016 = vmatmul.mubr.bf16.vlgmr.msra.gmra.mrb[32].mxu1 %v13005_v20  ;;  %6174 = vmatmul.mubr.bf16.vlgmr.msra.gmra.mrb[36].mxu0 %v13005_v20 }
 0x44f   :  { %6025 = vmatprep.mubr.bf16.mxu1 %v13015_v52  ;;  %6063 = vmatpush1.bf16.msra.mxu1 %v9581_v49  ;;  %v3170_v49 = vld [vmem:[%s14312_s7 + $0x5e8] sm:$0xff] }
 0x450   :  { %6183 = vmatprep.mubr.bf16.mxu0 %v13015_v52  ;;  %6064 = vmatprep.subr.bf16.mxu1 %v9590_v59  ;;  %v9631_v59 = vcombine.low %v3158_v8, %v3162_v45  ;;  %v9639_v31 = vcombine.low %v3166_v47, %v3170_v49  ;;  %v3011_v8 = vld [vmem:[%s14312_s7 + $0xf0] sm:$0xff]  ;;  %v3008_v45 = vld [vmem:[%s14312_s7 + $0xd8] sm:$0xff] }
 0x451   :  { %6221 = vmatpush1.bf16.msra.mxu0 %v9583_v62  ;;  %v9638_v62 = vcombine.high %v3165_v46, %v3169_v41 }
 0x452   :  { %6222 = vmatprep.subr.bf16.mxu0 %v9592_v51  ;;  %v9640_v51 = vcombine.high %v3166_v47, %v3170_v49 }
 0x453   :  { %6065 = vmatpush1.bf16.msra.mxu1 %v9589_v53  ;;  %v2983_v53 = vld [vmem:[%s14312_s7 + $0x10] sm:$0xff] }
 0x454   :  { %6066 = vmatprep.subr.bf16.mxu1 %v9598_v16  ;;  %v2987_v16 = vld [vmem:[%s14312_s7 + $0x30] sm:$0xff] }
 0x455   :  { %6223 = vmatpush1.bf16.msra.mxu0 %v9591_v54  ;;  %v9637_v54 = vcombine.low %v3165_v46, %v3169_v41  ;;  %v9458_v26 = vcombine.high %v2983_v53, %v2987_v16  ;;  %v9457_v23 = vcombine.low %v2983_v53, %v2987_v16  ;;  %v3012_v46 = vld [vmem:[%s14312_s7 + $0xf8] sm:$0xff] }
 0x456   :  { %6026 = vmatmul.mubr.bf16.gmra.mrb[36].mxu1 %v13037_v9  ;;  %6184 = vmatmul.mubr.bf16.gmra.mrb[40].mxu0 %v13037_v9  ;;  %v9483_v16 = vcombine.low %v3008_v45, %v3012_v46 }
 0x457   :  { %6035 = vmatprep.mubr.bf16.mxu1 %v13047_v48  ;;  %6193 = vmatprep.mubr.bf16.mxu0 %v13047_v48 }
 0x458   :  { %6067 = vmatpush1.bf16.msra.mxu1 %v9597_v2  ;;  %6224 = vmatprep.subr.bf16.mxu0 %v9600_v37  ;;  %v13125_v2 = vld [vmem:[#allocation2 + $0x28] sm:$0xff]  ;;  %v2991_v37 = vld [vmem:[%s14312_s7 + $0x50] sm:$0xff] }
 0x459   :  { %6068 = vmatprep.subr.bf16.mxu1 %v9606_v7  ;;  %6225 = vmatpush1.bf16.msra.mxu0 %v9599_v15 }
 0x45a   :  { %6226 = vmatprep.subr.bf16.mxu0 %v9608_v11  ;;  %v2995_v11 = vld [vmem:[%s14312_s7 + $0x70] sm:$0xff] }
 0x45b   :  { %v9466_v24 = vcombine.high %v2991_v37, %v2995_v11  ;;  %v9465_v39 = vcombine.low %v2991_v37, %v2995_v11 }
 0x45c   :  { %6069 = vmatpush1.bf16.msra.mxu1 %v9605_v14 }
 0x45d   :  { %6070 = vmatprep.subr.bf16.mxu1 %v9614_v17  ;;  %6227 = vmatpush1.bf16.msra.mxu0 %v9607_v22 }
 0x45e   :  { %6036 = vmatmul.mubr.bf16.gmra.mrb[40].mxu1 %v13069_v30  ;;  %6194 = vmatmul.mubr.bf16.gmra.mrb[44].mxu0 %v13069_v30 }
 0x45f   :  { %6045 = vmatprep.mubr.bf16.mxu1 %v13079_v43  ;;  %6203 = vmatprep.mubr.bf16.mxu0 %v13079_v43 }
 0x460   :  { %6071 = vmatpush1.bf16.msra.mxu1 %v9613_v25  ;;  %6228 = vmatprep.subr.bf16.mxu0 %v9616_v28  ;;  %v9468_v25 = vcombine.high %v2992_v12, %v2996_v13  ;;  %v2999_v28 = vld [vmem:[%s14312_s7 + $0x90] sm:$0xff] }
 0x461   :  { %6229 = vmatpush1.bf16.msra.mxu0 %v9615_v32  ;;  %6072 = vmatprep.subr.bf16.mxu1 %v9622_v33  ;;  %v3003_v32 = vld [vmem:[%s14312_s7 + $0xb0] sm:$0xff]  ;;  %v3000_v33 = vld [vmem:[%s14312_s7 + $0x98] sm:$0xff] }
 0x462   :  { %6230 = vmatprep.subr.bf16.mxu0 %v9624_v35  ;;  %v3004_v35 = vld [vmem:[%s14312_s7 + $0xb8] sm:$0xff]  ;;  %v9473_v41 = vcombine.low %v2999_v28, %v3003_v32  ;;  %v3031_v12 = vld [vmem:[%s14312_s7 + $0x190] sm:$0xff] }
 0x463   :  { %v9475_v47 = vcombine.low %v3000_v33, %v3004_v35  ;;  %v3035_v13 = vld [vmem:[%s14312_s7 + $0x1b0] sm:$0xff] }
 0x464   :  { %6073 = vmatpush1.bf16.msra.mxu1 %v9621_v44  ;;  %v9474_v44 = vcombine.high %v2999_v28, %v3003_v32  ;;  %v9505_v28 = vcombine.low %v3031_v12, %v3035_v13 }
 0x465   :  { %6231 = vmatpush1.bf16.msra.mxu0 %v9623_v55  ;;  %6074 = vmatprep.subr.bf16.mxu1 %v9630_v29  ;;  %v9476_v55 = vcombine.high %v3000_v33, %v3004_v35  ;;  %v3007_v29 = vld [vmem:[%s14312_s7 + $0xd0] sm:$0xff] }
 0x466   :  { %6046 = vmatmul.mubr.bf16.gmra.mrb[44].mxu1 %v13101_v60  ;;  %6204 = vmatmul.mubr.bf16.gmra.mrb[48].mxu0 %v13101_v60  ;;  %v9482_v49 = vcombine.high %v3007_v29, %v3011_v8  ;;  %v9481_v53 = vcombine.low %v3007_v29, %v3011_v8 }
 0x467   :  { %6055 = vmatprep.mubr.bf16.mxu1 %v13105_v61  ;;  %6213 = vmatprep.mubr.bf16.mxu0 %v13105_v61 }
 0x468   :  { %6075 = vmatpush1.bf16.msra.mxu1 %v9629_v57  ;;  %6232 = vmatprep.subr.bf16.mxu0 %v9632_v58  ;;  %v9484_v57 = vcombine.high %v3008_v45, %v3012_v46  ;;  %v3015_v58 = vld [vmem:[%s14312_s7 + $0x110] sm:$0xff] }
 0x469   :  { %6233 = vmatpush1.bf16.msra.mxu0 %v9631_v59  ;;  %6076 = vmatprep.subr.bf16.mxu1 %v9638_v62  ;;  %v3019_v59 = vld [vmem:[%s14312_s7 + $0x130] sm:$0xff]  ;;  %v3016_v62 = vld [vmem:[%s14312_s7 + $0x118] sm:$0xff] }
 0x46a   :  { %6234 = vmatprep.subr.bf16.mxu0 %v9640_v51  ;;  %v3020_v51 = vld [vmem:[%s14312_s7 + $0x138] sm:$0xff]  ;;  %v9489_v37 = vcombine.low %v3015_v58, %v3019_v59 }
 0x46c   :  { %6077 = vmatpush1.bf16.msra.mxu1 %v9637_v54  ;;  %v9490_v54 = vcombine.high %v3015_v58, %v3019_v59 }
 0x46d   :  { %6235 = vmatpush1.bf16.msra.mxu0 %v9639_v31  ;;  %6299 = vmatprep.subr.bf16.mxu1 %v9458_v26  ;;  %v9492_v31 = vcombine.high %v3016_v62, %v3020_v51  ;;  %v3023_v26 = vld [vmem:[%s14312_s7 + $0x150] sm:$0xff] }
 0x46e   :  { %6056 = vmatmul.mubr.bf16.gmra.mrb[80].mxu1 %v13121_v1  ;;  %6214 = vmatmul.mubr.bf16.gmra.mrb[84].mxu0 %v13121_v1 }
 0x46f   :  { %6094 = vmatprep.mubr.bf16.mxu1 %v13125_v2  ;;  %6252 = vmatprep.mubr.bf16.mxu0 %v13125_v2 }
 0x470   :  { %6461 = vmatprep.subr.bf16.mxu0 %v9460_v0  ;;  %v3028_v0 = vld [vmem:[%s14312_s7 + $0x178] sm:$0xff] }
 0x471   :  { %v4457_v7 = vpop.f32.mrb[48].mxu1  ;;  %v4615_v15 = vpop.f32.mrb[52].mxu0  ;;  %v9500_v11 = vcombine.high %v3024_v63, %v3028_v0 }
 0x472   :  { %v4458_v14 = vpop.f32.mrb[49].mxu1  ;;  %v4616_v22 = vpop.f32.mrb[53].mxu0  ;;  %v9491_v7 = vcombine.low %v3016_v62, %v3020_v51  ;;  %v9498_v15 = vcombine.high %v3023_v26, %v3027_v56  ;;  %v13253_v62 = vld [vmem:[#allocation3 + $0x70] sm:$0xf]  ;;  %v3063_v51 = vld [vmem:[%s14312_s7 + $0x290] sm:$0xff] }
 0x473   :  { %v4459_v17 = vpop.f32.mrb[50].mxu1  ;;  %v4617_v10 = vpop.f32.mrb[54].mxu0  ;;  %v3032_v14 = vld [vmem:[%s14312_s7 + $0x198] sm:$0xff] }
 0x474   :  { %v4460_v36 = vpop.f32.mrb[51].mxu1  ;;  %v4618_v50 = vpop.f32.mrb[55].mxu0  ;;  %v3036_v22 = vld [vmem:[%s14312_s7 + $0x1b8] sm:$0xff]  ;;  %v9497_v17 = vcombine.low %v3023_v26, %v3027_v56  ;;  %v9499_v10 = vcombine.low %v3024_v63, %v3028_v0 }
 0x475   :  { %v3039_v36 = vld [vmem:[%s14312_s7 + $0x1d0] sm:$0xff]  ;;  %v9507_v32 = vcombine.low %v3032_v14, %v3036_v22  ;;  %v3068_v26 = vld [vmem:[%s14312_s7 + $0x2b8] sm:$0xff] }
 0x476   :  { %6095 = vmatmul.mubr.bf16.vlgmr.msra.gmra.mrb[32].mxu1 %v13125_v2  ;;  %6253 = vmatmul.mubr.bf16.vlgmr.msra.gmra.mrb[36].mxu0 %v13125_v2  ;;  %v3043_v50 = vld [vmem:[%s14312_s7 + $0x1f0] sm:$0xff] }
 0x477   :  { %6300 = vmatpush1.bf16.msra.mxu1 %v9457_v23  ;;  %6462 = vmatpush1.bf16.msra.mxu0 %v9459_v34  ;;  %v9506_v23 = vcombine.high %v3031_v12, %v3035_v13  ;;  %v9508_v34 = vcombine.high %v3032_v14, %v3036_v22  ;;  %v9514_v33 = vcombine.high %v3039_v36, %v3043_v50 }
 0x478   :  { %6301 = vmatprep.subr.bf16.mxu1 %v9466_v24  ;;  %6463 = vmatprep.subr.bf16.mxu0 %v9468_v25  ;;  %v3040_v24 = vld [vmem:[%s14312_s7 + $0x1d8] sm:$0xff]  ;;  %v9513_v29 = vcombine.low %v3039_v36, %v3043_v50 }
 0x479   :  { %6104 = vmatprep.mubr.bf16.mxu1 %v13125_v2  ;;  %6262 = vmatprep.mubr.bf16.mxu0 %v13125_v2  ;;  %v3044_v25 = vld [vmem:[%s14312_s7 + $0x1f8] sm:$0xff] }
 0x47a   :  { %v9516_v35 = vcombine.high %v3040_v24, %v3044_v25  ;;  %v9515_v8 = vcombine.low %v3040_v24, %v3044_v25  ;;  %v3079_v24 = vld [vmem:[%s14312_s7 + $0x310] sm:$0xff] }
 0x47b   :  { %6302 = vmatpush1.bf16.msra.mxu1 %v9465_v39  ;;  %6464 = vmatpush1.bf16.msra.mxu0 %v9467_v42  ;;  %v3047_v39 = vld [vmem:[%s14312_s7 + $0x210] sm:$0xff] }
 0x47c   :  { %6303 = vmatprep.subr.bf16.mxu1 %v9474_v44  ;;  %6465 = vmatprep.subr.bf16.mxu0 %v9476_v55  ;;  %v3051_v42 = vld [vmem:[%s14312_s7 + $0x230] sm:$0xff]  ;;  %v3048_v44 = vld [vmem:[%s14312_s7 + $0x218] sm:$0xff] }
 0x47d   :  { %v3052_v55 = vld [vmem:[%s14312_s7 + $0x238] sm:$0xff]  ;;  %v9522_v45 = vcombine.high %v3047_v39, %v3051_v42  ;;  %v9521_v58 = vcombine.low %v3047_v39, %v3051_v42 }
 0x47e   :  { %6105 = vmatmul.mubr.bf16.gmra.mrb[36].mxu1 %v13125_v2  ;;  %6263 = vmatmul.mubr.bf16.gmra.mrb[40].mxu0 %v13125_v2  ;;  %v9524_v46 = vcombine.high %v3048_v44, %v3052_v55  ;;  %v9523_v59 = vcombine.low %v3048_v44, %v3052_v55 }
 0x47f   :  { %6304 = vmatpush1.bf16.msra.mxu1 %v9473_v41  ;;  %6466 = vmatpush1.bf16.msra.mxu0 %v9475_v47  ;;  %v3055_v41 = vld [vmem:[%s14312_s7 + $0x250] sm:$0xff] }
 0x480   :  { %6305 = vmatprep.subr.bf16.mxu1 %v9482_v49  ;;  %6467 = vmatprep.subr.bf16.mxu0 %v9484_v57  ;;  %v3059_v47 = vld [vmem:[%s14312_s7 + $0x270] sm:$0xff]  ;;  %v3056_v49 = vld [vmem:[%s14312_s7 + $0x258] sm:$0xff] }
 0x481   :  { %6114 = vmatprep.mubr.bf16.mxu1 %v13125_v2  ;;  %6272 = vmatprep.mubr.bf16.mxu0 %v13125_v2  ;;  %v3060_v57 = vld [vmem:[%s14312_s7 + $0x278] sm:$0xff]  ;;  %v9529_v56 = vcombine.low %v3055_v41, %v3059_v47 }
 0x482   :  { %v9531_v63 = vcombine.low %v3056_v49, %v3060_v57 }
 0x483   :  { %6306 = vmatpush1.bf16.msra.mxu1 %v9481_v53  ;;  %6468 = vmatpush1.bf16.msra.mxu0 %v9483_v16  ;;  %v9530_v53 = vcombine.high %v3055_v41, %v3059_v47  ;;  %v9532_v16 = vcombine.high %v3056_v49, %v3060_v57 }
 0x484   :  { %6307 = vmatprep.subr.bf16.mxu1 %v9490_v54  ;;  %6469 = vmatprep.subr.bf16.mxu0 %v9492_v31  ;;  %v3067_v54 = vld [vmem:[%s14312_s7 + $0x2b0] sm:$0xff]  ;;  %v3064_v31 = vld [vmem:[%s14312_s7 + $0x298] sm:$0xff] }
 0x485   :  { %v9538_v0 = vcombine.high %v3063_v51, %v3067_v54 }
 0x486   :  { %6115 = vmatmul.mubr.bf16.gmra.mrb[40].mxu1 %v13125_v2  ;;  %6273 = vmatmul.mubr.bf16.gmra.mrb[44].mxu0 %v13125_v2 }
 0x487   :  { %6308 = vmatpush1.bf16.msra.mxu1 %v9489_v37  ;;  %6470 = vmatpush1.bf16.msra.mxu0 %v9491_v7  ;;  %v9540_v37 = vcombine.high %v3064_v31, %v3068_v26  ;;  %v3071_v7 = vld [vmem:[%s14312_s7 + $0x2d0] sm:$0xff] }
 0x488   :  { %6309 = vmatprep.subr.bf16.mxu1 %v9498_v15  ;;  %6471 = vmatprep.subr.bf16.mxu0 %v9500_v11  ;;  %v3075_v15 = vld [vmem:[%s14312_s7 + $0x2f0] sm:$0xff]  ;;  %v3072_v11 = vld [vmem:[%s14312_s7 + $0x2d8] sm:$0xff] }
 0x489   :  { %6124 = vmatprep.mubr.bf16.mxu1 %v13125_v2  ;;  %6282 = vmatprep.mubr.bf16.mxu0 %v13125_v2  ;;  %v9546_v36 = vcombine.high %v3071_v7, %v3075_v15  ;;  %v9545_v39 = vcombine.low %v3071_v7, %v3075_v15 }
 0x48b   :  { %6310 = vmatpush1.bf16.msra.mxu1 %v9497_v17  ;;  %6472 = vmatpush1.bf16.msra.mxu0 %v9499_v10  ;;  %v9537_v17 = vcombine.low %v3063_v51, %v3067_v54  ;;  %v9539_v10 = vcombine.low %v3064_v31, %v3068_v26  ;;  %v3096_v51 = vld [vmem:[%s14312_s7 + $0x398] sm:$0xff] }
 0x48c   :  { %6311 = vmatprep.subr.bf16.mxu1 %v9506_v23  ;;  %6473 = vmatprep.subr.bf16.mxu0 %v9508_v34 }
 0x48e   :  { %6125 = vmatmul.mubr.bf16.gmra.mrb[44].mxu1 %v13125_v2  ;;  %6283 = vmatmul.mubr.bf16.gmra.mrb[48].mxu0 %v13125_v2 }
 0x48f   :  { %6312 = vmatpush1.bf16.msra.mxu1 %v9505_v28  ;;  %6474 = vmatpush1.bf16.msra.mxu0 %v9507_v32  ;;  %v3083_v32 = vld [vmem:[%s14312_s7 + $0x330] sm:$0xff] }
 0x490   :  { %6313 = vmatprep.subr.bf16.mxu1 %v9514_v33  ;;  %6475 = vmatprep.subr.bf16.mxu0 %v9516_v35  ;;  %v3080_v33 = vld [vmem:[%s14312_s7 + $0x318] sm:$0xff]  ;;  %v9554_v44 = vcombine.high %v3079_v24, %v3083_v32  ;;  %v9553_v41 = vcombine.low %v3079_v24, %v3083_v32 }
 0x491   :  { %6134 = vmatprep.mubr.bf16.mxu1 %v13125_v2  ;;  %6292 = vmatprep.mubr.bf16.mxu0 %v13125_v2  ;;  %v3084_v35 = vld [vmem:[%s14312_s7 + $0x338] sm:$0xff] }
 0x492   :  { %v9556_v55 = vcombine.high %v3080_v33, %v3084_v35  ;;  %v9555_v47 = vcombine.low %v3080_v33, %v3084_v35  ;;  %v3127_v35 = vld [vmem:[%s14312_s7 + $0x490] sm:$0xff] }
 0x493   :  { %6314 = vmatpush1.bf16.msra.mxu1 %v9513_v29  ;;  %6476 = vmatpush1.bf16.msra.mxu0 %v9515_v8  ;;  %v3087_v29 = vld [vmem:[%s14312_s7 + $0x350] sm:$0xff] }
 0x494   :  { %6315 = vmatprep.subr.bf16.mxu1 %v9522_v45  ;;  %6477 = vmatprep.subr.bf16.mxu0 %v9524_v46  ;;  %v3091_v8 = vld [vmem:[%s14312_s7 + $0x370] sm:$0xff]  ;;  %v3088_v45 = vld [vmem:[%s14312_s7 + $0x358] sm:$0xff] }
 0x495   :  { %v3092_v46 = vld [vmem:[%s14312_s7 + $0x378] sm:$0xff]  ;;  %v9562_v49 = vcombine.high %v3087_v29, %v3091_v8 }
 0x496   :  { %6135 = vmatmul.mubr.bf16.gmra.mrb[84].mxu1 %v13253_v62  ;;  %6293 = vmatmul.mubr.bf16.gmra.mrb[88].mxu0 %v13253_v62  ;;  %v9564_v57 = vcombine.high %v3088_v45, %v3092_v46  ;;  %v9563_v54 = vcombine.low %v3088_v45, %v3092_v46  ;;  %v3132_v45 = vld [vmem:[%s14312_s7 + $0x4b8] sm:$0xff] }
 0x497   :  { %6316 = vmatpush1.bf16.msra.mxu1 %v9521_v58  ;;  %6478 = vmatpush1.bf16.msra.mxu0 %v9523_v59  ;;  %v3095_v58 = vld [vmem:[%s14312_s7 + $0x390] sm:$0xff]  ;;  %v3136_v46 = vld [vmem:[%s14312_s7 + $0x4d8] sm:$0xff] }
 0x498   :  { %6331 = vmatprep.mubr.bf16.mxu1 %v12917_v27  ;;  %6493 = vmatprep.mubr.bf16.mxu0 %v12917_v27  ;;  %v3076_v27 = vld [vmem:[%s14312_s7 + $0x2f8] sm:$0xff]  ;;  %v3099_v59 = vld [vmem:[%s14312_s7 + $0x3b0] sm:$0xff] }
 0x499   :  { %6317 = vmatprep.subr.bf16.mxu1 %v9530_v53  ;;  %6479 = vmatprep.subr.bf16.mxu0 %v9532_v16  ;;  %v4536_v12 = vpop.f32.mrb[52].mxu1  ;;  %v4694_v13 = vpop.f32.mrb[56].mxu0  ;;  %v9548_v50 = vcombine.high %v3072_v11, %v3076_v27  ;;  %v9547_v42 = vcombine.low %v3072_v11, %v3076_v27  ;;  %v3100_v53 = vld [vmem:[%s14312_s7 + $0x3b8] sm:$0xff]  ;;  %v9561_v16 = vcombine.low %v3087_v29, %v3091_v8 }
 0x49a   :  { %v4537_v14 = vpop.f32.mrb[53].mxu1  ;;  %v4695_v22 = vpop.f32.mrb[57].mxu0  ;;  %v9570_v31 = vcombine.high %v3095_v58, %v3099_v59  ;;  %v9572_v26 = vcombine.high %v3096_v51, %v3100_v53  ;;  %v9569_v7 = vcombine.low %v3095_v58, %v3099_v59  ;;  %v9571_v15 = vcombine.low %v3096_v51, %v3100_v53  ;;  %v3111_v12 = vld [vmem:[%s14312_s7 + $0x410] sm:$0xff]  ;;  %v3128_v8 = vld [vmem:[%s14312_s7 + $0x498] sm:$0xff] }
 0x49b   :  { %6318 = vmatpush1.bf16.msra.mxu1 %v9529_v56  ;;  %6480 = vmatpush1.bf16.msra.mxu0 %v9531_v63  ;;  %v4538_v23 = vpop.f32.mrb[54].mxu1  ;;  %v4696_v34 = vpop.f32.mrb[58].mxu0  ;;  %v3103_v56 = vld [vmem:[%s14312_s7 + $0x3d0] sm:$0xff]  ;;  %v3112_v14 = vld [vmem:[%s14312_s7 + $0x418] sm:$0xff]  ;;  %v9603_v58 = vcombine.low %v3128_v8, %v3132_v45 }
 0x49c   :  { %6319 = vmatprep.subr.bf16.mxu1 %v9538_v0  ;;  %6481 = vmatprep.subr.bf16.mxu0 %v9540_v37  ;;  %v4539_v25 = vpop.f32.mrb[55].mxu1  ;;  %v4697_v28 = vpop.f32.mrb[59].mxu0  ;;  %v3107_v63 = vld [vmem:[%s14312_s7 + $0x3f0] sm:$0xff]  ;;  %v3104_v0 = vld [vmem:[%s14312_s7 + $0x3d8] sm:$0xff] }
 0x49d   :  { %v3108_v37 = vld [vmem:[%s14312_s7 + $0x3f8] sm:$0xff]  ;;  %v9578_v11 = vcombine.high %v3103_v56, %v3107_v63  ;;  %v3115_v13 = vld [vmem:[%s14312_s7 + $0x430] sm:$0xff] }
 0x49e   :  { %v9580_v27 = vcombine.high %v3104_v0, %v3108_v37  ;;  %v3116_v22 = vld [vmem:[%s14312_s7 + $0x438] sm:$0xff]  ;;  %v9586_v23 = vcombine.high %v3111_v12, %v3115_v13  ;;  %v9585_v24 = vcombine.low %v3111_v12, %v3115_v13  ;;  %v3143_v59 = vld [vmem:[%s14312_s7 + $0x510] sm:$0xff] }
 0x49f   :  { %6320 = vmatpush1.bf16.msra.mxu1 %v9537_v17  ;;  %6482 = vmatpush1.bf16.msra.mxu0 %v9539_v10  ;;  %v9577_v17 = vcombine.low %v3103_v56, %v3107_v63  ;;  %v9579_v10 = vcombine.low %v3104_v0, %v3108_v37  ;;  %v9588_v34 = vcombine.high %v3112_v14, %v3116_v22  ;;  %v3120_v25 = vld [vmem:[%s14312_s7 + $0x458] sm:$0xff]  ;;  %v3147_v51 = vld [vmem:[%s14312_s7 + $0x530] sm:$0xff] }
 0x4a0   :  { %6321 = vmatprep.subr.bf16.mxu1 %v9546_v36  ;;  %6483 = vmatprep.subr.bf16.mxu0 %v9548_v50  ;;  %v3119_v36 = vld [vmem:[%s14312_s7 + $0x450] sm:$0xff]  ;;  %v3124_v28 = vld [vmem:[%s14312_s7 + $0x478] sm:$0xff]  ;;  %v9587_v33 = vcombine.low %v3112_v14, %v3116_v22  ;;  %v9617_v37 = vcombine.low %v3143_v59, %v3147_v51 }
 0x4a1   :  { %v3123_v50 = vld [vmem:[%s14312_s7 + $0x470] sm:$0xff]  ;;  %v9595_v29 = vcombine.low %v3120_v25, %v3124_v28  ;;  %v3152_v63 = vld [vmem:[%s14312_s7 + $0x558] sm:$0xff] }
 0x4a2   :  { %v9594_v32 = vcombine.high %v3119_v36, %v3123_v50  ;;  %v3155_v56 = vld [vmem:[%s14312_s7 + $0x570] sm:$0xff]  ;;  %v3156_v0 = vld [vmem:[%s14312_s7 + $0x578] sm:$0xff] }
 0x4a3   :  { %6322 = vmatpush1.bf16.msra.mxu1 %v9545_v39  ;;  %6484 = vmatpush1.bf16.msra.mxu0 %v9547_v42  ;;  %v3131_v39 = vld [vmem:[%s14312_s7 + $0x4b0] sm:$0xff]  ;;  %v9596_v42 = vcombine.high %v3120_v25, %v3124_v28  ;;  %v9627_v22 = vcombine.low %v3152_v63, %v3156_v0 }
 0x4a4   :  { %6323 = vmatprep.subr.bf16.mxu1 %v9554_v44  ;;  %6485 = vmatprep.subr.bf16.mxu0 %v9556_v55  ;;  %v9593_v44 = vcombine.low %v3119_v36, %v3123_v50  ;;  %v9602_v55 = vcombine.high %v3127_v35, %v3131_v39  ;;  %v3159_v12 = vld [vmem:[%s14312_s7 + $0x590] sm:$0xff]  ;;  %v3172_v36 = vld [vmem:[%s14312_s7 + $0x5f8] sm:$0xff] }
 0x4a5   :  { %v3163_v13 = vld [vmem:[%s14312_s7 + $0x5b0] sm:$0xff] }
 0x4a6   :  { %v9633_v50 = vcombine.low %v3159_v12, %v3163_v13 }
 0x4a7   :  { %6324 = vmatpush1.bf16.msra.mxu1 %v9553_v41  ;;  %6486 = vmatpush1.bf16.msra.mxu0 %v9555_v47  ;;  %v3140_v41 = vld [vmem:[%s14312_s7 + $0x4f8] sm:$0xff]  ;;  %v9601_v47 = vcombine.low %v3127_v35, %v3131_v39 }
 0x4a8   :  { %6325 = vmatprep.subr.bf16.mxu1 %v9562_v49  ;;  %6487 = vmatprep.subr.bf16.mxu0 %v9564_v57  ;;  %v9604_v49 = vcombine.high %v3128_v8, %v3132_v45  ;;  %v9612_v53 = vcombine.high %v3136_v46, %v3140_v41  ;;  %v10776_v45 = vld [vmem:[%s14314_s9 + $0x140] sm:$0xff]  }
 0x4ab   :  { %6326 = vmatpush1.bf16.msra.mxu1 %v9561_v16  ;;  %6488 = vmatpush1.bf16.msra.mxu0 %v9563_v54  ;;  %v9618_v54 = vcombine.high %v3143_v59, %v3147_v51 }
 0x4ac   :  { %6327 = vmatprep.subr.bf16.mxu1 %v9570_v31  ;;  %6489 = vmatprep.subr.bf16.mxu0 %v9572_v26  ;;  %v3144_v31 = vld [vmem:[%s14312_s7 + $0x518] sm:$0xff] }
 0x4ad   :  { %v3148_v26 = vld [vmem:[%s14312_s7 + $0x538] sm:$0xff] }
 0x4af   :  { %6328 = vmatpush1.bf16.msra.mxu1 %v9569_v7  ;;  %6490 = vmatpush1.bf16.msra.mxu0 %v9571_v15  ;;  %v9620_v7 = vcombine.high %v3144_v31, %v3148_v26  ;;  %v9619_v15 = vcombine.low %v3144_v31, %v3148_v26  ;;  %v10782_v26 = vld [vmem:[%s14314_s9 + $0x208] sm:$0xff]  }
 0x4b0   :  { %6329 = vmatprep.subr.bf16.mxu1 %v9578_v11  ;;  %6491 = vmatprep.subr.bf16.mxu0 %v9580_v27  ;;  %v9628_v27 = vcombine.high %v3152_v63, %v3156_v0  ;;  %v10785_v63 = vld [vmem:[%s14314_s9 + $0x198] sm:$0xff]   ;;  %v10786_v0 = vld [vmem:[%s14314_s9 + $0x210] sm:$0xff]  }
 0x4b3   :  { %6330 = vmatpush1.bf16.msra.mxu1 %v9577_v17  ;;  %6492 = vmatpush1.bf16.msra.mxu0 %v9579_v10  ;;  %v3160_v17 = vld [vmem:[%s14312_s7 + $0x598] sm:$0xff] }
 0x4b4   :  { %6380 = vmatprep.subr.bf16.mxu1 %v9586_v23  ;;  %6542 = vmatprep.subr.bf16.mxu0 %v9588_v34  ;;  %v3164_v10 = vld [vmem:[%s14312_s7 + $0x5b8] sm:$0xff]  ;;  %v3171_v23 = vld [vmem:[%s14312_s7 + $0x5f0] sm:$0xff] }
 0x4b5   :  { %v3168_v34 = vld [vmem:[%s14312_s7 + $0x5d8] sm:$0xff]  ;;  %v9635_v25 = vcombine.low %v3160_v17, %v3164_v10 }
 0x4b6   :  { %6332 = vmatmul.mubr.bf16.vlgmr.msra.gmra.mrb[56].mxu1 %v13005_v20  ;;  %6494 = vmatmul.mubr.bf16.vlgmr.msra.gmra.mrb[60].mxu0 %v13005_v20  ;;  %v3135_v20 = vld [vmem:[%s14312_s7 + $0x4d0] sm:$0xff]  ;;  %v9643_v35 = vcombine.low %v3168_v34, %v3172_v36 }
 0x4b7   :  { %6341 = vmatprep.mubr.bf16.mxu1 %v13015_v52  ;;  %6381 = vmatpush1.bf16.msra.mxu1 %v9585_v24  ;;  %v9636_v24 = vcombine.high %v3160_v17, %v3164_v10  ;;  %v10796_v17 = vld [vmem:[%s14314_s9 + $0x168] sm:$0xff]  }
 0x4b8   :  { %6503 = vmatprep.mubr.bf16.mxu0 %v13015_v52  ;;  %6382 = vmatprep.subr.bf16.mxu1 %v9594_v32  ;;  %v3139_v52 = vld [vmem:[%s14312_s7 + $0x4f0] sm:$0xff]  ;;  %v9644_v32 = vcombine.high %v3168_v34, %v3172_v36  ;;  %v10798_v10 = vld [vmem:[%s14314_s9 + $0x1e8] sm:$0xff]  }
 0x4b9   :  { %6543 = vmatpush1.bf16.msra.mxu0 %v9587_v33  ;;  %v9610_v57 = vcombine.high %v3135_v20, %v3139_v52  ;;  %v9609_v16 = vcombine.low %v3135_v20, %v3139_v52  ;;  %v10777_v20 = vld [vmem:[%s14314_s9 + $0x188] sm:$0xff]   ;;  %v10778_v52 = vld [vmem:[%s14314_s9 + $0x200] sm:$0xff]  }
 0x4ba   :  { %6544 = vmatprep.subr.bf16.mxu0 %v9596_v42 }
 0x4bb   :  { %6383 = vmatpush1.bf16.msra.mxu1 %v9593_v44 }
 0x4bc   :  { %6384 = vmatprep.subr.bf16.mxu1 %v9602_v55 }
 0x4bd   :  { %6545 = vmatpush1.bf16.msra.mxu0 %v9595_v29 }
 0x4be   :  { %6342 = vmatmul.mubr.bf16.gmra.mrb[60].mxu1 %v13037_v9  ;;  %6504 = vmatmul.mubr.bf16.gmra.mrb[64].mxu0 %v13037_v9  ;;  %v9611_v9 = vcombine.low %v3136_v46, %v3140_v41  ;;  %v10779_v46 = vld [vmem:[%s14314_s9 + $0x148] sm:$0xff]   ;;  %v10780_v41 = vld [vmem:[%s14314_s9 + $0x1c0] sm:$0xff]  }
 0x4bf   :  { %6351 = vmatprep.mubr.bf16.mxu1 %v13047_v48  ;;  %6513 = vmatprep.mubr.bf16.mxu0 %v13047_v48  ;;  %v3151_v48 = vld [vmem:[%s14312_s7 + $0x550] sm:$0xff] }
 0x4c0   :  { %6385 = vmatpush1.bf16.msra.mxu1 %v9601_v47  ;;  %6546 = vmatprep.subr.bf16.mxu0 %v9604_v49  ;;  %v9626_v11 = vcombine.high %v3151_v48, %v3155_v56  ;;  %v9625_v14 = vcombine.low %v3151_v48, %v3155_v56  ;;  %v10783_v48 = vld [vmem:[%s14314_s9 + $0x150] sm:$0xff]   ;;  %v10784_v56 = vld [vmem:[%s14314_s9 + $0x1c8] sm:$0xff]  }
 0x4c1   :  { %6386 = vmatprep.subr.bf16.mxu1 %v9610_v57  ;;  %6547 = vmatpush1.bf16.msra.mxu0 %v9603_v58 }
 0x4c2   :  { %6548 = vmatprep.subr.bf16.mxu0 %v9612_v53 }
 0x4c4   :  { %6387 = vmatpush1.bf16.msra.mxu1 %v9609_v16 }
 0x4c5   :  { %6388 = vmatprep.subr.bf16.mxu1 %v9618_v54  ;;  %6549 = vmatpush1.bf16.msra.mxu0 %v9611_v9 }
 0x4c6   :  { %6352 = vmatmul.mubr.bf16.gmra.mrb[64].mxu1 %v13069_v30  ;;  %6514 = vmatmul.mubr.bf16.gmra.mrb[68].mxu0 %v13069_v30  ;;  %v9634_v30 = vcombine.high %v3159_v12, %v3163_v13  ;;  %v10793_v12 = vld [vmem:[%s14314_s9 + $0x220] sm:$0xff]  }
 0x4c7   :  { %6361 = vmatprep.mubr.bf16.mxu1 %v13079_v43  ;;  %6523 = vmatprep.mubr.bf16.mxu0 %v13079_v43  ;;  %v3167_v43 = vld [vmem:[%s14312_s7 + $0x5d0] sm:$0xff]  ;;  %v10791_v13 = vld [vmem:[%s14314_s9 + $0x160] sm:$0xff]  }
 0x4c8   :  { %6389 = vmatpush1.bf16.msra.mxu1 %v9617_v37  ;;  %6550 = vmatprep.subr.bf16.mxu0 %v9620_v7  ;;  %v9642_v28 = vcombine.high %v3167_v43, %v3171_v23  ;;  %v9641_v33 = vcombine.low %v3167_v43, %v3171_v23  ;;  %v10788_v37 = vld [vmem:[%s14314_s9 + $0x1d0] sm:$0xff]   ;;  %v10787_v7 = vld [vmem:[%s14314_s9 + $0x158] sm:$0xff]  }
 0x4c9   :  { %6390 = vmatprep.subr.bf16.mxu1 %v9626_v11  ;;  %6551 = vmatpush1.bf16.msra.mxu0 %v9619_v15  ;;  %v10790_v15 = vld [vmem:[%s14314_s9 + $0x218] sm:$0xff]   ;;  %v10799_v43 = vld [vmem:[%s14314_s9 + $0x1b0] sm:$0xff]  }
 0x4ca   :  { %6552 = vmatprep.subr.bf16.mxu0 %v9628_v27  ;;  %v10792_v11 = vld [vmem:[%s14314_s9 + $0x1d8] sm:$0xff]   ;;  %v10789_v27 = vld [vmem:[%s14314_s9 + $0x1a0] sm:$0xff]   ;;  %v10801_v23 = vld [vmem:[%s14314_s9 + $0x230] sm:$0xff]  }
 0x4cc   :  { %6391 = vmatpush1.bf16.msra.mxu1 %v9625_v14  ;;  %v10795_v14 = vld [vmem:[%s14314_s9 + $0x1e0] sm:$0xff]  }
 0x4cd   :  { %6553 = vmatpush1.bf16.msra.mxu0 %v9627_v22  ;;  %6392 = vmatprep.subr.bf16.mxu1 %v9634_v30  ;;  %v10794_v22 = vld [vmem:[%s14314_s9 + $0x1a8] sm:$0xff]  }
 0x4ce   :  { %6362 = vmatmul.mubr.bf16.gmra.mrb[68].mxu1 %v13101_v60  ;;  %6524 = vmatmul.mubr.bf16.gmra.mrb[72].mxu0 %v13101_v60  ;;  %v10797_v30 = vld [vmem:[%s14314_s9 + $0x228] sm:$0xff]  }
 0x4cf   :  { %6371 = vmatprep.mubr.bf16.mxu1 %v13105_v61  ;;  %6533 = vmatprep.mubr.bf16.mxu0 %v13105_v61 }
 0x4d0   :  { %6393 = vmatpush1.bf16.msra.mxu1 %v9633_v50  ;;  %6554 = vmatprep.subr.bf16.mxu0 %v9636_v24  ;;  %v10800_v50 = vld [vmem:[%s14314_s9 + $0x170] sm:$0xff]  }
 0x4d1   :  { %6555 = vmatpush1.bf16.msra.mxu0 %v9635_v25  ;;  %6394 = vmatprep.subr.bf16.mxu1 %v9642_v28  ;;  %v10802_v24 = vld [vmem:[%s14314_s9 + $0x1f0] sm:$0xff]  }
 0x4d2   :  { %6556 = vmatprep.subr.bf16.mxu0 %v9644_v32  ;;  %v13560_v32 = vld [vmem:[%s14315_s8] sm:$0xff] }
 0x4d4   :  { %6395 = vmatpush1.bf16.msra.mxu1 %v9641_v33 }
 0x4d5   :  { %6557 = vmatpush1.bf16.msra.mxu0 %v9643_v35 }
 0x4d6   :  { %6372 = vmatmul.mubr.bf16.gmra.mrb[88].mxu1 %v13121_v1  ;;  %6534 = vmatmul.mubr.bf16.gmra.mrb[92].mxu0 %v13121_v1  ;;  %v10775_v1 = vld [vmem:[%s14314_s9 + $0x180] sm:$0xff]  }
 0x4d7   :  { %6412 = vmatprep.mubr.bf16.mxu1 %v13125_v2  ;;  %6574 = vmatprep.mubr.bf16.mxu0 %v13125_v2 }
 0x4d8   :  { %9822 = vmatprep.subr.bf16.mxu1 %v10775_v1  ;;  %9892 = vmatprep.subr.bf16.mxu0 %v10778_v52  ;;  %v13584_v1 = vrot.slane %v13560_v32, %v11216_v21 }
 0x4d9   :  { %v4773_v60 = vpop.f32.mrb[72].mxu1  ;;  %v4935_v39 = vpop.f32.mrb[76].mxu0 }
 0x4da   :  { %v4775_v61 = vpop.f32.mrb[73].mxu1  ;;  %v4937_v42 = vpop.f32.mrb[77].mxu0 }
 0x4db   :  { %v4777_v44 = vpop.f32.mrb[74].mxu1  ;;  %v4939_v55 = vpop.f32.mrb[78].mxu0 }
 0x4dc   :  { %v4778_v29 = vpop.f32.mrb[75].mxu1  ;;  %v4940_v8 = vpop.f32.mrb[79].mxu0  ;;  %v10804_v44 = vld [vmem:[%s14314_s9 + $0x178] sm:$0xff]  }
 0x4dd   :  { %v10806_v55 = vld [vmem:[%s14314_s9 + $0x1f8] sm:$0xff]   ;;  %v13576_v29 = vrot.slane %v13560_v32, %v11210_v19  ;;  %v13580_v8 = vrot.slane %v13560_v32, %v11605_v38 }
 0x4de   :  { %6413 = vmatmul.mubr.bf16.vlgmr.msra.gmra.mrb[56].mxu1 %v13125_v2  ;;  %6575 = vmatmul.mubr.bf16.vlgmr.msra.gmra.mrb[60].mxu0 %v13125_v2 }
 0x4df   :  { %6422 = vmatprep.mubr.bf16.mxu1 %v13125_v2  ;;  %6584 = vmatprep.mubr.bf16.mxu0 %v13125_v2 }
 0x4e0   :  { %9823 = vmatpush3.bf16.msra.mxu1 %v10776_v45  ;;  %9893 = vmatpush3.bf16.msra.mxu0 %v10780_v41  ;;  %v13588_v45 = vrot.slane %v13560_v32, %v11611_v40 }
 0x4e1   :  { %9824 = vmatprep.subr.bf16.mxu1 %v10777_v20  ;;  %9894 = vmatprep.subr.bf16.mxu0 %v10782_v26 }
 0x4e4   :  { %9825 = vmatpush3.bf16.msra.mxu1 %v10779_v46  ;;  %9895 = vmatpush3.bf16.msra.mxu0 %v10784_v56 }
 0x4e5   :  { %9896 = vmatprep.subr.bf16.mxu0 %v10786_v0 }
 0x4e6   :  { %6423 = vmatmul.mubr.bf16.gmra.mrb[60].mxu1 %v13125_v2  ;;  %6585 = vmatmul.mubr.bf16.gmra.mrb[64].mxu0 %v13125_v2 }
 0x4e7   :  { %6432 = vmatprep.mubr.bf16.mxu1 %v13125_v2  ;;  %6594 = vmatprep.mubr.bf16.mxu0 %v13125_v2 }
 0x4e8   :  { %9897 = vmatpush3.bf16.msra.mxu0 %v10788_v37 }
 0x4e9   :  { %9898 = vmatprep.subr.bf16.mxu0 %v10790_v15  ;;  %v10931_v15 = vmov 0.0  }
 0x4ec   :  { %9899 = vmatpush3.bf16.msra.mxu0 %v10792_v11 }
 0x4ed   :  { %9900 = vmatprep.subr.bf16.mxu0 %v10793_v12 }
 0x4ee   :  { %6433 = vmatmul.mubr.bf16.gmra.mrb[64].mxu1 %v13125_v2  ;;  %6595 = vmatmul.mubr.bf16.gmra.mrb[68].mxu0 %v13125_v2 }
 0x4ef   :  { %6442 = vmatprep.mubr.bf16.mxu1 %v13125_v2  ;;  %6604 = vmatprep.mubr.bf16.mxu0 %v13125_v2 }
 0x4f0   :  { %9901 = vmatpush3.bf16.msra.mxu0 %v10795_v14 }
 0x4f1   :  { %9902 = vmatprep.subr.bf16.mxu0 %v10797_v30 }
 0x4f4   :  { %9903 = vmatpush3.bf16.msra.mxu0 %v10798_v10 }
 0x4f5   :  { %9904 = vmatprep.subr.bf16.mxu0 %v10801_v23 }
 0x4f6   :  { %6443 = vmatmul.mubr.bf16.gmra.mrb[68].mxu1 %v13125_v2  ;;  %6605 = vmatmul.mubr.bf16.gmra.mrb[72].mxu0 %v13125_v2 }
 0x4f7   :  { %6452 = vmatprep.mubr.bf16.mxu1 %v13125_v2  ;;  %6614 = vmatprep.mubr.bf16.mxu0 %v13125_v2 }
 0x4f8   :  { %9905 = vmatpush3.bf16.msra.mxu0 %v10802_v24 }
 0x4fe   :  { %6453 = vmatmul.mubr.bf16.gmra.mrb[92].mxu1 %v13253_v62  ;;  %6615 = vmatmul.mubr.bf16.gmra.mrb[96].mxu0 %v13253_v62  ;;  %v10781_v62 = vld [vmem:[%s14314_s9 + $0x190] sm:$0xff]  }
 0x4ff   :  { %9826 = vmatprep.subr.bf16.mxu1 %v10781_v62 }
 0x500   :  { %9827 = vmatpush3.bf16.msra.mxu1 %v10783_v48 }
 0x501   :  { %v4854_v47 = vpop.f32.mrb[76].mxu1  ;;  %v5016_v49 = vpop.f32.mrb[80].mxu0  ;;  %9828 = vmatprep.subr.bf16.mxu1 %v10785_v63 }
 0x502   :  { %v13483_v57 = vadd.f32 %v4854_v47, %v4773_v60  ;;  %v13485_v58 = vadd.f32 %v5016_v49, %v4935_v39  ;;  %v4856_v59 = vpop.f32.mrb[77].mxu1  ;;  %v5018_v51 = vpop.f32.mrb[81].mxu0 }
 0x503   :  { %v13487_v53 = vadd.f32 %v4856_v59, %v4775_v61  ;;  %v13489_v16 = vadd.f32 %v5018_v51, %v4937_v42  ;;  %v4858_v54 = vpop.f32.mrb[78].mxu1  ;;  %v5020_v9 = vpop.f32.mrb[82].mxu0  ;;  %v10803_v61 = vld [vmem:[%s14314_s9 + $0x1b8] sm:$0xff]  }
 0x504   :  { %v4859_v31 = vpop.f32.mrb[79].mxu1  ;;  %v5021_v2 = vpop.f32.mrb[83].mxu0  ;;  %9829 = vmatpush3.bf16.msra.mxu1 %v10787_v7  ;;  %v10805_v42 = vld [vmem:[%s14314_s9 + $0x238] sm:$0xff]  }
 0x505   :  { %9830 = vmatprep.subr.bf16.mxu1 %v10789_v27  ;;  %9906 = vmatprep.subr.bf16.mxu0 %v10805_v42 }
 0x506   :  { %9907 = vmatpush3.bf16.msra.mxu0 %v10806_v55  ;;  %v10808_v55 = vld [vmem:[%s14314_s9 + $0x40] sm:$0xff]  }
 0x507   :  { %9979 = vmatprep.subr.bf16.mxu0 %v10808_v55 }
 0x508   :  { %9831 = vmatpush3.bf16.msra.mxu1 %v10791_v13 }
 0x509   :  { %9832 = vmatprep.subr.bf16.mxu1 %v10794_v22 }
 0x50c   :  { %9833 = vmatpush3.bf16.msra.mxu1 %v10796_v17 }
 0x50d   :  { %9834 = vmatprep.subr.bf16.mxu1 %v10799_v43 }
 0x510   :  { %9835 = vmatpush3.bf16.msra.mxu1 %v10800_v50 }
 0x511   :  { %9836 = vmatprep.subr.bf16.mxu1 %v10803_v61 }
 0x514   :  { %9837 = vmatpush3.bf16.msra.mxu1 %v10804_v44 }
 0x515   :  { %10136 = vmatprep.subr.bf16.mxu1 %v10931_v15 }
 0x541   :  { %v6057_v34 = vpop.f32.mrb[80].mxu1  ;;  %v6215_v36 = vpop.f32.mrb[84].mxu0 }
 0x542   :  { %v6058_v25 = vpop.f32.mrb[81].mxu1  ;;  %v6216_v28 = vpop.f32.mrb[85].mxu0 }
 0x543   :  { %v6059_v33 = vpop.f32.mrb[82].mxu1  ;;  %v6217_v35 = vpop.f32.mrb[86].mxu0 }
 0x544   :  { %v6060_v60 = vpop.f32.mrb[83].mxu1  ;;  %v6218_v39 = vpop.f32.mrb[87].mxu0 }
 0x549   :  { %v6096_v20 = vpop.f32.mrb[32].mxu1  ;;  %v6254_v52 = vpop.f32.mrb[36].mxu0 }
 0x54a   :  { %v6665_v19 = vadd.f32 %v13576_v29, %v6096_v20  ;;  %v6667_v46 = vadd.f32 %v13580_v8, %v6254_v52  ;;  %v6098_v38 = vpop.f32.mrb[33].mxu1  ;;  %v6256_v41 = vpop.f32.mrb[37].mxu0 }
 0x54b   :  { %v6666_v47 = vadd.f32 %v13584_v1, %v6098_v38  ;;  %v6668_v49 = vadd.f32 %v13588_v45, %v6256_v41  ;;  %v6100_v21 = vpop.f32.mrb[34].mxu1  ;;  %v6258_v59 = vpop.f32.mrb[38].mxu0 }
 0x54c   :  { %v6673_v51 = vadd.f32 %v13576_v29, %v6100_v21  ;;  %v6675_v40 = vadd.f32 %v13580_v8, %v6258_v59  ;;  %v6102_v54 = vpop.f32.mrb[35].mxu1  ;;  %v6260_v9 = vpop.f32.mrb[39].mxu0  ;;  %v6733_v31 = vmax.f32 %v6665_v19, 0.0  ;;  %v6735_v26 = vmax.f32 %v6667_v46, 0.0 }
 0x54d   :  { %v6674_v2 = vadd.f32 %v13584_v1, %v6102_v54  ;;  %v6676_v62 = vadd.f32 %v13588_v45, %v6260_v9  ;;  %v6734_v63 = vmax.f32 %v6666_v47, 0.0  ;;  %v6736_v0 = vmax.f32 %v6668_v49, 0.0 }
 0x54e   :  { %v6741_v48 = vmax.f32 %v6673_v51, 0.0  ;;  %v6743_v56 = vmax.f32 %v6675_v40, 0.0 }
 0x54f   :  { %v6742_v37 = vmax.f32 %v6674_v2, 0.0  ;;  %v6744_v7 = vmax.f32 %v6676_v62, 0.0 }
 0x550   :  { %v6801_v11 = vpack.c.bf16 %v6741_v48, %v6733_v31  ;;  %v6803_v27 = vpack.c.bf16 %v6743_v56, %v6735_v26 }
 0x551   :  { %v6802_v12 = vpack.c.bf16 %v6742_v37, %v6734_v63  ;;  %v6804_v13 = vpack.c.bf16 %v6744_v7, %v6736_v0  ;;  %v6106_v14 = vpop.f32.mrb[36].mxu1  ;;  %v6264_v22 = vpop.f32.mrb[40].mxu0 }
 0x552   :  { %v6841_v30 = vrot.slane %v6801_v11, 4  ;;  %6869 = vst [vmem:[#allocation4 + $0x28] sm:$0xf0] %v6801_v11  ;;  %v6843_v17 = vrot.slane %v6803_v27, 4  ;;  %6871 = vst [vmem:[#allocation4 + $0x38] sm:$0xf0] %v6803_v27  ;;  %v6681_v10 = vadd.f32 %v13576_v29, %v6106_v14  ;;  %v6683_v43 = vadd.f32 %v13580_v8, %v6264_v22 }
 0x553   :  { %v6108_v23 = vpop.f32.mrb[37].mxu1  ;;  %v6266_v34 = vpop.f32.mrb[41].mxu0  ;;  %v6842_v36 = vrot.slane %v6802_v12, 4  ;;  %6870 = vst [vmem:[#allocation4 + $0x30] sm:$0xf0] %v6802_v12  ;;  %v6844_v50 = vrot.slane %v6804_v13, 4 }
 0x554   :  { %6872 = vst [vmem:[#allocation4 + $0x40] sm:$0xf0] %v6804_v13  ;;  %v6682_v24 = vadd.f32 %v13584_v1, %v6108_v23  ;;  %v6684_v25 = vadd.f32 %v13588_v45, %v6266_v34  ;;  %v6110_v28 = vpop.f32.mrb[38].mxu1  ;;  %v6268_v33 = vpop.f32.mrb[42].mxu0  ;;  %6849 = vst [vmem:[#allocation4] sm:$0xf0] %v6841_v30 }
 0x555   :  { %6851 = vst [vmem:[#allocation4 + $0x10] sm:$0xf0] %v6843_v17  ;;  %v6689_v35 = vadd.f32 %v13576_v29, %v6110_v28  ;;  %v6691_v60 = vadd.f32 %v13580_v8, %v6268_v33  ;;  %v6112_v39 = vpop.f32.mrb[39].mxu1  ;;  %v6270_v61 = vpop.f32.mrb[43].mxu0  ;;  %6850 = vst [vmem:[#allocation4 + $0x8] sm:$0xf0] %v6842_v36 }
 0x556   :  { %6852 = vst [vmem:[#allocation4 + $0x18] sm:$0xf0] %v6844_v50  ;;  %v6690_v42 = vadd.f32 %v13584_v1, %v6112_v39  ;;  %v6692_v44 = vadd.f32 %v13588_v45, %v6270_v61  ;;  %v6749_v20 = vmax.f32 %v6681_v10, 0.0  ;;  %v6751_v52 = vmax.f32 %v6683_v43, 0.0 }
 0x557   :  { %v6757_v19 = vmax.f32 %v6689_v35, 0.0  ;;  %v6759_v46 = vmax.f32 %v6691_v60, 0.0  ;;  %v6750_v38 = vmax.f32 %v6682_v24, 0.0  ;;  %v6752_v41 = vmax.f32 %v6684_v25, 0.0 }
 0x558   :  { %v6758_v47 = vmax.f32 %v6690_v42, 0.0  ;;  %v6760_v49 = vmax.f32 %v6692_v44, 0.0 }
 0x559   :  { %v6809_v21 = vpack.c.bf16 %v6757_v19, %v6749_v20  ;;  %v6811_v59 = vpack.c.bf16 %v6759_v46, %v6751_v52  ;;  %v6116_v54 = vpop.f32.mrb[40].mxu1  ;;  %v6274_v9 = vpop.f32.mrb[44].mxu0 }
 0x55a   :  { %v6810_v51 = vpack.c.bf16 %v6758_v47, %v6750_v38  ;;  %v6812_v40 = vpack.c.bf16 %v6760_v49, %v6752_v41  ;;  %v6697_v62 = vadd.f32 %v13576_v29, %v6116_v54  ;;  %v6699_v26 = vadd.f32 %v13580_v8, %v6274_v9  ;;  %v6118_v48 = vpop.f32.mrb[41].mxu1  ;;  %v6276_v56 = vpop.f32.mrb[45].mxu0 }
 0x55b   :  { %v6881_v31 = vrot.slane %v6809_v21, 4  ;;  %6909 = vst [vmem:[#allocation4 + $0x78] sm:$0xf0] %v6809_v21  ;;  %v6883_v2 = vrot.slane %v6811_v59, 4  ;;  %6911 = vst [vmem:[#allocation4 + $0x88] sm:$0xf0] %v6811_v59  ;;  %v6698_v37 = vadd.f32 %v13584_v1, %v6118_v48  ;;  %v6700_v7 = vadd.f32 %v13588_v45, %v6276_v56 }
 0x55c   :  { %v6882_v63 = vrot.slane %v6810_v51, 4  ;;  %6910 = vst [vmem:[#allocation4 + $0x80] sm:$0xf0] %v6810_v51  ;;  %v6884_v0 = vrot.slane %v6812_v40, 4  ;;  %6912 = vst [vmem:[#allocation4 + $0x90] sm:$0xf0] %v6812_v40 }
 0x55d   :  { %v6120_v11 = vpop.f32.mrb[42].mxu1  ;;  %v6278_v27 = vpop.f32.mrb[46].mxu0  ;;  %6889 = vst [vmem:[#allocation4 + $0x50] sm:$0xf0] %v6881_v31  ;;  %6891 = vst [vmem:[#allocation4 + $0x60] sm:$0xf0] %v6883_v2 }
 0x55e   :  { %v6705_v12 = vadd.f32 %v13576_v29, %v6120_v11  ;;  %v6707_v13 = vadd.f32 %v13580_v8, %v6278_v27  ;;  %v6122_v14 = vpop.f32.mrb[43].mxu1  ;;  %v6280_v22 = vpop.f32.mrb[47].mxu0  ;;  %6890 = vst [vmem:[#allocation4 + $0x58] sm:$0xf0] %v6882_v63  ;;  %6892 = vst [vmem:[#allocation4 + $0x68] sm:$0xf0] %v6884_v0 }
 0x55f   :  { %v6706_v30 = vadd.f32 %v13584_v1, %v6122_v14  ;;  %v6708_v17 = vadd.f32 %v13588_v45, %v6280_v22  ;;  %v6765_v10 = vmax.f32 %v6697_v62, 0.0  ;;  %v6767_v43 = vmax.f32 %v6699_v26, 0.0 }
 0x560   :  { %v6773_v23 = vmax.f32 %v6705_v12, 0.0  ;;  %v6775_v34 = vmax.f32 %v6707_v13, 0.0  ;;  %v6766_v36 = vmax.f32 %v6698_v37, 0.0  ;;  %v6768_v50 = vmax.f32 %v6700_v7, 0.0 }
 0x561   :  { %v6774_v24 = vmax.f32 %v6706_v30, 0.0  ;;  %v6776_v25 = vmax.f32 %v6708_v17, 0.0  ;;  %v6126_v39 = vpop.f32.mrb[44].mxu1  ;;  %v6284_v61 = vpop.f32.mrb[48].mxu0 }
 0x562   :  { %v6817_v28 = vpack.c.bf16 %v6773_v23, %v6765_v10  ;;  %v6819_v33 = vpack.c.bf16 %v6775_v34, %v6767_v43  ;;  %v6713_v55 = vadd.f32 %v13576_v29, %v6126_v39  ;;  %v6715_v20 = vadd.f32 %v13580_v8, %v6284_v61  ;;  %v6128_v52 = vpop.f32.mrb[45].mxu1  ;;  %v6286_v19 = vpop.f32.mrb[49].mxu0 }
 0x563   :  { %v6818_v35 = vpack.c.bf16 %v6774_v24, %v6766_v36  ;;  %v6820_v60 = vpack.c.bf16 %v6776_v25, %v6768_v50  ;;  %v6714_v41 = vadd.f32 %v13584_v1, %v6128_v52  ;;  %v6716_v47 = vadd.f32 %v13588_v45, %v6286_v19  ;;  %v6130_v49 = vpop.f32.mrb[46].mxu1  ;;  %v6288_v21 = vpop.f32.mrb[50].mxu0 }
 0x564   :  { %v6921_v42 = vrot.slane %v6817_v28, 4  ;;  %6949 = vst [vmem:[#allocation4 + $0xc8] sm:$0xf0] %v6817_v28  ;;  %v6923_v44 = vrot.slane %v6819_v33, 4  ;;  %6951 = vst [vmem:[#allocation4 + $0xd8] sm:$0xf0] %v6819_v33  ;;  %v6721_v59 = vadd.f32 %v13576_v29, %v6130_v49  ;;  %v6723_v51 = vadd.f32 %v13580_v8, %v6288_v21 }
 0x565   :  { %v6922_v46 = vrot.slane %v6818_v35, 4  ;;  %6950 = vst [vmem:[#allocation4 + $0xd0] sm:$0xf0] %v6818_v35  ;;  %v6924_v38 = vrot.slane %v6820_v60, 4  ;;  %6952 = vst [vmem:[#allocation4 + $0xe0] sm:$0xf0] %v6820_v60 }
 0x566   :  { %6929 = vst [vmem:[#allocation4 + $0xa0] sm:$0xf0] %v6921_v42  ;;  %6931 = vst [vmem:[#allocation4 + $0xb0] sm:$0xf0] %v6923_v44  ;;  %v6132_v40 = vpop.f32.mrb[47].mxu1  ;;  %v6290_v54 = vpop.f32.mrb[51].mxu0 }
 0x567   :  { %6930 = vst [vmem:[#allocation4 + $0xa8] sm:$0xf0] %v6922_v46  ;;  %6932 = vst [vmem:[#allocation4 + $0xb8] sm:$0xf0] %v6924_v38  ;;  %v6722_v9 = vadd.f32 %v13584_v1, %v6132_v40  ;;  %v6724_v31 = vadd.f32 %v13588_v45, %v6290_v54  ;;  %v6781_v2 = vmax.f32 %v6713_v55, 0.0  ;;  %v6783_v62 = vmax.f32 %v6715_v20, 0.0 }
 0x568   :  { %v6789_v26 = vmax.f32 %v6721_v59, 0.0  ;;  %v6791_v48 = vmax.f32 %v6723_v51, 0.0  ;;  %v6782_v56 = vmax.f32 %v6714_v41, 0.0  ;;  %v6784_v63 = vmax.f32 %v6716_v47, 0.0 }
 0x569   :  { %v6790_v0 = vmax.f32 %v6722_v9, 0.0  ;;  %v6792_v37 = vmax.f32 %v6724_v31, 0.0  ;;  %v6136_v27 = vpop.f32.mrb[84].mxu1  ;;  %v6294_v12 = vpop.f32.mrb[88].mxu0 }
 0x56a   :  { %v6825_v7 = vpack.c.bf16 %v6789_v26, %v6781_v2  ;;  %v6827_v29 = vpack.c.bf16 %v6791_v48, %v6783_v62  ;;  %v6137_v1 = vpop.f32.mrb[85].mxu1  ;;  %v6295_v45 = vpop.f32.mrb[89].mxu0 }
 0x56b   :  { %v6826_v11 = vpack.c.bf16 %v6790_v0, %v6782_v56  ;;  %v6828_v8 = vpack.c.bf16 %v6792_v37, %v6784_v63  ;;  %v6138_v17 = vpop.f32.mrb[86].mxu1  ;;  %v6296_v10 = vpop.f32.mrb[90].mxu0 }
 0x56c   :  { %v6961_v13 = vrot.slane %v6825_v7, 4  ;;  %6989 = vst [vmem:[#allocation4 + $0x118] sm:$0xf0] %v6825_v7  ;;  %v6963_v14 = vrot.slane %v6827_v29, 4  ;;  %6991 = vst [vmem:[#allocation4 + $0x128] sm:$0xf0] %v6827_v29 }
 0x56d   :  { %v6962_v22 = vrot.slane %v6826_v11, 4  ;;  %6990 = vst [vmem:[#allocation4 + $0x120] sm:$0xf0] %v6826_v11  ;;  %v6964_v30 = vrot.slane %v6828_v8, 4  ;;  %6992 = vst [vmem:[#allocation4 + $0x130] sm:$0xf0] %v6828_v8 }
 0x56e   :  { %6969 = vst [vmem:[#allocation4 + $0xf0] sm:$0xf0] %v6961_v13  ;;  %6971 = vst [vmem:[#allocation4 + $0x100] sm:$0xf0] %v6963_v14  ;;  %v6139_v43 = vpop.f32.mrb[87].mxu1  ;;  %v6297_v23 = vpop.f32.mrb[91].mxu0 }
 0x56f   :  { %6970 = vst [vmem:[#allocation4 + $0xf8] sm:$0xf0] %v6962_v22  ;;  %6972 = vst [vmem:[#allocation4 + $0x108] sm:$0xf0] %v6964_v30 }
 0x5a9   :  { %v6373_v34 = vpop.f32.mrb[88].mxu1  ;;  %v6535_v36 = vpop.f32.mrb[92].mxu0 }
 0x5aa   :  { %v13627_v50 = vadd.f32 %v6373_v34, %v13483_v57  ;;  %v13630_v24 = vadd.f32 %v6535_v36, %v13485_v58  ;;  %v6375_v25 = vpop.f32.mrb[89].mxu1  ;;  %v6537_v28 = vpop.f32.mrb[93].mxu0  ;;  %v13641_v57 = vrot.slane %v13560_v32, %v308_v3  ;;  %v13646_v58 = vrot.slane %v13560_v32, %v316_v4  ;;  %v13674_v36 = vld [vmem:[#allocation4 + $0x8] sm:$0xf0] }
 0x5ab   :  { %v13633_v33 = vadd.f32 %v6375_v25, %v13487_v53  ;;  %v13636_v35 = vadd.f32 %v6537_v28, %v13489_v16  ;;  %v6377_v60 = vpop.f32.mrb[90].mxu1  ;;  %v6539_v39 = vpop.f32.mrb[94].mxu0  ;;  %v13651_v53 = vrot.slane %v13560_v32, %v312_v5  ;;  %v13656_v16 = vrot.slane %v13560_v32, %v320_v6  ;;  %v13676_v25 = vld [vmem:[#allocation4] sm:$0xf0] }
 0x5ac   :  { %v6378_v61 = vpop.f32.mrb[91].mxu1  ;;  %v6540_v42 = vpop.f32.mrb[95].mxu0 }
 0x5ad   :  { %v13678_v42 = vld [vmem:[#allocation4 + $0x18] sm:$0xf0] }
 0x5b1   :  { %v6414_v44 = vpop.f32.mrb[56].mxu1  ;;  %v6576_v55 = vpop.f32.mrb[60].mxu0 }
 0x5b2   :  { %v6669_v3 = vadd.f32 %v13641_v57, %v6414_v44  ;;  %v6671_v20 = vadd.f32 %v13646_v58, %v6576_v55  ;;  %v6416_v52 = vpop.f32.mrb[57].mxu1  ;;  %v6578_v19 = vpop.f32.mrb[61].mxu0 }
 0x5b3   :  { %v6670_v4 = vadd.f32 %v13651_v53, %v6416_v52  ;;  %v6672_v46 = vadd.f32 %v13656_v16, %v6578_v19  ;;  %v6418_v38 = vpop.f32.mrb[58].mxu1  ;;  %v6580_v5 = vpop.f32.mrb[62].mxu0 }
 0x5b4   :  { %v6677_v41 = vadd.f32 %v13641_v57, %v6418_v38  ;;  %v6679_v18 = vadd.f32 %v13646_v58, %v6580_v5  ;;  %v6420_v6 = vpop.f32.mrb[59].mxu1  ;;  %v6582_v32 = vpop.f32.mrb[63].mxu0  ;;  %v6737_v21 = vmax.f32 %v6669_v3, 0.0  ;;  %v6739_v59 = vmax.f32 %v6671_v20, 0.0 }
 0x5b5   :  { %v6678_v47 = vadd.f32 %v13651_v53, %v6420_v6  ;;  %v6680_v49 = vadd.f32 %v13656_v16, %v6582_v32  ;;  %v6738_v54 = vmax.f32 %v6670_v4, 0.0  ;;  %v6740_v9 = vmax.f32 %v6672_v46, 0.0 }
 0x5b6   :  { %v6745_v51 = vmax.f32 %v6677_v41, 0.0  ;;  %v6747_v40 = vmax.f32 %v6679_v18, 0.0  ;;  %v7261_v4 = vrot.slane %v13674_v36, 4  ;;  %v7267_v18 = vrot.slane %v13678_v42, 4  ;;  %v10807_v36 = vld [vmem:[%s14314_s9 + $0x240] sm:$0xff]  }
 0x5b7   :  { %v6746_v31 = vmax.f32 %v6678_v47, 0.0  ;;  %v6748_v2 = vmax.f32 %v6680_v49, 0.0  ;;  %v7258_v6 = vrot.slane %v13676_v25, 4 }
 0x5b8   :  { %v6805_v62 = vpack.c.bf16 %v6745_v51, %v6737_v21  ;;  %v6807_v26 = vpack.c.bf16 %v6747_v40, %v6739_v59 }
 0x5b9   :  { %v6806_v48 = vpack.c.bf16 %v6746_v31, %v6738_v54  ;;  %v6808_v56 = vpack.c.bf16 %v6748_v2, %v6740_v9  ;;  %v6424_v63 = vpop.f32.mrb[60].mxu1  ;;  %v6586_v0 = vpop.f32.mrb[64].mxu0 }
 0x5ba   :  { %v6857_v37 = vrot.slane %v6805_v62, 4  ;;  %v6859_v7 = vrot.slane %v6807_v26, 4  ;;  %v6685_v29 = vadd.f32 %v13641_v57, %v6424_v63  ;;  %v6687_v11 = vadd.f32 %v13646_v58, %v6586_v0  ;;  %v6426_v8 = vpop.f32.mrb[61].mxu1  ;;  %v6588_v27 = vpop.f32.mrb[65].mxu0 }
 0x5bb   :  { %v6858_v12 = vrot.slane %v6806_v48, 4  ;;  %v6860_v13 = vrot.slane %v6808_v56, 4  ;;  %v6686_v14 = vadd.f32 %v13651_v53, %v6426_v8  ;;  %v6688_v1 = vadd.f32 %v13656_v16, %v6588_v27  ;;  %v6428_v45 = vpop.f32.mrb[62].mxu1  ;;  %v6590_v22 = vpop.f32.mrb[66].mxu0 }
 0x5bc   :  { %6865 = vst [vmem:[#allocation4 + $0x28] sm:$0xf] %v6857_v37  ;;  %6867 = vst [vmem:[#allocation4 + $0x38] sm:$0xf] %v6859_v7  ;;  %v6693_v30 = vadd.f32 %v13641_v57, %v6428_v45  ;;  %v6695_v17 = vadd.f32 %v13646_v58, %v6590_v22  ;;  %v6430_v10 = vpop.f32.mrb[63].mxu1  ;;  %v6592_v43 = vpop.f32.mrb[67].mxu0 }
 0x5bd   :  { %6866 = vst [vmem:[#allocation4 + $0x30] sm:$0xf] %v6858_v12  ;;  %6868 = vst [vmem:[#allocation4 + $0x40] sm:$0xf] %v6860_v13  ;;  %v6694_v23 = vadd.f32 %v13651_v53, %v6430_v10  ;;  %v6696_v34 = vadd.f32 %v13656_v16, %v6592_v43  ;;  %v6753_v28 = vmax.f32 %v6685_v29, 0.0  ;;  %v6755_v60 = vmax.f32 %v6687_v11, 0.0 }
 0x5be   :  { %v6761_v39 = vmax.f32 %v6693_v30, 0.0  ;;  %v6763_v61 = vmax.f32 %v6695_v17, 0.0  ;;  %v6754_v44 = vmax.f32 %v6686_v14, 0.0  ;;  %v6756_v55 = vmax.f32 %v6688_v1, 0.0  ;;  %v7044_v17 = vld [vmem:[#allocation4 + $0x10] sm:$0xf0] }
 0x5bf   :  { %v6762_v3 = vmax.f32 %v6694_v23, 0.0  ;;  %v6764_v20 = vmax.f32 %v6696_v34, 0.0 }
 0x5c0   :  { %v6813_v52 = vpack.c.bf16 %v6761_v39, %v6753_v28  ;;  %v6815_v19 = vpack.c.bf16 %v6763_v61, %v6755_v60 }
 0x5c1   :  { %v6814_v46 = vpack.c.bf16 %v6762_v3, %v6754_v44  ;;  %v6816_v38 = vpack.c.bf16 %v6764_v20, %v6756_v55  ;;  %v6434_v5 = vpop.f32.mrb[64].mxu1  ;;  %v6596_v41 = vpop.f32.mrb[68].mxu0  ;;  %v7264_v20 = vrot.slane %v7044_v17, 4 }
 0x5c2   :  { %6873 = vst [vmem:[#allocation4 + $0x50] sm:$0xf] %v6813_v52  ;;  %v6897_v32 = vrot.slane %v6813_v52, 4  ;;  %6875 = vst [vmem:[#allocation4 + $0x60] sm:$0xf] %v6815_v19  ;;  %v6899_v47 = vrot.slane %v6815_v19, 4  ;;  %v6701_v49 = vadd.f32 %v13641_v57, %v6434_v5  ;;  %v6703_v21 = vadd.f32 %v13646_v58, %v6596_v41 }
 0x5c3   :  { %v6436_v59 = vpop.f32.mrb[65].mxu1  ;;  %v6598_v51 = vpop.f32.mrb[69].mxu0  ;;  %6874 = vst [vmem:[#allocation4 + $0x58] sm:$0xf] %v6814_v46  ;;  %v6898_v40 = vrot.slane %v6814_v46, 4  ;;  %v6900_v54 = vrot.slane %v6816_v38, 4 }
 0x5c4   :  { %6876 = vst [vmem:[#allocation4 + $0x68] sm:$0xf] %v6816_v38  ;;  %v6702_v9 = vadd.f32 %v13651_v53, %v6436_v59  ;;  %v6704_v31 = vadd.f32 %v13656_v16, %v6598_v51  ;;  %v6438_v2 = vpop.f32.mrb[66].mxu1  ;;  %v6600_v62 = vpop.f32.mrb[70].mxu0  ;;  %v13687_v26 = vld [vmem:[#allocation4 + $0x28] sm:$0xff]  ;;  %v13689_v48 = vld [vmem:[#allocation4 + $0x38] sm:$0xff] }
 0x5c5   :  { %6905 = vst [vmem:[#allocation4 + $0x78] sm:$0xf] %v6897_v32  ;;  %6907 = vst [vmem:[#allocation4 + $0x88] sm:$0xf] %v6899_v47  ;;  %v6769_v56 = vmax.f32 %v6701_v49, 0.0  ;;  %v6771_v63 = vmax.f32 %v6703_v21, 0.0  ;;  %v6709_v0 = vadd.f32 %v13641_v57, %v6438_v2  ;;  %v6711_v37 = vadd.f32 %v13646_v58, %v6600_v62 }
 0x5c6   :  { %v6440_v7 = vpop.f32.mrb[67].mxu1  ;;  %v6602_v29 = vpop.f32.mrb[71].mxu0  ;;  %v13693_v11 = vld [vmem:[#allocation4 + $0x30] sm:$0xff]  ;;  %v13695_v8 = vld [vmem:[#allocation4 + $0x40] sm:$0xff]  ;;  %6906 = vst [vmem:[#allocation4 + $0x80] sm:$0xf] %v6898_v40 }
 0x5c7   :  { %6908 = vst [vmem:[#allocation4 + $0x90] sm:$0xf] %v6900_v54  ;;  %v6770_v27 = vmax.f32 %v6702_v9, 0.0  ;;  %v6772_v12 = vmax.f32 %v6704_v31, 0.0  ;;  %v6710_v13 = vadd.f32 %v13651_v53, %v6440_v7  ;;  %v6712_v14 = vadd.f32 %v13656_v16, %v6602_v29  ;;  %v10809_v52 = vld [vmem:[%s14314_s9] sm:$0xff]  }
 0x5c8   :  { %v6777_v1 = vmax.f32 %v6709_v0, 0.0  ;;  %v6779_v45 = vmax.f32 %v6711_v37, 0.0  ;;  %v7262_v22 = vrot.slane %v13693_v11, 4  ;;  %v7268_v30 = vrot.slane %v13695_v8, 4 }
 0x5c9   :  { %v6778_v10 = vmax.f32 %v6710_v13, 0.0  ;;  %v6780_v43 = vmax.f32 %v6712_v14, 0.0  ;;  %v7259_v23 = vrot.slane %v13687_v26, 4  ;;  %v7265_v34 = vrot.slane %v13689_v48, 4  ;;  %v6444_v44 = vpop.f32.mrb[68].mxu1  ;;  %v6606_v55 = vpop.f32.mrb[72].mxu0 }
 0x5ca   :  { %v6821_v25 = vpack.c.bf16 %v6777_v1, %v6769_v56  ;;  %v6823_v28 = vpack.c.bf16 %v6779_v45, %v6771_v63  ;;  %v7263_v60 = vsel %vm1387_vm3, %v7261_v4, %v7262_v22  ;;  %v7269_v39 = vsel %vm1387_vm3, %v7267_v18, %v7268_v30  ;;  %v6446_v5 = vpop.f32.mrb[69].mxu1  ;;  %v6608_v41 = vpop.f32.mrb[73].mxu0  ;;  %v10810_v18 = vld [vmem:[%s14314_s9 + $0x248] sm:$0xff]   ;;  %v13730_v40 = vld [vmem:[#allocation4 + $0x58] sm:$0xff]  ;;  %v13736_v0 = vld [vmem:[#allocation4 + $0x50] sm:$0xff] }
 0x5cb   :  { %v6822_v61 = vpack.c.bf16 %v6778_v10, %v6770_v27  ;;  %v6824_v42 = vpack.c.bf16 %v6780_v43, %v6772_v12  ;;  %7660 = vmatprep.mubr.bf16.mxu1 %v7263_v60  ;;  %7764 = vmatprep.mubr.bf16.mxu0 %v7269_v39  ;;  %v7260_v3 = vsel %vm1387_vm3, %v7258_v6, %v7259_v23  ;;  %v10811_v6 = vld [vmem:[%s14314_s9 + $0x48] sm:$0xff]   ;;  %v6448_v59 = vpop.f32.mrb[70].mxu1  ;;  %v6610_v51 = vpop.f32.mrb[74].mxu0  ;;  %v13742_v12 = vld [vmem:[#allocation4 + $0x60] sm:$0xff]  ;;  %v7275_v1 = vrot.slane %v13730_v40, 4  ;;  %v10814_v60 = vld [vmem:[%s14314_s9 + $0x50] sm:$0xff]  }
 0x5cc   :  { %6913 = vst [vmem:[#allocation4 + $0xa0] sm:$0xf] %v6821_v25  ;;  %v6937_v19 = vrot.slane %v6821_v25, 4  ;;  %6915 = vst [vmem:[#allocation4 + $0xb0] sm:$0xf] %v6823_v28  ;;  %v6939_v4 = vrot.slane %v6823_v28, 4  ;;  %v6717_v46 = vadd.f32 %v13641_v57, %v6444_v44  ;;  %v6719_v38 = vadd.f32 %v13646_v58, %v6606_v55  ;;  %7661 = vmatmul.mubr.bf16.vlgmr.msra.gmra.mrb[96].mxu1 %v7260_v3 }
 0x5cd   :  { %6914 = vst [vmem:[#allocation4 + $0xa8] sm:$0xf] %v6822_v61  ;;  %v6938_v32 = vrot.slane %v6822_v61, 4  ;;  %6916 = vst [vmem:[#allocation4 + $0xb8] sm:$0xf] %v6824_v42  ;;  %v6940_v47 = vrot.slane %v6824_v42, 4  ;;  %v7266_v49 = vsel %vm1387_vm3, %v7264_v20, %v7265_v34  ;;  %v6718_v21 = vadd.f32 %v13651_v53, %v6446_v5  ;;  %10137 = vmatpush3.bf16.msra.mxu1 %v10807_v36 }
 0x5ce   :  { %v13732_v54 = vld [vmem:[#allocation4 + $0x68] sm:$0xff]  ;;  %6945 = vst [vmem:[#allocation4 + $0xc8] sm:$0xf] %v6937_v19  ;;  %6947 = vst [vmem:[#allocation4 + $0xd8] sm:$0xf] %v6939_v4  ;;  %v6785_v9 = vmax.f32 %v6717_v46, 0.0  ;;  %7765 = vmatmul.mubr.bf16.vlgmr.msra.gmra.mrb[100].mxu0 %v7266_v49  ;;  %v6720_v2 = vadd.f32 %v13656_v16, %v6608_v41  ;;  %v6725_v62 = vadd.f32 %v13641_v57, %v6448_v59  ;;  %10138 = vmatprep.subr.bf16.mxu1 %v10931_v15 }
 0x5cf   :  { %v6787_v31 = vmax.f32 %v6719_v38, 0.0  ;;  %v6450_v56 = vpop.f32.mrb[71].mxu1  ;;  %v6612_v63 = vpop.f32.mrb[75].mxu0  ;;  %6946 = vst [vmem:[#allocation4 + $0xd0] sm:$0xf] %v6938_v32  ;;  %v6786_v37 = vmax.f32 %v6718_v21, 0.0  ;;  %v6727_v7 = vadd.f32 %v13646_v58, %v6610_v51  ;;  %9980 = vmatpush3.bf16.msra.mxu0 %v10809_v52  ;;  %v7276_v61 = vsel %vm1387_vm3, %v7262_v22, %v7275_v1 }
 0x5d0   :  { %6948 = vst [vmem:[#allocation4 + $0xe0] sm:$0xf] %v6940_v47  ;;  %v6726_v29 = vadd.f32 %v13651_v53, %v6450_v56  ;;  %v6728_v27 = vadd.f32 %v13656_v16, %v6612_v63  ;;  %v6788_v13 = vmax.f32 %v6720_v2, 0.0  ;;  %v6793_v14 = vmax.f32 %v6725_v62, 0.0  ;;  %v13746_v17 = vld [vmem:[#allocation4 + $0x80] sm:$0xff]  ;;  %9981 = vmatprep.subr.bf16.mxu0 %v10811_v6  ;;  %v10812_v10 = vld [vmem:[%s14314_s9 + $0x8] sm:$0xff]   ;;  %7668 = vmatprep.mubr.bf16.mxu1 %v7276_v61 }
 0x5d1   :  { %v7279_v45 = vrot.slane %v13732_v54, 4  ;;  %v6795_v43 = vmax.f32 %v6727_v7, 0.0  ;;  %v7273_v28 = vrot.slane %v13736_v0, 4  ;;  %10139 = vmatpush3.bf16.msra.mxu1 %v10810_v18  ;;  %v7277_v44 = vrot.slane %v13742_v12, 4  ;;  %v6454_v52 = vpop.f32.mrb[92].mxu1  ;;  %v6616_v19 = vpop.f32.mrb[96].mxu0 }
 0x5d2   :  { %v6794_v36 = vmax.f32 %v6726_v29, 0.0  ;;  %v6796_v25 = vmax.f32 %v6728_v27, 0.0  ;;  %v6829_v39 = vpack.c.bf16 %v6793_v14, %v6785_v9  ;;  %10140 = vmatprep.subr.bf16.mxu1 %v10931_v15  ;;  %v7285_v4 = vrot.slane %v13746_v17, 4  ;;  %v10813_v22 = vld [vmem:[%s14314_s9 + $0x250] sm:$0xff]   ;;  %v6456_v41 = vpop.f32.mrb[93].mxu1  ;;  %v6618_v18 = vpop.f32.mrb[97].mxu0 }
 0x5d3   :  { %v7280_v42 = vsel %vm1387_vm3, %v7268_v30, %v7279_v45  ;;  %v6831_v55 = vpack.c.bf16 %v6795_v43, %v6787_v31  ;;  %v6455_v30 = vadd.f32 %v6454_v52, %v13627_v50  ;;  %v6617_v38 = vadd.f32 %v6616_v19, %v13630_v24  ;;  %v13776_v6 = vld [vmem:[#allocation4 + $0x90] sm:$0xff]  ;;  %9982 = vmatpush3.bf16.msra.mxu0 %v10812_v10  ;;  %v13778_v32 = vld [vmem:[#allocation4 + $0x78] sm:$0xff]  ;;  %v6458_v59 = vpop.f32.mrb[94].mxu1  ;;  %v13795_v62 = vld [vmem:[#allocation4 + $0x88] sm:$0xff]  ;;  %v6620_v63 = vpop.f32.mrb[98].mxu0 }
 0x5d4   :  { %v6830_v3 = vpack.c.bf16 %v6794_v36, %v6786_v37  ;;  %v6832_v20 = vpack.c.bf16 %v6796_v25, %v6788_v13  ;;  %7772 = vmatprep.mubr.bf16.mxu0 %v7280_v42  ;;  %6953 = vst [vmem:[#allocation4 + $0xf0] sm:$0xf] %v6829_v39  ;;  %v6977_v46 = vrot.slane %v6829_v39, 4  ;;  %v7274_v5 = vsel %vm1387_vm3, %v7259_v23, %v7273_v28  ;;  %v10815_v47 = vld [vmem:[%s14314_s9 + $0x10] sm:$0xff]   ;;  %v10817_v21 = vld [vmem:[%s14314_s9 + $0x58] sm:$0xff]   ;;  %v13797_v56 = vld [vmem:[#allocation4 + $0xa8] sm:$0xff] }
 0x5d5   :  { %6955 = vst [vmem:[#allocation4 + $0x100] sm:$0xf] %v6831_v55  ;;  %v6979_v50 = vrot.slane %v6831_v55, 4  ;;  %7669 = vmatmul.mubr.bf16.gmra.mrb[100].mxu1 %v7274_v5  ;;  %v7278_v23 = vsel %vm1387_vm3, %v7265_v34, %v7277_v44  ;;  %9983 = vmatprep.subr.bf16.mxu0 %v10814_v60  ;;  %v6729_v51 = vadd.f32 %v13641_v57, %v6455_v30  ;;  %v6459_v34 = vpop.f32.mrb[95].mxu1  ;;  %v7283_v37 = vrot.slane %v13778_v32, 4  ;;  %v13809_v14 = vld [vmem:[#allocation4 + $0xb8] sm:$0xff] }
 0x5d6   :  { %6954 = vst [vmem:[#allocation4 + $0xf8] sm:$0xf] %v6830_v3  ;;  %v6978_v24 = vrot.slane %v6830_v3, 4  ;;  %6956 = vst [vmem:[#allocation4 + $0x108] sm:$0xf] %v6832_v20  ;;  %v6980_v49 = vrot.slane %v6832_v20, 4  ;;  %v6731_v9 = vadd.f32 %v13646_v58, %v6617_v38  ;;  %7773 = vmatmul.mubr.bf16.gmra.mrb[104].mxu0 %v7278_v23  ;;  %v6457_v31 = vadd.f32 %v6456_v41, %v13633_v33 }
 0x5d7   :  { %6985 = vst [vmem:[#allocation4 + $0x118] sm:$0xf] %v6977_v46  ;;  %v6619_v2 = vadd.f32 %v6618_v18, %v13636_v35  ;;  %6987 = vst [vmem:[#allocation4 + $0x128] sm:$0xf] %v6979_v50  ;;  %v7286_v57 = vsel %vm1387_vm3, %v7275_v1, %v7285_v4  ;;  %v7289_v58 = vrot.slane %v13776_v6, 4  ;;  %10141 = vmatpush3.bf16.msra.mxu1 %v10813_v22  ;;  %v10816_v33 = vld [vmem:[%s14314_s9 + $0x258] sm:$0xff]   ;;  %9984 = vmatpush3.bf16.msra.mxu0 %v10815_v47 }
 0x5d8   :  { %6986 = vst [vmem:[#allocation4 + $0x120] sm:$0xf] %v6978_v24  ;;  %6988 = vst [vmem:[#allocation4 + $0x130] sm:$0xf] %v6980_v49  ;;  %v6621_v35 = vpop.f32.mrb[99].mxu0  ;;  %v6797_v7 = vmax.f32 %v6729_v51, 0.0  ;;  %v6730_v27 = vadd.f32 %v13651_v53, %v6457_v31  ;;  %7676 = vmatprep.mubr.bf16.mxu1 %v7286_v57  ;;  %10142 = vmatprep.subr.bf16.mxu1 %v10931_v15  ;;  %v7284_v3 = vsel %vm1387_vm3, %v7273_v28, %v7283_v37 }
 0x5d9   :  { %v6799_v29 = vmax.f32 %v6731_v9, 0.0  ;;  %v6732_v13 = vadd.f32 %v13656_v16, %v6619_v2  ;;  %v10818_v1 = vld [vmem:[%s14314_s9 + $0x18] sm:$0xff]   ;;  %v7290_v10 = vsel %vm1387_vm3, %v7279_v45, %v7289_v58  ;;  %v7287_v43 = vrot.slane %v13795_v62, 4  ;;  %9985 = vmatprep.subr.bf16.mxu0 %v10817_v21  ;;  %v10820_v53 = vld [vmem:[%s14314_s9 + $0x60] sm:$0xff]   ;;  %v10823_v28 = vld [vmem:[%s14314_s9 + $0x68] sm:$0xff]  }
 0x5da   :  { %v7295_v36 = vrot.slane %v13797_v56, 4  ;;  %v6833_v16 = vpack.c.bf16 %v6797_v7, %v6797_v7  ;;  %v6798_v60 = vmax.f32 %v6730_v27, 0.0  ;;  %7780 = vmatprep.mubr.bf16.mxu0 %v7290_v10  ;;  %v7299_v61 = vrot.slane %v13809_v14, 4  ;;  %v10819_v45 = vld [vmem:[%s14314_s9 + $0x260] sm:$0xff]   ;;  %v13848_v30 = vld [vmem:[#allocation4 + $0xb0] sm:$0xff]  ;;  %v10824_v41 = vld [vmem:[%s14314_s9 + $0x28] sm:$0xff]  }
 0x5db   :  { %v6835_v25 = vpack.c.bf16 %v6799_v29, %v6799_v29  ;;  %v6800_v39 = vmax.f32 %v6732_v13, 0.0  ;;  %10143 = vmatpush3.bf16.msra.mxu1 %v10816_v33  ;;  %9986 = vmatpush3.bf16.msra.mxu0 %v10818_v1  ;;  %v10821_v20 = vld [vmem:[%s14314_s9 + $0x20] sm:$0xff]   ;;  %v7288_v52 = vsel %vm1387_vm3, %v7277_v44, %v7287_v43  ;;  %v13850_v44 = vld [vmem:[#allocation4 + $0xd0] sm:$0xff]  ;;  %v7297_v18 = vrot.slane %v13848_v30, 4  ;;  %v13880_v9 = vld [vmem:[#allocation4 + $0xc8] sm:$0xff] }
 0x5dc   :  { %6993 = vst [vmem:[#allocation4 + $0x140] sm:$0xf] %v6833_v16  ;;  %v6834_v42 = vpack.c.bf16 %v6798_v60, %v6798_v60  ;;  %10144 = vmatprep.subr.bf16.mxu1 %v10931_v15  ;;  %v7296_v19 = vsel %vm1387_vm3, %v7285_v4, %v7295_v36  ;;  %v13842_v22 = vld [vmem:[#allocation4 + $0xa0] sm:$0xff]  ;;  %9987 = vmatprep.subr.bf16.mxu0 %v10820_v53  ;;  %v10822_v4 = vld [vmem:[%s14314_s9 + $0x268] sm:$0xff]   ;;  %v7305_v47 = vrot.slane %v13850_v44, 4  ;;  %v10826_v50 = vld [vmem:[%s14314_s9 + $0x70] sm:$0xff]  }
 0x5dd   :  { %6995 = vst [vmem:[#allocation4 + $0x150] sm:$0xf] %v6835_v25  ;;  %v6836_v55 = vpack.c.bf16 %v6800_v39, %v6800_v39  ;;  %7677 = vmatmul.mubr.bf16.gmra.mrb[104].mxu1 %v7284_v3  ;;  %v7300_v46 = vsel %vm1387_vm3, %v7289_v58, %v7299_v61  ;;  %v13852_v38 = vld [vmem:[#allocation4 + $0xe0] sm:$0xff]  ;;  %v7293_v5 = vrot.slane %v13842_v22, 4  ;;  %v10825_v49 = vld [vmem:[%s14314_s9 + $0x270] sm:$0xff]   ;;  %v7298_v59 = vsel %vm1387_vm3, %v7287_v43, %v7297_v18  ;;  %v10829_v31 = vld [vmem:[%s14314_s9 + $0x78] sm:$0xff]  }
 0x5de   :  { %6994 = vst [vmem:[#allocation4 + $0x148] sm:$0xf] %v6834_v42  ;;  %7781 = vmatmul.mubr.bf16.gmra.mrb[108].mxu0 %v7288_v52  ;;  %7684 = vmatprep.mubr.bf16.mxu1 %v7296_v19  ;;  %v7309_v24 = vrot.slane %v13852_v38, 4  ;;  %v10827_v21 = vld [vmem:[%s14314_s9 + $0x30] sm:$0xff]   ;;  %v7306_v51 = vsel %vm1387_vm3, %v7295_v36, %v7305_v47  ;;  %v13886_v34 = vld [vmem:[#allocation4 + $0xd8] sm:$0xff]  ;;  %v13890_v57 = vld [vmem:[#allocation4 + $0x108] sm:$0xff] }
 0x5df   :  { %6996 = vst [vmem:[#allocation4 + $0x158] sm:$0xf] %v6836_v55  ;;  %7788 = vmatprep.mubr.bf16.mxu0 %v7300_v46  ;;  %10145 = vmatpush3.bf16.msra.mxu1 %v10819_v45  ;;  %v7294_v23 = vsel %vm1387_vm3, %v7283_v37, %v7293_v5  ;;  %v13888_v63 = vld [vmem:[#allocation4 + $0xf8] sm:$0xff]  ;;  %v7303_v37 = vrot.slane %v13880_v9, 4  ;;  %v10831_v35 = vld [vmem:[%s14314_s9 + $0xc0] sm:$0xff]   ;;  %v7307_v7 = vrot.slane %v13886_v34, 4 }
 0x5e0   :  { %9988 = vmatpush3.bf16.msra.mxu0 %v10821_v20  ;;  %10146 = vmatprep.subr.bf16.mxu1 %v10931_v15  ;;  %v7310_v2 = vsel %vm1387_vm3, %v7299_v61, %v7309_v24  ;;  %v10828_v58 = vld [vmem:[%s14314_s9 + $0x278] sm:$0xff]   ;;  %v7315_v29 = vrot.slane %v13888_v63, 4  ;;  %v7319_v27 = vrot.slane %v13890_v57, 4  ;;  %v13909_v43 = vld [vmem:[#allocation4 + $0xf0] sm:$0xff]  ;;  %v13913_v53 = vld [vmem:[#allocation4 + $0x100] sm:$0xff] }
 0x5e1   :  { %9989 = vmatprep.subr.bf16.mxu0 %v10823_v28  ;;  %v10830_v33 = vld [vmem:[%s14314_s9 + $0x38] sm:$0xff]   ;;  %v7304_v13 = vsel %vm1387_vm3, %v7293_v5, %v7303_v37  ;;  %v7308_v1 = vsel %vm1387_vm3, %v7297_v18, %v7307_v7  ;;  %v13915_v16 = vld [vmem:[#allocation4 + $0x120] sm:$0xff]  ;;  %v13917_v25 = vld [vmem:[#allocation4 + $0x130] sm:$0xff]  ;;  %v7313_v60 = vrot.slane %v13909_v43, 4  ;;  %v7317_v39 = vrot.slane %v13913_v53, 4 }
 0x5e2   :  { %v7316_v10 = vsel %vm1387_vm3, %v7305_v47, %v7315_v29  ;;  %v7320_v36 = vsel %vm1387_vm3, %v7309_v24, %v7319_v27  ;;  %v7325_v61 = vrot.slane %v13915_v16, 4  ;;  %v7329_v45 = vrot.slane %v13917_v25, 4  ;;  %v13926_v20 = vld [vmem:[#allocation4 + $0x118] sm:$0xff]  ;;  %v13929_v19 = vld [vmem:[#allocation4 + $0x128] sm:$0xff] }
 0x5e3   :  { %10147 = vmatpush3.bf16.msra.mxu1 %v10822_v4  ;;  %v7314_v42 = vsel %vm1387_vm3, %v7303_v37, %v7313_v60  ;;  %v7318_v55 = vsel %vm1387_vm3, %v7307_v7, %v7317_v39  ;;  %v7323_v4 = vrot.slane %v13926_v20, 4  ;;  %v7327_v5 = vrot.slane %v13929_v19, 4  ;;  %v6998_v37 = vld [vmem:[#allocation4 + $0x8] sm:$0xff] }
 0x5e4   :  { %9990 = vmatpush3.bf16.msra.mxu0 %v10824_v41  ;;  %10148 = vmatprep.subr.bf16.mxu1 %v10931_v15  ;;  %v7326_v3 = vsel %vm1387_vm3, %v7315_v29, %v7325_v61  ;;  %v7330_v52 = vsel %vm1387_vm3, %v7319_v27, %v7329_v45  ;;  %v10832_v27 = vld [vmem:[%s14314_s9 + $0x80] sm:$0xff]  }
 0x5e5   :  { %7685 = vmatmul.mubr.bf16.gmra.mrb[108].mxu1 %v7294_v23  ;;  %9991 = vmatprep.subr.bf16.mxu0 %v10826_v50  ;;  %v7048_v28 = vld [vmem:[#allocation4 + $0x148] sm:$0xff]  ;;  %v7324_v47 = vsel %vm1387_vm3, %v7313_v60, %v7323_v4  ;;  %v7328_v50 = vsel %vm1387_vm3, %v7317_v39, %v7327_v5  ;;  %v10837_v39 = vld [vmem:[%s14314_s9 + $0xd0] sm:$0xff]  }
 0x5e6   :  { %7789 = vmatmul.mubr.bf16.gmra.mrb[112].mxu0 %v7298_v59  ;;  %7692 = vmatprep.mubr.bf16.mxu1 %v7306_v51  ;;  %v7050_v46 = vld [vmem:[#allocation4 + $0x158] sm:$0xff]  ;;  %v7335_v41 = vrot.slane %v7048_v28, 4  ;;  %v10836_v60 = vld [vmem:[%s14314_s9 + $0x108] sm:$0xff]  }
 0x5e7   :  { %7796 = vmatprep.mubr.bf16.mxu0 %v7310_v2  ;;  %10149 = vmatpush3.bf16.msra.mxu1 %v10825_v49  ;;  %v7339_v18 = vrot.slane %v7050_v46, 4  ;;  %v7047_v49 = vld [vmem:[#allocation4 + $0x140] sm:$0xff]  ;;  %v10847_v28 = vld [vmem:[%s14314_s9 + $0xa8] sm:$0xff]  }
 0x5e8   :  { %9992 = vmatpush3.bf16.msra.mxu0 %v10827_v21  ;;  %10150 = vmatprep.subr.bf16.mxu1 %v10931_v15  ;;  %v7336_v24 = vsel %vm1387_vm3, %v7325_v61, %v7335_v41  ;;  %v7049_v21 = vld [vmem:[#allocation4 + $0x150] sm:$0xff]  ;;  %v7333_v59 = vrot.slane %v7047_v49, 4  ;;  %v10848_v46 = vld [vmem:[%s14314_s9 + $0x128] sm:$0xff]  }
 0x5e9   :  { %9993 = vmatprep.subr.bf16.mxu0 %v10829_v31  ;;  %v7340_v23 = vsel %vm1387_vm3, %v7329_v45, %v7339_v18  ;;  %v7337_v51 = vrot.slane %v7049_v21, 4  ;;  %v10839_v61 = vld [vmem:[%s14314_s9 + $0x110] sm:$0xff]   ;;  %v10840_v45 = vld [vmem:[%s14314_s9 + $0xd8] sm:$0xff]  }
 0x5ea   :  { %v7334_v31 = vsel %vm1387_vm3, %v7323_v4, %v7333_v59  ;;  %v10851_v4 = vld [vmem:[%s14314_s9 + $0x130] sm:$0xff]  }
 0x5eb   :  { %10151 = vmatpush3.bf16.msra.mxu1 %v10828_v58  ;;  %v7338_v2 = vsel %vm1387_vm3, %v7327_v5, %v7337_v51  ;;  %v7046_v58 = vld [vmem:[#allocation4 + $0x20] sm:$0xf0]  ;;  %v10852_v5 = vld [vmem:[%s14314_s9 + $0xf8] sm:$0xff]  }
 0x5ec   :  { %9994 = vmatpush3.bf16.msra.mxu0 %v10830_v33  ;;  %10049 = vmatprep.subr.bf16.mxu1 %v10831_v35  ;;  %v7270_v33 = vrot.slane %v7046_v58, 4  ;;  %v13941_v35 = vld [vmem:[#allocation2 + $0x28] sm:$0xff] }
 0x5ed   :  { %7693 = vmatmul.mubr.bf16.gmra.mrb[112].mxu1 %v7304_v13  ;;  %10188 = vmatprep.subr.bf16.mxu0 %v10931_v15  ;;  %v13944_v7 = vrot.slane %v13941_v35, 4  ;;  %v10833_v13 = vld [vmem:[%s14314_s9 + $0x100] sm:$0xff]  }
 0x5ee   :  { %7797 = vmatmul.mubr.bf16.gmra.mrb[116].mxu0 %v7308_v1  ;;  %7700 = vmatprep.mubr.bf16.mxu1 %v7316_v10  ;;  %v10834_v1 = vld [vmem:[%s14314_s9 + $0xc8] sm:$0xff]   ;;  %v6997_v10 = vld [vmem:[#allocation4] sm:$0xff] }
 0x5ef   :  { %7804 = vmatprep.mubr.bf16.mxu0 %v7320_v36  ;;  %v7272_v29 = vsel %vm1387_vm3, %v7270_v33, %v13944_v7  ;;  %v10835_v36 = vld [vmem:[%s14314_s9 + $0x88] sm:$0xff]  }
 0x5f5   :  { %7701 = vmatmul.mubr.bf16.gmra.mrb[116].mxu1 %v7314_v42  ;;  %v10841_v42 = vld [vmem:[%s14314_s9 + $0x98] sm:$0xff]  }
 0x5f6   :  { %7805 = vmatmul.mubr.bf16.gmra.mrb[120].mxu0 %v7318_v55  ;;  %7708 = vmatprep.mubr.bf16.mxu1 %v7326_v3  ;;  %v10842_v55 = vld [vmem:[%s14314_s9 + $0x118] sm:$0xff]   ;;  %v10845_v3 = vld [vmem:[%s14314_s9 + $0x120] sm:$0xff]  }
 0x5f7   :  { %7812 = vmatprep.mubr.bf16.mxu0 %v7330_v52  ;;  %v10846_v52 = vld [vmem:[%s14314_s9 + $0xe8] sm:$0xff]  }
 0x5fd   :  { %7709 = vmatmul.mubr.bf16.gmra.mrb[120].mxu1 %v7324_v47 }
 0x5fe   :  { %7813 = vmatmul.mubr.bf16.gmra.mrb[124].mxu0 %v7328_v50  ;;  %7716 = vmatprep.mubr.bf16.mxu1 %v7336_v24 }
 0x5ff   :  { %7820 = vmatprep.mubr.bf16.mxu0 %v7340_v23 }
 0x605   :  { %7717 = vmatmul.mubr.bf16.gmra.mrb[124].mxu1 %v7334_v31 }
 0x606   :  { %7821 = vmatmul.mubr.bf16.gmra.mrb[128].mxu0 %v7338_v2  ;;  %7724 = vmatprep.mubr.bf16.mxu1 %v7335_v41  ;;  %v10853_v41 = vld [vmem:[%s14314_s9 + $0xb8] sm:$0xff]  }
 0x607   :  { %7828 = vmatprep.mubr.bf16.mxu0 %v7339_v18  ;;  %v10854_v18 = vld [vmem:[%s14314_s9 + $0x138] sm:$0xff]  }
 0x60d   :  { %7725 = vmatmul.mubr.bf16.gmra.mrb[128].mxu1 %v7333_v59 }
 0x60e   :  { %7829 = vmatmul.mubr.bf16.gmra.mrb[132].mxu0 %v7337_v51  ;;  %10152 = vmatprep.mubr.msk.bf16.mxu1 %vm10932_vm4, %v10931_v15 }
 0x60f   :  { %8212 = vmatprep.mubr.bf16.mxu0 %v6998_v37 }
 0x615   :  { %10153 = vmatmul.mubr.bf16.vlgmr.msra.gmra.mrb[132].mxu1 %v7272_v29 }
 0x616   :  { %8213 = vmatmul.mubr.bf16.vlgmr.msra.gmra.mrb[136].mxu0 %v6997_v10  ;;  %10050 = vmatpush3.bf16.msra.mxu1 %v10832_v27 }
 0x617   :  { %8220 = vmatprep.mubr.bf16.mxu0 %v13693_v11  ;;  %10189 = vmatpush3.bf16.msra.mxu0 %v10833_v13  ;;  %v10838_v11 = vld [vmem:[%s14314_s9 + $0x90] sm:$0xff]  }
 0x618   :  { %10156 = vmatprep.mubr.msk.bf16.mxu1 %vm10932_vm4, %v10931_v15  ;;  %10051 = vmatprep.subr.bf16.mxu1 %v10834_v1 }
 0x619   :  { %10190 = vmatprep.subr.bf16.mxu0 %v10931_v15 }
 0x61a   :  { %10052 = vmatpush3.bf16.msra.mxu1 %v10835_v36 }
 0x61b   :  { %10191 = vmatpush3.bf16.msra.mxu0 %v10836_v60  ;;  %10053 = vmatprep.subr.bf16.mxu1 %v10837_v39 }
 0x61c   :  { %10192 = vmatprep.subr.bf16.mxu0 %v10931_v15 }
 0x61d   :  { %10157 = vmatmul.mubr.bf16.gmra.mrb[136].mxu1 %v13944_v7 }
 0x61e   :  { %8221 = vmatmul.mubr.bf16.gmra.mrb[140].mxu0 %v13687_v26  ;;  %10160 = vmatprep.mubr.msk.bf16.mxu1 %vm10932_vm4, %v10931_v15  ;;  %v10843_v26 = vld [vmem:[%s14314_s9 + $0xe0] sm:$0xff]  }
 0x61f   :  { %8228 = vmatprep.mubr.bf16.mxu0 %v13730_v40  ;;  %10054 = vmatpush3.bf16.msra.mxu1 %v10838_v11  ;;  %v10844_v40 = vld [vmem:[%s14314_s9 + $0xa0] sm:$0xff]  }
 0x620   :  { %10193 = vmatpush3.bf16.msra.mxu0 %v10839_v61  ;;  %10055 = vmatprep.subr.bf16.mxu1 %v10840_v45 }
 0x621   :  { %10194 = vmatprep.subr.bf16.mxu0 %v10931_v15 }
 0x623   :  { %10056 = vmatpush3.bf16.msra.mxu1 %v10841_v42 }
 0x624   :  { %10195 = vmatpush3.bf16.msra.mxu0 %v10842_v55  ;;  %10057 = vmatprep.subr.bf16.mxu1 %v10843_v26 }
 0x625   :  { %10161 = vmatmul.mubr.bf16.gmra.mrb[140].mxu1 %v13944_v7  ;;  %10196 = vmatprep.subr.bf16.mxu0 %v10931_v15 }
 0x626   :  { %8229 = vmatmul.mubr.bf16.gmra.mrb[144].mxu0 %v13736_v0  ;;  %10164 = vmatprep.mubr.msk.bf16.mxu1 %vm10932_vm4, %v10931_v15  ;;  %v10849_v0 = vld [vmem:[%s14314_s9 + $0xf0] sm:$0xff]  }
 0x627   :  { %8236 = vmatprep.mubr.bf16.mxu0 %v13746_v17  ;;  %10058 = vmatpush3.bf16.msra.mxu1 %v10844_v40  ;;  %v10850_v17 = vld [vmem:[%s14314_s9 + $0xb0] sm:$0xff]  }
 0x628   :  { %10197 = vmatpush3.bf16.msra.mxu0 %v10845_v3  ;;  %10059 = vmatprep.subr.bf16.mxu1 %v10846_v52 }
 0x629   :  { %10198 = vmatprep.subr.bf16.mxu0 %v10931_v15 }
 0x62b   :  { %10060 = vmatpush3.bf16.msra.mxu1 %v10847_v28 }
 0x62c   :  { %10199 = vmatpush3.bf16.msra.mxu0 %v10848_v46  ;;  %10061 = vmatprep.subr.bf16.mxu1 %v10849_v0 }
 0x62d   :  { %10165 = vmatmul.mubr.bf16.gmra.mrb[144].mxu1 %v13944_v7  ;;  %10200 = vmatprep.subr.bf16.mxu0 %v10931_v15 }
 0x62e   :  { %8237 = vmatmul.mubr.bf16.gmra.mrb[148].mxu0 %v13778_v32  ;;  %10168 = vmatprep.mubr.msk.bf16.mxu1 %vm10932_vm4, %v10931_v15  ;;  %v7038_v32 = vld [vmem:[#allocation4 + $0x148] sm:$0xf] }
 0x62f   :  { %8244 = vmatprep.mubr.bf16.mxu0 %v13797_v56  ;;  %10062 = vmatpush3.bf16.msra.mxu1 %v10850_v17  ;;  %v7037_v56 = vld [vmem:[#allocation4 + $0x140] sm:$0xf] }
 0x630   :  { %10201 = vmatpush3.bf16.msra.mxu0 %v10851_v4  ;;  %10063 = vmatprep.subr.bf16.mxu1 %v10852_v5 }
 0x631   :  { %10202 = vmatprep.subr.bf16.mxu0 %v10931_v15 }
 0x633   :  { %10064 = vmatpush3.bf16.msra.mxu1 %v10853_v41 }
 0x634   :  { %10203 = vmatpush3.bf16.msra.mxu0 %v10854_v18 }
 0x635   :  { %10169 = vmatmul.mubr.bf16.gmra.mrb[148].mxu1 %v13944_v7 }
 0x636   :  { %8245 = vmatmul.mubr.bf16.gmra.mrb[152].mxu0 %v13842_v22  ;;  %10172 = vmatprep.mubr.msk.bf16.mxu1 %vm10932_vm4, %v10931_v15  ;;  %v7000_v22 = vld [vmem:[#allocation4 + $0x18] sm:$0xff] }
 0x637   :  { %8252 = vmatprep.mubr.bf16.mxu0 %v13850_v44  ;;  %v6999_v44 = vld [vmem:[#allocation4 + $0x10] sm:$0xff] }
 0x63d   :  { %10173 = vmatmul.mubr.bf16.gmra.mrb[152].mxu1 %v13944_v7 }
 0x63e   :  { %8253 = vmatmul.mubr.bf16.gmra.mrb[156].mxu0 %v13880_v9  ;;  %10176 = vmatprep.mubr.msk.bf16.mxu1 %vm10932_vm4, %v10931_v15 }
 0x63f   :  { %8260 = vmatprep.mubr.bf16.mxu0 %v13888_v63 }
 0x645   :  { %10177 = vmatmul.mubr.bf16.gmra.mrb[156].mxu1 %v13944_v7 }
 0x646   :  { %8261 = vmatmul.mubr.bf16.gmra.mrb[160].mxu0 %v13909_v43  ;;  %10180 = vmatprep.mubr.msk.bf16.mxu1 %vm10932_vm4, %v10931_v15 }
 0x647   :  { %8268 = vmatprep.mubr.bf16.mxu0 %v13915_v16 }
 0x64d   :  { %10181 = vmatmul.mubr.bf16.gmra.mrb[160].mxu1 %v13944_v7 }
 0x64e   :  { %8269 = vmatmul.mubr.bf16.gmra.mrb[164].mxu0 %v13926_v20  ;;  %10184 = vmatprep.mubr.msk.bf16.mxu1 %vm10932_vm4, %v10931_v15 }
 0x64f   :  { %8276 = vmatprep.mubr.bf16.mxu0 %v7038_v32 }
 0x655   :  { %10185 = vmatmul.mubr.bf16.gmra.mrb[164].mxu1 %v13944_v7 }
 0x656   :  { %8277 = vmatmul.mubr.bf16.gmra.mrb[168].mxu0 %v7037_v56  ;;  %8316 = vmatprep.mubr.bf16.mxu1 %v7000_v22 }
 0x657   :  { %10204 = vmatprep.mubr.msk.bf16.mxu0 %vm10932_vm4, %v10931_v15 }
 0x65d   :  { %8317 = vmatmul.mubr.bf16.vlgmr.msra.gmra.mrb[168].mxu1 %v6999_v44 }
 0x65e   :  { %8324 = vmatprep.mubr.bf16.mxu1 %v13695_v8  ;;  %10205 = vmatmul.mubr.bf16.vlgmr.msra.gmra.mrb[172].mxu0 %v13941_v35  ;;  %v7041_v8 = vld [vmem:[#allocation4 + $0x160] sm:$0xf] }
 0x65f   :  { %10208 = vmatprep.mubr.msk.bf16.mxu0 %vm10932_vm4, %v10931_v15 }
 0x665   :  { %8325 = vmatmul.mubr.bf16.gmra.mrb[172].mxu1 %v13689_v48  ;;  %v7040_v48 = vld [vmem:[#allocation4 + $0x158] sm:$0xf] }
 0x666   :  { %8332 = vmatprep.mubr.bf16.mxu1 %v13732_v54  ;;  %10209 = vmatmul.mubr.bf16.gmra.mrb[176].mxu0 %v13941_v35  ;;  %v7039_v54 = vld [vmem:[#allocation4 + $0x150] sm:$0xf] }
 0x667   :  { %10212 = vmatprep.mubr.msk.bf16.mxu0 %vm10932_vm4, %v10931_v15 }
 0x66d   :  { %8333 = vmatmul.mubr.bf16.gmra.mrb[176].mxu1 %v13742_v12 }
 0x66e   :  { %8340 = vmatprep.mubr.bf16.mxu1 %v13776_v6  ;;  %10213 = vmatmul.mubr.bf16.gmra.mrb[180].mxu0 %v13941_v35 }
 0x66f   :  { %10216 = vmatprep.mubr.msk.bf16.mxu0 %vm10932_vm4, %v10931_v15 }
 0x675   :  { %8341 = vmatmul.mubr.bf16.gmra.mrb[180].mxu1 %v13795_v62 }
 0x676   :  { %8348 = vmatprep.mubr.bf16.mxu1 %v13809_v14  ;;  %10217 = vmatmul.mubr.bf16.gmra.mrb[184].mxu0 %v13941_v35 }
 0x677   :  { %10220 = vmatprep.mubr.msk.bf16.mxu0 %vm10932_vm4, %v10931_v15 }
 0x67d   :  { %8349 = vmatmul.mubr.bf16.gmra.mrb[184].mxu1 %v13848_v30 }
 0x67e   :  { %8356 = vmatprep.mubr.bf16.mxu1 %v13852_v38  ;;  %10221 = vmatmul.mubr.bf16.gmra.mrb[188].mxu0 %v13941_v35 }
 0x67f   :  { %10224 = vmatprep.mubr.msk.bf16.mxu0 %vm10932_vm4, %v10931_v15 }
 0x685   :  { %8357 = vmatmul.mubr.bf16.gmra.mrb[188].mxu1 %v13886_v34 }
 0x686   :  { %8364 = vmatprep.mubr.bf16.mxu1 %v13890_v57  ;;  %10225 = vmatmul.mubr.bf16.gmra.mrb[192].mxu0 %v13941_v35 }
 0x687   :  { %10228 = vmatprep.mubr.msk.bf16.mxu0 %vm10932_vm4, %v10931_v15 }
 0x68d   :  { %8365 = vmatmul.mubr.bf16.gmra.mrb[192].mxu1 %v13913_v53 }
 0x68e   :  { %8372 = vmatprep.mubr.bf16.mxu1 %v13917_v25  ;;  %10229 = vmatmul.mubr.bf16.gmra.mrb[196].mxu0 %v13941_v35 }
 0x68f   :  { %10232 = vmatprep.mubr.msk.bf16.mxu0 %vm10932_vm4, %v10931_v15 }
 0x695   :  { %8373 = vmatmul.mubr.bf16.gmra.mrb[196].mxu1 %v13929_v19 }
 0x696   :  { %8380 = vmatprep.mubr.bf16.mxu1 %v7040_v48  ;;  %10233 = vmatmul.mubr.bf16.gmra.mrb[200].mxu0 %v13941_v35 }
 0x697   :  { %10236 = vmatprep.mubr.msk.bf16.mxu0 %vm10932_vm4, %v10931_v15 }
 0x69d   :  { %8381 = vmatmul.mubr.bf16.gmra.mrb[200].mxu1 %v7039_v54 }
 0x69e   :  { %10237 = vmatmul.mubr.bf16.gmra.mrb[204].mxu0 %v7041_v8 }
 0x69f   :  { %v9838_v12 = vpop.f32.mrb[96].mxu1 }
 0x6a0   :  { %v9839_v6 = vpop.f32.mrb[97].mxu1 }
 0x6a1   :  { %v9908_v62 = vpop.f32.mrb[100].mxu0  ;;  %v9840_v14 = vadd.f32 %v9839_v6, %v9838_v12  ;;  %v9841_v30 = vpop.f32.mrb[98].mxu1 }
 0x6a2   :  { %v9909_v38 = vpop.f32.mrb[101].mxu0  ;;  %v9842_v9 = vpop.f32.mrb[99].mxu1 }
 0x6a3   :  { %v9910_v34 = vadd.f32 %v9909_v38, %v9908_v62  ;;  %v9911_v63 = vpop.f32.mrb[102].mxu0  ;;  %v9843_v57 = vadd.f32 %v9842_v9, %v9841_v30 }
 0x6a4   :  { %v9912_v43 = vpop.f32.mrb[103].mxu0 }
 0x6a5   :  { %v9913_v53 = vadd.f32 %v9912_v43, %v9911_v63  ;;  %v14102_v16 = vadd.f32 %v9910_v34, %v9840_v14 }
 0x6a7   :  { %v14104_v25 = vadd.f32 %v9913_v53, %v9843_v57 }
 0x6a8   :  { %v9844_v15 = vpop.f32.mrb[100].mxu1 }
 0x6a9   :  { %v9914_v20 = vpop.f32.mrb[104].mxu0  ;;  %v9845_v19 = vpop.f32.mrb[101].mxu1 }
 0x6aa   :  { %v9846_v47 = vadd.f32 %v9845_v19, %v9844_v15  ;;  %v9915_v50 = vpop.f32.mrb[105].mxu0  ;;  %v9847_v24 = vpop.f32.mrb[102].mxu1 }
 0x6ab   :  { %v9916_v49 = vadd.f32 %v9915_v50, %v9914_v20  ;;  %v9917_v23 = vpop.f32.mrb[106].mxu0  ;;  %v9848_v21 = vpop.f32.mrb[103].mxu1 }
 0x6ac   :  { %v9849_v59 = vadd.f32 %v9848_v21, %v9847_v24  ;;  %v9918_v51 = vpop.f32.mrb[107].mxu0 }
 0x6ad   :  { %v9919_v31 = vadd.f32 %v9918_v51, %v9917_v23  ;;  %v14106_v2 = vadd.f32 %v9916_v49, %v9846_v47 }
 0x6af   :  { %v14108_v58 = vadd.f32 %v9919_v31, %v9849_v59 }
 0x6b0   :  { %v9850_v37 = vpop.f32.mrb[104].mxu1 }
 0x6b1   :  { %v9920_v33 = vpop.f32.mrb[108].mxu0  ;;  %v9851_v35 = vpop.f32.mrb[105].mxu1 }
 0x6b2   :  { %v9852_v7 = vadd.f32 %v9851_v35, %v9850_v37  ;;  %v9921_v29 = vpop.f32.mrb[109].mxu0  ;;  %v9853_v27 = vpop.f32.mrb[106].mxu1 }
 0x6b3   :  { %v9922_v13 = vadd.f32 %v9921_v29, %v9920_v33  ;;  %v9923_v1 = vpop.f32.mrb[110].mxu0  ;;  %v9854_v10 = vpop.f32.mrb[107].mxu1 }
 0x6b4   :  { %v9855_v36 = vadd.f32 %v9854_v10, %v9853_v27  ;;  %v9924_v60 = vpop.f32.mrb[111].mxu0 }
 0x6b5   :  { %v9925_v39 = vadd.f32 %v9924_v60, %v9923_v1  ;;  %v14110_v11 = vadd.f32 %v9922_v13, %v9852_v7 }
 0x6b7   :  { %v14112_v61 = vadd.f32 %v9925_v39, %v9855_v36 }
 0x6b8   :  { %v9856_v45 = vpop.f32.mrb[108].mxu1 }
 0x6b9   :  { %v9926_v42 = vpop.f32.mrb[112].mxu0  ;;  %v9857_v55 = vpop.f32.mrb[109].mxu1 }
 0x6ba   :  { %v9858_v26 = vadd.f32 %v9857_v55, %v9856_v45  ;;  %v9927_v40 = vpop.f32.mrb[113].mxu0  ;;  %v9859_v3 = vpop.f32.mrb[110].mxu1 }
 0x6bb   :  { %v9928_v52 = vadd.f32 %v9927_v40, %v9926_v42  ;;  %v9929_v28 = vpop.f32.mrb[114].mxu0  ;;  %v9860_v46 = vpop.f32.mrb[111].mxu1 }
 0x6bc   :  { %v9861_v0 = vadd.f32 %v9860_v46, %v9859_v3  ;;  %v9930_v17 = vpop.f32.mrb[115].mxu0 }
 0x6bd   :  { %v9931_v4 = vadd.f32 %v9930_v17, %v9929_v28  ;;  %v14114_v5 = vadd.f32 %v9928_v52, %v9858_v26 }
 0x6bf   :  { %v14116_v41 = vadd.f32 %v9931_v4, %v9861_v0 }
 0x6c0   :  { %v9862_v18 = vpop.f32.mrb[112].mxu1 }
 0x6c1   :  { %v9932_v32 = vpop.f32.mrb[116].mxu0  ;;  %v9863_v56 = vpop.f32.mrb[113].mxu1 }
 0x6c2   :  { %v9864_v22 = vadd.f32 %v9863_v56, %v9862_v18  ;;  %v9933_v44 = vpop.f32.mrb[117].mxu0  ;;  %v9865_v48 = vpop.f32.mrb[114].mxu1 }
 0x6c3   :  { %v9934_v8 = vadd.f32 %v9933_v44, %v9932_v32  ;;  %v9935_v54 = vpop.f32.mrb[118].mxu0  ;;  %v9866_v12 = vpop.f32.mrb[115].mxu1 }
 0x6c4   :  { %v9867_v6 = vadd.f32 %v9866_v12, %v9865_v48  ;;  %v9936_v62 = vpop.f32.mrb[119].mxu0 }
 0x6c5   :  { %v9937_v14 = vadd.f32 %v9936_v62, %v9935_v54  ;;  %v14118_v30 = vadd.f32 %v9934_v8, %v9864_v22 }
 0x6c7   :  { %v14120_v38 = vadd.f32 %v9937_v14, %v9867_v6 }
 0x6c8   :  { %v9868_v9 = vpop.f32.mrb[116].mxu1 }
 0x6c9   :  { %v9938_v34 = vpop.f32.mrb[120].mxu0  ;;  %v9869_v63 = vpop.f32.mrb[117].mxu1 }
 0x6ca   :  { %v9870_v57 = vadd.f32 %v9869_v63, %v9868_v9  ;;  %v9939_v43 = vpop.f32.mrb[121].mxu0  ;;  %v9871_v53 = vpop.f32.mrb[118].mxu1 }
 0x6cb   :  { %v9940_v15 = vadd.f32 %v9939_v43, %v9938_v34  ;;  %v9941_v20 = vpop.f32.mrb[122].mxu0  ;;  %v9872_v19 = vpop.f32.mrb[119].mxu1 }
 0x6cc   :  { %v9873_v47 = vadd.f32 %v9872_v19, %v9871_v53  ;;  %v9942_v50 = vpop.f32.mrb[123].mxu0 }
 0x6cd   :  { %v9943_v24 = vadd.f32 %v9942_v50, %v9941_v20  ;;  %v14122_v49 = vadd.f32 %v9940_v15, %v9870_v57 }
 0x6cf   :  { %v14124_v23 = vadd.f32 %v9943_v24, %v9873_v47 }
 0x6d0   :  { %v9874_v21 = vpop.f32.mrb[120].mxu1 }
 0x6d1   :  { %v9944_v59 = vpop.f32.mrb[124].mxu0  ;;  %v9875_v51 = vpop.f32.mrb[121].mxu1 }
 0x6d2   :  { %v9876_v31 = vadd.f32 %v9875_v51, %v9874_v21  ;;  %v9945_v37 = vpop.f32.mrb[125].mxu0  ;;  %v9877_v33 = vpop.f32.mrb[122].mxu1 }
 0x6d3   :  { %v9946_v35 = vadd.f32 %v9945_v37, %v9944_v59  ;;  %v9947_v7 = vpop.f32.mrb[126].mxu0  ;;  %v9878_v29 = vpop.f32.mrb[123].mxu1 }
 0x6d4   :  { %v9879_v27 = vadd.f32 %v9878_v29, %v9877_v33  ;;  %v9948_v13 = vpop.f32.mrb[127].mxu0 }
 0x6d5   :  { %v9949_v1 = vadd.f32 %v9948_v13, %v9947_v7  ;;  %v14126_v10 = vadd.f32 %v9946_v35, %v9876_v31 }
 0x6d7   :  { %v14128_v36 = vadd.f32 %v9949_v1, %v9879_v27 }
 0x6d8   :  { %v9880_v60 = vpop.f32.mrb[124].mxu1 }
 0x6d9   :  { %v9950_v39 = vpop.f32.mrb[128].mxu0  ;;  %v9881_v45 = vpop.f32.mrb[125].mxu1 }
 0x6da   :  { %v9882_v42 = vadd.f32 %v9881_v45, %v9880_v60  ;;  %v9951_v55 = vpop.f32.mrb[129].mxu0  ;;  %v9883_v26 = vpop.f32.mrb[126].mxu1 }
 0x6db   :  { %v9952_v40 = vadd.f32 %v9951_v55, %v9950_v39  ;;  %v9953_v3 = vpop.f32.mrb[130].mxu0  ;;  %v9884_v52 = vpop.f32.mrb[127].mxu1 }
 0x6dc   :  { %v9885_v28 = vadd.f32 %v9884_v52, %v9883_v26  ;;  %v9954_v46 = vpop.f32.mrb[131].mxu0 }
 0x6dd   :  { %v9955_v0 = vadd.f32 %v9954_v46, %v9953_v3  ;;  %v14130_v17 = vadd.f32 %v9952_v40, %v9882_v42 }
 0x6df   :  { %v14132_v4 = vadd.f32 %v9955_v0, %v9885_v28 }
 0x6e0   :  { %v9886_v18 = vpop.f32.mrb[128].mxu1 }
 0x6e1   :  { %v9956_v32 = vpop.f32.mrb[132].mxu0  ;;  %v9887_v56 = vpop.f32.mrb[129].mxu1 }
 0x6e2   :  { %v9888_v22 = vadd.f32 %v9887_v56, %v9886_v18  ;;  %v9957_v44 = vpop.f32.mrb[133].mxu0  ;;  %v9889_v48 = vpop.f32.mrb[130].mxu1 }
 0x6e3   :  { %v9958_v8 = vadd.f32 %v9957_v44, %v9956_v32  ;;  %v9959_v54 = vpop.f32.mrb[134].mxu0  ;;  %v9890_v12 = vpop.f32.mrb[131].mxu1 }
 0x6e4   :  { %v9960_v6 = vpop.f32.mrb[135].mxu0 }
 0x6e5   :  { %v14134_v62 = vadd.f32 %v9958_v8, %v9888_v22 }
 0x6e8   :  { %v7870_v14 = vpop.f32.mrb[132].mxu1 }
 0x6e9   :  { %v7871_v9 = vadd.f32 %v7870_v14, %v14102_v16  ;;  %v9995_v34 = vpop.f32.mrb[136].mxu0  ;;  %v10154_v63 = vpop.f32.mrb[133].mxu1 }
 0x6ea   :  { %v9996_v57 = vpop.f32.mrb[137].mxu0  ;;  %v7873_v43 = vpop.f32.mrb[134].mxu1 }
 0x6eb   :  { %v9997_v53 = vadd.f32 %v9996_v57, %v9995_v34  ;;  %v7874_v15 = vadd.f32 %v7873_v43, %v14104_v25  ;;  %v9998_v20 = vpop.f32.mrb[138].mxu0  ;;  %v10155_v19 = vpop.f32.mrb[135].mxu1 }
 0x6ec   :  { %v9999_v47 = vpop.f32.mrb[139].mxu0 }
 0x6ed   :  { %v14138_v50 = vadd.f32 %v9997_v53, %v7871_v9  ;;  %v10000_v24 = vadd.f32 %v9999_v47, %v9998_v20 }
 0x6ef   :  { %v14140_v21 = vadd.f32 %v10000_v24, %v7874_v15 }
 0x6f0   :  { %v7878_v59 = vpop.f32.mrb[136].mxu1 }
 0x6f1   :  { %v7879_v51 = vadd.f32 %v7878_v59, %v14106_v2  ;;  %v10001_v31 = vpop.f32.mrb[140].mxu0  ;;  %v10158_v16 = vpop.f32.mrb[137].mxu1 }
 0x6f2   :  { %v10002_v37 = vpop.f32.mrb[141].mxu0  ;;  %v7881_v33 = vpop.f32.mrb[138].mxu1 }
 0x6f3   :  { %v10003_v35 = vadd.f32 %v10002_v37, %v10001_v31  ;;  %v7882_v7 = vadd.f32 %v7881_v33, %v14108_v58  ;;  %v10004_v29 = vpop.f32.mrb[142].mxu0  ;;  %v10159_v25 = vpop.f32.mrb[139].mxu1 }
 0x6f4   :  { %v10005_v27 = vpop.f32.mrb[143].mxu0 }
 0x6f5   :  { %v14144_v13 = vadd.f32 %v10003_v35, %v7879_v51  ;;  %v10006_v1 = vadd.f32 %v10005_v27, %v10004_v29 }
 0x6f7   :  { %v14146_v60 = vadd.f32 %v10006_v1, %v7882_v7 }
 0x6f8   :  { %v7886_v39 = vpop.f32.mrb[140].mxu1 }
 0x6f9   :  { %v7887_v45 = vadd.f32 %v7886_v39, %v14110_v11  ;;  %v10007_v42 = vpop.f32.mrb[144].mxu0  ;;  %v10162_v2 = vpop.f32.mrb[141].mxu1 }
 0x6fa   :  { %v10008_v55 = vpop.f32.mrb[145].mxu0  ;;  %v7889_v26 = vpop.f32.mrb[142].mxu1 }
 0x6fb   :  { %v10009_v40 = vadd.f32 %v10008_v55, %v10007_v42  ;;  %v7890_v3 = vadd.f32 %v7889_v26, %v14112_v61  ;;  %v10010_v52 = vpop.f32.mrb[146].mxu0  ;;  %v10163_v58 = vpop.f32.mrb[143].mxu1 }
 0x6fc   :  { %v10011_v28 = vpop.f32.mrb[147].mxu0 }
 0x6fd   :  { %v14150_v46 = vadd.f32 %v10009_v40, %v7887_v45  ;;  %v10012_v0 = vadd.f32 %v10011_v28, %v10010_v52 }
 0x6ff   :  { %v14152_v18 = vadd.f32 %v10012_v0, %v7890_v3 }
 0x700   :  { %v7894_v32 = vpop.f32.mrb[144].mxu1 }
 0x701   :  { %v7895_v56 = vadd.f32 %v7894_v32, %v14114_v5  ;;  %v10013_v22 = vpop.f32.mrb[148].mxu0  ;;  %v10166_v11 = vpop.f32.mrb[145].mxu1 }
 0x702   :  { %v10014_v44 = vpop.f32.mrb[149].mxu0  ;;  %v7897_v48 = vpop.f32.mrb[146].mxu1 }
 0x703   :  { %v10015_v8 = vadd.f32 %v10014_v44, %v10013_v22  ;;  %v7898_v54 = vadd.f32 %v7897_v48, %v14116_v41  ;;  %v10016_v12 = vpop.f32.mrb[150].mxu0  ;;  %v10167_v61 = vpop.f32.mrb[147].mxu1 }
 0x704   :  { %v10017_v6 = vpop.f32.mrb[151].mxu0 }
 0x705   :  { %v14156_v14 = vadd.f32 %v10015_v8, %v7895_v56  ;;  %v10018_v9 = vadd.f32 %v10017_v6, %v10016_v12 }
 0x707   :  { %v14158_v34 = vadd.f32 %v10018_v9, %v7898_v54 }
 0x708   :  { %v7902_v63 = vpop.f32.mrb[148].mxu1 }
 0x709   :  { %v7903_v57 = vadd.f32 %v7902_v63, %v14118_v30  ;;  %v10019_v43 = vpop.f32.mrb[152].mxu0  ;;  %v10170_v5 = vpop.f32.mrb[149].mxu1 }
 0x70a   :  { %v10020_v53 = vpop.f32.mrb[153].mxu0  ;;  %v7905_v15 = vpop.f32.mrb[150].mxu1 }
 0x70b   :  { %v10021_v20 = vadd.f32 %v10020_v53, %v10019_v43  ;;  %v7906_v19 = vadd.f32 %v7905_v15, %v14120_v38  ;;  %v10022_v47 = vpop.f32.mrb[154].mxu0  ;;  %v10171_v41 = vpop.f32.mrb[151].mxu1 }
 0x70c   :  { %v10023_v24 = vpop.f32.mrb[155].mxu0 }
 0x70d   :  { %v14162_v59 = vadd.f32 %v10021_v20, %v7903_v57  ;;  %v10024_v51 = vadd.f32 %v10023_v24, %v10022_v47 }
 0x70f   :  { %v14164_v31 = vadd.f32 %v10024_v51, %v7906_v19 }
 0x710   :  { %v7910_v16 = vpop.f32.mrb[152].mxu1 }
 0x711   :  { %v7911_v37 = vadd.f32 %v7910_v16, %v14122_v49  ;;  %v10025_v33 = vpop.f32.mrb[156].mxu0  ;;  %v10174_v30 = vpop.f32.mrb[153].mxu1 }
 0x712   :  { %v10026_v35 = vpop.f32.mrb[157].mxu0  ;;  %v7913_v7 = vpop.f32.mrb[154].mxu1 }
 0x713   :  { %v10027_v29 = vadd.f32 %v10026_v35, %v10025_v33  ;;  %v7914_v25 = vadd.f32 %v7913_v7, %v14124_v23  ;;  %v10028_v27 = vpop.f32.mrb[158].mxu0  ;;  %v10175_v38 = vpop.f32.mrb[155].mxu1 }
 0x714   :  { %v10029_v1 = vpop.f32.mrb[159].mxu0 }
 0x715   :  { %v14168_v39 = vadd.f32 %v10027_v29, %v7911_v37  ;;  %v10030_v45 = vadd.f32 %v10029_v1, %v10028_v27 }
 0x717   :  { %v14170_v42 = vadd.f32 %v10030_v45, %v7914_v25 }
 0x718   :  { %v7918_v2 = vpop.f32.mrb[156].mxu1 }
 0x719   :  { %v7919_v55 = vadd.f32 %v7918_v2, %v14126_v10  ;;  %v10031_v26 = vpop.f32.mrb[160].mxu0  ;;  %v10178_v49 = vpop.f32.mrb[157].mxu1  ;;  %v14192_v2 = vld [vmem:[%s14316_s10] ss:$0 sm:$0xff] }
 0x71a   :  { %v10032_v40 = vpop.f32.mrb[161].mxu0  ;;  %v7921_v3 = vpop.f32.mrb[158].mxu1 }
 0x71b   :  { %v10033_v52 = vadd.f32 %v10032_v40, %v10031_v26  ;;  %v7922_v58 = vadd.f32 %v7921_v3, %v14128_v36  ;;  %v10034_v28 = vpop.f32.mrb[162].mxu0  ;;  %v10179_v23 = vpop.f32.mrb[159].mxu1 }
 0x71c   :  { %v10035_v0 = vpop.f32.mrb[163].mxu0 }
 0x71d   :  { %v14174_v32 = vadd.f32 %v10033_v52, %v7919_v55  ;;  %v10036_v56 = vadd.f32 %v10035_v0, %v10034_v28 }
 0x71f   :  { %v14176_v22 = vadd.f32 %v10036_v56, %v7922_v58 }
 0x720   :  { %v7926_v11 = vpop.f32.mrb[160].mxu1 }
 0x721   :  { %v7927_v44 = vadd.f32 %v7926_v11, %v14130_v17  ;;  %v10037_v48 = vpop.f32.mrb[164].mxu0  ;;  %v10182_v10 = vpop.f32.mrb[161].mxu1 }
 0x722   :  { %v10038_v8 = vpop.f32.mrb[165].mxu0  ;;  %v7929_v54 = vpop.f32.mrb[162].mxu1 }
 0x723   :  { %v10039_v12 = vadd.f32 %v10038_v8, %v10037_v48  ;;  %v7930_v61 = vadd.f32 %v7929_v54, %v14132_v4  ;;  %v10040_v6 = vpop.f32.mrb[166].mxu0  ;;  %v10183_v36 = vpop.f32.mrb[163].mxu1 }
 0x724   :  { %v10041_v9 = vpop.f32.mrb[167].mxu0 }
 0x725   :  { %v14180_v63 = vadd.f32 %v10039_v12, %v7927_v44  ;;  %v10042_v57 = vadd.f32 %v10041_v9, %v10040_v6 }
 0x727   :  { %v14182_v43 = vadd.f32 %v10042_v57, %v7930_v61 }
 0x728   :  { %v7934_v5 = vpop.f32.mrb[164].mxu1 }
 0x729   :  { %v7935_v53 = vadd.f32 %v7934_v5, %v14134_v62  ;;  %v10043_v15 = vpop.f32.mrb[168].mxu0  ;;  %v10186_v17 = vpop.f32.mrb[165].mxu1 }
 0x72a   :  { %v10044_v20 = vpop.f32.mrb[169].mxu0  ;;  %v7937_v19 = vpop.f32.mrb[166].mxu1 }
 0x72b   :  { %v10045_v47 = vadd.f32 %v10044_v20, %v10043_v15  ;;  %v10046_v41 = vpop.f32.mrb[170].mxu0  ;;  %v10187_v24 = vpop.f32.mrb[167].mxu1 }
 0x72c   :  { %v10047_v51 = vpop.f32.mrb[171].mxu0 }
 0x72d   :  { %v14185_v4 = vadd.f32 %v10045_v47, %v7935_v53 }
 0x730   :  { %v10065_v16 = vpop.f32.mrb[168].mxu1 }
 0x731   :  { %v10066_v37 = vpop.f32.mrb[169].mxu1  ;;  %v8422_v33 = vpop.f32.mrb[172].mxu0 }
 0x732   :  { %v10067_v30 = vadd.f32 %v10066_v37, %v10065_v16  ;;  %v10068_v35 = vpop.f32.mrb[170].mxu1  ;;  %v10206_v7 = vpop.f32.mrb[173].mxu0 }
 0x733   :  { %v10069_v29 = vpop.f32.mrb[171].mxu1  ;;  %v8425_v25 = vpop.f32.mrb[174].mxu0 }
 0x734   :  { %v10070_v27 = vadd.f32 %v10069_v29, %v10068_v35  ;;  %v8319_v62 = vadd.f32 %v10067_v30, %v14138_v50  ;;  %v10207_v38 = vpop.f32.mrb[175].mxu0 }
 0x736   :  { %v8423_v1 = vadd.f32 %v8422_v33, %v8319_v62  ;;  %v8322_v45 = vadd.f32 %v10070_v27, %v14140_v21 }
 0x738   :  { %v8426_v55 = vadd.f32 %v8425_v25, %v8322_v45  ;;  %v10071_v26 = vpop.f32.mrb[172].mxu1  ;;  %v8499_v3 = vadd.f32 %v14192_v2, %v8423_v1 }
 0x739   :  { %v10072_v49 = vpop.f32.mrb[173].mxu1  ;;  %v8430_v40 = vpop.f32.mrb[176].mxu0 }
 0x73a   :  { %v8500_v52 = vadd.f32 %v14192_v2, %v8426_v55  ;;  %v10073_v58 = vadd.f32 %v10072_v49, %v10071_v26  ;;  %v10074_v50 = vpop.f32.mrb[174].mxu1  ;;  %v10210_v28 = vpop.f32.mrb[177].mxu0 }
 0x73b   :  { %v10075_v23 = vpop.f32.mrb[175].mxu1  ;;  %v8433_v0 = vpop.f32.mrb[178].mxu0 }
 0x73c   :  { %v8517_v21 = vsel %vm8516_vm5, %v8499_v3, %v8500_v52  ;;  %v10076_v56 = vadd.f32 %v10075_v23, %v10074_v50  ;;  %v8327_v11 = vadd.f32 %v10073_v58, %v14144_v13  ;;  %v10211_v44 = vpop.f32.mrb[179].mxu0 }
 0x73d   :  { %v9806_v48 = vmul.f32 -1.442695, %v8517_v21 }
 0x73e   :  { %v8431_v10 = vadd.f32 %v8430_v40, %v8327_v11  ;;  %v8330_v8 = vadd.f32 %v10076_v56, %v14146_v60 }
 0x73f   :  { %10855 = vpow2.f32 %v9806_v48 }
 0x740   :  { %v8501_v54 = vadd.f32 %v14192_v2, %v8431_v10  ;;  %v8434_v12 = vadd.f32 %v8433_v0, %v8330_v8  ;;  %v10077_v61 = vpop.f32.mrb[176].mxu1 }
 0x741   :  { %v10078_v6 = vpop.f32.mrb[177].mxu1  ;;  %v8438_v36 = vpop.f32.mrb[180].mxu0 }
 0x742   :  { %v8518_v9 = vsel %vm8516_vm5, %v8500_v52, %v8501_v54  ;;  %v8502_v57 = vadd.f32 %v14192_v2, %v8434_v12  ;;  %v10079_v5 = vadd.f32 %v10078_v6, %v10077_v61  ;;  %v10080_v53 = vpop.f32.mrb[178].mxu1  ;;  %v10214_v15 = vpop.f32.mrb[181].mxu0 }
 0x743   :  { %v9807_v13 = vmul.f32 -1.442695, %v8518_v9  ;;  %v10081_v17 = vpop.f32.mrb[179].mxu1  ;;  %v8441_v20 = vpop.f32.mrb[182].mxu0 }
 0x744   :  { %v8519_v19 = vsel %vm8516_vm5, %v8501_v54, %v8502_v57  ;;  %v10082_v60 = vadd.f32 %v10081_v17, %v10080_v53  ;;  %v8335_v47 = vadd.f32 %v10079_v5, %v14150_v46  ;;  %v10215_v41 = vpop.f32.mrb[183].mxu0 }
 0x745   :  { %10857 = vpow2.f32 %v9807_v13  ;;  %v9808_v24 = vmul.f32 -1.442695, %v8519_v19 }
 0x746   :  { %v8439_v51 = vadd.f32 %v8438_v36, %v8335_v47  ;;  %v8338_v16 = vadd.f32 %v10082_v60, %v14152_v18 }
 0x747   :  { %10859 = vpow2.f32 %v9808_v24 }
 0x748   :  { %v8503_v37 = vadd.f32 %v14192_v2, %v8439_v51  ;;  %v8442_v33 = vadd.f32 %v8441_v20, %v8338_v16  ;;  %v10083_v30 = vpop.f32.mrb[180].mxu1 }
 0x749   :  { %v10856_v35 = vpop.eup %10855  ;;  %v10084_v7 = vpop.f32.mrb[181].mxu1 }
 0x74a   :  { %v8446_v29 = vpop.f32.mrb[184].mxu0  ;;  %v8581_v25 = vadd.f32 1.0, %v10856_v35  ;;  %v8520_v27 = vsel %vm8516_vm5, %v8502_v57, %v8503_v37  ;;  %v8504_v62 = vadd.f32 %v14192_v2, %v8442_v33  ;;  %v10085_v46 = vadd.f32 %v10084_v7, %v10083_v30  ;;  %v10086_v38 = vpop.f32.mrb[182].mxu1 }
 0x74b   :  { %v10218_v1 = vpop.f32.mrb[185].mxu0  ;;  %v9809_v45 = vmul.f32 -1.442695, %v8520_v27  ;;  %v10087_v55 = vpop.f32.mrb[183].mxu1 }
 0x74c   :  { %v8449_v26 = vpop.f32.mrb[186].mxu0  ;;  %10861 = vrcp.f32 %v8581_v25  ;;  %v8521_v18 = vsel %vm8516_vm5, %v8503_v37, %v8504_v62  ;;  %v10088_v49 = vadd.f32 %v10087_v55, %v10086_v38  ;;  %v8343_v40 = vadd.f32 %v10085_v46, %v14156_v14 }
 0x74d   :  { %v10219_v3 = vpop.f32.mrb[187].mxu0  ;;  %10863 = vpow2.f32 %v9809_v45  ;;  %v9810_v52 = vmul.f32 -1.442695, %v8521_v18 }
 0x74e   :  { %v8447_v58 = vadd.f32 %v8446_v29, %v8343_v40  ;;  %v8346_v50 = vadd.f32 %v10088_v49, %v14158_v34 }
 0x74f   :  { %v10858_v28 = vpop.eup %10857  ;;  %10865 = vpow2.f32 %v9810_v52 }
 0x750   :  { %v8582_v23 = vadd.f32 1.0, %v10858_v28  ;;  %v8505_v0 = vadd.f32 %v14192_v2, %v8447_v58  ;;  %v8450_v21 = vadd.f32 %v8449_v26, %v8346_v50  ;;  %v10089_v56 = vpop.f32.mrb[184].mxu1 }
 0x751   :  { %v10860_v11 = vpop.eup %10859  ;;  %v10090_v44 = vpop.f32.mrb[185].mxu1 }
 0x752   :  { %v8454_v48 = vpop.f32.mrb[188].mxu0  ;;  %10867 = vrcp.f32 %v8582_v23  ;;  %v8583_v10 = vadd.f32 1.0, %v10860_v11  ;;  %v8522_v14 = vsel %vm8516_vm5, %v8504_v62, %v8505_v0  ;;  %v8506_v8 = vadd.f32 %v14192_v2, %v8450_v21  ;;  %v10092_v54 = vpop.f32.mrb[186].mxu1 }
 0x753   :  { %v10222_v12 = vpop.f32.mrb[189].mxu0  ;;  %v9811_v61 = vmul.f32 -1.442695, %v8522_v14  ;;  %v10091_v34 = vadd.f32 %v10090_v44, %v10089_v56  ;;  %v10093_v6 = vpop.f32.mrb[187].mxu1 }
 0x754   :  { %v8457_v36 = vpop.f32.mrb[190].mxu0  ;;  %10869 = vrcp.f32 %v8583_v10  ;;  %v8523_v9 = vsel %vm8516_vm5, %v8505_v0, %v8506_v8  ;;  %v10094_v57 = vadd.f32 %v10093_v6, %v10092_v54 }
 0x755   :  { %v10223_v5 = vpop.f32.mrb[191].mxu0  ;;  %10871 = vpow2.f32 %v9811_v61  ;;  %v9812_v53 = vmul.f32 -1.442695, %v8523_v9  ;;  %v8351_v15 = vadd.f32 %v10091_v34, %v14162_v59 }
 0x756   :  { %v10862_v13 = vpop.eup %10861  ;;  %v8354_v17 = vadd.f32 %v10094_v57, %v14164_v31 }
 0x757   :  { %v10864_v20 = vpop.eup %10863  ;;  %8630 = vst.msk [vmem:[%s14317_s11] sm:$0xff] %vm8629_vm6, %v10862_v13  ;;  %10873 = vpow2.f32 %v9812_v53  ;;  %v8455_v19 = vadd.f32 %v8454_v48, %v8351_v15 }
 0x758   :  { %v8584_v60 = vadd.f32 1.0, %v10864_v20  ;;  %v8458_v47 = vadd.f32 %v8457_v36, %v8354_v17  ;;  %v10095_v41 = vpop.f32.mrb[188].mxu1 }
 0x759   :  { %v10866_v24 = vpop.eup %10865  ;;  %v8507_v51 = vadd.f32 %v14192_v2, %v8455_v19  ;;  %v10096_v16 = vpop.f32.mrb[189].mxu1 }
 0x75a   :  { %v8462_v37 = vpop.f32.mrb[192].mxu0  ;;  %10875 = vrcp.f32 %v8584_v60  ;;  %v8585_v59 = vadd.f32 1.0, %v10866_v24  ;;  %v8508_v31 = vadd.f32 %v14192_v2, %v8458_v47  ;;  %v10097_v33 = vadd.f32 %v10096_v16, %v10095_v41  ;;  %v10098_v30 = vpop.f32.mrb[190].mxu1 }
 0x75b   :  { %v10226_v35 = vpop.f32.mrb[193].mxu0  ;;  %v8524_v7 = vsel %vm8516_vm5, %v8506_v8, %v8507_v51  ;;  %v10099_v29 = vpop.f32.mrb[191].mxu1 }
 0x75c   :  { %v8465_v25 = vpop.f32.mrb[194].mxu0  ;;  %v10868_v27 = vpop.eup %10867  ;;  %10877 = vrcp.f32 %v8585_v59  ;;  %v9813_v62 = vmul.f32 -1.442695, %v8524_v7  ;;  %v8525_v46 = vsel %vm8516_vm5, %v8507_v51, %v8508_v31  ;;  %v10100_v38 = vadd.f32 %v10099_v29, %v10098_v30 }
 0x75d   :  { %v10227_v1 = vpop.f32.mrb[195].mxu0  ;;  %8631 = vst.msk [vmem:[%s14317_s11 + $0x8] sm:$0xff] %vm8629_vm6, %v10868_v27  ;;  %v9814_v45 = vmul.f32 -1.442695, %v8525_v46  ;;  %v8359_v55 = vadd.f32 %v10097_v33, %v14168_v39 }
 0x75e   :  { %v10870_v26 = vpop.eup %10869  ;;  %10879 = vpow2.f32 %v9813_v62  ;;  %v8362_v18 = vadd.f32 %v10100_v38, %v14170_v42 }
 0x75f   :  { %v10872_v49 = vpop.eup %10871  ;;  %8632 = vst.msk [vmem:[%s14317_s11 + $0x10] sm:$0xff] %vm8629_vm6, %v10870_v26  ;;  %10881 = vpow2.f32 %v9814_v45  ;;  %v8463_v40 = vadd.f32 %v8462_v37, %v8359_v55 }
 0x760   :  { %v8586_v3 = vadd.f32 1.0, %v10872_v49  ;;  %v8466_v52 = vadd.f32 %v8465_v25, %v8362_v18  ;;  %v10101_v58 = vpop.f32.mrb[192].mxu1 }
 0x761   :  { %v10874_v50 = vpop.eup %10873  ;;  %v8509_v28 = vadd.f32 %v14192_v2, %v8463_v40  ;;  %v10102_v23 = vpop.f32.mrb[193].mxu1 }
 0x762   :  { %v8470_v39 = vpop.f32.mrb[196].mxu0  ;;  %10883 = vrcp.f32 %v8586_v3  ;;  %v8587_v0 = vadd.f32 1.0, %v10874_v50  ;;  %v8510_v42 = vadd.f32 %v14192_v2, %v8466_v52  ;;  %v10103_v21 = vadd.f32 %v10102_v23, %v10101_v58  ;;  %v10104_v56 = vpop.f32.mrb[194].mxu1 }
 0x763   :  { %v10230_v11 = vpop.f32.mrb[197].mxu0  ;;  %v8526_v44 = vsel %vm8516_vm5, %v8508_v31, %v8509_v28  ;;  %v10105_v48 = vpop.f32.mrb[195].mxu1 }
 0x764   :  { %v8473_v10 = vpop.f32.mrb[198].mxu0  ;;  %v10876_v14 = vpop.eup %10875  ;;  %10885 = vrcp.f32 %v8587_v0  ;;  %v9815_v8 = vmul.f32 -1.442695, %v8526_v44  ;;  %v8527_v54 = vsel %vm8516_vm5, %v8509_v28, %v8510_v42  ;;  %v10106_v12 = vadd.f32 %v10105_v48, %v10104_v56 }
 0x765   :  { %v10231_v61 = vpop.f32.mrb[199].mxu0  ;;  %8633 = vst.msk [vmem:[%s14317_s11 + $0x18] sm:$0xff] %vm8629_vm6, %v10876_v14  ;;  %v9816_v34 = vmul.f32 -1.442695, %v8527_v54  ;;  %v8367_v6 = vadd.f32 %v10103_v21, %v14174_v32 }
 0x766   :  { %v10878_v36 = vpop.eup %10877  ;;  %10887 = vpow2.f32 %v9815_v8  ;;  %v8370_v9 = vadd.f32 %v10106_v12, %v14176_v22 }
 0x767   :  { %8634 = vst.msk [vmem:[%s14317_s11 + $0x20] sm:$0xff] %vm8629_vm6, %v10878_v36  ;;  %10889 = vpow2.f32 %v9816_v34  ;;  %v8471_v57 = vadd.f32 %v8470_v39, %v8367_v6 }
 0x768   :  { %v10880_v5 = vpop.eup %10879  ;;  %v8474_v53 = vadd.f32 %v8473_v10, %v8370_v9  ;;  %v10107_v15 = vpop.f32.mrb[196].mxu1 }
 0x769   :  { %v10882_v13 = vpop.eup %10881  ;;  %v8588_v17 = vadd.f32 1.0, %v10880_v5  ;;  %v8511_v20 = vadd.f32 %v14192_v2, %v8471_v57  ;;  %v10108_v19 = vpop.f32.mrb[197].mxu1 }
 0x76a   :  { %v8478_v32 = vpop.f32.mrb[200].mxu0  ;;  %v8589_v60 = vadd.f32 1.0, %v10882_v13  ;;  %v8512_v47 = vadd.f32 %v14192_v2, %v8474_v53  ;;  %v10109_v22 = vadd.f32 %v10108_v19, %v10107_v15  ;;  %v10110_v41 = vpop.f32.mrb[198].mxu1 }
 0x76b   :  { %v10234_v24 = vpop.f32.mrb[201].mxu0  ;;  %10891 = vrcp.f32 %v8588_v17  ;;  %v8528_v51 = vsel %vm8516_vm5, %v8510_v42, %v8511_v20  ;;  %v10111_v16 = vpop.f32.mrb[199].mxu1 }
 0x76c   :  { %v8481_v37 = vpop.f32.mrb[202].mxu0  ;;  %v10884_v59 = vpop.eup %10883  ;;  %10893 = vrcp.f32 %v8589_v60  ;;  %v9817_v31 = vmul.f32 -1.442695, %v8528_v51  ;;  %v8529_v33 = vsel %vm8516_vm5, %v8511_v20, %v8512_v47  ;;  %v10112_v30 = vadd.f32 %v10111_v16, %v10110_v41 }
 0x76d   :  { %v10235_v35 = vpop.f32.mrb[203].mxu0  ;;  %8635 = vst.msk [vmem:[%s14317_s11 + $0x28] sm:$0xff] %vm8629_vm6, %v10884_v59  ;;  %v9818_v7 = vmul.f32 -1.442695, %v8529_v33  ;;  %v8375_v29 = vadd.f32 %v10109_v22, %v14180_v63 }
 0x76e   :  { %v10886_v25 = vpop.eup %10885  ;;  %10895 = vpow2.f32 %v9817_v31  ;;  %v8378_v27 = vadd.f32 %v10112_v30, %v14182_v43 }
 0x76f   :  { %8636 = vst.msk [vmem:[%s14317_s11 + $0x30] sm:$0xff] %vm8629_vm6, %v10886_v25  ;;  %10897 = vpow2.f32 %v9818_v7  ;;  %v8479_v62 = vadd.f32 %v8478_v32, %v8375_v29 }
 0x770   :  { %v10888_v46 = vpop.eup %10887  ;;  %v8482_v38 = vadd.f32 %v8481_v37, %v8378_v27  ;;  %v10113_v1 = vpop.f32.mrb[200].mxu1 }
 0x771   :  { %v10890_v45 = vpop.eup %10889  ;;  %v8590_v55 = vadd.f32 1.0, %v10888_v46  ;;  %v8513_v26 = vadd.f32 %v14192_v2, %v8479_v62  ;;  %v10114_v18 = vpop.f32.mrb[201].mxu1 }
 0x772   :  { %v8486_v63 = vpop.f32.mrb[204].mxu0  ;;  %v8591_v49 = vadd.f32 1.0, %v10890_v45  ;;  %v8514_v40 = vadd.f32 %v14192_v2, %v8482_v38  ;;  %v10115_v43 = vadd.f32 %v10114_v18, %v10113_v1  ;;  %v10116_v3 = vpop.f32.mrb[202].mxu1 }
 0x773   :  { %v10238_v52 = vpop.f32.mrb[205].mxu0  ;;  %10899 = vrcp.f32 %v8590_v55  ;;  %v8530_v58 = vsel %vm8516_vm5, %v8512_v47, %v8513_v26  ;;  %v10117_v50 = vpop.f32.mrb[203].mxu1 }
 0x774   :  { %v8489_v28 = vpop.f32.mrb[206].mxu0  ;;  %10901 = vrcp.f32 %v8591_v49  ;;  %v9819_v23 = vmul.f32 -1.442695, %v8530_v58  ;;  %v8531_v39 = vsel %vm8516_vm5, %v8513_v26, %v8514_v40  ;;  %v8383_v0 = vadd.f32 %v10115_v43, %v14185_v4 }
 0x775   :  { %v10239_v42 = vpop.f32.mrb[207].mxu0  ;;  %v10892_v21 = vpop.eup %10891  ;;  %v9820_v56 = vmul.f32 -1.442695, %v8531_v39 }
 0x776   :  { %v10894_v11 = vpop.eup %10893  ;;  %8637 = vst.msk [vmem:[%s14317_s11 + $0x38] sm:$0xff] %vm8629_vm6, %v10892_v21  ;;  %10903 = vpow2.f32 %v9819_v23  ;;  %v8487_v44 = vadd.f32 %v8486_v63, %v8383_v0 }
 0x777   :  { %8638 = vst.msk [vmem:[%s14317_s11 + $0x40] sm:$0xff] %vm8629_vm6, %v10894_v11  ;;  %10905 = vpow2.f32 %v9820_v56 }
 0x778   :  { %v10896_v48 = vpop.eup %10895  ;;  %v8515_v4 = vadd.f32 %v14192_v2, %v8487_v44 }
 0x779   :  { %v10898_v10 = vpop.eup %10897  ;;  %v8592_v14 = vadd.f32 1.0, %v10896_v48 }
 0x77a   :  { %v8593_v8 = vadd.f32 1.0, %v10898_v10  ;;  %v8532_v54 = vsel %vm8516_vm5, %v8514_v40, %v8515_v4 }
 0x77b   :  { %10907 = vrcp.f32 %v8592_v14  ;;  %v9821_v12 = vmul.f32 -1.442695, %v8532_v54 }
 0x77c   :  { %10909 = vrcp.f32 %v8593_v8 }
 0x77d   :  { %v10900_v61 = vpop.eup %10899  ;;  %10911 = vpow2.f32 %v9821_v12 }
 0x77e   :  { %v10902_v34 = vpop.eup %10901  ;;  %8639 = vst.msk [vmem:[%s14317_s11 + $0x48] sm:$0xff] %vm8629_vm6, %v10900_v61 }
 0x77f   :  { %8640 = vst.msk [vmem:[%s14317_s11 + $0x50] sm:$0xff] %vm8629_vm6, %v10902_v34 }
 0x780   :  { %v10904_v2 = vpop.eup %10903 }
 0x781   :  { %v10906_v6 = vpop.eup %10905  ;;  %v8594_v36 = vadd.f32 1.0, %v10904_v2 }
 0x782   :  { %v8595_v9 = vadd.f32 1.0, %v10906_v6 }
 0x783   :  { %10913 = vrcp.f32 %v8594_v36 }
 0x784   :  { %10915 = vrcp.f32 %v8595_v9 }
 0x785   :  { %v10908_v57 = vpop.eup %10907 }
 0x786   :  { %v10910_v5 = vpop.eup %10909  ;;  %8641 = vst.msk [vmem:[%s14317_s11 + $0x58] sm:$0xff] %vm8629_vm6, %v10908_v57 }
 0x787   :  { %v10912_v53 = vpop.eup %10911  ;;  %8642 = vst.msk [vmem:[%s14317_s11 + $0x60] sm:$0xff] %vm8629_vm6, %v10910_v5 }
 0x788   :  { %v8596_v15 = vadd.f32 1.0, %v10912_v53 }
 0x78a   :  { %10917 = vrcp.f32 %v8596_v15 }
 0x78d   :  { %v10914_v13 = vpop.eup %10913 }
 0x78e   :  { %v10916_v17 = vpop.eup %10915  ;;  %8643 = vst.msk [vmem:[%s14317_s11 + $0x68] sm:$0xff] %vm8629_vm6, %v10914_v13 }
 0x78f   :  { %8644 = vst.msk [vmem:[%s14317_s11 + $0x70] sm:$0xff] %vm8629_vm6, %v10916_v17 }
 0x794   :  { %v10918_v20 = vpop.eup %10917 }
 0x795   :  { %8645 = vst.msk [vmem:[%s14317_s11 + $0x78] sm:$0xff] %vm8629_vm6, %v10918_v20 }

</bundles_post_ra>
